<compile_context>
chip_gen: v7x
topology: tpu7x:2x2x1
jax: 0.10.0
libtpu: 0.0.40
codegen_flags: <defaults>
</compile_context>

<pallas_src>
import functools
import math

import jax
import jax.numpy as jnp
import numpy as np
from jax.experimental import pallas as pl
from jax.experimental.pallas import tpu as pltpu

GROWTH = 32
BN_SIZE = 4
INTER = BN_SIZE * GROWTH            # 128 bottleneck channels
BLOCK_CONFIG = (6, 12, 48, 32)      # densenet201
NUM_INIT_FEATURES = 64
CIN_BUCKET = 256                    # bucket for the 1x1-conv K dimension


def _row_block(m, cap=512):
    for bm in (512, 256, 128, 64, 32, 16, 8):
        if bm <= cap and m >= bm and m % bm == 0:
            return bm
    return m


# ------------------------------ Pallas kernels ------------------------------


def _dense_layer_kernel(buf_ref, mask_ref, s1_ref, t1_ref, w1_ref, s2_ref,
                        t2_ref, w2_ref, o_ref, b_scr, *, wp):
    """Fused dense layer: norm1+relu -> 1x1 conv -> norm2+relu -> 3x3 conv."""
    mt = buf_ref.shape[0]
    guard = wp + 1
    mp = mt - 2 * guard
    kb = w1_ref.shape[0]
    # norm1 + relu on the first kb channels of the concatenated feature buffer
    # (channels beyond the true cin are zero and have zero weight rows).
    x = buf_ref[:, :kb]
    a = jnp.maximum(x * s1_ref[...] + t1_ref[...], 0.0).astype(jnp.bfloat16)
    # 1x1 bottleneck conv on the MXU (bf16 operands, f32 accumulation).
    mid = jnp.dot(a, w1_ref[...], preferred_element_type=jnp.float32)
    # norm2 + relu, then zero the spatial-padding / guard rows so the 3x3 conv
    # sees exact zero padding.
    b_scr[...] = (jnp.maximum(mid * s2_ref[...] + t2_ref[...], 0.0)
                  * mask_ref[...])
    # 3x3 conv (padding=1) as nine constant row shifts over the padded layout.
    acc = jnp.zeros((mp, GROWTH), jnp.float32)
    for di in range(3):
        for dj in range(3):
            t = di * 3 + dj
            start = guard + (di - 1) * wp + (dj - 1)
            bt = b_scr[start:start + mp, :].astype(jnp.bfloat16)
            wt = w2_ref[t * INTER:(t + 1) * INTER, :]
            acc = acc + jnp.dot(bt, wt, preferred_element_type=jnp.float32)
    o_ref[...] = acc


def _stem_conv_pool_kernel(x_ref, w_ref, b_ref, s_ref, t_ref, o_ref):
    """conv1(3x3) + bn1 + relu + 2x2/2 maxpool; x_ref holds the 4 pool taps."""
    acc = None
    for a in range(4):
        y = jnp.dot(x_ref[a].astype(jnp.bfloat16), w_ref[...],
                    preferred_element_type=jnp.float32) + b_ref[...]
        y = jnp.maximum(y * s_ref[...] + t_ref[...], 0.0)
        acc = y if acc is None else jnp.maximum(acc, y)
    o_ref[...] = acc


def _mm_bnrelu_kernel(x_ref, w_ref, s_ref, t_ref, o_ref):
    """matmul (bias-free conv) with fused BatchNorm + ReLU epilogue."""
    y = jnp.dot(x_ref[...].astype(jnp.bfloat16), w_ref[...],
                preferred_element_type=jnp.float32)
    o_ref[...] = jnp.maximum(y * s_ref[...] + t_ref[...], 0.0)


def _window_max_kernel(x_ref, o_ref):
    acc = x_ref[0]
    for i in range(1, x_ref.shape[0]):
        acc = jnp.maximum(acc, x_ref[i])
    o_ref[...] = acc


def _transition_kernel(x_ref, s_ref, t_ref, w_ref, o_ref):
    """norm + relu + (2x2 avg pool folded before) 1x1 conv."""
    acc = jnp.maximum(x_ref[0] * s_ref[...] + t_ref[...], 0.0)
    for a in range(1, 4):
        acc = acc + jnp.maximum(x_ref[a] * s_ref[...] + t_ref[...], 0.0)
    acc = (acc * 0.25).astype(jnp.bfloat16)
    o_ref[...] = jnp.dot(acc, w_ref[...], preferred_element_type=jnp.float32)


def _head_kernel(x_ref, pool_ref, s5_ref, t5_ref, w1_ref, b1_ref,
                 sb_ref, tb_ref, w2_ref, b2_ref, o_ref):
    """norm5 + relu + global avg pool + all three ResClassifier heads."""
    feat = jnp.maximum(x_ref[...] * s5_ref[...] + t5_ref[...], 0.0)
    pooled = jnp.dot(pool_ref[...], feat, preferred_element_type=jnp.float32)
    h = jnp.dot(pooled.astype(jnp.bfloat16), w1_ref[...],
                preferred_element_type=jnp.float32) + b1_ref[...]
    h = jnp.maximum(h, 0.0) * sb_ref[...] + tb_ref[...]     # relu -> bn1
    o_ref[...] = jnp.dot(h.astype(jnp.bfloat16), w2_ref[...],
                         preferred_element_type=jnp.float32) + b2_ref[...]


# ------------------------------ pallas_call wrappers -------------------------


def stem_conv_pool_call(x4, w, b, s, t):
    _, m, k = x4.shape
    n = w.shape[1]
    bm = _row_block(m)
    return pl.pallas_call(
        _stem_conv_pool_kernel,
        out_shape=jax.ShapeDtypeStruct((m, n), jnp.float32),
        grid=(m // bm,),
        in_specs=[pl.BlockSpec((4, bm, k), lambda i: (0, i, 0)),
                  pl.BlockSpec((k, n), lambda i: (0, 0)),
                  pl.BlockSpec((1, n), lambda i: (0, 0)),
                  pl.BlockSpec((1, n), lambda i: (0, 0)),
                  pl.BlockSpec((1, n), lambda i: (0, 0))],
        out_specs=pl.BlockSpec((bm, n), lambda i: (i, 0)),
        compiler_params=pltpu.CompilerParams(
            dimension_semantics=("parallel",)),
    )(x4, w, b, s, t)


def mm_bnrelu_call(x, w, s, t):
    m, k = x.shape
    n = w.shape[1]
    bm = _row_block(m)
    return pl.pallas_call(
        _mm_bnrelu_kernel,
        out_shape=jax.ShapeDtypeStruct((m, n), jnp.float32),
        grid=(m // bm,),
        in_specs=[pl.BlockSpec((bm, k), lambda i: (i, 0)),
                  pl.BlockSpec((k, n), lambda i: (0, 0)),
                  pl.BlockSpec((1, n), lambda i: (0, 0)),
                  pl.BlockSpec((1, n), lambda i: (0, 0))],
        out_specs=pl.BlockSpec((bm, n), lambda i: (i, 0)),
        compiler_params=pltpu.CompilerParams(
            dimension_semantics=("parallel",)),
    )(x, w, s, t)


def window_max_call(stacked):
    wn, m, c = stacked.shape
    bm = _row_block(m)
    return pl.pallas_call(
        _window_max_kernel,
        out_shape=jax.ShapeDtypeStruct((m, c), jnp.float32),
        grid=(m // bm,),
        in_specs=[pl.BlockSpec((wn, bm, c), lambda i: (0, i, 0))],
        out_specs=pl.BlockSpec((bm, c), lambda i: (i, 0)),
        compiler_params=pltpu.CompilerParams(
            dimension_semantics=("parallel",)),
    )(stacked)


def transition_call(taps, s, t, w):
    _, m, c = taps.shape
    n = w.shape[1]
    return pl.pallas_call(
        _transition_kernel,
        out_shape=jax.ShapeDtypeStruct((m, n), jnp.float32),
        grid=(1,),
        in_specs=[pl.BlockSpec((4, m, c), lambda i: (0, 0, 0)),
                  pl.BlockSpec((1, c), lambda i: (0, 0)),
                  pl.BlockSpec((1, c), lambda i: (0, 0)),
                  pl.BlockSpec((c, n), lambda i: (0, 0))],
        out_specs=pl.BlockSpec((m, n), lambda i: (0, 0)),
    )(taps, s, t, w)


def heads_call(x2, pool, s5, t5, w1, b1, sb, tb, w2, b2):
    m, c = x2.shape
    nb = pool.shape[0]
    hdim = w1.shape[1]
    ntot = w2.shape[1]
    return pl.pallas_call(
        _head_kernel,
        out_shape=jax.ShapeDtypeStruct((nb, ntot), jnp.float32),
        grid=(1,),
        in_specs=[pl.BlockSpec((m, c), lambda i: (0, 0)),
                  pl.BlockSpec((nb, m), lambda i: (0, 0)),
                  pl.BlockSpec((1, c), lambda i: (0, 0)),
                  pl.BlockSpec((1, c), lambda i: (0, 0)),
                  pl.BlockSpec((c, hdim), lambda i: (0, 0)),
                  pl.BlockSpec((1, hdim), lambda i: (0, 0)),
                  pl.BlockSpec((1, hdim), lambda i: (0, 0)),
                  pl.BlockSpec((1, hdim), lambda i: (0, 0)),
                  pl.BlockSpec((hdim, ntot), lambda i: (0, 0)),
                  pl.BlockSpec((1, ntot), lambda i: (0, 0))],
        out_specs=pl.BlockSpec((nb, ntot), lambda i: (0, 0)),
        compiler_params=pltpu.CompilerParams(
            vmem_limit_bytes=48 * 1024 * 1024),
    )(x2, pool, s5, t5, w1, b1, sb, tb, w2, b2)


# ------------------------------ layout helpers (JAX glue) --------------------


def _im2col(x, k, stride, pad):
    if pad:
        x = jnp.pad(x, ((0, 0), (pad, pad), (pad, pad), (0, 0)))
    n, h, w, c = x.shape
    ho = (h - k) // stride + 1
    wo = (w - k) // stride + 1
    patches = [x[:, di:di + stride * ho:stride, dj:dj + stride * wo:stride, :]
               for di in range(k) for dj in range(k)]
    cols = jnp.concatenate(patches, axis=-1)
    return cols.reshape(n * ho * wo, k * k * c), (n, ho, wo)


def _make_block_buffer(x, c_out):
    """NHWC feature map -> padded-row 2-D block buffer (zeros in the tail)."""
    n, h, w, c = x.shape
    hp, wp = h + 2, w + 2
    g = wp + 1
    xp = jnp.pad(x, ((0, 0), (1, 1), (1, 1), (0, c_out - c)))
    x2 = xp.reshape(n * hp * wp, c_out)
    return jnp.pad(x2, ((g, g), (0, 0)))


def _extract_interior(buf, n, h, w):
    hp, wp = h + 2, w + 2
    g = wp + 1
    c = buf.shape[1]
    x = buf[g:g + n * hp * wp, :].reshape(n, hp, wp, c)
    return x[:, 1:h + 1, 1:w + 1, :]


@functools.lru_cache(maxsize=None)
def _block_mask(n, h, w):
    hp, wp = h + 2, w + 2
    g = wp + 1
    m = np.zeros((n, hp, wp, 1), np.float32)
    m[:, 1:h + 1, 1:w + 1, :] = 1.0
    m = m.reshape(n * hp * wp, 1)
    m = np.pad(m, ((g, g), (0, 0)))
    return jnp.asarray(m)


# ------------------------------ jitted stage wrappers -------------------------


@jax.jit
def stem_forward(x, conv1_w, conv1_b, bn1_s, bn1_t, conv0_w, norm0_s, norm0_t):
    n, h, w, cin = x.shape
    # conv1 (3x3, pad 1) + bn1 + relu + 2x2/2 maxpool, fused.
    xp = jnp.pad(x, ((0, 0), (1, 1), (1, 1), (0, 0)))
    ho, wo = h // 2, w // 2
    slabs = []
    for a in range(2):
        for b in range(2):
            patches = [xp[:, a + di:a + di + 2 * ho:2,
                          b + dj:b + dj + 2 * wo:2, :]
                       for di in range(3) for dj in range(3)]
            slabs.append(jnp.concatenate(patches, axis=-1)
                         .reshape(n * ho * wo, 9 * cin))
    x4 = jnp.stack(slabs, axis=0)                       # (4, n*ho*wo, 9*cin)
    h1 = stem_conv_pool_call(x4, conv1_w, conv1_b, bn1_s, bn1_t)
    h1 = h1.reshape(n, ho, wo, 3)
    # conv0 (7x7, stride 2, pad 3, bias-free) + norm0 + relu, fused.
    cols, (n0, ho0, wo0) = _im2col(h1, 7, 2, 3)
    h2 = mm_bnrelu_call(cols, conv0_w, norm0_s, norm0_t)
    h2 = h2.reshape(n0, ho0, wo0, NUM_INIT_FEATURES)
    # 3x3 stride-2 pad-1 maxpool.
    hp = jnp.pad(h2, ((0, 0), (1, 1), (1, 1), (0, 0)),
                 constant_values=-jnp.inf)
    h3, w3 = ho0 // 2, wo0 // 2
    pool_slabs = jnp.stack(
        [hp[:, di:di + 2 * h3:2, dj:dj + 2 * w3:2, :]
         .reshape(n * h3 * w3, NUM_INIT_FEATURES)
         for di in range(3) for dj in range(3)], axis=0)
    h4 = window_max_call(pool_slabs)
    return h4.reshape(n, h3, w3, NUM_INIT_FEATURES)


@functools.partial(jax.jit, static_argnames=("c_out",))
def make_block_buffer(x, *, c_out):
    return _make_block_buffer(x, c_out)


@functools.partial(jax.jit, static_argnames=("wp",), donate_argnums=(0,))
def dense_layer(buf, mask, n1s, n1t, w1, n2s, n2t, w2, off, *, wp):
    mt, c_out = buf.shape
    guard = wp + 1
    mp = mt - 2 * guard
    kb = w1.shape[0]
    kernel = functools.partial(_dense_layer_kernel, wp=wp)
    new = pl.pallas_call(
        kernel,
        out_shape=jax.ShapeDtypeStruct((mp, GROWTH), jnp.float32),
        grid=(1,),
        in_specs=[pl.BlockSpec((mt, c_out), lambda i: (0, 0)),
                  pl.BlockSpec((mt, 1), lambda i: (0, 0)),
                  pl.BlockSpec((1, kb), lambda i: (0, 0)),
                  pl.BlockSpec((1, kb), lambda i: (0, 0)),
                  pl.BlockSpec((kb, INTER), lambda i: (0, 0)),
                  pl.BlockSpec((1, INTER), lambda i: (0, 0)),
                  pl.BlockSpec((1, INTER), lambda i: (0, 0)),
                  pl.BlockSpec((9 * INTER, GROWTH), lambda i: (0, 0))],
        out_specs=pl.BlockSpec((mp, GROWTH), lambda i: (0, 0)),
        scratch_shapes=[pltpu.VMEM((mt, INTER), jnp.float32)],
    )(buf, mask, n1s, n1t, w1, n2s, n2t, w2)
    # Write the 32 new growth channels into the persistent feature buffer.
    return jax.lax.dynamic_update_slice(
        buf, new, (jnp.asarray(guard, jnp.int32), off))


@functools.partial(jax.jit, static_argnames=("n", "h", "wd", "c_next"))
def transition_forward(buf, s, t, wmat, *, n, h, wd, c_next):
    feat = _extract_interior(buf, n, h, wd)
    c = feat.shape[-1]
    ho, wo = h // 2, wd // 2
    taps = jnp.stack([feat[:, a::2, b::2, :].reshape(n * ho * wo, c)
                      for a in range(2) for b in range(2)], axis=0)
    y = transition_call(taps, s, t, wmat)
    y = y.reshape(n, ho, wo, c // 2)
    return _make_block_buffer(y, c_next)


@functools.partial(jax.jit, static_argnames=("n", "h", "wd", "splits"))
def final_forward(buf, s5, t5, w1, b1, sb, tb, w2, b2, *, n, h, wd, splits):
    feat = _extract_interior(buf, n, h, wd)
    c = feat.shape[-1]
    x2 = feat.reshape(n * h * wd, c)
    pool = jnp.kron(jnp.eye(n, dtype=jnp.float32),
                    jnp.full((1, h * wd), 1.0 / (h * wd), jnp.float32))
    out = heads_call(x2, pool, s5, t5, w1, b1, sb, tb, w2, b2)
    res, o = [], 0
    for ncls in splits:
        res.append(out[:, o:o + ncls])
        o += ncls
    return tuple(res)


# ------------------------------ parameters -----------------------------------

_rng = np.random.default_rng(0)     # deterministic synthetic weights


def _w(fan_in, fan_out, gain=2.0):
    return jnp.asarray(_rng.normal(0.0, math.sqrt(gain / fan_in),
                                   (fan_in, fan_out)).astype(np.float32))


def _bias(n, scale=0.01):
    return jnp.asarray((scale * _rng.normal(0.0, 1.0, (1, n))).astype(np.float32))


def _bn(c, eps=1e-5):
    gamma = 1.0 + 0.1 * _rng.normal(0.0, 1.0, c)
    beta = 0.05 * _rng.normal(0.0, 1.0, c)
    mean = 0.05 * _rng.normal(0.0, 1.0, c)
    var = 1.0 + 0.1 * _rng.random(c)
    scale = gamma / np.sqrt(var + eps)
    shift = beta - mean * scale
    return (jnp.asarray(scale.reshape(1, c).astype(np.float32)),
            jnp.asarray(shift.reshape(1, c).astype(np.float32)))


def init_params(in_channels, num_classes, width=1024):
    P = {}
    P["conv1_w"] = _w(3 * 3 * in_channels, 3).astype(jnp.bfloat16)
    P["conv1_b"] = _bias(3)
    P["bn1"] = _bn(3)
    P["conv0_w"] = _w(7 * 7 * 3, NUM_INIT_FEATURES).astype(jnp.bfloat16)  # bias=False
    P["norm0"] = _bn(NUM_INIT_FEATURES)

    blocks, transitions = [], []
    c = NUM_INIT_FEATURES
    for bi, L in enumerate(BLOCK_CONFIG):
        c_out = c + L * GROWTH
        layers = []
        for i in range(L):
            cin = c + i * GROWTH
            kb = min(-(-cin // CIN_BUCKET) * CIN_BUCKET, c_out)
            n1s, n1t = _bn(cin)
            n1s = jnp.pad(n1s, ((0, 0), (0, kb - cin)))
            n1t = jnp.pad(n1t, ((0, 0), (0, kb - cin)))
            w1 = jnp.pad(_w(cin, INTER),
                         ((0, kb - cin), (0, 0))).astype(jnp.bfloat16)
            n2s, n2t = _bn(INTER)
            w2 = _w(3 * 3 * INTER, GROWTH).astype(jnp.bfloat16)
            layers.append(dict(n1s=n1s, n1t=n1t, w1=w1, n2s=n2s, n2t=n2t,
                               w2=w2, off=jnp.asarray(cin, jnp.int32)))
        blocks.append(layers)
        if bi < len(BLOCK_CONFIG) - 1:
            ts, tt = _bn(c_out)
            transitions.append(dict(s=ts, t=tt,
                                    w=_w(c_out, c_out // 2).astype(jnp.bfloat16)))
            c = c_out // 2
        else:
            c = c_out
    P["blocks"] = blocks
    P["transitions"] = transitions
    P["norm5"] = _bn(c)                 # c == 1920 for densenet201

    # Fused classifier heads (linear1_1 / bn2 in ResClassifier are unused).
    w1s, b1s, sbs, tbs, w2s, b2s = [], [], [], [], [], []
    for nc in num_classes:
        w1s.append(_w(c, width, gain=1.0))
        b1s.append(_bias(width))
        bs, bt = _bn(width)
        sbs.append(bs)
        tbs.append(bt)
        w2s.append(np.asarray(_w(width, nc, gain=1.0)))
        b2s.append(_bias(nc))
    P["head_w1"] = jnp.concatenate(w1s, axis=1).astype(jnp.bfloat16)
    P["head_b1"] = jnp.concatenate(b1s, axis=1)
    P["head_bns"] = jnp.concatenate(sbs, axis=1)
    P["head_bnt"] = jnp.concatenate(tbs, axis=1)
    ntot = sum(num_classes)
    w2bd = np.zeros((len(num_classes) * width, ntot), np.float32)
    co = 0
    for hi, nc in enumerate(num_classes):
        w2bd[hi * width:(hi + 1) * width, co:co + nc] = w2s[hi]
        co += nc
    P["head_w2"] = jnp.asarray(w2bd).astype(jnp.bfloat16)
    P["head_b2"] = jnp.concatenate(b2s, axis=1)
    return P


# ------------------------------ forward pass ----------------------------------


def dense_block_forward(buf, layers, n, h, w):
    mask = _block_mask(n, h, w)
    wp = w + 2
    for lp in layers:
        buf = dense_layer(buf, mask, lp["n1s"], lp["n1t"], lp["w1"],
                          lp["n2s"], lp["n2t"], lp["w2"], lp["off"], wp=wp)
    return buf


def densenet_forward(x_nchw, P, num_classes):
    x = jnp.transpose(x_nchw, (0, 2, 3, 1)).astype(jnp.float32)  # NCHW -> NHWC
    h = stem_forward(x, P["conv1_w"], P["conv1_b"], P["bn1"][0], P["bn1"][1],
                     P["conv0_w"], P["norm0"][0], P["norm0"][1])
    n, hh, ww, _ = h.shape
    c = NUM_INIT_FEATURES
    nblocks = len(P["blocks"])
    buf = None
    for bi, layers in enumerate(P["blocks"]):
        c_out = c + len(layers) * GROWTH
        if bi == 0:
            buf = make_block_buffer(h, c_out=c_out)
        buf = dense_block_forward(buf, layers, n, hh, ww)
        if bi < nblocks - 1:
            tp = P["transitions"][bi]
            c_next_in = c_out // 2
            c_next_out = c_next_in + len(P["blocks"][bi + 1]) * GROWTH
            buf = transition_forward(buf, tp["s"], tp["t"], tp["w"],
                                     n=n, h=hh, wd=ww, c_next=c_next_out)
            hh //= 2
            ww //= 2
            c = c_next_in
        else:
            c = c_out
    return final_forward(buf, P["norm5"][0], P["norm5"][1],
                         P["head_w1"], P["head_b1"], P["head_bns"],
                         P["head_bnt"], P["head_w2"], P["head_b2"],
                         n=n, h=hh, wd=ww, splits=tuple(num_classes))


# ------------------------------ main ------------------------------------------

if __name__ == "__main__":
    in_channels = 4
    num_classes = (3, 5, 7)
    params = init_params(in_channels, num_classes)

    # densenet201 downsamples by 64x overall, so 64x64 is the smallest valid
    # square input for this module; batch=2, in_channels=4.
    x = jax.random.normal(jax.random.PRNGKey(0),
                          (2, in_channels, 64, 64), dtype=jnp.float32)

    y0, y1, y2 = densenet_forward(x, params, num_classes)
    jax.block_until_ready((y0, y1, y2))

    assert y0.shape == (2, num_classes[0])
    assert y1.shape == (2, num_classes[1])
    assert y2.shape == (2, num_classes[2])
    assert bool(jnp.isfinite(y0).all() & jnp.isfinite(y1).all()
                & jnp.isfinite(y2).all())
    print("KERNEL_OK")
</pallas_src>

<mosaic_0001>
module attributes {stable_mosaic.version = 11 : i64} {
  func.func @_stem_conv_pool_kernel(%arg0: i32, %arg1: memref<4x512x36xf32, #tpu.memory_space<vmem>>, %arg2: memref<36x3xbf16, #tpu.memory_space<vmem>>, %arg3: memref<1x3xf32, #tpu.memory_space<vmem>>, %arg4: memref<1x3xf32, #tpu.memory_space<vmem>>, %arg5: memref<1x3xf32, #tpu.memory_space<vmem>>, %arg6: memref<512x3xf32, #tpu.memory_space<vmem>>) attributes {dimension_semantics = [#tpu.dimension_semantics<parallel>], iteration_bounds = array<i64: 4>, scalar_prefetch = 0 : i64, scratch_operands = 0 : i64, tpu.core_type = #tpu.core_type<tc>, window_params = [{transform_indices = @transform_0, window_bounds = array<i64: 4, 512, 36>}, {pipeline_mode = #tpu.pipeline_mode<synchronous>, transform_indices = @transform_1, window_bounds = array<i64: 36, 3>}, {pipeline_mode = #tpu.pipeline_mode<synchronous>, transform_indices = @transform_2, window_bounds = array<i64: 1, 3>}, {pipeline_mode = #tpu.pipeline_mode<synchronous>, transform_indices = @transform_3, window_bounds = array<i64: 1, 3>}, {pipeline_mode = #tpu.pipeline_mode<synchronous>, transform_indices = @transform_4, window_bounds = array<i64: 1, 3>}, {transform_indices = @transform_5, window_bounds = array<i64: 512, 3>}]} {
    %c0 = arith.constant 0 : index
    %c0_0 = arith.constant 0 : index
    %c0_1 = arith.constant 0 : index
    %0 = vector.load %arg1[%c0, %c0_0, %c0_1] : memref<4x512x36xf32, #tpu.memory_space<vmem>>, vector<1x512x36xf32>
    %1 = vector.shape_cast %0 : vector<1x512x36xf32> to vector<512x36xf32>
    %2 = arith.truncf %1 : vector<512x36xf32> to vector<512x36xbf16>
    %c0_2 = arith.constant 0 : index
    %c0_3 = arith.constant 0 : index
    %3 = vector.load %arg2[%c0_2, %c0_3] : memref<36x3xbf16, #tpu.memory_space<vmem>>, vector<36x3xbf16>
    %cst = arith.constant dense<0.000000e+00> : vector<512x3xf32>
    %4 = tpu.matmul %2, %3, %cst {dimension_numbers = #tpu.dot_dimension_numbers<[1], [0], [0], [1], [0, 0, 1, 1], [], []>} : vector<512x36xbf16>, vector<36x3xbf16>, vector<512x3xf32> -> vector<512x3xf32>
    %c0_4 = arith.constant 0 : index
    %c0_5 = arith.constant 0 : index
    %5 = vector.load %arg3[%c0_4, %c0_5] : memref<1x3xf32, #tpu.memory_space<vmem>>, vector<1x3xf32>
    %6 = vector.broadcast %5 : vector<1x3xf32> to vector<512x3xf32>
    %7 = arith.addf %4, %6 : vector<512x3xf32>
    %c0_6 = arith.constant 0 : index
    %c0_7 = arith.constant 0 : index
    %8 = vector.load %arg4[%c0_6, %c0_7] : memref<1x3xf32, #tpu.memory_space<vmem>>, vector<1x3xf32>
    %9 = vector.broadcast %8 : vector<1x3xf32> to vector<512x3xf32>
    %10 = arith.mulf %7, %9 : vector<512x3xf32>
    %c0_8 = arith.constant 0 : index
    %c0_9 = arith.constant 0 : index
    %11 = vector.load %arg5[%c0_8, %c0_9] : memref<1x3xf32, #tpu.memory_space<vmem>>, vector<1x3xf32>
    %12 = vector.broadcast %11 : vector<1x3xf32> to vector<512x3xf32>
    %13 = arith.addf %10, %12 : vector<512x3xf32>
    %cst_10 = arith.constant 0.000000e+00 : f32
    %14 = vector.broadcast %cst_10 : f32 to vector<512x3xf32>
    %15 = arith.maximumf %13, %14 : vector<512x3xf32>
    %c1 = arith.constant 1 : index
    %c0_11 = arith.constant 0 : index
    %c0_12 = arith.constant 0 : index
    %16 = vector.load %arg1[%c1, %c0_11, %c0_12] : memref<4x512x36xf32, #tpu.memory_space<vmem>>, vector<1x512x36xf32>
    %17 = vector.shape_cast %16 : vector<1x512x36xf32> to vector<512x36xf32>
    %18 = arith.truncf %17 : vector<512x36xf32> to vector<512x36xbf16>
    %c0_13 = arith.constant 0 : index
    %c0_14 = arith.constant 0 : index
    %19 = vector.load %arg2[%c0_13, %c0_14] : memref<36x3xbf16, #tpu.memory_space<vmem>>, vector<36x3xbf16>
    %cst_15 = arith.constant dense<0.000000e+00> : vector<512x3xf32>
    %20 = tpu.matmul %18, %19, %cst_15 {dimension_numbers = #tpu.dot_dimension_numbers<[1], [0], [0], [1], [0, 0, 1, 1], [], []>} : vector<512x36xbf16>, vector<36x3xbf16>, vector<512x3xf32> -> vector<512x3xf32>
    %c0_16 = arith.constant 0 : index
    %c0_17 = arith.constant 0 : index
    %21 = vector.load %arg3[%c0_16, %c0_17] : memref<1x3xf32, #tpu.memory_space<vmem>>, vector<1x3xf32>
    %22 = vector.broadcast %21 : vector<1x3xf32> to vector<512x3xf32>
    %23 = arith.addf %20, %22 : vector<512x3xf32>
    %c0_18 = arith.constant 0 : index
    %c0_19 = arith.constant 0 : index
    %24 = vector.load %arg4[%c0_18, %c0_19] : memref<1x3xf32, #tpu.memory_space<vmem>>, vector<1x3xf32>
    %25 = vector.broadcast %24 : vector<1x3xf32> to vector<512x3xf32>
    %26 = arith.mulf %23, %25 : vector<512x3xf32>
    %c0_20 = arith.constant 0 : index
    %c0_21 = arith.constant 0 : index
    %27 = vector.load %arg5[%c0_20, %c0_21] : memref<1x3xf32, #tpu.memory_space<vmem>>, vector<1x3xf32>
    %28 = vector.broadcast %27 : vector<1x3xf32> to vector<512x3xf32>
    %29 = arith.addf %26, %28 : vector<512x3xf32>
    %cst_22 = arith.constant 0.000000e+00 : f32
    %30 = vector.broadcast %cst_22 : f32 to vector<512x3xf32>
    %31 = arith.maximumf %29, %30 : vector<512x3xf32>
    %32 = arith.maximumf %15, %31 : vector<512x3xf32>
    %c2 = arith.constant 2 : index
    %c0_23 = arith.constant 0 : index
    %c0_24 = arith.constant 0 : index
    %33 = vector.load %arg1[%c2, %c0_23, %c0_24] : memref<4x512x36xf32, #tpu.memory_space<vmem>>, vector<1x512x36xf32>
    %34 = vector.shape_cast %33 : vector<1x512x36xf32> to vector<512x36xf32>
    %35 = arith.truncf %34 : vector<512x36xf32> to vector<512x36xbf16>
    %c0_25 = arith.constant 0 : index
    %c0_26 = arith.constant 0 : index
    %36 = vector.load %arg2[%c0_25, %c0_26] : memref<36x3xbf16, #tpu.memory_space<vmem>>, vector<36x3xbf16>
    %cst_27 = arith.constant dense<0.000000e+00> : vector<512x3xf32>
    %37 = tpu.matmul %35, %36, %cst_27 {dimension_numbers = #tpu.dot_dimension_numbers<[1], [0], [0], [1], [0, 0, 1, 1], [], []>} : vector<512x36xbf16>, vector<36x3xbf16>, vector<512x3xf32> -> vector<512x3xf32>
    %c0_28 = arith.constant 0 : index
    %c0_29 = arith.constant 0 : index
    %38 = vector.load %arg3[%c0_28, %c0_29] : memref<1x3xf32, #tpu.memory_space<vmem>>, vector<1x3xf32>
    %39 = vector.broadcast %38 : vector<1x3xf32> to vector<512x3xf32>
    %40 = arith.addf %37, %39 : vector<512x3xf32>
    %c0_30 = arith.constant 0 : index
    %c0_31 = arith.constant 0 : index
    %41 = vector.load %arg4[%c0_30, %c0_31] : memref<1x3xf32, #tpu.memory_space<vmem>>, vector<1x3xf32>
    %42 = vector.broadcast %41 : vector<1x3xf32> to vector<512x3xf32>
    %43 = arith.mulf %40, %42 : vector<512x3xf32>
    %c0_32 = arith.constant 0 : index
    %c0_33 = arith.constant 0 : index
    %44 = vector.load %arg5[%c0_32, %c0_33] : memref<1x3xf32, #tpu.memory_space<vmem>>, vector<1x3xf32>
    %45 = vector.broadcast %44 : vector<1x3xf32> to vector<512x3xf32>
    %46 = arith.addf %43, %45 : vector<512x3xf32>
    %cst_34 = arith.constant 0.000000e+00 : f32
    %47 = vector.broadcast %cst_34 : f32 to vector<512x3xf32>
    %48 = arith.maximumf %46, %47 : vector<512x3xf32>
    %49 = arith.maximumf %32, %48 : vector<512x3xf32>
    %c3 = arith.constant 3 : index
    %c0_35 = arith.constant 0 : index
    %c0_36 = arith.constant 0 : index
    %50 = vector.load %arg1[%c3, %c0_35, %c0_36] : memref<4x512x36xf32, #tpu.memory_space<vmem>>, vector<1x512x36xf32>
    %51 = vector.shape_cast %50 : vector<1x512x36xf32> to vector<512x36xf32>
    %52 = arith.truncf %51 : vector<512x36xf32> to vector<512x36xbf16>
    %c0_37 = arith.constant 0 : index
    %c0_38 = arith.constant 0 : index
    %53 = vector.load %arg2[%c0_37, %c0_38] : memref<36x3xbf16, #tpu.memory_space<vmem>>, vector<36x3xbf16>
    %cst_39 = arith.constant dense<0.000000e+00> : vector<512x3xf32>
    %54 = tpu.matmul %52, %53, %cst_39 {dimension_numbers = #tpu.dot_dimension_numbers<[1], [0], [0], [1], [0, 0, 1, 1], [], []>} : vector<512x36xbf16>, vector<36x3xbf16>, vector<512x3xf32> -> vector<512x3xf32>
    %c0_40 = arith.constant 0 : index
    %c0_41 = arith.constant 0 : index
    %55 = vector.load %arg3[%c0_40, %c0_41] : memref<1x3xf32, #tpu.memory_space<vmem>>, vector<1x3xf32>
    %56 = vector.broadcast %55 : vector<1x3xf32> to vector<512x3xf32>
    %57 = arith.addf %54, %56 : vector<512x3xf32>
    %c0_42 = arith.constant 0 : index
    %c0_43 = arith.constant 0 : index
    %58 = vector.load %arg4[%c0_42, %c0_43] : memref<1x3xf32, #tpu.memory_space<vmem>>, vector<1x3xf32>
    %59 = vector.broadcast %58 : vector<1x3xf32> to vector<512x3xf32>
    %60 = arith.mulf %57, %59 : vector<512x3xf32>
    %c0_44 = arith.constant 0 : index
    %c0_45 = arith.constant 0 : index
    %61 = vector.load %arg5[%c0_44, %c0_45] : memref<1x3xf32, #tpu.memory_space<vmem>>, vector<1x3xf32>
    %62 = vector.broadcast %61 : vector<1x3xf32> to vector<512x3xf32>
    %63 = arith.addf %60, %62 : vector<512x3xf32>
    %cst_46 = arith.constant 0.000000e+00 : f32
    %64 = vector.broadcast %cst_46 : f32 to vector<512x3xf32>
    %65 = arith.maximumf %63, %64 : vector<512x3xf32>
    %66 = arith.maximumf %49, %65 : vector<512x3xf32>
    %c0_47 = arith.constant 0 : index
    %c0_48 = arith.constant 0 : index
    %67 = vector.load %arg6[%c0_47, %c0_48] : memref<512x3xf32, #tpu.memory_space<vmem>>, vector<512x3xf32>
    tpu.vector_store %arg6[%c0_47, %c0_48], %66 {strides = array<i32>} : memref<512x3xf32, #tpu.memory_space<vmem>>, vector<512x3xf32>,
    return
  }
  func.func @transform_0(%arg0: i32) -> (i32, i32, i32) {
    %c0_i32 = arith.constant 0 : i32
    %c0_i32_0 = arith.constant 0 : i32
    %c0_i32_1 = arith.constant 0 : i32
    return %c0_i32, %arg0, %c0_i32_0 : i32, i32, i32
  }
  func.func @transform_1(%arg0: i32) -> (i32, i32) {
    %c0_i32 = arith.constant 0 : i32
    %c0_i32_0 = arith.constant 0 : i32
    %c0_i32_1 = arith.constant 0 : i32
    return %c0_i32, %c0_i32_0 : i32, i32
  }
  func.func @transform_2(%arg0: i32) -> (i32, i32) {
    %c0_i32 = arith.constant 0 : i32
    %c0_i32_0 = arith.constant 0 : i32
    %c0_i32_1 = arith.constant 0 : i32
    return %c0_i32, %c0_i32_0 : i32, i32
  }
  func.func @transform_3(%arg0: i32) -> (i32, i32) {
    %c0_i32 = arith.constant 0 : i32
    %c0_i32_0 = arith.constant 0 : i32
    %c0_i32_1 = arith.constant 0 : i32
    return %c0_i32, %c0_i32_0 : i32, i32
  }
  func.func @transform_4(%arg0: i32) -> (i32, i32) {
    %c0_i32 = arith.constant 0 : i32
    %c0_i32_0 = arith.constant 0 : i32
    %c0_i32_1 = arith.constant 0 : i32
    return %c0_i32, %c0_i32_0 : i32, i32
  }
  func.func @transform_5(%arg0: i32) -> (i32, i32) {
    %c0_i32 = arith.constant 0 : i32
    %c0_i32_0 = arith.constant 0 : i32
    return %arg0, %c0_i32 : i32, i32
  }
}

module attributes {stable_mosaic.version = 11 : i64} {
  func.func @_mm_bnrelu_kernel(%arg0: i32, %arg1: memref<512x147xf32, #tpu.memory_space<vmem>>, %arg2: memref<147x64xbf16, #tpu.memory_space<vmem>>, %arg3: memref<1x64xf32, #tpu.memory_space<vmem>>, %arg4: memref<1x64xf32, #tpu.memory_space<vmem>>, %arg5: memref<512x64xf32, #tpu.memory_space<vmem>>) attributes {dimension_semantics = [#tpu.dimension_semantics<parallel>], iteration_bounds = array<i64: 1>, scalar_prefetch = 0 : i64, scratch_operands = 0 : i64, tpu.core_type = #tpu.core_type<tc>, window_params = [{transform_indices = @transform_0, window_bounds = array<i64: 512, 147>}, {pipeline_mode = #tpu.pipeline_mode<synchronous>, transform_indices = @transform_1, window_bounds = array<i64: 147, 64>}, {pipeline_mode = #tpu.pipeline_mode<synchronous>, transform_indices = @transform_2, window_bounds = array<i64: 1, 64>}, {pipeline_mode = #tpu.pipeline_mode<synchronous>, transform_indices = @transform_3, window_bounds = array<i64: 1, 64>}, {transform_indices = @transform_4, window_bounds = array<i64: 512, 64>}]} {
    %c0 = arith.constant 0 : index
    %c0_0 = arith.constant 0 : index
    %0 = vector.load %arg1[%c0, %c0_0] : memref<512x147xf32, #tpu.memory_space<vmem>>, vector<512x147xf32>
    %1 = arith.truncf %0 : vector<512x147xf32> to vector<512x147xbf16>
    %c0_1 = arith.constant 0 : index
    %c0_2 = arith.constant 0 : index
    %2 = vector.load %arg2[%c0_1, %c0_2] : memref<147x64xbf16, #tpu.memory_space<vmem>>, vector<147x64xbf16>
    %cst = arith.constant dense<0.000000e+00> : vector<512x64xf32>
    %3 = tpu.matmul %1, %2, %cst {dimension_numbers = #tpu.dot_dimension_numbers<[1], [0], [0], [1], [0, 0, 1, 1], [], []>} : vector<512x147xbf16>, vector<147x64xbf16>, vector<512x64xf32> -> vector<512x64xf32>
    %c0_3 = arith.constant 0 : index
    %c0_4 = arith.constant 0 : index
    %4 = vector.load %arg3[%c0_3, %c0_4] : memref<1x64xf32, #tpu.memory_space<vmem>>, vector<1x64xf32>
    %5 = vector.broadcast %4 : vector<1x64xf32> to vector<512x64xf32>
    %6 = arith.mulf %3, %5 : vector<512x64xf32>
    %c0_5 = arith.constant 0 : index
    %c0_6 = arith.constant 0 : index
    %7 = vector.load %arg4[%c0_5, %c0_6] : memref<1x64xf32, #tpu.memory_space<vmem>>, vector<1x64xf32>
    %8 = vector.broadcast %7 : vector<1x64xf32> to vector<512x64xf32>
    %9 = arith.addf %6, %8 : vector<512x64xf32>
    %cst_7 = arith.constant 0.000000e+00 : f32
    %10 = vector.broadcast %cst_7 : f32 to vector<512x64xf32>
    %11 = arith.maximumf %9, %10 : vector<512x64xf32>
    %c0_8 = arith.constant 0 : index
    %c0_9 = arith.constant 0 : index
    %12 = vector.load %arg5[%c0_8, %c0_9] : memref<512x64xf32, #tpu.memory_space<vmem>>, vector<512x64xf32>
    tpu.vector_store %arg5[%c0_8, %c0_9], %11 {strides = array<i32>} : memref<512x64xf32, #tpu.memory_space<vmem>>, vector<512x64xf32>,
    return
  }
  func.func @transform_0(%arg0: i32) -> (i32, i32) {
    %c0_i32 = arith.constant 0 : i32
    %c0_i32_0 = arith.constant 0 : i32
    return %arg0, %c0_i32 : i32, i32
  }
  func.func @transform_1(%arg0: i32) -> (i32, i32) {
    %c0_i32 = arith.constant 0 : i32
    %c0_i32_0 = arith.constant 0 : i32
    %c0_i32_1 = arith.constant 0 : i32
    return %c0_i32, %c0_i32_0 : i32, i32
  }
  func.func @transform_2(%arg0: i32) -> (i32, i32) {
    %c0_i32 = arith.constant 0 : i32
    %c0_i32_0 = arith.constant 0 : i32
    %c0_i32_1 = arith.constant 0 : i32
    return %c0_i32, %c0_i32_0 : i32, i32
  }
  func.func @transform_3(%arg0: i32) -> (i32, i32) {
    %c0_i32 = arith.constant 0 : i32
    %c0_i32_0 = arith.constant 0 : i32
    %c0_i32_1 = arith.constant 0 : i32
    return %c0_i32, %c0_i32_0 : i32, i32
  }
  func.func @transform_4(%arg0: i32) -> (i32, i32) {
    %c0_i32 = arith.constant 0 : i32
    %c0_i32_0 = arith.constant 0 : i32
    return %arg0, %c0_i32 : i32, i32
  }
}

module attributes {stable_mosaic.version = 11 : i64} {
  func.func @_window_max_kernel(%arg0: i32, %arg1: memref<9x128x64xf32, #tpu.memory_space<vmem>>, %arg2: memref<128x64xf32, #tpu.memory_space<vmem>>) attributes {dimension_semantics = [#tpu.dimension_semantics<parallel>], iteration_bounds = array<i64: 1>, scalar_prefetch = 0 : i64, scratch_operands = 0 : i64, tpu.core_type = #tpu.core_type<tc>, window_params = [{transform_indices = @transform_0, window_bounds = array<i64: 9, 128, 64>}, {transform_indices = @transform_1, window_bounds = array<i64: 128, 64>}]} {
    %c0 = arith.constant 0 : index
    %c0_0 = arith.constant 0 : index
    %c0_1 = arith.constant 0 : index
    %0 = vector.load %arg1[%c0, %c0_0, %c0_1] : memref<9x128x64xf32, #tpu.memory_space<vmem>>, vector<1x128x64xf32>
    %1 = vector.shape_cast %0 : vector<1x128x64xf32> to vector<128x64xf32>
    %c1 = arith.constant 1 : index
    %c0_2 = arith.constant 0 : index
    %c0_3 = arith.constant 0 : index
    %2 = vector.load %arg1[%c1, %c0_2, %c0_3] : memref<9x128x64xf32, #tpu.memory_space<vmem>>, vector<1x128x64xf32>
    %3 = vector.shape_cast %2 : vector<1x128x64xf32> to vector<128x64xf32>
    %4 = arith.maximumf %1, %3 : vector<128x64xf32>
    %c2 = arith.constant 2 : index
    %c0_4 = arith.constant 0 : index
    %c0_5 = arith.constant 0 : index
    %5 = vector.load %arg1[%c2, %c0_4, %c0_5] : memref<9x128x64xf32, #tpu.memory_space<vmem>>, vector<1x128x64xf32>
    %6 = vector.shape_cast %5 : vector<1x128x64xf32> to vector<128x64xf32>
    %7 = arith.maximumf %4, %6 : vector<128x64xf32>
    %c3 = arith.constant 3 : index
    %c0_6 = arith.constant 0 : index
    %c0_7 = arith.constant 0 : index
    %8 = vector.load %arg1[%c3, %c0_6, %c0_7] : memref<9x128x64xf32, #tpu.memory_space<vmem>>, vector<1x128x64xf32>
    %9 = vector.shape_cast %8 : vector<1x128x64xf32> to vector<128x64xf32>
    %10 = arith.maximumf %7, %9 : vector<128x64xf32>
    %c4 = arith.constant 4 : index
    %c0_8 = arith.constant 0 : index
    %c0_9 = arith.constant 0 : index
    %11 = vector.load %arg1[%c4, %c0_8, %c0_9] : memref<9x128x64xf32, #tpu.memory_space<vmem>>, vector<1x128x64xf32>
    %12 = vector.shape_cast %11 : vector<1x128x64xf32> to vector<128x64xf32>
    %13 = arith.maximumf %10, %12 : vector<128x64xf32>
    %c5 = arith.constant 5 : index
    %c0_10 = arith.constant 0 : index
    %c0_11 = arith.constant 0 : index
    %14 = vector.load %arg1[%c5, %c0_10, %c0_11] : memref<9x128x64xf32, #tpu.memory_space<vmem>>, vector<1x128x64xf32>
    %15 = vector.shape_cast %14 : vector<1x128x64xf32> to vector<128x64xf32>
    %16 = arith.maximumf %13, %15 : vector<128x64xf32>
    %c6 = arith.constant 6 : index
    %c0_12 = arith.constant 0 : index
    %c0_13 = arith.constant 0 : index
    %17 = vector.load %arg1[%c6, %c0_12, %c0_13] : memref<9x128x64xf32, #tpu.memory_space<vmem>>, vector<1x128x64xf32>
    %18 = vector.shape_cast %17 : vector<1x128x64xf32> to vector<128x64xf32>
    %19 = arith.maximumf %16, %18 : vector<128x64xf32>
    %c7 = arith.constant 7 : index
    %c0_14 = arith.constant 0 : index
    %c0_15 = arith.constant 0 : index
    %20 = vector.load %arg1[%c7, %c0_14, %c0_15] : memref<9x128x64xf32, #tpu.memory_space<vmem>>, vector<1x128x64xf32>
    %21 = vector.shape_cast %20 : vector<1x128x64xf32> to vector<128x64xf32>
    %22 = arith.maximumf %19, %21 : vector<128x64xf32>
    %c8 = arith.constant 8 : index
    %c0_16 = arith.constant 0 : index
    %c0_17 = arith.constant 0 : index
    %23 = vector.load %arg1[%c8, %c0_16, %c0_17] : memref<9x128x64xf32, #tpu.memory_space<vmem>>, vector<1x128x64xf32>
    %24 = vector.shape_cast %23 : vector<1x128x64xf32> to vector<128x64xf32>
    %25 = arith.maximumf %22, %24 : vector<128x64xf32>
    %c0_18 = arith.constant 0 : index
    %c0_19 = arith.constant 0 : index
    %26 = vector.load %arg2[%c0_18, %c0_19] : memref<128x64xf32, #tpu.memory_space<vmem>>, vector<128x64xf32>
    tpu.vector_store %arg2[%c0_18, %c0_19], %25 {strides = array<i32>} : memref<128x64xf32, #tpu.memory_space<vmem>>, vector<128x64xf32>,
    return
  }
  func.func @transform_0(%arg0: i32) -> (i32, i32, i32) {
    %c0_i32 = arith.constant 0 : i32
    %c0_i32_0 = arith.constant 0 : i32
    %c0_i32_1 = arith.constant 0 : i32
    return %c0_i32, %arg0, %c0_i32_0 : i32, i32, i32
  }
  func.func @transform_1(%arg0: i32) -> (i32, i32) {
    %c0_i32 = arith.constant 0 : i32
    %c0_i32_0 = arith.constant 0 : i32
    return %arg0, %c0_i32 : i32, i32
  }
}

</mosaic_0001>

<bundles_post_ra>
// kernel: stem_forward.3
= control target key start
LH: loop header
LB: loop body
LE: loop exit
PB: predicated region body
PF: predicated region fallthrough
CT: control target
= control target key end

     0   :  { %s5197_s18 = smov 0   ;;  %s5199_s19 = smov 0   ;;  %s7941_s0 = inlined_call_operand.vmem [shape: f32[4,2048,36], index: 0, kind: input, shape index: {}]   ;;  %s7942_s1 = inlined_call_operand.vmem [shape: bf16[36,3], index: 1, kind: input, shape index: {}]   ;;  %s7943_s2 = inlined_call_operand.vmem [shape: f32[1,3], index: 2, kind: input, shape index: {}]   ;;  %s7944_s3 = inlined_call_operand.vmem [shape: f32[1,3], index: 3, kind: input, shape index: {}]   ;;  %s7945_s4 = inlined_call_operand.vmem [shape: f32[1,3], index: 4, kind: input, shape index: {}]   ;;  %s7946_s5 = inlined_call_operand.vmem [shape: f32[2048,3], index: 5, kind: output, shape index: {}]  }
   0x1   :  { %s5201_s20 = smov 0  }
   0x2 LB: > { %s4343_s21 = sadd.s32 4294967295, %s5165_s20   ;;  %s5214_s22 = sadd.s32 1, %s5165_s20   ;;  %s5165_s20 = sphi %s5201_s20, %s8034_s20   ;;  %s5161_s19 = sphi %s5199_s19, %s8033_s19   ;;  %s5157_s18 = sphi %s5197_s18, %s8032_s18  }
   0x3   : > { %s19_s23 = ssub.s32 %s5165_s20, %s5214_s22  ;;  %s22_s24 = sadd.s32 1, %s5161_s19 }
   0x4   : > { %p20_p0 = scmp.eq.s32.totalorder %s19_s23, 0  ;;  %p29_p1 = scmp.ne.s32.totalorder %s5161_s19, %s5157_s18 }
   0x5   : > { %p30_p2 = scmp.eq.s32.totalorder %s5165_s20, 0  ;;  %p4346_p4 = scmp.ge.s32.totalorder %s5165_s20, 4 }
   0x6   : > { %s5223_s25 = scalar_select %p20_p0, %s5161_s19, %s22_s24  }
   0x7   : > { %p31_p3 = por %p30_p2, %p29_p1  ;;  %177 = sbr.rel (%p4346_p4) target bundleno = 146 (0x92), region = 32 }
   0xe   : > { %180 = sbr.rel (!%p31_p3) target bundleno = 146 (0x92), region = 36  ;;  %s182_s26 = sand.u32 (%p31_p3), 1, %s5161_s19  }
   0xf   : > { %s4682_s27 = sshll.u32 (%p31_p3), %s5165_s20, 9  ;;  %s4347_s28 = sshll.u32 (%p31_p3), %s182_s26, 11 }
  0x10   : > { %s5231_s6 = scalar_lea.vmem (%p31_p3), %s7941_s0, %s4682_s27  ;;  %s5236_s7 = scalar_lea.vmem (%p31_p3), [#allocation2], %s4347_s28 }
  0x11   : > { %v725_v0 = vld [vmem:[%s5231_s6] sm:$0xff] (%p31_p3)  ;;  %v727_v1 = vld [vmem:[%s5231_s6 + $0x8] sm:$0xff] (%p31_p3)  ;;  %v729_v2 = vld [vmem:[%s5231_s6 + $0x10] sm:$0xff] (%p31_p3) }
  0x12   : > { %726 = vst [vmem:[%s5236_s7] sm:$0xff] (%p31_p3), %v725_v0  ;;  %728 = vst [vmem:[%s5236_s7 + $0x8] sm:$0xff] (%p31_p3), %v727_v1  ;;  %v731_v3 = vld [vmem:[%s5231_s6 + $0x18] sm:$0xff] (%p31_p3)  ;;  %v733_v4 = vld [vmem:[%s5231_s6 + $0x20] sm:$0xff] (%p31_p3) }
  0x13   : > { %730 = vst [vmem:[%s5236_s7 + $0x10] sm:$0xff] (%p31_p3), %v729_v2  ;;  %v735_v5 = vld [vmem:[%s5231_s6 + $0x28] sm:$0xff] (%p31_p3)  ;;  %732 = vst [vmem:[%s5236_s7 + $0x18] sm:$0xff] (%p31_p3), %v731_v3  ;;  %v737_v6 = vld [vmem:[%s5231_s6 + $0x30] sm:$0xff] (%p31_p3) }
  0x14   : > { %734 = vst [vmem:[%s5236_s7 + $0x20] sm:$0xff] (%p31_p3), %v733_v4  ;;  %736 = vst [vmem:[%s5236_s7 + $0x28] sm:$0xff] (%p31_p3), %v735_v5  ;;  %v739_v7 = vld [vmem:[%s5231_s6 + $0x38] sm:$0xff] (%p31_p3)  ;;  %v741_v8 = vld [vmem:[%s5231_s6 + $0x40] sm:$0xff] (%p31_p3) }
  0x15   : > { %738 = vst [vmem:[%s5236_s7 + $0x30] sm:$0xff] %v737_v6  ;;  %740 = vst [vmem:[%s5236_s7 + $0x38] sm:$0xff] %v739_v7  ;;  %v743_v9 = vld [vmem:[%s5231_s6 + $0x48] sm:$0xff]  ;;  %v745_v10 = vld [vmem:[%s5231_s6 + $0x50] sm:$0xff] }
  0x16   : > { %742 = vst [vmem:[%s5236_s7 + $0x40] sm:$0xff] %v741_v8  ;;  %v747_v11 = vld [vmem:[%s5231_s6 + $0x58] sm:$0xff]  ;;  %744 = vst [vmem:[%s5236_s7 + $0x48] sm:$0xff] %v743_v9  ;;  %v749_v12 = vld [vmem:[%s5231_s6 + $0x60] sm:$0xff] }
  0x17   : > { %746 = vst [vmem:[%s5236_s7 + $0x50] sm:$0xff] %v745_v10  ;;  %748 = vst [vmem:[%s5236_s7 + $0x58] sm:$0xff] %v747_v11  ;;  %v751_v13 = vld [vmem:[%s5231_s6 + $0x68] sm:$0xff]  ;;  %v753_v14 = vld [vmem:[%s5231_s6 + $0x70] sm:$0xff] }
  0x18   : > { %750 = vst [vmem:[%s5236_s7 + $0x60] sm:$0xff] %v749_v12  ;;  %752 = vst [vmem:[%s5236_s7 + $0x68] sm:$0xff] %v751_v13  ;;  %v755_v15 = vld [vmem:[%s5231_s6 + $0x78] sm:$0xff]  ;;  %v757_v16 = vld [vmem:[%s5231_s6 + $0x80] sm:$0xff] }
  0x19   : > { %754 = vst [vmem:[%s5236_s7 + $0x70] sm:$0xff] %v753_v14  ;;  %v759_v17 = vld [vmem:[%s5231_s6 + $0x88] sm:$0xff]  ;;  %756 = vst [vmem:[%s5236_s7 + $0x78] sm:$0xff] %v755_v15  ;;  %v761_v18 = vld [vmem:[%s5231_s6 + $0x90] sm:$0xff] }
  0x1a   : > { %758 = vst [vmem:[%s5236_s7 + $0x80] sm:$0xff] %v757_v16  ;;  %760 = vst [vmem:[%s5236_s7 + $0x88] sm:$0xff] %v759_v17  ;;  %v763_v19 = vld [vmem:[%s5231_s6 + $0x98] sm:$0xff]  ;;  %v765_v20 = vld [vmem:[%s5231_s6 + $0xa0] sm:$0xff] }
  0x1b   : > { %762 = vst [vmem:[%s5236_s7 + $0x90] sm:$0xff] %v761_v18  ;;  %764 = vst [vmem:[%s5236_s7 + $0x98] sm:$0xff] %v763_v19  ;;  %v767_v21 = vld [vmem:[%s5231_s6 + $0xa8] sm:$0xff]  ;;  %v769_v22 = vld [vmem:[%s5231_s6 + $0xb0] sm:$0xff] }
  0x1c   : > { %766 = vst [vmem:[%s5236_s7 + $0xa0] sm:$0xff] %v765_v20  ;;  %v771_v23 = vld [vmem:[%s5231_s6 + $0xb8] sm:$0xff]  ;;  %768 = vst [vmem:[%s5236_s7 + $0xa8] sm:$0xff] %v767_v21  ;;  %v773_v24 = vld [vmem:[%s5231_s6 + $0xc0] sm:$0xff] }
  0x1d   : > { %770 = vst [vmem:[%s5236_s7 + $0xb0] sm:$0xff] %v769_v22  ;;  %772 = vst [vmem:[%s5236_s7 + $0xb8] sm:$0xff] %v771_v23  ;;  %v775_v25 = vld [vmem:[%s5231_s6 + $0xc8] sm:$0xff]  ;;  %v777_v26 = vld [vmem:[%s5231_s6 + $0xd0] sm:$0xff] }
  0x1e   : > { %774 = vst [vmem:[%s5236_s7 + $0xc0] sm:$0xff] %v773_v24  ;;  %776 = vst [vmem:[%s5236_s7 + $0xc8] sm:$0xff] %v775_v25  ;;  %v779_v27 = vld [vmem:[%s5231_s6 + $0xd8] sm:$0xff]  ;;  %v781_v28 = vld [vmem:[%s5231_s6 + $0xe0] sm:$0xff] }
  0x1f   : > { %778 = vst [vmem:[%s5236_s7 + $0xd0] sm:$0xff] %v777_v26  ;;  %v783_v29 = vld [vmem:[%s5231_s6 + $0xe8] sm:$0xff]  ;;  %780 = vst [vmem:[%s5236_s7 + $0xd8] sm:$0xff] %v779_v27  ;;  %v785_v30 = vld [vmem:[%s5231_s6 + $0xf0] sm:$0xff] }
  0x20   : > { %782 = vst [vmem:[%s5236_s7 + $0xe0] sm:$0xff] %v781_v28  ;;  %784 = vst [vmem:[%s5236_s7 + $0xe8] sm:$0xff] %v783_v29  ;;  %v787_v31 = vld [vmem:[%s5231_s6 + $0xf8] sm:$0xff]  ;;  %v789_v32 = vld [vmem:[%s5231_s6 + $0x100] sm:$0xff] }
  0x21   : > { %786 = vst [vmem:[%s5236_s7 + $0xf0] sm:$0xff] %v785_v30  ;;  %788 = vst [vmem:[%s5236_s7 + $0xf8] sm:$0xff] %v787_v31  ;;  %v791_v33 = vld [vmem:[%s5231_s6 + $0x108] sm:$0xff]  ;;  %v793_v34 = vld [vmem:[%s5231_s6 + $0x110] sm:$0xff] }
  0x22   : > { %790 = vst [vmem:[%s5236_s7 + $0x100] sm:$0xff] %v789_v32  ;;  %v795_v35 = vld [vmem:[%s5231_s6 + $0x118] sm:$0xff]  ;;  %792 = vst [vmem:[%s5236_s7 + $0x108] sm:$0xff] %v791_v33  ;;  %v797_v36 = vld [vmem:[%s5231_s6 + $0x120] sm:$0xff] }
  0x23   : > { %794 = vst [vmem:[%s5236_s7 + $0x110] sm:$0xff] %v793_v34  ;;  %796 = vst [vmem:[%s5236_s7 + $0x118] sm:$0xff] %v795_v35  ;;  %v799_v37 = vld [vmem:[%s5231_s6 + $0x128] sm:$0xff]  ;;  %v801_v38 = vld [vmem:[%s5231_s6 + $0x130] sm:$0xff] }
  0x24   : > { %798 = vst [vmem:[%s5236_s7 + $0x120] sm:$0xff] %v797_v36  ;;  %800 = vst [vmem:[%s5236_s7 + $0x128] sm:$0xff] %v799_v37  ;;  %v803_v39 = vld [vmem:[%s5231_s6 + $0x138] sm:$0xff]  ;;  %v805_v40 = vld [vmem:[%s5231_s6 + $0x140] sm:$0xff] }
  0x25   : > { %802 = vst [vmem:[%s5236_s7 + $0x130] sm:$0xff] %v801_v38  ;;  %v807_v41 = vld [vmem:[%s5231_s6 + $0x148] sm:$0xff]  ;;  %804 = vst [vmem:[%s5236_s7 + $0x138] sm:$0xff] %v803_v39  ;;  %v809_v42 = vld [vmem:[%s5231_s6 + $0x150] sm:$0xff] }
  0x26   : > { %806 = vst [vmem:[%s5236_s7 + $0x140] sm:$0xff] %v805_v40  ;;  %808 = vst [vmem:[%s5236_s7 + $0x148] sm:$0xff] %v807_v41  ;;  %v811_v43 = vld [vmem:[%s5231_s6 + $0x158] sm:$0xff]  ;;  %v813_v44 = vld [vmem:[%s5231_s6 + $0x160] sm:$0xff] }
  0x27   : > { %810 = vst [vmem:[%s5236_s7 + $0x150] sm:$0xff] %v809_v42  ;;  %812 = vst [vmem:[%s5236_s7 + $0x158] sm:$0xff] %v811_v43  ;;  %v815_v45 = vld [vmem:[%s5231_s6 + $0x168] sm:$0xff]  ;;  %v817_v46 = vld [vmem:[%s5231_s6 + $0x170] sm:$0xff] }
  0x28   : > { %814 = vst [vmem:[%s5236_s7 + $0x160] sm:$0xff] %v813_v44  ;;  %v819_v47 = vld [vmem:[%s5231_s6 + $0x178] sm:$0xff]  ;;  %816 = vst [vmem:[%s5236_s7 + $0x168] sm:$0xff] %v815_v45  ;;  %v821_v48 = vld [vmem:[%s5231_s6 + $0x180] sm:$0xff] }
  0x29   : > { %818 = vst [vmem:[%s5236_s7 + $0x170] sm:$0xff] %v817_v46  ;;  %820 = vst [vmem:[%s5236_s7 + $0x178] sm:$0xff] %v819_v47  ;;  %v823_v49 = vld [vmem:[%s5231_s6 + $0x188] sm:$0xff]  ;;  %v825_v50 = vld [vmem:[%s5231_s6 + $0x190] sm:$0xff] }
  0x2a   : > { %822 = vst [vmem:[%s5236_s7 + $0x180] sm:$0xff] %v821_v48  ;;  %824 = vst [vmem:[%s5236_s7 + $0x188] sm:$0xff] %v823_v49  ;;  %v827_v51 = vld [vmem:[%s5231_s6 + $0x198] sm:$0xff]  ;;  %v829_v52 = vld [vmem:[%s5231_s6 + $0x1a0] sm:$0xff] }
  0x2b   : > { %826 = vst [vmem:[%s5236_s7 + $0x190] sm:$0xff] %v825_v50  ;;  %v831_v53 = vld [vmem:[%s5231_s6 + $0x1a8] sm:$0xff]  ;;  %828 = vst [vmem:[%s5236_s7 + $0x198] sm:$0xff] %v827_v51  ;;  %v833_v54 = vld [vmem:[%s5231_s6 + $0x1b0] sm:$0xff] }
  0x2c   : > { %830 = vst [vmem:[%s5236_s7 + $0x1a0] sm:$0xff] %v829_v52  ;;  %832 = vst [vmem:[%s5236_s7 + $0x1a8] sm:$0xff] %v831_v53  ;;  %v835_v55 = vld [vmem:[%s5231_s6 + $0x1b8] sm:$0xff]  ;;  %v837_v56 = vld [vmem:[%s5231_s6 + $0x1c0] sm:$0xff] }
  0x2d   : > { %834 = vst [vmem:[%s5236_s7 + $0x1b0] sm:$0xff] %v833_v54  ;;  %836 = vst [vmem:[%s5236_s7 + $0x1b8] sm:$0xff] %v835_v55  ;;  %v839_v57 = vld [vmem:[%s5231_s6 + $0x1c8] sm:$0xff]  ;;  %v841_v58 = vld [vmem:[%s5231_s6 + $0x1d0] sm:$0xff] }
  0x2e   : > { %838 = vst [vmem:[%s5236_s7 + $0x1c0] sm:$0xff] %v837_v56  ;;  %v843_v59 = vld [vmem:[%s5231_s6 + $0x1d8] sm:$0xff]  ;;  %840 = vst [vmem:[%s5236_s7 + $0x1c8] sm:$0xff] %v839_v57  ;;  %v845_v60 = vld [vmem:[%s5231_s6 + $0x1e0] sm:$0xff] }
  0x2f   : > { %842 = vst [vmem:[%s5236_s7 + $0x1d0] sm:$0xff] %v841_v58  ;;  %844 = vst [vmem:[%s5236_s7 + $0x1d8] sm:$0xff] %v843_v59  ;;  %v847_v61 = vld [vmem:[%s5231_s6 + $0x1e8] sm:$0xff]  ;;  %v849_v62 = vld [vmem:[%s5231_s6 + $0x1f0] sm:$0xff] }
  0x30   : > { %846 = vst [vmem:[%s5236_s7 + $0x1e0] sm:$0xff] %v845_v60  ;;  %848 = vst [vmem:[%s5236_s7 + $0x1e8] sm:$0xff] %v847_v61  ;;  %v851_v63 = vld [vmem:[%s5231_s6 + $0x1f8] sm:$0xff]  ;;  %v853_v0 = vld [vmem:[%s5231_s6 + $0x800] sm:$0xff] }
  0x31   : > { %850 = vst [vmem:[%s5236_s7 + $0x1f0] sm:$0xff] %v849_v62  ;;  %v855_v1 = vld [vmem:[%s5231_s6 + $0x808] sm:$0xff]  ;;  %852 = vst [vmem:[%s5236_s7 + $0x1f8] sm:$0xff] %v851_v63  ;;  %v857_v2 = vld [vmem:[%s5231_s6 + $0x810] sm:$0xff] }
  0x32   : > { %854 = vst [vmem:[%s5236_s7 + $0x200] sm:$0xff] %v853_v0  ;;  %856 = vst [vmem:[%s5236_s7 + $0x208] sm:$0xff] %v855_v1  ;;  %v859_v3 = vld [vmem:[%s5231_s6 + $0x818] sm:$0xff]  ;;  %v861_v4 = vld [vmem:[%s5231_s6 + $0x820] sm:$0xff] }
  0x33   : > { %858 = vst [vmem:[%s5236_s7 + $0x210] sm:$0xff] %v857_v2  ;;  %860 = vst [vmem:[%s5236_s7 + $0x218] sm:$0xff] %v859_v3  ;;  %v863_v5 = vld [vmem:[%s5231_s6 + $0x828] sm:$0xff]  ;;  %v865_v6 = vld [vmem:[%s5231_s6 + $0x830] sm:$0xff] }
  0x34   : > { %862 = vst [vmem:[%s5236_s7 + $0x220] sm:$0xff] %v861_v4  ;;  %v867_v7 = vld [vmem:[%s5231_s6 + $0x838] sm:$0xff]  ;;  %864 = vst [vmem:[%s5236_s7 + $0x228] sm:$0xff] %v863_v5  ;;  %v869_v8 = vld [vmem:[%s5231_s6 + $0x840] sm:$0xff] }
  0x35   : > { %866 = vst [vmem:[%s5236_s7 + $0x230] sm:$0xff] %v865_v6  ;;  %868 = vst [vmem:[%s5236_s7 + $0x238] sm:$0xff] %v867_v7  ;;  %v871_v9 = vld [vmem:[%s5231_s6 + $0x848] sm:$0xff]  ;;  %v873_v10 = vld [vmem:[%s5231_s6 + $0x850] sm:$0xff] }
  0x36   : > { %870 = vst [vmem:[%s5236_s7 + $0x240] sm:$0xff] %v869_v8  ;;  %872 = vst [vmem:[%s5236_s7 + $0x248] sm:$0xff] %v871_v9  ;;  %v875_v11 = vld [vmem:[%s5231_s6 + $0x858] sm:$0xff]  ;;  %v877_v12 = vld [vmem:[%s5231_s6 + $0x860] sm:$0xff] }
  0x37   : > { %874 = vst [vmem:[%s5236_s7 + $0x250] sm:$0xff] %v873_v10  ;;  %v879_v13 = vld [vmem:[%s5231_s6 + $0x868] sm:$0xff]  ;;  %876 = vst [vmem:[%s5236_s7 + $0x258] sm:$0xff] %v875_v11  ;;  %v881_v14 = vld [vmem:[%s5231_s6 + $0x870] sm:$0xff] }
  0x38   : > { %878 = vst [vmem:[%s5236_s7 + $0x260] sm:$0xff] %v877_v12  ;;  %880 = vst [vmem:[%s5236_s7 + $0x268] sm:$0xff] %v879_v13  ;;  %v883_v15 = vld [vmem:[%s5231_s6 + $0x878] sm:$0xff]  ;;  %v885_v16 = vld [vmem:[%s5231_s6 + $0x880] sm:$0xff] }
  0x39   : > { %882 = vst [vmem:[%s5236_s7 + $0x270] sm:$0xff] %v881_v14  ;;  %884 = vst [vmem:[%s5236_s7 + $0x278] sm:$0xff] %v883_v15  ;;  %v887_v17 = vld [vmem:[%s5231_s6 + $0x888] sm:$0xff]  ;;  %v889_v18 = vld [vmem:[%s5231_s6 + $0x890] sm:$0xff] }
  0x3a   : > { %886 = vst [vmem:[%s5236_s7 + $0x280] sm:$0xff] %v885_v16  ;;  %v891_v19 = vld [vmem:[%s5231_s6 + $0x898] sm:$0xff]  ;;  %888 = vst [vmem:[%s5236_s7 + $0x288] sm:$0xff] %v887_v17  ;;  %v893_v20 = vld [vmem:[%s5231_s6 + $0x8a0] sm:$0xff] }
  0x3b   : > { %890 = vst [vmem:[%s5236_s7 + $0x290] sm:$0xff] %v889_v18  ;;  %892 = vst [vmem:[%s5236_s7 + $0x298] sm:$0xff] %v891_v19  ;;  %v895_v21 = vld [vmem:[%s5231_s6 + $0x8a8] sm:$0xff]  ;;  %v897_v22 = vld [vmem:[%s5231_s6 + $0x8b0] sm:$0xff] }
  0x3c   : > { %894 = vst [vmem:[%s5236_s7 + $0x2a0] sm:$0xff] %v893_v20  ;;  %896 = vst [vmem:[%s5236_s7 + $0x2a8] sm:$0xff] %v895_v21  ;;  %v899_v23 = vld [vmem:[%s5231_s6 + $0x8b8] sm:$0xff]  ;;  %v901_v24 = vld [vmem:[%s5231_s6 + $0x8c0] sm:$0xff] }
  0x3d   : > { %898 = vst [vmem:[%s5236_s7 + $0x2b0] sm:$0xff] %v897_v22  ;;  %v903_v25 = vld [vmem:[%s5231_s6 + $0x8c8] sm:$0xff]  ;;  %900 = vst [vmem:[%s5236_s7 + $0x2b8] sm:$0xff] %v899_v23  ;;  %v905_v26 = vld [vmem:[%s5231_s6 + $0x8d0] sm:$0xff] }
  0x3e   : > { %902 = vst [vmem:[%s5236_s7 + $0x2c0] sm:$0xff] %v901_v24  ;;  %904 = vst [vmem:[%s5236_s7 + $0x2c8] sm:$0xff] %v903_v25  ;;  %v907_v27 = vld [vmem:[%s5231_s6 + $0x8d8] sm:$0xff]  ;;  %v909_v28 = vld [vmem:[%s5231_s6 + $0x8e0] sm:$0xff] }
  0x3f   : > { %906 = vst [vmem:[%s5236_s7 + $0x2d0] sm:$0xff] %v905_v26  ;;  %908 = vst [vmem:[%s5236_s7 + $0x2d8] sm:$0xff] %v907_v27  ;;  %v911_v29 = vld [vmem:[%s5231_s6 + $0x8e8] sm:$0xff]  ;;  %v913_v30 = vld [vmem:[%s5231_s6 + $0x8f0] sm:$0xff] }
  0x40   : > { %910 = vst [vmem:[%s5236_s7 + $0x2e0] sm:$0xff] %v909_v28  ;;  %v915_v31 = vld [vmem:[%s5231_s6 + $0x8f8] sm:$0xff]  ;;  %912 = vst [vmem:[%s5236_s7 + $0x2e8] sm:$0xff] %v911_v29  ;;  %v917_v32 = vld [vmem:[%s5231_s6 + $0x900] sm:$0xff] }
  0x41   : > { %914 = vst [vmem:[%s5236_s7 + $0x2f0] sm:$0xff] %v913_v30  ;;  %916 = vst [vmem:[%s5236_s7 + $0x2f8] sm:$0xff] %v915_v31  ;;  %v919_v33 = vld [vmem:[%s5231_s6 + $0x908] sm:$0xff]  ;;  %v921_v34 = vld [vmem:[%s5231_s6 + $0x910] sm:$0xff] }
  0x42   : > { %918 = vst [vmem:[%s5236_s7 + $0x300] sm:$0xff] %v917_v32  ;;  %920 = vst [vmem:[%s5236_s7 + $0x308] sm:$0xff] %v919_v33  ;;  %v923_v35 = vld [vmem:[%s5231_s6 + $0x918] sm:$0xff]  ;;  %v925_v36 = vld [vmem:[%s5231_s6 + $0x920] sm:$0xff] }
  0x43   : > { %922 = vst [vmem:[%s5236_s7 + $0x310] sm:$0xff] %v921_v34  ;;  %v927_v37 = vld [vmem:[%s5231_s6 + $0x928] sm:$0xff]  ;;  %924 = vst [vmem:[%s5236_s7 + $0x318] sm:$0xff] %v923_v35  ;;  %v929_v38 = vld [vmem:[%s5231_s6 + $0x930] sm:$0xff] }
  0x44   : > { %926 = vst [vmem:[%s5236_s7 + $0x320] sm:$0xff] %v925_v36  ;;  %928 = vst [vmem:[%s5236_s7 + $0x328] sm:$0xff] %v927_v37  ;;  %v931_v39 = vld [vmem:[%s5231_s6 + $0x938] sm:$0xff]  ;;  %v933_v40 = vld [vmem:[%s5231_s6 + $0x940] sm:$0xff] }
  0x45   : > { %930 = vst [vmem:[%s5236_s7 + $0x330] sm:$0xff] %v929_v38  ;;  %932 = vst [vmem:[%s5236_s7 + $0x338] sm:$0xff] %v931_v39  ;;  %v935_v41 = vld [vmem:[%s5231_s6 + $0x948] sm:$0xff]  ;;  %v937_v42 = vld [vmem:[%s5231_s6 + $0x950] sm:$0xff] }
  0x46   : > { %934 = vst [vmem:[%s5236_s7 + $0x340] sm:$0xff] %v933_v40  ;;  %v939_v43 = vld [vmem:[%s5231_s6 + $0x958] sm:$0xff]  ;;  %936 = vst [vmem:[%s5236_s7 + $0x348] sm:$0xff] %v935_v41  ;;  %v941_v44 = vld [vmem:[%s5231_s6 + $0x960] sm:$0xff] }
  0x47   : > { %938 = vst [vmem:[%s5236_s7 + $0x350] sm:$0xff] %v937_v42  ;;  %940 = vst [vmem:[%s5236_s7 + $0x358] sm:$0xff] %v939_v43  ;;  %v943_v45 = vld [vmem:[%s5231_s6 + $0x968] sm:$0xff]  ;;  %v945_v46 = vld [vmem:[%s5231_s6 + $0x970] sm:$0xff] }
  0x48   : > { %942 = vst [vmem:[%s5236_s7 + $0x360] sm:$0xff] %v941_v44  ;;  %944 = vst [vmem:[%s5236_s7 + $0x368] sm:$0xff] %v943_v45  ;;  %v947_v47 = vld [vmem:[%s5231_s6 + $0x978] sm:$0xff]  ;;  %v949_v48 = vld [vmem:[%s5231_s6 + $0x980] sm:$0xff] }
  0x49   : > { %946 = vst [vmem:[%s5236_s7 + $0x370] sm:$0xff] %v945_v46  ;;  %v951_v49 = vld [vmem:[%s5231_s6 + $0x988] sm:$0xff]  ;;  %948 = vst [vmem:[%s5236_s7 + $0x378] sm:$0xff] %v947_v47  ;;  %v953_v50 = vld [vmem:[%s5231_s6 + $0x990] sm:$0xff] }
  0x4a   : > { %950 = vst [vmem:[%s5236_s7 + $0x380] sm:$0xff] %v949_v48  ;;  %952 = vst [vmem:[%s5236_s7 + $0x388] sm:$0xff] %v951_v49  ;;  %v955_v51 = vld [vmem:[%s5231_s6 + $0x998] sm:$0xff]  ;;  %v957_v52 = vld [vmem:[%s5231_s6 + $0x9a0] sm:$0xff] }
  0x4b   : > { %954 = vst [vmem:[%s5236_s7 + $0x390] sm:$0xff] %v953_v50  ;;  %956 = vst [vmem:[%s5236_s7 + $0x398] sm:$0xff] %v955_v51  ;;  %v959_v53 = vld [vmem:[%s5231_s6 + $0x9a8] sm:$0xff]  ;;  %v961_v54 = vld [vmem:[%s5231_s6 + $0x9b0] sm:$0xff] }
  0x4c   : > { %958 = vst [vmem:[%s5236_s7 + $0x3a0] sm:$0xff] %v957_v52  ;;  %v963_v55 = vld [vmem:[%s5231_s6 + $0x9b8] sm:$0xff]  ;;  %960 = vst [vmem:[%s5236_s7 + $0x3a8] sm:$0xff] %v959_v53  ;;  %v965_v56 = vld [vmem:[%s5231_s6 + $0x9c0] sm:$0xff] }
  0x4d   : > { %962 = vst [vmem:[%s5236_s7 + $0x3b0] sm:$0xff] %v961_v54  ;;  %964 = vst [vmem:[%s5236_s7 + $0x3b8] sm:$0xff] %v963_v55  ;;  %v967_v57 = vld [vmem:[%s5231_s6 + $0x9c8] sm:$0xff]  ;;  %v969_v58 = vld [vmem:[%s5231_s6 + $0x9d0] sm:$0xff] }
  0x4e   : > { %966 = vst [vmem:[%s5236_s7 + $0x3c0] sm:$0xff] %v965_v56  ;;  %968 = vst [vmem:[%s5236_s7 + $0x3c8] sm:$0xff] %v967_v57  ;;  %v971_v59 = vld [vmem:[%s5231_s6 + $0x9d8] sm:$0xff]  ;;  %v973_v60 = vld [vmem:[%s5231_s6 + $0x9e0] sm:$0xff] }
  0x4f   : > { %970 = vst [vmem:[%s5236_s7 + $0x3d0] sm:$0xff] %v969_v58  ;;  %v975_v61 = vld [vmem:[%s5231_s6 + $0x9e8] sm:$0xff]  ;;  %972 = vst [vmem:[%s5236_s7 + $0x3d8] sm:$0xff] %v971_v59  ;;  %v977_v62 = vld [vmem:[%s5231_s6 + $0x9f0] sm:$0xff] }
  0x50   : > { %974 = vst [vmem:[%s5236_s7 + $0x3e0] sm:$0xff] %v973_v60  ;;  %976 = vst [vmem:[%s5236_s7 + $0x3e8] sm:$0xff] %v975_v61  ;;  %v979_v63 = vld [vmem:[%s5231_s6 + $0x9f8] sm:$0xff]  ;;  %v981_v0 = vld [vmem:[%s5231_s6 + $0x1000] sm:$0xff] }
  0x51   : > { %978 = vst [vmem:[%s5236_s7 + $0x3f0] sm:$0xff] %v977_v62  ;;  %980 = vst [vmem:[%s5236_s7 + $0x3f8] sm:$0xff] %v979_v63  ;;  %v983_v1 = vld [vmem:[%s5231_s6 + $0x1008] sm:$0xff]  ;;  %v985_v2 = vld [vmem:[%s5231_s6 + $0x1010] sm:$0xff] }
  0x52   : > { %982 = vst [vmem:[%s5236_s7 + $0x400] sm:$0xff] %v981_v0  ;;  %v987_v3 = vld [vmem:[%s5231_s6 + $0x1018] sm:$0xff]  ;;  %984 = vst [vmem:[%s5236_s7 + $0x408] sm:$0xff] %v983_v1  ;;  %v989_v4 = vld [vmem:[%s5231_s6 + $0x1020] sm:$0xff] }
  0x53   : > { %986 = vst [vmem:[%s5236_s7 + $0x410] sm:$0xff] %v985_v2  ;;  %988 = vst [vmem:[%s5236_s7 + $0x418] sm:$0xff] %v987_v3  ;;  %v991_v5 = vld [vmem:[%s5231_s6 + $0x1028] sm:$0xff]  ;;  %v993_v6 = vld [vmem:[%s5231_s6 + $0x1030] sm:$0xff] }
  0x54   : > { %990 = vst [vmem:[%s5236_s7 + $0x420] sm:$0xff] %v989_v4  ;;  %992 = vst [vmem:[%s5236_s7 + $0x428] sm:$0xff] %v991_v5  ;;  %v995_v7 = vld [vmem:[%s5231_s6 + $0x1038] sm:$0xff]  ;;  %v997_v8 = vld [vmem:[%s5231_s6 + $0x1040] sm:$0xff] }
  0x55   : > { %994 = vst [vmem:[%s5236_s7 + $0x430] sm:$0xff] %v993_v6  ;;  %v999_v9 = vld [vmem:[%s5231_s6 + $0x1048] sm:$0xff]  ;;  %996 = vst [vmem:[%s5236_s7 + $0x438] sm:$0xff] %v995_v7  ;;  %v1001_v10 = vld [vmem:[%s5231_s6 + $0x1050] sm:$0xff] }
  0x56   : > { %998 = vst [vmem:[%s5236_s7 + $0x440] sm:$0xff] %v997_v8  ;;  %1000 = vst [vmem:[%s5236_s7 + $0x448] sm:$0xff] %v999_v9  ;;  %v1003_v11 = vld [vmem:[%s5231_s6 + $0x1058] sm:$0xff]  ;;  %v1005_v12 = vld [vmem:[%s5231_s6 + $0x1060] sm:$0xff] }
  0x57   : > { %1002 = vst [vmem:[%s5236_s7 + $0x450] sm:$0xff] %v1001_v10  ;;  %1004 = vst [vmem:[%s5236_s7 + $0x458] sm:$0xff] %v1003_v11  ;;  %v1007_v13 = vld [vmem:[%s5231_s6 + $0x1068] sm:$0xff]  ;;  %v1009_v14 = vld [vmem:[%s5231_s6 + $0x1070] sm:$0xff] }
  0x58   : > { %1006 = vst [vmem:[%s5236_s7 + $0x460] sm:$0xff] %v1005_v12  ;;  %v1011_v15 = vld [vmem:[%s5231_s6 + $0x1078] sm:$0xff]  ;;  %1008 = vst [vmem:[%s5236_s7 + $0x468] sm:$0xff] %v1007_v13  ;;  %v1013_v16 = vld [vmem:[%s5231_s6 + $0x1080] sm:$0xff] }
  0x59   : > { %1010 = vst [vmem:[%s5236_s7 + $0x470] sm:$0xff] %v1009_v14  ;;  %1012 = vst [vmem:[%s5236_s7 + $0x478] sm:$0xff] %v1011_v15  ;;  %v1015_v17 = vld [vmem:[%s5231_s6 + $0x1088] sm:$0xff]  ;;  %v1017_v18 = vld [vmem:[%s5231_s6 + $0x1090] sm:$0xff] }
  0x5a   : > { %1014 = vst [vmem:[%s5236_s7 + $0x480] sm:$0xff] %v1013_v16  ;;  %1016 = vst [vmem:[%s5236_s7 + $0x488] sm:$0xff] %v1015_v17  ;;  %v1019_v19 = vld [vmem:[%s5231_s6 + $0x1098] sm:$0xff]  ;;  %v1021_v20 = vld [vmem:[%s5231_s6 + $0x10a0] sm:$0xff] }
  0x5b   : > { %1018 = vst [vmem:[%s5236_s7 + $0x490] sm:$0xff] %v1017_v18  ;;  %v1023_v21 = vld [vmem:[%s5231_s6 + $0x10a8] sm:$0xff]  ;;  %1020 = vst [vmem:[%s5236_s7 + $0x498] sm:$0xff] %v1019_v19  ;;  %v1025_v22 = vld [vmem:[%s5231_s6 + $0x10b0] sm:$0xff] }
  0x5c   : > { %1022 = vst [vmem:[%s5236_s7 + $0x4a0] sm:$0xff] %v1021_v20  ;;  %1024 = vst [vmem:[%s5236_s7 + $0x4a8] sm:$0xff] %v1023_v21  ;;  %v1027_v23 = vld [vmem:[%s5231_s6 + $0x10b8] sm:$0xff]  ;;  %v1029_v24 = vld [vmem:[%s5231_s6 + $0x10c0] sm:$0xff] }
  0x5d   : > { %1026 = vst [vmem:[%s5236_s7 + $0x4b0] sm:$0xff] %v1025_v22  ;;  %1028 = vst [vmem:[%s5236_s7 + $0x4b8] sm:$0xff] %v1027_v23  ;;  %v1031_v25 = vld [vmem:[%s5231_s6 + $0x10c8] sm:$0xff]  ;;  %v1033_v26 = vld [vmem:[%s5231_s6 + $0x10d0] sm:$0xff] }
  0x5e   : > { %1030 = vst [vmem:[%s5236_s7 + $0x4c0] sm:$0xff] %v1029_v24  ;;  %v1035_v27 = vld [vmem:[%s5231_s6 + $0x10d8] sm:$0xff]  ;;  %1032 = vst [vmem:[%s5236_s7 + $0x4c8] sm:$0xff] %v1031_v25  ;;  %v1037_v28 = vld [vmem:[%s5231_s6 + $0x10e0] sm:$0xff] }
  0x5f   : > { %1034 = vst [vmem:[%s5236_s7 + $0x4d0] sm:$0xff] %v1033_v26  ;;  %1036 = vst [vmem:[%s5236_s7 + $0x4d8] sm:$0xff] %v1035_v27  ;;  %v1039_v29 = vld [vmem:[%s5231_s6 + $0x10e8] sm:$0xff]  ;;  %v1041_v30 = vld [vmem:[%s5231_s6 + $0x10f0] sm:$0xff] }
  0x60   : > { %1038 = vst [vmem:[%s5236_s7 + $0x4e0] sm:$0xff] %v1037_v28  ;;  %1040 = vst [vmem:[%s5236_s7 + $0x4e8] sm:$0xff] %v1039_v29  ;;  %v1043_v31 = vld [vmem:[%s5231_s6 + $0x10f8] sm:$0xff]  ;;  %v1045_v32 = vld [vmem:[%s5231_s6 + $0x1100] sm:$0xff] }
  0x61   : > { %1042 = vst [vmem:[%s5236_s7 + $0x4f0] sm:$0xff] %v1041_v30  ;;  %v1047_v33 = vld [vmem:[%s5231_s6 + $0x1108] sm:$0xff]  ;;  %1044 = vst [vmem:[%s5236_s7 + $0x4f8] sm:$0xff] %v1043_v31  ;;  %v1049_v34 = vld [vmem:[%s5231_s6 + $0x1110] sm:$0xff] }
  0x62   : > { %1046 = vst [vmem:[%s5236_s7 + $0x500] sm:$0xff] %v1045_v32  ;;  %1048 = vst [vmem:[%s5236_s7 + $0x508] sm:$0xff] %v1047_v33  ;;  %v1051_v35 = vld [vmem:[%s5231_s6 + $0x1118] sm:$0xff]  ;;  %v1053_v36 = vld [vmem:[%s5231_s6 + $0x1120] sm:$0xff] }
  0x63   : > { %1050 = vst [vmem:[%s5236_s7 + $0x510] sm:$0xff] %v1049_v34  ;;  %1052 = vst [vmem:[%s5236_s7 + $0x518] sm:$0xff] %v1051_v35  ;;  %v1055_v37 = vld [vmem:[%s5231_s6 + $0x1128] sm:$0xff]  ;;  %v1057_v38 = vld [vmem:[%s5231_s6 + $0x1130] sm:$0xff] }
  0x64   : > { %1054 = vst [vmem:[%s5236_s7 + $0x520] sm:$0xff] %v1053_v36  ;;  %v1059_v39 = vld [vmem:[%s5231_s6 + $0x1138] sm:$0xff]  ;;  %1056 = vst [vmem:[%s5236_s7 + $0x528] sm:$0xff] %v1055_v37  ;;  %v1061_v40 = vld [vmem:[%s5231_s6 + $0x1140] sm:$0xff] }
  0x65   : > { %1058 = vst [vmem:[%s5236_s7 + $0x530] sm:$0xff] %v1057_v38  ;;  %1060 = vst [vmem:[%s5236_s7 + $0x538] sm:$0xff] %v1059_v39  ;;  %v1063_v41 = vld [vmem:[%s5231_s6 + $0x1148] sm:$0xff]  ;;  %v1065_v42 = vld [vmem:[%s5231_s6 + $0x1150] sm:$0xff] }
  0x66   : > { %1062 = vst [vmem:[%s5236_s7 + $0x540] sm:$0xff] %v1061_v40  ;;  %1064 = vst [vmem:[%s5236_s7 + $0x548] sm:$0xff] %v1063_v41  ;;  %v1067_v43 = vld [vmem:[%s5231_s6 + $0x1158] sm:$0xff]  ;;  %v1069_v44 = vld [vmem:[%s5231_s6 + $0x1160] sm:$0xff] }
  0x67   : > { %1066 = vst [vmem:[%s5236_s7 + $0x550] sm:$0xff] %v1065_v42  ;;  %v1071_v45 = vld [vmem:[%s5231_s6 + $0x1168] sm:$0xff]  ;;  %1068 = vst [vmem:[%s5236_s7 + $0x558] sm:$0xff] %v1067_v43  ;;  %v1073_v46 = vld [vmem:[%s5231_s6 + $0x1170] sm:$0xff] }
  0x68   : > { %1070 = vst [vmem:[%s5236_s7 + $0x560] sm:$0xff] %v1069_v44  ;;  %1072 = vst [vmem:[%s5236_s7 + $0x568] sm:$0xff] %v1071_v45  ;;  %v1075_v47 = vld [vmem:[%s5231_s6 + $0x1178] sm:$0xff]  ;;  %v1077_v48 = vld [vmem:[%s5231_s6 + $0x1180] sm:$0xff] }
  0x69   : > { %1074 = vst [vmem:[%s5236_s7 + $0x570] sm:$0xff] %v1073_v46  ;;  %1076 = vst [vmem:[%s5236_s7 + $0x578] sm:$0xff] %v1075_v47  ;;  %v1079_v49 = vld [vmem:[%s5231_s6 + $0x1188] sm:$0xff]  ;;  %v1081_v50 = vld [vmem:[%s5231_s6 + $0x1190] sm:$0xff] }
  0x6a   : > { %1078 = vst [vmem:[%s5236_s7 + $0x580] sm:$0xff] %v1077_v48  ;;  %v1083_v51 = vld [vmem:[%s5231_s6 + $0x1198] sm:$0xff]  ;;  %1080 = vst [vmem:[%s5236_s7 + $0x588] sm:$0xff] %v1079_v49  ;;  %v1085_v52 = vld [vmem:[%s5231_s6 + $0x11a0] sm:$0xff] }
  0x6b   : > { %1082 = vst [vmem:[%s5236_s7 + $0x590] sm:$0xff] %v1081_v50  ;;  %1084 = vst [vmem:[%s5236_s7 + $0x598] sm:$0xff] %v1083_v51  ;;  %v1087_v53 = vld [vmem:[%s5231_s6 + $0x11a8] sm:$0xff]  ;;  %v1089_v54 = vld [vmem:[%s5231_s6 + $0x11b0] sm:$0xff] }
  0x6c   : > { %1086 = vst [vmem:[%s5236_s7 + $0x5a0] sm:$0xff] %v1085_v52  ;;  %1088 = vst [vmem:[%s5236_s7 + $0x5a8] sm:$0xff] %v1087_v53  ;;  %v1091_v55 = vld [vmem:[%s5231_s6 + $0x11b8] sm:$0xff]  ;;  %v1093_v56 = vld [vmem:[%s5231_s6 + $0x11c0] sm:$0xff] }
  0x6d   : > { %1090 = vst [vmem:[%s5236_s7 + $0x5b0] sm:$0xff] %v1089_v54  ;;  %v1095_v57 = vld [vmem:[%s5231_s6 + $0x11c8] sm:$0xff]  ;;  %1092 = vst [vmem:[%s5236_s7 + $0x5b8] sm:$0xff] %v1091_v55  ;;  %v1097_v58 = vld [vmem:[%s5231_s6 + $0x11d0] sm:$0xff] }
  0x6e   : > { %1094 = vst [vmem:[%s5236_s7 + $0x5c0] sm:$0xff] %v1093_v56  ;;  %1096 = vst [vmem:[%s5236_s7 + $0x5c8] sm:$0xff] %v1095_v57  ;;  %v1099_v59 = vld [vmem:[%s5231_s6 + $0x11d8] sm:$0xff]  ;;  %v1101_v60 = vld [vmem:[%s5231_s6 + $0x11e0] sm:$0xff] }
  0x6f   : > { %1098 = vst [vmem:[%s5236_s7 + $0x5d0] sm:$0xff] %v1097_v58  ;;  %1100 = vst [vmem:[%s5236_s7 + $0x5d8] sm:$0xff] %v1099_v59  ;;  %v1103_v61 = vld [vmem:[%s5231_s6 + $0x11e8] sm:$0xff]  ;;  %v1105_v62 = vld [vmem:[%s5231_s6 + $0x11f0] sm:$0xff] }
  0x70   : > { %1102 = vst [vmem:[%s5236_s7 + $0x5e0] sm:$0xff] %v1101_v60  ;;  %v1107_v63 = vld [vmem:[%s5231_s6 + $0x11f8] sm:$0xff]  ;;  %1104 = vst [vmem:[%s5236_s7 + $0x5e8] sm:$0xff] %v1103_v61  ;;  %v1109_v0 = vld [vmem:[%s5231_s6 + $0x1800] sm:$0xff] }
  0x71   : > { %1106 = vst [vmem:[%s5236_s7 + $0x5f0] sm:$0xff] %v1105_v62  ;;  %1108 = vst [vmem:[%s5236_s7 + $0x5f8] sm:$0xff] %v1107_v63  ;;  %v1111_v1 = vld [vmem:[%s5231_s6 + $0x1808] sm:$0xff]  ;;  %v1113_v2 = vld [vmem:[%s5231_s6 + $0x1810] sm:$0xff] }
  0x72   : > { %1110 = vst [vmem:[%s5236_s7 + $0x600] sm:$0xff] %v1109_v0  ;;  %1112 = vst [vmem:[%s5236_s7 + $0x608] sm:$0xff] %v1111_v1  ;;  %v1115_v3 = vld [vmem:[%s5231_s6 + $0x1818] sm:$0xff]  ;;  %v1117_v4 = vld [vmem:[%s5231_s6 + $0x1820] sm:$0xff] }
  0x73   : > { %1114 = vst [vmem:[%s5236_s7 + $0x610] sm:$0xff] %v1113_v2  ;;  %v1119_v5 = vld [vmem:[%s5231_s6 + $0x1828] sm:$0xff]  ;;  %1116 = vst [vmem:[%s5236_s7 + $0x618] sm:$0xff] %v1115_v3  ;;  %v1121_v6 = vld [vmem:[%s5231_s6 + $0x1830] sm:$0xff] }
  0x74   : > { %1118 = vst [vmem:[%s5236_s7 + $0x620] sm:$0xff] %v1117_v4  ;;  %1120 = vst [vmem:[%s5236_s7 + $0x628] sm:$0xff] %v1119_v5  ;;  %v1123_v7 = vld [vmem:[%s5231_s6 + $0x1838] sm:$0xff]  ;;  %v1125_v8 = vld [vmem:[%s5231_s6 + $0x1840] sm:$0xff] }
  0x75   : > { %1122 = vst [vmem:[%s5236_s7 + $0x630] sm:$0xff] %v1121_v6  ;;  %1124 = vst [vmem:[%s5236_s7 + $0x638] sm:$0xff] %v1123_v7  ;;  %v1127_v9 = vld [vmem:[%s5231_s6 + $0x1848] sm:$0xff]  ;;  %v1129_v10 = vld [vmem:[%s5231_s6 + $0x1850] sm:$0xff] }
  0x76   : > { %1126 = vst [vmem:[%s5236_s7 + $0x640] sm:$0xff] %v1125_v8  ;;  %v1131_v11 = vld [vmem:[%s5231_s6 + $0x1858] sm:$0xff]  ;;  %1128 = vst [vmem:[%s5236_s7 + $0x648] sm:$0xff] %v1127_v9  ;;  %v1133_v12 = vld [vmem:[%s5231_s6 + $0x1860] sm:$0xff] }
  0x77   : > { %1130 = vst [vmem:[%s5236_s7 + $0x650] sm:$0xff] %v1129_v10  ;;  %1132 = vst [vmem:[%s5236_s7 + $0x658] sm:$0xff] %v1131_v11  ;;  %v1135_v13 = vld [vmem:[%s5231_s6 + $0x1868] sm:$0xff]  ;;  %v1137_v14 = vld [vmem:[%s5231_s6 + $0x1870] sm:$0xff] }
  0x78   : > { %1134 = vst [vmem:[%s5236_s7 + $0x660] sm:$0xff] %v1133_v12  ;;  %1136 = vst [vmem:[%s5236_s7 + $0x668] sm:$0xff] %v1135_v13  ;;  %v1139_v15 = vld [vmem:[%s5231_s6 + $0x1878] sm:$0xff]  ;;  %v1141_v16 = vld [vmem:[%s5231_s6 + $0x1880] sm:$0xff] }
  0x79   : > { %1138 = vst [vmem:[%s5236_s7 + $0x670] sm:$0xff] %v1137_v14  ;;  %v1143_v17 = vld [vmem:[%s5231_s6 + $0x1888] sm:$0xff]  ;;  %1140 = vst [vmem:[%s5236_s7 + $0x678] sm:$0xff] %v1139_v15  ;;  %v1145_v18 = vld [vmem:[%s5231_s6 + $0x1890] sm:$0xff] }
  0x7a   : > { %1142 = vst [vmem:[%s5236_s7 + $0x680] sm:$0xff] %v1141_v16  ;;  %1144 = vst [vmem:[%s5236_s7 + $0x688] sm:$0xff] %v1143_v17  ;;  %v1147_v19 = vld [vmem:[%s5231_s6 + $0x1898] sm:$0xff]  ;;  %v1149_v20 = vld [vmem:[%s5231_s6 + $0x18a0] sm:$0xff] }
  0x7b   : > { %1146 = vst [vmem:[%s5236_s7 + $0x690] sm:$0xff] %v1145_v18  ;;  %1148 = vst [vmem:[%s5236_s7 + $0x698] sm:$0xff] %v1147_v19  ;;  %v1151_v21 = vld [vmem:[%s5231_s6 + $0x18a8] sm:$0xff]  ;;  %v1153_v22 = vld [vmem:[%s5231_s6 + $0x18b0] sm:$0xff] }
  0x7c   : > { %1150 = vst [vmem:[%s5236_s7 + $0x6a0] sm:$0xff] %v1149_v20  ;;  %v1155_v23 = vld [vmem:[%s5231_s6 + $0x18b8] sm:$0xff]  ;;  %1152 = vst [vmem:[%s5236_s7 + $0x6a8] sm:$0xff] %v1151_v21  ;;  %v1157_v24 = vld [vmem:[%s5231_s6 + $0x18c0] sm:$0xff] }
  0x7d   : > { %1154 = vst [vmem:[%s5236_s7 + $0x6b0] sm:$0xff] %v1153_v22  ;;  %1156 = vst [vmem:[%s5236_s7 + $0x6b8] sm:$0xff] %v1155_v23  ;;  %v1159_v25 = vld [vmem:[%s5231_s6 + $0x18c8] sm:$0xff]  ;;  %v1161_v26 = vld [vmem:[%s5231_s6 + $0x18d0] sm:$0xff] }
  0x7e   : > { %1158 = vst [vmem:[%s5236_s7 + $0x6c0] sm:$0xff] %v1157_v24  ;;  %1160 = vst [vmem:[%s5236_s7 + $0x6c8] sm:$0xff] %v1159_v25  ;;  %v1163_v27 = vld [vmem:[%s5231_s6 + $0x18d8] sm:$0xff]  ;;  %v1165_v28 = vld [vmem:[%s5231_s6 + $0x18e0] sm:$0xff] }
  0x7f   : > { %1162 = vst [vmem:[%s5236_s7 + $0x6d0] sm:$0xff] %v1161_v26  ;;  %v1167_v29 = vld [vmem:[%s5231_s6 + $0x18e8] sm:$0xff]  ;;  %1164 = vst [vmem:[%s5236_s7 + $0x6d8] sm:$0xff] %v1163_v27  ;;  %v1169_v30 = vld [vmem:[%s5231_s6 + $0x18f0] sm:$0xff] }
  0x80   : > { %1166 = vst [vmem:[%s5236_s7 + $0x6e0] sm:$0xff] %v1165_v28  ;;  %1168 = vst [vmem:[%s5236_s7 + $0x6e8] sm:$0xff] %v1167_v29  ;;  %v1171_v31 = vld [vmem:[%s5231_s6 + $0x18f8] sm:$0xff]  ;;  %v1173_v32 = vld [vmem:[%s5231_s6 + $0x1900] sm:$0xff] }
  0x81   : > { %1170 = vst [vmem:[%s5236_s7 + $0x6f0] sm:$0xff] %v1169_v30  ;;  %1172 = vst [vmem:[%s5236_s7 + $0x6f8] sm:$0xff] %v1171_v31  ;;  %v1175_v33 = vld [vmem:[%s5231_s6 + $0x1908] sm:$0xff]  ;;  %v1177_v34 = vld [vmem:[%s5231_s6 + $0x1910] sm:$0xff] }
  0x82   : > { %1174 = vst [vmem:[%s5236_s7 + $0x700] sm:$0xff] %v1173_v32  ;;  %v1179_v35 = vld [vmem:[%s5231_s6 + $0x1918] sm:$0xff]  ;;  %1176 = vst [vmem:[%s5236_s7 + $0x708] sm:$0xff] %v1175_v33  ;;  %v1181_v36 = vld [vmem:[%s5231_s6 + $0x1920] sm:$0xff] }
  0x83   : > { %1178 = vst [vmem:[%s5236_s7 + $0x710] sm:$0xff] %v1177_v34  ;;  %1180 = vst [vmem:[%s5236_s7 + $0x718] sm:$0xff] %v1179_v35  ;;  %v1183_v37 = vld [vmem:[%s5231_s6 + $0x1928] sm:$0xff]  ;;  %v1185_v38 = vld [vmem:[%s5231_s6 + $0x1930] sm:$0xff] }
  0x84   : > { %1182 = vst [vmem:[%s5236_s7 + $0x720] sm:$0xff] %v1181_v36  ;;  %1184 = vst [vmem:[%s5236_s7 + $0x728] sm:$0xff] %v1183_v37  ;;  %v1187_v39 = vld [vmem:[%s5231_s6 + $0x1938] sm:$0xff]  ;;  %v1189_v40 = vld [vmem:[%s5231_s6 + $0x1940] sm:$0xff] }
  0x85   : > { %1186 = vst [vmem:[%s5236_s7 + $0x730] sm:$0xff] %v1185_v38  ;;  %v1191_v41 = vld [vmem:[%s5231_s6 + $0x1948] sm:$0xff]  ;;  %1188 = vst [vmem:[%s5236_s7 + $0x738] sm:$0xff] %v1187_v39  ;;  %v1193_v42 = vld [vmem:[%s5231_s6 + $0x1950] sm:$0xff] }
  0x86   : > { %1190 = vst [vmem:[%s5236_s7 + $0x740] sm:$0xff] %v1189_v40  ;;  %1192 = vst [vmem:[%s5236_s7 + $0x748] sm:$0xff] %v1191_v41  ;;  %v1195_v43 = vld [vmem:[%s5231_s6 + $0x1958] sm:$0xff]  ;;  %v1197_v44 = vld [vmem:[%s5231_s6 + $0x1960] sm:$0xff] }
  0x87   : > { %1194 = vst [vmem:[%s5236_s7 + $0x750] sm:$0xff] %v1193_v42  ;;  %1196 = vst [vmem:[%s5236_s7 + $0x758] sm:$0xff] %v1195_v43  ;;  %v1199_v45 = vld [vmem:[%s5231_s6 + $0x1968] sm:$0xff]  ;;  %v1201_v46 = vld [vmem:[%s5231_s6 + $0x1970] sm:$0xff] }
  0x88   : > { %1198 = vst [vmem:[%s5236_s7 + $0x760] sm:$0xff] %v1197_v44  ;;  %v1203_v47 = vld [vmem:[%s5231_s6 + $0x1978] sm:$0xff]  ;;  %1200 = vst [vmem:[%s5236_s7 + $0x768] sm:$0xff] %v1199_v45  ;;  %v1205_v48 = vld [vmem:[%s5231_s6 + $0x1980] sm:$0xff] }
  0x89   : > { %1202 = vst [vmem:[%s5236_s7 + $0x770] sm:$0xff] %v1201_v46  ;;  %1204 = vst [vmem:[%s5236_s7 + $0x778] sm:$0xff] %v1203_v47  ;;  %v1207_v49 = vld [vmem:[%s5231_s6 + $0x1988] sm:$0xff]  ;;  %v1209_v50 = vld [vmem:[%s5231_s6 + $0x1990] sm:$0xff] }
  0x8a   : > { %1206 = vst [vmem:[%s5236_s7 + $0x780] sm:$0xff] %v1205_v48  ;;  %1208 = vst [vmem:[%s5236_s7 + $0x788] sm:$0xff] %v1207_v49  ;;  %v1211_v51 = vld [vmem:[%s5231_s6 + $0x1998] sm:$0xff]  ;;  %v1213_v52 = vld [vmem:[%s5231_s6 + $0x19a0] sm:$0xff] }
  0x8b   : > { %1210 = vst [vmem:[%s5236_s7 + $0x790] sm:$0xff] %v1209_v50  ;;  %v1215_v53 = vld [vmem:[%s5231_s6 + $0x19a8] sm:$0xff]  ;;  %1212 = vst [vmem:[%s5236_s7 + $0x798] sm:$0xff] %v1211_v51  ;;  %v1217_v54 = vld [vmem:[%s5231_s6 + $0x19b0] sm:$0xff] }
  0x8c   : > { %1214 = vst [vmem:[%s5236_s7 + $0x7a0] sm:$0xff] %v1213_v52  ;;  %1216 = vst [vmem:[%s5236_s7 + $0x7a8] sm:$0xff] %v1215_v53  ;;  %v1219_v55 = vld [vmem:[%s5231_s6 + $0x19b8] sm:$0xff]  ;;  %v1221_v56 = vld [vmem:[%s5231_s6 + $0x19c0] sm:$0xff] }
  0x8d   : > { %1218 = vst [vmem:[%s5236_s7 + $0x7b0] sm:$0xff] %v1217_v54  ;;  %1220 = vst [vmem:[%s5236_s7 + $0x7b8] sm:$0xff] %v1219_v55  ;;  %v1223_v57 = vld [vmem:[%s5231_s6 + $0x19c8] sm:$0xff]  ;;  %v1225_v58 = vld [vmem:[%s5231_s6 + $0x19d0] sm:$0xff] }
  0x8e   : > { %1222 = vst [vmem:[%s5236_s7 + $0x7c0] sm:$0xff] %v1221_v56  ;;  %v1227_v59 = vld [vmem:[%s5231_s6 + $0x19d8] sm:$0xff]  ;;  %1224 = vst [vmem:[%s5236_s7 + $0x7c8] sm:$0xff] %v1223_v57  ;;  %v1229_v60 = vld [vmem:[%s5231_s6 + $0x19e0] sm:$0xff] }
  0x8f   : > { %1226 = vst [vmem:[%s5236_s7 + $0x7d0] sm:$0xff] %v1225_v58  ;;  %1228 = vst [vmem:[%s5236_s7 + $0x7d8] sm:$0xff] %v1227_v59  ;;  %v1231_v61 = vld [vmem:[%s5231_s6 + $0x19e8] sm:$0xff]  ;;  %v1233_v62 = vld [vmem:[%s5231_s6 + $0x19f0] sm:$0xff] }
  0x90   : > { %1230 = vst [vmem:[%s5236_s7 + $0x7e0] sm:$0xff] %v1229_v60  ;;  %1232 = vst [vmem:[%s5236_s7 + $0x7e8] sm:$0xff] %v1231_v61  ;;  %v1235_v63 = vld [vmem:[%s5231_s6 + $0x19f8] sm:$0xff] }
  0x91   : > { %1234 = vst [vmem:[%s5236_s7 + $0x7f0] sm:$0xff] %v1233_v62  ;;  %1236 = vst [vmem:[%s5236_s7 + $0x7f8] sm:$0xff] %v1235_v63 }
  0x92 PF: > { %p4350_p5 = scmp.ge.s32.totalorder %s5165_s20, 1  ;;  %p1241_p6 = scmp.lt.s32.totalorder %s5165_s20, 5 }
  0x94   : > { %p1242_p7 = pnand %p4350_p5, %p1241_p6 }
  0x96   : > { %1245 = sbr.rel (%p1242_p7) target bundleno = 695 (0x2b7), region = 74 }
  0x9d   : > { %v5131_v0 = vld [vmem:[%s7942_s1] sm:$0xff]   ;;  %v5132_v1 = vld [vmem:[%s7942_s1 + $0x8] sm:$0xff]   ;;  %s1248_s12 = sand.u32 1, %s5157_s18   ;;  %v5133_v2 = vld [vmem:[%s7942_s1 + $0x10] ss:$0 sps:$4 sm:$0x33]  }
  0x9e   : > { %4823 = vmatprep.subr.bf16.mxu0 %v5131_v0  ;;  %4893 = vmatprep.subr.bf16.mxu1 %v5131_v0  ;;  %s4351_s13 = sshll.u32 %s1248_s12, 11  ;;  %vm1503_vm0 = vcmask 1041408   ;;  %vm1406_vm1 = vcmask 293888   ;;  %s6943_s9 = sshll.u32 %s4343_s21, 6  ;;  %vm4216_vm2 = vcmask 23552  }
  0x9f   : > { %4824 = vmatpush3.bf16.msra.mxu0 %v5131_v0  ;;  %4894 = vmatpush3.bf16.msra.mxu1 %v5131_v0  ;;  %s5759_s16 = scalar_lea.vmem [#allocation2], %s4351_s13  ;;  %v1505_v13 = vsel %vm1503_vm0, %v5133_v2, 0  ;;  %p1277_p8 = scmp.lt.s32.totalorder %s6943_s9, 255 }
  0xa0   : > { %4825 = vmatprep.subr.bf16.mxu0 %v5132_v1  ;;  %4895 = vmatprep.subr.bf16.mxu1 %v5132_v1  ;;  %v1283_v3 = vld [vmem:[%s5759_s16] sm:$0xff]  ;;  %v1284_v4 = vld [vmem:[%s5759_s16 + $0x8] sm:$0xff]  ;;  %v1285_v9 = vld [vmem:[%s5759_s16 + $0x10] sm:$0xff] }
  0xa1   : > { %v4392_v5 = vld [vmem:[%s5759_s16 + $0x200] sm:$0xff]  ;;  %v1347_v6 = vpack.c.bf16 %v1284_v4, %v1283_v3  ;;  %v4393_v7 = vld [vmem:[%s5759_s16 + $0x208] sm:$0xff]  ;;  %v1286_v10 = vld [vmem:[%s5759_s16 + $0x18] sm:$0xff]  ;;  %s8036_s9 = smov (!%p1277_p8, %s6943_s9), 255 }
  0xa2   : > { %v2067_v8 = vpack.c.bf16 %v4393_v7, %v4392_v5  ;;  %v4394_v11 = vld [vmem:[%s5759_s16 + $0x210] sm:$0xff]  ;;  %v4395_v12 = vld [vmem:[%s5759_s16 + $0x218] sm:$0xff]  ;;  %v1287_v14 = vld [vmem:[%s5759_s16 + $0x20] sm:$0xff]  ;;  %v1348_v18 = vpack.c.bf16 %v1286_v10, %v1285_v9  ;;  %s4353_s20 = sshll.u32 %s8036_s9, 3 }
  0xa3   : > { %4826 = vmatpush3.bf16.msra.mxu0 %v5132_v1  ;;  %4896 = vmatpush3.bf16.msra.mxu1 %v5132_v1  ;;  %v1288_v15 = vld [vmem:[%s5759_s16 + $0x28] sm:$0xff]  ;;  %v4396_v16 = vld [vmem:[%s5759_s16 + $0x220] sm:$0xff]  ;;  %v2068_v19 = vpack.c.bf16 %v4395_v12, %v4394_v11  ;;  %v1289_v22 = vld [vmem:[%s5759_s16 + $0x30] sm:$0xff]  ;;  %s7035_s11 = scalar_lea.vmem %s7946_s5, %s4353_s20 }
  0xa4   : > { %5103 = vmatprep.subr.msk.bf16.mxu0 %vm1503_vm0, %v5133_v2  ;;  %5104 = vmatprep.subr.msk.bf16.mxu1 %vm1503_vm0, %v5133_v2  ;;  %v4397_v17 = vld [vmem:[%s5759_s16 + $0x228] sm:$0xff]  ;;  %v1349_v20 = vpack.c.bf16 %v1288_v15, %v1287_v14  ;;  %v1290_v23 = vld [vmem:[%s5759_s16 + $0x38] sm:$0xff]  ;;  %v4398_v24 = vld [vmem:[%s5759_s16 + $0x230] sm:$0xff] }
  0xa5   : > { %4829 = vmatprep.mubr.msk.bf16.mxu0 %vm1406_vm1, %v1347_v6  ;;  %4899 = vmatprep.mubr.msk.bf16.mxu1 %vm1406_vm1, %v2067_v8  ;;  %v2069_v21 = vpack.c.bf16 %v4397_v17, %v4396_v16  ;;  %v4399_v25 = vld [vmem:[%s5759_s16 + $0x238] sm:$0xff]  ;;  %v1291_v26 = vld [vmem:[%s5759_s16 + $0x40] sm:$0xff]  ;;  %v1292_v27 = vld [vmem:[%s5759_s16 + $0x48] sm:$0xff]  ;;  %v1350_v30 = vpack.c.bf16 %v1290_v23, %v1289_v22 }
  0xa6   : > { %v4400_v28 = vld [vmem:[%s5759_s16 + $0x240] sm:$0xff]  ;;  %v4401_v29 = vld [vmem:[%s5759_s16 + $0x248] sm:$0xff]  ;;  %v2070_v31 = vpack.c.bf16 %v4399_v25, %v4398_v24  ;;  %v1351_v32 = vpack.c.bf16 %v1292_v27, %v1291_v26  ;;  %v1293_v34 = vld [vmem:[%s5759_s16 + $0x50] sm:$0xff] }
  0xa7   : > { %4828 = vmatpush3.bf16.msra.mxu0 %v1505_v13  ;;  %4898 = vmatpush3.bf16.msra.mxu1 %v1505_v13  ;;  %v2071_v33 = vpack.c.bf16 %v4401_v29, %v4400_v28  ;;  %v1294_v35 = vld [vmem:[%s5759_s16 + $0x58] sm:$0xff]  ;;  %v4402_v36 = vld [vmem:[%s5759_s16 + $0x250] sm:$0xff]  ;;  %v1295_v38 = vld [vmem:[%s5759_s16 + $0x60] sm:$0xff] }
  0xa8   : > { %4963 = vmatprep.subr.bf16.mxu0 %v5131_v0  ;;  %5033 = vmatprep.subr.bf16.mxu1 %v5131_v0  ;;  %v4403_v37 = vld [vmem:[%s5759_s16 + $0x258] sm:$0xff]  ;;  %v1296_v39 = vld [vmem:[%s5759_s16 + $0x68] sm:$0xff]  ;;  %v4404_v40 = vld [vmem:[%s5759_s16 + $0x260] sm:$0xff]  ;;  %v1352_v42 = vpack.c.bf16 %v1294_v35, %v1293_v34 }
  0xa9   : > { %v4405_v41 = vld [vmem:[%s5759_s16 + $0x268] sm:$0xff]  ;;  %v2072_v43 = vpack.c.bf16 %v4403_v37, %v4402_v36  ;;  %v1353_v44 = vpack.c.bf16 %v1296_v39, %v1295_v38  ;;  %v1297_v46 = vld [vmem:[%s5759_s16 + $0x70] sm:$0xff]  ;;  %v1298_v47 = vld [vmem:[%s5759_s16 + $0x78] sm:$0xff] }
  0xaa   : > { %4830 = vmatmul.mubr.msk.bf16.vlgmr.msra.gmra.mrb[0].mxu0 %vm1406_vm1, %v1348_v18  ;;  %4900 = vmatmul.mubr.msk.bf16.vlgmr.msra.gmra.mrb[0].mxu1 %vm1406_vm1, %v2068_v19  ;;  %v2073_v45 = vpack.c.bf16 %v4405_v41, %v4404_v40  ;;  %v4406_v48 = vld [vmem:[%s5759_s16 + $0x270] sm:$0xff]  ;;  %v4407_v49 = vld [vmem:[%s5759_s16 + $0x278] sm:$0xff]  ;;  %v1299_v50 = vld [vmem:[%s5759_s16 + $0x80] sm:$0xff]  ;;  %v1354_v54 = vpack.c.bf16 %v1298_v47, %v1297_v46 }
  0xab   : > { %4964 = vmatpush3.bf16.msra.mxu0 %v5131_v0  ;;  %5034 = vmatpush3.bf16.msra.mxu1 %v5131_v0  ;;  %v1300_v51 = vld [vmem:[%s5759_s16 + $0x88] sm:$0xff]  ;;  %v4408_v52 = vld [vmem:[%s5759_s16 + $0x280] sm:$0xff]  ;;  %v2074_v55 = vpack.c.bf16 %v4407_v49, %v4406_v48  ;;  %v1301_v58 = vld [vmem:[%s5759_s16 + $0x90] sm:$0xff] }
  0xac   : > { %4833 = vmatprep.mubr.msk.bf16.mxu0 %vm1406_vm1, %v1349_v20  ;;  %4903 = vmatprep.mubr.msk.bf16.mxu1 %vm1406_vm1, %v2069_v21  ;;  %v4409_v53 = vld [vmem:[%s5759_s16 + $0x288] sm:$0xff]  ;;  %v1355_v56 = vpack.c.bf16 %v1300_v51, %v1299_v50  ;;  %v1302_v59 = vld [vmem:[%s5759_s16 + $0x98] sm:$0xff]  ;;  %v4410_v60 = vld [vmem:[%s5759_s16 + $0x290] sm:$0xff] }
  0xad   : > { %4965 = vmatprep.subr.bf16.mxu0 %v5132_v1  ;;  %5035 = vmatprep.subr.bf16.mxu1 %v5132_v1  ;;  %v2075_v57 = vpack.c.bf16 %v4409_v53, %v4408_v52  ;;  %v4411_v61 = vld [vmem:[%s5759_s16 + $0x298] sm:$0xff]  ;;  %v1303_v62 = vld [vmem:[%s5759_s16 + $0xa0] sm:$0xff]  ;;  %v1304_v63 = vld [vmem:[%s5759_s16 + $0xa8] sm:$0xff] }
  0xae   : > { %v4412_v0 = vld [vmem:[%s5759_s16 + $0x2a0] sm:$0xff]  ;;  %v2076_v3 = vpack.c.bf16 %v4411_v61, %v4410_v60  ;;  %v1357_v4 = vpack.c.bf16 %v1304_v63, %v1303_v62  ;;  %v1305_v6 = vld [vmem:[%s5759_s16 + $0xb0] sm:$0xff]  ;;  %v1306_v7 = vld [vmem:[%s5759_s16 + $0xb8] sm:$0xff] }
  0xaf   : > { %4966 = vmatpush3.bf16.msra.mxu0 %v5132_v1  ;;  %5036 = vmatpush3.bf16.msra.mxu1 %v5132_v1  ;;  %v4413_v1 = vld [vmem:[%s5759_s16 + $0x2a8] sm:$0xff]  ;;  %v4414_v8 = vld [vmem:[%s5759_s16 + $0x2b0] sm:$0xff]  ;;  %v4415_v9 = vld [vmem:[%s5759_s16 + $0x2b8] sm:$0xff]  ;;  %v1358_v14 = vpack.c.bf16 %v1306_v7, %v1305_v6 }
  0xb0   : > { %5105 = vmatprep.subr.msk.bf16.mxu0 %vm1503_vm0, %v5133_v2  ;;  %5106 = vmatprep.subr.msk.bf16.mxu1 %vm1503_vm0, %v5133_v2  ;;  %v1356_v2 = vpack.c.bf16 %v1302_v59, %v1301_v58  ;;  %v2077_v5 = vpack.c.bf16 %v4413_v1, %v4412_v0  ;;  %v1307_v10 = vld [vmem:[%s5759_s16 + $0xc0] sm:$0xff]  ;;  %v1308_v11 = vld [vmem:[%s5759_s16 + $0xc8] sm:$0xff]  ;;  %v2078_v15 = vpack.c.bf16 %v4415_v9, %v4414_v8  ;;  %v1309_v18 = vld [vmem:[%s5759_s16 + $0xd0] sm:$0xff] }
  0xb1   : > { %v4416_v12 = vld [vmem:[%s5759_s16 + $0x2c0] sm:$0xff]  ;;  %v1359_v16 = vpack.c.bf16 %v1308_v11, %v1307_v10  ;;  %v1310_v19 = vld [vmem:[%s5759_s16 + $0xd8] sm:$0xff]  ;;  %v4418_v20 = vld [vmem:[%s5759_s16 + $0x2d0] sm:$0xff] }
  0xb2   : > { %4834 = vmatmul.mubr.msk.bf16.gmra.mrb[4].mxu0 %vm1406_vm1, %v1350_v30  ;;  %4904 = vmatmul.mubr.msk.bf16.gmra.mrb[4].mxu1 %vm1406_vm1, %v2070_v31  ;;  %v4419_v21 = vld [vmem:[%s5759_s16 + $0x2d8] sm:$0xff]  ;;  %v1311_v22 = vld [vmem:[%s5759_s16 + $0xe0] sm:$0xff]  ;;  %v1312_v23 = vld [vmem:[%s5759_s16 + $0xe8] sm:$0xff]  ;;  %v1360_v26 = vpack.c.bf16 %v1310_v19, %v1309_v18 }
  0xb3   : > { %4837 = vmatprep.mubr.msk.bf16.mxu0 %vm1406_vm1, %v1351_v32  ;;  %4907 = vmatprep.mubr.msk.bf16.mxu1 %vm1406_vm1, %v2071_v33  ;;  %v4420_v24 = vld [vmem:[%s5759_s16 + $0x2e0] sm:$0xff]  ;;  %v4421_v25 = vld [vmem:[%s5759_s16 + $0x2e8] sm:$0xff]  ;;  %v2080_v27 = vpack.c.bf16 %v4419_v21, %v4418_v20  ;;  %v1361_v28 = vpack.c.bf16 %v1312_v23, %v1311_v22  ;;  %v1313_v30 = vld [vmem:[%s5759_s16 + $0xf0] sm:$0xff] }
  0xb4   : > { %4968 = vmatpush3.bf16.msra.mxu0 %v1505_v13  ;;  %5038 = vmatpush3.bf16.msra.mxu1 %v1505_v13  ;;  %v4417_v13 = vld [vmem:[%s5759_s16 + $0x2c8] sm:$0xff]  ;;  %v2081_v29 = vpack.c.bf16 %v4421_v25, %v4420_v24  ;;  %v1314_v31 = vld [vmem:[%s5759_s16 + $0xf8] sm:$0xff]  ;;  %v4422_v32 = vld [vmem:[%s5759_s16 + $0x2f0] sm:$0xff] }
  0xb5   : > { %v2079_v17 = vpack.c.bf16 %v4417_v13, %v4416_v12  ;;  %v4423_v33 = vld [vmem:[%s5759_s16 + $0x2f8] sm:$0xff]  ;;  %v1315_v34 = vld [vmem:[%s5759_s16 + $0x100] sm:$0xff]  ;;  %v1316_v35 = vld [vmem:[%s5759_s16 + $0x108] sm:$0xff]  ;;  %v1362_v38 = vpack.c.bf16 %v1314_v31, %v1313_v30 }
  0xb6   : > { %v4424_v36 = vld [vmem:[%s5759_s16 + $0x300] sm:$0xff]  ;;  %v4425_v37 = vld [vmem:[%s5759_s16 + $0x308] sm:$0xff]  ;;  %v2082_v39 = vpack.c.bf16 %v4423_v33, %v4422_v32  ;;  %v1363_v40 = vpack.c.bf16 %v1316_v35, %v1315_v34 }
  0xb7   : > { %v2083_v41 = vpack.c.bf16 %v4425_v37, %v4424_v36  ;;  %v1319_v46 = vld [vmem:[%s5759_s16 + $0x120] sm:$0xff]  ;;  %v1320_v47 = vld [vmem:[%s5759_s16 + $0x128] sm:$0xff] }
  0xb8   : > { %v4428_v48 = vld [vmem:[%s5759_s16 + $0x320] sm:$0xff]  ;;  %v4429_v49 = vld [vmem:[%s5759_s16 + $0x328] sm:$0xff]  ;;  %v1365_v52 = vpack.c.bf16 %v1320_v47, %v1319_v46 }
  0xb9   : > { %v2085_v53 = vpack.c.bf16 %v4429_v49, %v4428_v48  ;;  %v1323_v58 = vld [vmem:[%s5759_s16 + $0x140] sm:$0xff]  ;;  %v1324_v59 = vld [vmem:[%s5759_s16 + $0x148] sm:$0xff] }
  0xba   : > { %4838 = vmatmul.mubr.msk.bf16.gmra.mrb[8].mxu0 %vm1406_vm1, %v1352_v42  ;;  %4908 = vmatmul.mubr.msk.bf16.gmra.mrb[8].mxu1 %vm1406_vm1, %v2072_v43  ;;  %v1317_v42 = vld [vmem:[%s5759_s16 + $0x110] sm:$0xff]  ;;  %v1318_v43 = vld [vmem:[%s5759_s16 + $0x118] sm:$0xff]  ;;  %v4432_v60 = vld [vmem:[%s5759_s16 + $0x340] sm:$0xff]  ;;  %v1367_v0 = vpack.c.bf16 %v1324_v59, %v1323_v58 }
  0xbb   : > { %4841 = vmatprep.mubr.msk.bf16.mxu0 %vm1406_vm1, %v1353_v44  ;;  %4911 = vmatprep.mubr.msk.bf16.mxu1 %vm1406_vm1, %v2073_v45  ;;  %v4426_v44 = vld [vmem:[%s5759_s16 + $0x310] sm:$0xff]  ;;  %v4427_v45 = vld [vmem:[%s5759_s16 + $0x318] sm:$0xff]  ;;  %v1364_v50 = vpack.c.bf16 %v1318_v43, %v1317_v42  ;;  %v4433_v61 = vld [vmem:[%s5759_s16 + $0x348] sm:$0xff] }
  0xbc   : > { %v2084_v51 = vpack.c.bf16 %v4427_v45, %v4426_v44  ;;  %v2087_v1 = vpack.c.bf16 %v4433_v61, %v4432_v60  ;;  %v1327_v6 = vld [vmem:[%s5759_s16 + $0x160] sm:$0xff]  ;;  %v1328_v7 = vld [vmem:[%s5759_s16 + $0x168] sm:$0xff] }
  0xbd   : > { %v4436_v8 = vld [vmem:[%s5759_s16 + $0x360] sm:$0xff]  ;;  %v4437_v9 = vld [vmem:[%s5759_s16 + $0x368] sm:$0xff]  ;;  %v1369_v12 = vpack.c.bf16 %v1328_v7, %v1327_v6 }
  0xbe   : > { %v2089_v13 = vpack.c.bf16 %v4437_v9, %v4436_v8  ;;  %v1331_v18 = vld [vmem:[%s5759_s16 + $0x180] sm:$0xff]  ;;  %v1332_v19 = vld [vmem:[%s5759_s16 + $0x188] sm:$0xff] }
  0xbf   : > { %v4440_v20 = vld [vmem:[%s5759_s16 + $0x380] sm:$0xff]  ;;  %v4441_v21 = vld [vmem:[%s5759_s16 + $0x388] sm:$0xff]  ;;  %v1371_v24 = vpack.c.bf16 %v1332_v19, %v1331_v18 }
  0xc0   : > { %v2091_v25 = vpack.c.bf16 %v4441_v21, %v4440_v20  ;;  %v1335_v30 = vld [vmem:[%s5759_s16 + $0x1a0] sm:$0xff]  ;;  %v1336_v31 = vld [vmem:[%s5759_s16 + $0x1a8] sm:$0xff] }
  0xc1   : > { %v4444_v32 = vld [vmem:[%s5759_s16 + $0x3a0] sm:$0xff]  ;;  %v4445_v33 = vld [vmem:[%s5759_s16 + $0x3a8] sm:$0xff]  ;;  %v1373_v36 = vpack.c.bf16 %v1336_v31, %v1335_v30 }
  0xc2   : > { %4842 = vmatmul.mubr.msk.bf16.gmra.mrb[12].mxu0 %vm1406_vm1, %v1354_v54  ;;  %4912 = vmatmul.mubr.msk.bf16.gmra.mrb[12].mxu1 %vm1406_vm1, %v2074_v55  ;;  %v1321_v54 = vld [vmem:[%s5759_s16 + $0x130] sm:$0xff]  ;;  %v1322_v55 = vld [vmem:[%s5759_s16 + $0x138] sm:$0xff]  ;;  %v2093_v37 = vpack.c.bf16 %v4445_v33, %v4444_v32  ;;  %v1339_v42 = vld [vmem:[%s5759_s16 + $0x1c0] sm:$0xff] }
  0xc3   : > { %4845 = vmatprep.mubr.msk.bf16.mxu0 %vm1406_vm1, %v1355_v56  ;;  %4915 = vmatprep.mubr.msk.bf16.mxu1 %vm1406_vm1, %v2075_v57  ;;  %v4430_v56 = vld [vmem:[%s5759_s16 + $0x330] sm:$0xff]  ;;  %v4431_v57 = vld [vmem:[%s5759_s16 + $0x338] sm:$0xff]  ;;  %v1366_v62 = vpack.c.bf16 %v1322_v55, %v1321_v54  ;;  %v1340_v43 = vld [vmem:[%s5759_s16 + $0x1c8] sm:$0xff] }
  0xc4   : > { %v2086_v63 = vpack.c.bf16 %v4431_v57, %v4430_v56  ;;  %v4448_v44 = vld [vmem:[%s5759_s16 + $0x3c0] sm:$0xff]  ;;  %v4449_v45 = vld [vmem:[%s5759_s16 + $0x3c8] sm:$0xff]  ;;  %v1375_v48 = vpack.c.bf16 %v1340_v43, %v1339_v42 }
  0xc5   : > { %v2095_v49 = vpack.c.bf16 %v4449_v45, %v4448_v44  ;;  %v1343_v54 = vld [vmem:[%s5759_s16 + $0x1e0] sm:$0xff]  ;;  %v1344_v55 = vld [vmem:[%s5759_s16 + $0x1e8] sm:$0xff] }
  0xc6   : > { %v4452_v56 = vld [vmem:[%s5759_s16 + $0x3e0] sm:$0xff]  ;;  %v4453_v57 = vld [vmem:[%s5759_s16 + $0x3e8] sm:$0xff]  ;;  %v1377_v60 = vpack.c.bf16 %v1344_v55, %v1343_v54 }
  0xc7   : > { %v2097_v61 = vpack.c.bf16 %v4453_v57, %v4452_v56 }
  0xca   : > { %4846 = vmatmul.mubr.msk.bf16.gmra.mrb[16].mxu0 %vm1406_vm1, %v1356_v2  ;;  %4916 = vmatmul.mubr.msk.bf16.gmra.mrb[16].mxu1 %vm1406_vm1, %v2076_v3  ;;  %v1325_v2 = vld [vmem:[%s5759_s16 + $0x150] sm:$0xff]  ;;  %v1326_v3 = vld [vmem:[%s5759_s16 + $0x158] sm:$0xff] }
  0xcb   : > { %4849 = vmatprep.mubr.msk.bf16.mxu0 %vm1406_vm1, %v1357_v4  ;;  %4919 = vmatprep.mubr.msk.bf16.mxu1 %vm1406_vm1, %v2077_v5  ;;  %v4434_v4 = vld [vmem:[%s5759_s16 + $0x350] sm:$0xff]  ;;  %v4435_v5 = vld [vmem:[%s5759_s16 + $0x358] sm:$0xff]  ;;  %v1368_v10 = vpack.c.bf16 %v1326_v3, %v1325_v2  ;;  %v4488_v2 = vld [vmem:[%s5759_s16 + $0x400] sm:$0xff] }
  0xcc   : > { %v2088_v11 = vpack.c.bf16 %v4435_v5, %v4434_v4  ;;  %v4489_v3 = vld [vmem:[%s5759_s16 + $0x408] sm:$0xff]  ;;  %v4584_v4 = vld [vmem:[%s5759_s16 + $0x600] sm:$0xff] }
  0xcd   : > { %v4585_v5 = vld [vmem:[%s5759_s16 + $0x608] sm:$0xff]  ;;  %v2805_v8 = vpack.c.bf16 %v4489_v3, %v4488_v2 }
  0xce   : > { %v3543_v9 = vpack.c.bf16 %v4585_v5, %v4584_v4 }
  0xd2   : > { %4850 = vmatmul.mubr.msk.bf16.gmra.mrb[20].mxu0 %vm1406_vm1, %v1358_v14  ;;  %4920 = vmatmul.mubr.msk.bf16.gmra.mrb[20].mxu1 %vm1406_vm1, %v2078_v15  ;;  %v1329_v14 = vld [vmem:[%s5759_s16 + $0x170] sm:$0xff]  ;;  %v1330_v15 = vld [vmem:[%s5759_s16 + $0x178] sm:$0xff] }
  0xd3   : > { %4853 = vmatprep.mubr.msk.bf16.mxu0 %vm1406_vm1, %v1359_v16  ;;  %4923 = vmatprep.mubr.msk.bf16.mxu1 %vm1406_vm1, %v2079_v17  ;;  %v4438_v16 = vld [vmem:[%s5759_s16 + $0x370] sm:$0xff]  ;;  %v4439_v17 = vld [vmem:[%s5759_s16 + $0x378] sm:$0xff]  ;;  %v1370_v22 = vpack.c.bf16 %v1330_v15, %v1329_v14  ;;  %v4492_v14 = vld [vmem:[%s5759_s16 + $0x420] sm:$0xff] }
  0xd4   : > { %v2090_v23 = vpack.c.bf16 %v4439_v17, %v4438_v16  ;;  %v4493_v15 = vld [vmem:[%s5759_s16 + $0x428] sm:$0xff]  ;;  %v4588_v16 = vld [vmem:[%s5759_s16 + $0x620] sm:$0xff] }
  0xd5   : > { %v4589_v17 = vld [vmem:[%s5759_s16 + $0x628] sm:$0xff]  ;;  %v2807_v20 = vpack.c.bf16 %v4493_v15, %v4492_v14 }
  0xd6   : > { %v3545_v21 = vpack.c.bf16 %v4589_v17, %v4588_v16 }
  0xda   : > { %4854 = vmatmul.mubr.msk.bf16.gmra.mrb[24].mxu0 %vm1406_vm1, %v1360_v26  ;;  %4924 = vmatmul.mubr.msk.bf16.gmra.mrb[24].mxu1 %vm1406_vm1, %v2080_v27  ;;  %v1333_v26 = vld [vmem:[%s5759_s16 + $0x190] sm:$0xff]  ;;  %v1334_v27 = vld [vmem:[%s5759_s16 + $0x198] sm:$0xff] }
  0xdb   : > { %4857 = vmatprep.mubr.msk.bf16.mxu0 %vm1406_vm1, %v1361_v28  ;;  %4927 = vmatprep.mubr.msk.bf16.mxu1 %vm1406_vm1, %v2081_v29  ;;  %v4442_v28 = vld [vmem:[%s5759_s16 + $0x390] sm:$0xff]  ;;  %v4443_v29 = vld [vmem:[%s5759_s16 + $0x398] sm:$0xff]  ;;  %v1372_v34 = vpack.c.bf16 %v1334_v27, %v1333_v26  ;;  %v4496_v26 = vld [vmem:[%s5759_s16 + $0x440] sm:$0xff] }
  0xdc   : > { %v2092_v35 = vpack.c.bf16 %v4443_v29, %v4442_v28  ;;  %v4497_v27 = vld [vmem:[%s5759_s16 + $0x448] sm:$0xff]  ;;  %v4592_v28 = vld [vmem:[%s5759_s16 + $0x640] sm:$0xff] }
  0xdd   : > { %v4593_v29 = vld [vmem:[%s5759_s16 + $0x648] sm:$0xff]  ;;  %v2809_v32 = vpack.c.bf16 %v4497_v27, %v4496_v26 }
  0xde   : > { %v3547_v33 = vpack.c.bf16 %v4593_v29, %v4592_v28 }
  0xe2   : > { %4858 = vmatmul.mubr.msk.bf16.gmra.mrb[28].mxu0 %vm1406_vm1, %v1362_v38  ;;  %4928 = vmatmul.mubr.msk.bf16.gmra.mrb[28].mxu1 %vm1406_vm1, %v2082_v39  ;;  %v1337_v38 = vld [vmem:[%s5759_s16 + $0x1b0] sm:$0xff]  ;;  %v1338_v39 = vld [vmem:[%s5759_s16 + $0x1b8] sm:$0xff] }
  0xe3   : > { %4861 = vmatprep.mubr.msk.bf16.mxu0 %vm1406_vm1, %v1363_v40  ;;  %4931 = vmatprep.mubr.msk.bf16.mxu1 %vm1406_vm1, %v2083_v41  ;;  %v4446_v40 = vld [vmem:[%s5759_s16 + $0x3b0] sm:$0xff]  ;;  %v4447_v41 = vld [vmem:[%s5759_s16 + $0x3b8] sm:$0xff]  ;;  %v1374_v46 = vpack.c.bf16 %v1338_v39, %v1337_v38  ;;  %v4500_v38 = vld [vmem:[%s5759_s16 + $0x460] sm:$0xff] }
  0xe4   : > { %v2094_v47 = vpack.c.bf16 %v4447_v41, %v4446_v40  ;;  %v4501_v39 = vld [vmem:[%s5759_s16 + $0x468] sm:$0xff]  ;;  %v4596_v40 = vld [vmem:[%s5759_s16 + $0x660] sm:$0xff] }
  0xe5   : > { %v4597_v41 = vld [vmem:[%s5759_s16 + $0x668] sm:$0xff]  ;;  %v2811_v44 = vpack.c.bf16 %v4501_v39, %v4500_v38 }
  0xe6   : > { %v3549_v45 = vpack.c.bf16 %v4597_v41, %v4596_v40 }
  0xea   : > { %4862 = vmatmul.mubr.msk.bf16.gmra.mrb[32].mxu0 %vm1406_vm1, %v1364_v50  ;;  %4932 = vmatmul.mubr.msk.bf16.gmra.mrb[32].mxu1 %vm1406_vm1, %v2084_v51  ;;  %v1341_v50 = vld [vmem:[%s5759_s16 + $0x1d0] sm:$0xff]  ;;  %v1342_v51 = vld [vmem:[%s5759_s16 + $0x1d8] sm:$0xff] }
  0xeb   : > { %4865 = vmatprep.mubr.msk.bf16.mxu0 %vm1406_vm1, %v1365_v52  ;;  %4935 = vmatprep.mubr.msk.bf16.mxu1 %vm1406_vm1, %v2085_v53  ;;  %v4450_v52 = vld [vmem:[%s5759_s16 + $0x3d0] sm:$0xff]  ;;  %v4451_v53 = vld [vmem:[%s5759_s16 + $0x3d8] sm:$0xff]  ;;  %v1376_v58 = vpack.c.bf16 %v1342_v51, %v1341_v50  ;;  %v4504_v50 = vld [vmem:[%s5759_s16 + $0x480] sm:$0xff] }
  0xec   : > { %v2096_v59 = vpack.c.bf16 %v4451_v53, %v4450_v52  ;;  %v4505_v51 = vld [vmem:[%s5759_s16 + $0x488] sm:$0xff]  ;;  %v4600_v52 = vld [vmem:[%s5759_s16 + $0x680] sm:$0xff] }
  0xed   : > { %v4601_v53 = vld [vmem:[%s5759_s16 + $0x688] sm:$0xff]  ;;  %v2813_v56 = vpack.c.bf16 %v4505_v51, %v4504_v50 }
  0xee   : > { %v3551_v57 = vpack.c.bf16 %v4601_v53, %v4600_v52 }
  0xf2   : > { %4866 = vmatmul.mubr.msk.bf16.gmra.mrb[36].mxu0 %vm1406_vm1, %v1366_v62  ;;  %4936 = vmatmul.mubr.msk.bf16.gmra.mrb[36].mxu1 %vm1406_vm1, %v2086_v63  ;;  %v1345_v62 = vld [vmem:[%s5759_s16 + $0x1f0] sm:$0xff]  ;;  %v1346_v63 = vld [vmem:[%s5759_s16 + $0x1f8] sm:$0xff] }
  0xf3   : > { %4869 = vmatprep.mubr.msk.bf16.mxu0 %vm1406_vm1, %v1367_v0  ;;  %4939 = vmatprep.mubr.msk.bf16.mxu1 %vm1406_vm1, %v2087_v1  ;;  %v4454_v0 = vld [vmem:[%s5759_s16 + $0x3f0] sm:$0xff]  ;;  %v4455_v1 = vld [vmem:[%s5759_s16 + $0x3f8] sm:$0xff]  ;;  %v1378_v6 = vpack.c.bf16 %v1346_v63, %v1345_v62  ;;  %v4508_v62 = vld [vmem:[%s5759_s16 + $0x4a0] sm:$0xff] }
  0xf4   : > { %v2098_v7 = vpack.c.bf16 %v4455_v1, %v4454_v0  ;;  %v4509_v63 = vld [vmem:[%s5759_s16 + $0x4a8] sm:$0xff]  ;;  %v4604_v0 = vld [vmem:[%s5759_s16 + $0x6a0] sm:$0xff] }
  0xf5   : > { %v4605_v1 = vld [vmem:[%s5759_s16 + $0x6a8] sm:$0xff]  ;;  %v2815_v4 = vpack.c.bf16 %v4509_v63, %v4508_v62 }
  0xf6   : > { %v3553_v5 = vpack.c.bf16 %v4605_v1, %v4604_v0 }
  0xfa   : > { %4870 = vmatmul.mubr.msk.bf16.gmra.mrb[40].mxu0 %vm1406_vm1, %v1368_v10  ;;  %4940 = vmatmul.mubr.msk.bf16.gmra.mrb[40].mxu1 %vm1406_vm1, %v2088_v11  ;;  %v4490_v10 = vld [vmem:[%s5759_s16 + $0x410] sm:$0xff]  ;;  %v4491_v11 = vld [vmem:[%s5759_s16 + $0x418] sm:$0xff] }
  0xfb   : > { %4873 = vmatprep.mubr.msk.bf16.mxu0 %vm1406_vm1, %v1369_v12  ;;  %4943 = vmatprep.mubr.msk.bf16.mxu1 %vm1406_vm1, %v2089_v13  ;;  %v4586_v12 = vld [vmem:[%s5759_s16 + $0x610] sm:$0xff]  ;;  %v4587_v13 = vld [vmem:[%s5759_s16 + $0x618] sm:$0xff]  ;;  %v2806_v18 = vpack.c.bf16 %v4491_v11, %v4490_v10  ;;  %v4512_v10 = vld [vmem:[%s5759_s16 + $0x4c0] sm:$0xff] }
  0xfc   : > { %v3544_v19 = vpack.c.bf16 %v4587_v13, %v4586_v12  ;;  %v4513_v11 = vld [vmem:[%s5759_s16 + $0x4c8] sm:$0xff]  ;;  %v4608_v12 = vld [vmem:[%s5759_s16 + $0x6c0] sm:$0xff] }
  0xfd   : > { %v4609_v13 = vld [vmem:[%s5759_s16 + $0x6c8] sm:$0xff]  ;;  %v2817_v16 = vpack.c.bf16 %v4513_v11, %v4512_v10  ;;  %v6093_v10 = vld [vmem:[%s5759_s16 + $0x570] sm:$0xff]  ;;  %v6096_v11 = vld [vmem:[%s5759_s16 + $0x578] sm:$0xff] }
  0xfe   : > { %v3555_v17 = vpack.c.bf16 %v4609_v13, %v4608_v12  ;;  %v6099_v12 = vld [vmem:[%s5759_s16 + $0x770] sm:$0xff]  ;;  %v6102_v13 = vld [vmem:[%s5759_s16 + $0x778] sm:$0xff] }
 0x102   : > { %4874 = vmatmul.mubr.msk.bf16.gmra.mrb[44].mxu0 %vm1406_vm1, %v1370_v22  ;;  %4944 = vmatmul.mubr.msk.bf16.gmra.mrb[44].mxu1 %vm1406_vm1, %v2090_v23  ;;  %v4494_v22 = vld [vmem:[%s5759_s16 + $0x430] sm:$0xff]  ;;  %v4495_v23 = vld [vmem:[%s5759_s16 + $0x438] sm:$0xff] }
 0x103   : > { %4877 = vmatprep.mubr.msk.bf16.mxu0 %vm1406_vm1, %v1371_v24  ;;  %4947 = vmatprep.mubr.msk.bf16.mxu1 %vm1406_vm1, %v2091_v25  ;;  %v4590_v24 = vld [vmem:[%s5759_s16 + $0x630] sm:$0xff]  ;;  %v4591_v25 = vld [vmem:[%s5759_s16 + $0x638] sm:$0xff]  ;;  %v2808_v30 = vpack.c.bf16 %v4495_v23, %v4494_v22  ;;  %v4516_v22 = vld [vmem:[%s5759_s16 + $0x4e0] sm:$0xff] }
 0x104   : > { %v3546_v31 = vpack.c.bf16 %v4591_v25, %v4590_v24  ;;  %v4517_v23 = vld [vmem:[%s5759_s16 + $0x4e8] sm:$0xff]  ;;  %v4612_v24 = vld [vmem:[%s5759_s16 + $0x6e0] sm:$0xff] }
 0x105   : > { %v4613_v25 = vld [vmem:[%s5759_s16 + $0x6e8] sm:$0xff]  ;;  %v2819_v28 = vpack.c.bf16 %v4517_v23, %v4516_v22  ;;  %v6123_v22 = vld [vmem:[%s5759_s16 + $0x790] sm:$0xff]  ;;  %v6126_v23 = vld [vmem:[%s5759_s16 + $0x798] sm:$0xff] }
 0x106   : > { %v3557_v29 = vpack.c.bf16 %v4613_v25, %v4612_v24 }
 0x10a   : > { %4878 = vmatmul.mubr.msk.bf16.gmra.mrb[48].mxu0 %vm1406_vm1, %v1372_v34  ;;  %4948 = vmatmul.mubr.msk.bf16.gmra.mrb[48].mxu1 %vm1406_vm1, %v2092_v35  ;;  %v4498_v34 = vld [vmem:[%s5759_s16 + $0x450] sm:$0xff]  ;;  %v4499_v35 = vld [vmem:[%s5759_s16 + $0x458] sm:$0xff] }
 0x10b   : > { %4881 = vmatprep.mubr.msk.bf16.mxu0 %vm1406_vm1, %v1373_v36  ;;  %4951 = vmatprep.mubr.msk.bf16.mxu1 %vm1406_vm1, %v2093_v37  ;;  %v4594_v36 = vld [vmem:[%s5759_s16 + $0x650] sm:$0xff]  ;;  %v4595_v37 = vld [vmem:[%s5759_s16 + $0x658] sm:$0xff]  ;;  %v2810_v42 = vpack.c.bf16 %v4499_v35, %v4498_v34  ;;  %v4520_v34 = vld [vmem:[%s5759_s16 + $0x500] sm:$0xff] }
 0x10c   : > { %v3548_v43 = vpack.c.bf16 %v4595_v37, %v4594_v36  ;;  %v4521_v35 = vld [vmem:[%s5759_s16 + $0x508] sm:$0xff]  ;;  %v4616_v36 = vld [vmem:[%s5759_s16 + $0x700] sm:$0xff] }
 0x10d   : > { %v4617_v37 = vld [vmem:[%s5759_s16 + $0x708] sm:$0xff]  ;;  %v2821_v40 = vpack.c.bf16 %v4521_v35, %v4520_v34  ;;  %v6153_v34 = vld [vmem:[%s5759_s16 + $0x5c0] sm:$0xff] }
 0x10e   : > { %v3559_v41 = vpack.c.bf16 %v4617_v37, %v4616_v36  ;;  %v6156_v35 = vld [vmem:[%s5759_s16 + $0x5c8] sm:$0xff]  ;;  %v6159_v36 = vld [vmem:[%s5759_s16 + $0x7c0] sm:$0xff] }
 0x10f   : > { %v6162_v37 = vld [vmem:[%s5759_s16 + $0x7c8] sm:$0xff] }
 0x112   : > { %4882 = vmatmul.mubr.msk.bf16.gmra.mrb[52].mxu0 %vm1406_vm1, %v1374_v46  ;;  %4952 = vmatmul.mubr.msk.bf16.gmra.mrb[52].mxu1 %vm1406_vm1, %v2094_v47  ;;  %v4502_v46 = vld [vmem:[%s5759_s16 + $0x470] sm:$0xff]  ;;  %v4503_v47 = vld [vmem:[%s5759_s16 + $0x478] sm:$0xff] }
 0x113   : > { %4885 = vmatprep.mubr.msk.bf16.mxu0 %vm1406_vm1, %v1375_v48  ;;  %4955 = vmatprep.mubr.msk.bf16.mxu1 %vm1406_vm1, %v2095_v49  ;;  %v4598_v48 = vld [vmem:[%s5759_s16 + $0x670] sm:$0xff]  ;;  %v4599_v49 = vld [vmem:[%s5759_s16 + $0x678] sm:$0xff]  ;;  %v2812_v54 = vpack.c.bf16 %v4503_v47, %v4502_v46  ;;  %v4524_v46 = vld [vmem:[%s5759_s16 + $0x520] sm:$0xff] }
 0x114   : > { %v3550_v55 = vpack.c.bf16 %v4599_v49, %v4598_v48  ;;  %v4525_v47 = vld [vmem:[%s5759_s16 + $0x528] sm:$0xff]  ;;  %v4620_v48 = vld [vmem:[%s5759_s16 + $0x720] sm:$0xff] }
 0x115   : > { %v4621_v49 = vld [vmem:[%s5759_s16 + $0x728] sm:$0xff]  ;;  %v2823_v52 = vpack.c.bf16 %v4525_v47, %v4524_v46  ;;  %v6190_v46 = vld [vmem:[%s5759_s16 + $0x5e0] sm:$0xff] }
 0x116   : > { %v3561_v53 = vpack.c.bf16 %v4621_v49, %v4620_v48  ;;  %v6193_v47 = vld [vmem:[%s5759_s16 + $0x5e8] sm:$0xff] }
 0x11a   : > { %4886 = vmatmul.mubr.msk.bf16.gmra.mrb[56].mxu0 %vm1406_vm1, %v1376_v58  ;;  %4956 = vmatmul.mubr.msk.bf16.gmra.mrb[56].mxu1 %vm1406_vm1, %v2096_v59  ;;  %v4506_v58 = vld [vmem:[%s5759_s16 + $0x490] sm:$0xff]  ;;  %v4507_v59 = vld [vmem:[%s5759_s16 + $0x498] sm:$0xff] }
 0x11b   : > { %4889 = vmatprep.mubr.msk.bf16.mxu0 %vm1406_vm1, %v1377_v60  ;;  %4959 = vmatprep.mubr.msk.bf16.mxu1 %vm1406_vm1, %v2097_v61  ;;  %v4602_v60 = vld [vmem:[%s5759_s16 + $0x690] sm:$0xff]  ;;  %v4603_v61 = vld [vmem:[%s5759_s16 + $0x698] sm:$0xff]  ;;  %v2814_v2 = vpack.c.bf16 %v4507_v59, %v4506_v58  ;;  %v4528_v58 = vld [vmem:[%s5759_s16 + $0x540] sm:$0xff] }
 0x11c   : > { %v3552_v3 = vpack.c.bf16 %v4603_v61, %v4602_v60  ;;  %v4529_v59 = vld [vmem:[%s5759_s16 + $0x548] sm:$0xff]  ;;  %v4624_v60 = vld [vmem:[%s5759_s16 + $0x740] sm:$0xff] }
 0x11d   : > { %v4625_v61 = vld [vmem:[%s5759_s16 + $0x748] sm:$0xff]  ;;  %v2825_v0 = vpack.c.bf16 %v4529_v59, %v4528_v58  ;;  %v6221_v58 = vld [vmem:[%s5759_s16 + $0x5f8] sm:$0xff]  ;;  %v6224_v59 = vld [vmem:[%s5759_s16 + $0x7f0] sm:$0xff] }
 0x11e   : > { %v3563_v1 = vpack.c.bf16 %v4625_v61, %v4624_v60  ;;  %v6227_v60 = vld [vmem:[%s5759_s16 + $0x7f8] sm:$0xff] }
 0x122   : > { %4890 = vmatmul.mubr.msk.bf16.gmra.mrb[60].mxu0 %vm1406_vm1, %v1378_v6  ;;  %4960 = vmatmul.mubr.msk.bf16.gmra.mrb[60].mxu1 %vm1406_vm1, %v2098_v7  ;;  %v4510_v6 = vld [vmem:[%s5759_s16 + $0x4b0] sm:$0xff]  ;;  %v4511_v7 = vld [vmem:[%s5759_s16 + $0x4b8] sm:$0xff] }
 0x123   : > { %4969 = vmatprep.mubr.msk.bf16.mxu0 %vm1406_vm1, %v2805_v8  ;;  %5039 = vmatprep.mubr.msk.bf16.mxu1 %vm1406_vm1, %v3543_v9  ;;  %v4606_v8 = vld [vmem:[%s5759_s16 + $0x6b0] sm:$0xff]  ;;  %v4607_v9 = vld [vmem:[%s5759_s16 + $0x6b8] sm:$0xff]  ;;  %v2816_v14 = vpack.c.bf16 %v4511_v7, %v4510_v6  ;;  %v4532_v6 = vld [vmem:[%s5759_s16 + $0x560] sm:$0xff] }
 0x124   : > { %v3554_v15 = vpack.c.bf16 %v4607_v9, %v4606_v8  ;;  %v4533_v7 = vld [vmem:[%s5759_s16 + $0x568] sm:$0xff]  ;;  %v4628_v8 = vld [vmem:[%s5759_s16 + $0x760] sm:$0xff] }
 0x125   : > { %v4629_v9 = vld [vmem:[%s5759_s16 + $0x768] sm:$0xff]  ;;  %v2827_v24 = vpack.c.bf16 %v4533_v7, %v4532_v6 }
 0x126   : > { %v3565_v25 = vpack.c.bf16 %v4629_v9, %v4628_v8 }
 0x12a   : > { %4970 = vmatmul.mubr.msk.bf16.vlgmr.msra.gmra.mrb[64].mxu0 %vm1406_vm1, %v2806_v18  ;;  %5040 = vmatmul.mubr.msk.bf16.vlgmr.msra.gmra.mrb[64].mxu1 %vm1406_vm1, %v3544_v19  ;;  %v4514_v18 = vld [vmem:[%s5759_s16 + $0x4d0] sm:$0xff]  ;;  %v4515_v19 = vld [vmem:[%s5759_s16 + $0x4d8] sm:$0xff] }
 0x12b   : > { %4973 = vmatprep.mubr.msk.bf16.mxu0 %vm1406_vm1, %v2807_v20  ;;  %5043 = vmatprep.mubr.msk.bf16.mxu1 %vm1406_vm1, %v3545_v21  ;;  %v4610_v20 = vld [vmem:[%s5759_s16 + $0x6d0] sm:$0xff]  ;;  %v4611_v21 = vld [vmem:[%s5759_s16 + $0x6d8] sm:$0xff]  ;;  %v2818_v26 = vpack.c.bf16 %v4515_v19, %v4514_v18  ;;  %v6111_v18 = vld [vmem:[%s5759_s16 + $0x780] sm:$0xff] }
 0x12c   : > { %v3556_v27 = vpack.c.bf16 %v4611_v21, %v4610_v20  ;;  %v6114_v19 = vld [vmem:[%s5759_s16 + $0x788] sm:$0xff]  ;;  %v6117_v20 = vld [vmem:[%s5759_s16 + $0x590] sm:$0xff]  ;;  %v6120_v21 = vld [vmem:[%s5759_s16 + $0x598] sm:$0xff] }
 0x12d   : > { %v3567_v48 = vpack.c.bf16 %v6114_v19, %v6111_v18  ;;  %v2830_v49 = vpack.c.bf16 %v6120_v21, %v6117_v20 }
 0x132   : > { %4974 = vmatmul.mubr.msk.bf16.gmra.mrb[68].mxu0 %vm1406_vm1, %v2808_v30  ;;  %5044 = vmatmul.mubr.msk.bf16.gmra.mrb[68].mxu1 %vm1406_vm1, %v3546_v31  ;;  %v4518_v30 = vld [vmem:[%s5759_s16 + $0x4f0] sm:$0xff]  ;;  %v4519_v31 = vld [vmem:[%s5759_s16 + $0x4f8] sm:$0xff] }
 0x133   : > { %4977 = vmatprep.mubr.msk.bf16.mxu0 %vm1406_vm1, %v2809_v32  ;;  %5047 = vmatprep.mubr.msk.bf16.mxu1 %vm1406_vm1, %v3547_v33  ;;  %v4614_v32 = vld [vmem:[%s5759_s16 + $0x6f0] sm:$0xff]  ;;  %v4615_v33 = vld [vmem:[%s5759_s16 + $0x6f8] sm:$0xff]  ;;  %v2820_v38 = vpack.c.bf16 %v4519_v31, %v4518_v30 }
 0x134   : > { %v3558_v39 = vpack.c.bf16 %v4615_v33, %v4614_v32  ;;  %v6141_v30 = vld [vmem:[%s5759_s16 + $0x5b0] sm:$0xff]  ;;  %v6144_v31 = vld [vmem:[%s5759_s16 + $0x5b8] sm:$0xff] }
 0x135   : > { %v6147_v32 = vld [vmem:[%s5759_s16 + $0x7b0] sm:$0xff]  ;;  %v6150_v33 = vld [vmem:[%s5759_s16 + $0x7b8] sm:$0xff] }
 0x13a   : > { %4978 = vmatmul.mubr.msk.bf16.gmra.mrb[72].mxu0 %vm1406_vm1, %v2810_v42  ;;  %5048 = vmatmul.mubr.msk.bf16.gmra.mrb[72].mxu1 %vm1406_vm1, %v3548_v43  ;;  %v4522_v42 = vld [vmem:[%s5759_s16 + $0x510] sm:$0xff]  ;;  %v4523_v43 = vld [vmem:[%s5759_s16 + $0x518] sm:$0xff] }
 0x13b   : > { %4981 = vmatprep.mubr.msk.bf16.mxu0 %vm1406_vm1, %v2811_v44  ;;  %5051 = vmatprep.mubr.msk.bf16.mxu1 %vm1406_vm1, %v3549_v45  ;;  %v4618_v44 = vld [vmem:[%s5759_s16 + $0x710] sm:$0xff]  ;;  %v4619_v45 = vld [vmem:[%s5759_s16 + $0x718] sm:$0xff]  ;;  %v2822_v50 = vpack.c.bf16 %v4523_v43, %v4522_v42  ;;  %v2828_v42 = vpack.c.bf16 %v6096_v11, %v6093_v10  ;;  %v3566_v43 = vpack.c.bf16 %v6102_v13, %v6099_v12  ;;  %v6251_v10 = vld [vmem:[%s7945_s4] ss:$0 sm:$0xff] }
 0x13c   : > { %v3560_v51 = vpack.c.bf16 %v4619_v45, %v4618_v44  ;;  %v6187_v45 = vld [vmem:[%s5759_s16 + $0x7d8] sm:$0xff] }
 0x142   : > { %4982 = vmatmul.mubr.msk.bf16.gmra.mrb[76].mxu0 %vm1406_vm1, %v2812_v54  ;;  %5052 = vmatmul.mubr.msk.bf16.gmra.mrb[76].mxu1 %vm1406_vm1, %v3550_v55  ;;  %v4526_v54 = vld [vmem:[%s5759_s16 + $0x530] sm:$0xff]  ;;  %v4527_v55 = vld [vmem:[%s5759_s16 + $0x538] sm:$0xff] }
 0x143   : > { %4985 = vmatprep.mubr.msk.bf16.mxu0 %vm1406_vm1, %v2813_v56  ;;  %5055 = vmatprep.mubr.msk.bf16.mxu1 %vm1406_vm1, %v3551_v57  ;;  %v4622_v56 = vld [vmem:[%s5759_s16 + $0x730] sm:$0xff]  ;;  %v4623_v57 = vld [vmem:[%s5759_s16 + $0x738] sm:$0xff]  ;;  %v2824_v62 = vpack.c.bf16 %v4527_v55, %v4526_v54 }
 0x144   : > { %v3562_v63 = vpack.c.bf16 %v4623_v57, %v4622_v56  ;;  %v2832_v56 = vpack.c.bf16 %v6144_v31, %v6141_v30  ;;  %v3570_v57 = vpack.c.bf16 %v6150_v33, %v6147_v32 }
 0x14a   : > { %4986 = vmatmul.mubr.msk.bf16.gmra.mrb[80].mxu0 %vm1406_vm1, %v2814_v2  ;;  %5056 = vmatmul.mubr.msk.bf16.gmra.mrb[80].mxu1 %vm1406_vm1, %v3552_v3  ;;  %v4530_v2 = vld [vmem:[%s5759_s16 + $0x550] sm:$0xff]  ;;  %v4531_v3 = vld [vmem:[%s5759_s16 + $0x558] sm:$0xff] }
 0x14b   : > { %4989 = vmatprep.mubr.msk.bf16.mxu0 %vm1406_vm1, %v2815_v4  ;;  %5059 = vmatprep.mubr.msk.bf16.mxu1 %vm1406_vm1, %v3553_v5  ;;  %v4626_v4 = vld [vmem:[%s5759_s16 + $0x750] sm:$0xff]  ;;  %v4627_v5 = vld [vmem:[%s5759_s16 + $0x758] sm:$0xff] }
 0x152   : > { %4990 = vmatmul.mubr.msk.bf16.gmra.mrb[84].mxu0 %vm1406_vm1, %v2816_v14  ;;  %5060 = vmatmul.mubr.msk.bf16.gmra.mrb[84].mxu1 %vm1406_vm1, %v3554_v15  ;;  %v6105_v14 = vld [vmem:[%s5759_s16 + $0x580] sm:$0xff]  ;;  %v6108_v15 = vld [vmem:[%s5759_s16 + $0x588] sm:$0xff] }
 0x153   : > { %4993 = vmatprep.mubr.msk.bf16.mxu0 %vm1406_vm1, %v2817_v16  ;;  %5063 = vmatprep.mubr.msk.bf16.mxu1 %vm1406_vm1, %v3555_v17  ;;  %v2826_v16 = vpack.c.bf16 %v4531_v3, %v4530_v2  ;;  %v3564_v17 = vpack.c.bf16 %v4627_v5, %v4626_v4  ;;  %v2829_v44 = vpack.c.bf16 %v6108_v15, %v6105_v14 }
 0x15a   : > { %4994 = vmatmul.mubr.msk.bf16.gmra.mrb[88].mxu0 %vm1406_vm1, %v2818_v26  ;;  %5064 = vmatmul.mubr.msk.bf16.gmra.mrb[88].mxu1 %vm1406_vm1, %v3556_v27  ;;  %v6129_v26 = vld [vmem:[%s5759_s16 + $0x5a0] sm:$0xff]  ;;  %v6132_v27 = vld [vmem:[%s5759_s16 + $0x5a8] sm:$0xff] }
 0x15b   : > { %4997 = vmatprep.mubr.msk.bf16.mxu0 %vm1406_vm1, %v2819_v28  ;;  %5067 = vmatprep.mubr.msk.bf16.mxu1 %vm1406_vm1, %v3557_v29  ;;  %v6135_v28 = vld [vmem:[%s5759_s16 + $0x7a0] sm:$0xff]  ;;  %v6138_v29 = vld [vmem:[%s5759_s16 + $0x7a8] sm:$0xff]  ;;  %v2831_v54 = vpack.c.bf16 %v6132_v27, %v6129_v26 }
 0x15c   : > { %v3569_v55 = vpack.c.bf16 %v6138_v29, %v6135_v28 }
 0x162   : > { %4998 = vmatmul.mubr.msk.bf16.gmra.mrb[92].mxu0 %vm1406_vm1, %v2820_v38  ;;  %5068 = vmatmul.mubr.msk.bf16.gmra.mrb[92].mxu1 %vm1406_vm1, %v3558_v39  ;;  %v6167_v38 = vld [vmem:[%s7943_s2] ss:$0 sm:$0xff]  ;;  %v6170_v39 = vld [vmem:[%s5759_s16 + $0x5d0] sm:$0xff] }
 0x163   : > { %5001 = vmatprep.mubr.msk.bf16.mxu0 %vm1406_vm1, %v2821_v40  ;;  %5071 = vmatprep.mubr.msk.bf16.mxu1 %vm1406_vm1, %v3559_v41  ;;  %v6173_v40 = vld [vmem:[%s5759_s16 + $0x5d8] sm:$0xff]  ;;  %v6176_v41 = vld [vmem:[%s5759_s16 + $0x7d0] sm:$0xff] }
 0x164   : > { %v2834_v2 = vpack.c.bf16 %v6173_v40, %v6170_v39 }
 0x16a   : > { %5002 = vmatmul.mubr.msk.bf16.gmra.mrb[96].mxu0 %vm1406_vm1, %v2822_v50  ;;  %5072 = vmatmul.mubr.msk.bf16.gmra.mrb[96].mxu1 %vm1406_vm1, %v3560_v51  ;;  %v3568_v50 = vpack.c.bf16 %v6126_v23, %v6123_v22  ;;  %v6204_v51 = vld [vmem:[%s5759_s16 + $0x7e0] sm:$0xff] }
 0x16b   : > { %5005 = vmatprep.mubr.msk.bf16.mxu0 %vm1406_vm1, %v2823_v52  ;;  %5075 = vmatprep.mubr.msk.bf16.mxu1 %vm1406_vm1, %v3561_v53  ;;  %v6207_v52 = vld [vmem:[%s5759_s16 + $0x7e8] sm:$0xff]  ;;  %v6210_v53 = vld [vmem:[%s5759_s16 + $0x5f0] sm:$0xff] }
 0x172   : > { %5006 = vmatmul.mubr.msk.bf16.gmra.mrb[100].mxu0 %vm1406_vm1, %v2824_v62  ;;  %5076 = vmatmul.mubr.msk.bf16.gmra.mrb[100].mxu1 %vm1406_vm1, %v3562_v63  ;;  %v6232_v62 = vld [vmem:[%s7944_s3] ss:$0 sm:$0xff] }
 0x173   : > { %5009 = vmatprep.mubr.msk.bf16.mxu0 %vm1406_vm1, %v2825_v0  ;;  %5079 = vmatprep.mubr.msk.bf16.mxu1 %vm1406_vm1, %v3563_v1  ;;  %v2833_v0 = vpack.c.bf16 %v6156_v35, %v6153_v34  ;;  %v3571_v1 = vpack.c.bf16 %v6162_v37, %v6159_v36 }
 0x17a   : > { %5010 = vmatmul.mubr.msk.bf16.gmra.mrb[104].mxu0 %vm1406_vm1, %v2826_v16  ;;  %5080 = vmatmul.mubr.msk.bf16.gmra.mrb[104].mxu1 %vm1406_vm1, %v3564_v17 }
 0x17b   : > { %5013 = vmatprep.mubr.msk.bf16.mxu0 %vm1406_vm1, %v2827_v24  ;;  %5083 = vmatprep.mubr.msk.bf16.mxu1 %vm1406_vm1, %v3565_v25 }
 0x17d   : > { %v4831_v61 = vpop.f32.mrb[0].mxu0  ;;  %v4901_v63 = vpop.f32.mrb[0].mxu1 }
 0x17e   : > { %v1550_v4 = vadd.f32 %v4831_v61, %v6167_v38  ;;  %v2238_v5 = vadd.f32 %v4901_v63, %v6167_v38  ;;  %v1541_v6 = vpop.f32.mrb[1].mxu0  ;;  %v2229_v7 = vpop.f32.mrb[1].mxu1 }
 0x17f   : > { %v1542_v11 = vadd.f32 %v6167_v38, %v1541_v6  ;;  %v2230_v12 = vadd.f32 %v6167_v38, %v2229_v7  ;;  %v4832_v13 = vpop.f32.mrb[2].mxu0  ;;  %v4902_v16 = vpop.f32.mrb[2].mxu1 }
 0x180   : > { %v1805_v19 = vmul.f32 %v6232_v62, %v1550_v4  ;;  %v2486_v24 = vmul.f32 %v6232_v62, %v2238_v5  ;;  %v1553_v25 = vadd.f32 %v4832_v13, %v6167_v38  ;;  %v2241_v61 = vadd.f32 %v4902_v16, %v6167_v38  ;;  %v1544_v63 = vpop.f32.mrb[3].mxu0  ;;  %v2232_v6 = vpop.f32.mrb[3].mxu1 }
 0x181   : > { %v1803_v7 = vmul.f32 %v6232_v62, %v1542_v11  ;;  %v2484_v9 = vmul.f32 %v6232_v62, %v2230_v12  ;;  %v1545_v8 = vadd.f32 %v6167_v38, %v1544_v63  ;;  %v2233_v17 = vadd.f32 %v6167_v38, %v2232_v6 }
 0x182   : > { %v1876_v18 = vadd.f32 %v6251_v10, %v1805_v19  ;;  %v2550_v4 = vadd.f32 %v6251_v10, %v2486_v24  ;;  %v1806_v5 = vmul.f32 %v6232_v62, %v1553_v25  ;;  %v2487_v13 = vmul.f32 %v6232_v62, %v2241_v61  ;;  %5014 = vmatmul.mubr.msk.bf16.gmra.mrb[108].mxu0 %vm1406_vm1, %v2828_v42 }
 0x183   : > { %v1874_v16 = vadd.f32 %v6251_v10, %v1803_v7  ;;  %v2548_v11 = vadd.f32 %v6251_v10, %v2484_v9  ;;  %v1804_v12 = vmul.f32 %v6232_v62, %v1545_v8  ;;  %v2485_v63 = vmul.f32 %v6232_v62, %v2233_v17  ;;  %5084 = vmatmul.mubr.msk.bf16.gmra.mrb[108].mxu1 %vm1406_vm1, %v3566_v43 }
 0x184   : > { %v1940_v6 = vmax.f32 %v1876_v18, 0.0  ;;  %v2614_v19 = vmax.f32 %v2550_v4, 0.0  ;;  %v1877_v24 = vadd.f32 %v6251_v10, %v1806_v5  ;;  %v2551_v25 = vadd.f32 %v6251_v10, %v2487_v13  ;;  %5017 = vmatprep.mubr.msk.bf16.mxu0 %vm1406_vm1, %v2829_v44  ;;  %5087 = vmatprep.mubr.msk.bf16.mxu1 %vm1406_vm1, %v3567_v48 }
 0x185   : > { %v1938_v42 = vmax.f32 %v1874_v16, 0.0  ;;  %v2612_v9 = vmax.f32 %v2548_v11, 0.0  ;;  %v1875_v8 = vadd.f32 %v6251_v10, %v1804_v12  ;;  %v2549_v17 = vadd.f32 %v6251_v10, %v2485_v63  ;;  %v4835_v43 = vpop.f32.mrb[4].mxu0  ;;  %v4905_v18 = vpop.f32.mrb[4].mxu1 }
 0x186   : > { %v6286_v61 = vmax.f32 %v1940_v6, %v2614_v19  ;;  %v1941_v7 = vmax.f32 %v1877_v24, 0.0  ;;  %v2615_v4 = vmax.f32 %v2551_v25, 0.0  ;;  %v1566_v5 = vadd.f32 %v4835_v43, %v6167_v38  ;;  %v1557_v13 = vpop.f32.mrb[5].mxu0  ;;  %v2245_v14 = vpop.f32.mrb[5].mxu1 }
 0x187   : > { %v6289_v15 = vmax.f32 %v1938_v42, %v2612_v9  ;;  %v1939_v44 = vmax.f32 %v1875_v8, 0.0  ;;  %v2613_v48 = vmax.f32 %v2549_v17, 0.0  ;;  %v2254_v16 = vadd.f32 %v4905_v18, %v6167_v38  ;;  %v4836_v11 = vpop.f32.mrb[6].mxu0  ;;  %v4906_v12 = vpop.f32.mrb[6].mxu1 }
 0x188   : > { %v6292_v3 = vmax.f32 %v1941_v7, %v2615_v4  ;;  %v1809_v63 = vmul.f32 %v6232_v62, %v1566_v5  ;;  %v1558_v6 = vadd.f32 %v6167_v38, %v1557_v13  ;;  %v2246_v19 = vadd.f32 %v6167_v38, %v2245_v14  ;;  %v1560_v24 = vpop.f32.mrb[7].mxu0  ;;  %v2248_v25 = vpop.f32.mrb[7].mxu1 }
 0x189   : > { %v6297_v43 = vmax.f32 %v1939_v44, %v2613_v48  ;;  %v2490_v42 = vmul.f32 %v6232_v62, %v2254_v16  ;;  %v1569_v9 = vadd.f32 %v4836_v11, %v6167_v38  ;;  %v2257_v8 = vadd.f32 %v4906_v12, %v6167_v38 }
 0x18a   : > { %v1880_v17 = vadd.f32 %v6251_v10, %v1809_v63  ;;  %v1807_v18 = vmul.f32 %v6232_v62, %v1558_v6  ;;  %v2488_v7 = vmul.f32 %v6232_v62, %v2246_v19  ;;  %v1561_v4 = vadd.f32 %v6167_v38, %v1560_v24  ;;  %5018 = vmatmul.mubr.msk.bf16.gmra.mrb[112].mxu0 %vm1406_vm1, %v2830_v49 }
 0x18b   : > { %v2554_v5 = vadd.f32 %v6251_v10, %v2490_v42  ;;  %v1810_v13 = vmul.f32 %v6232_v62, %v1569_v9  ;;  %v2491_v14 = vmul.f32 %v6232_v62, %v2257_v8  ;;  %v2249_v44 = vadd.f32 %v6167_v38, %v2248_v25  ;;  %5088 = vmatmul.mubr.msk.bf16.gmra.mrb[112].mxu1 %vm1406_vm1, %v3568_v50 }
 0x18c   : > { %v1944_v48 = vmax.f32 %v1880_v17, 0.0  ;;  %v1878_v16 = vadd.f32 %v6251_v10, %v1807_v18  ;;  %v2552_v20 = vadd.f32 %v6251_v10, %v2488_v7  ;;  %v1808_v21 = vmul.f32 %v6232_v62, %v1561_v4  ;;  %5021 = vmatprep.mubr.msk.bf16.mxu0 %vm1406_vm1, %v2831_v54  ;;  %5091 = vmatprep.mubr.msk.bf16.mxu1 %vm1406_vm1, %v3569_v55 }
 0x18d   : > { %v2618_v22 = vmax.f32 %v2554_v5, 0.0  ;;  %v1881_v23 = vadd.f32 %v6251_v10, %v1810_v13  ;;  %v2555_v49 = vadd.f32 %v6251_v10, %v2491_v14  ;;  %v2489_v50 = vmul.f32 %v6232_v62, %v2249_v44  ;;  %v4839_v11 = vpop.f32.mrb[8].mxu0  ;;  %v4909_v12 = vpop.f32.mrb[8].mxu1 }
 0x18e   : > { %v1942_v63 = vmax.f32 %v1878_v16, 0.0  ;;  %v2616_v6 = vmax.f32 %v2552_v20, 0.0  ;;  %v1879_v26 = vadd.f32 %v6251_v10, %v1808_v21  ;;  %v1582_v27 = vadd.f32 %v4839_v11, %v6167_v38  ;;  %v1573_v54 = vpop.f32.mrb[9].mxu0  ;;  %v2261_v19 = vpop.f32.mrb[9].mxu1 }
 0x18f   : > { %v6334_v28 = vmax.f32 %v1944_v48, %v2618_v22  ;;  %v1945_v29 = vmax.f32 %v1881_v23, 0.0  ;;  %v2619_v55 = vmax.f32 %v2555_v49, 0.0  ;;  %v2553_v24 = vadd.f32 %v6251_v10, %v2489_v50  ;;  %v4840_v25 = vpop.f32.mrb[10].mxu0  ;;  %v4910_v42 = vpop.f32.mrb[10].mxu1 }
 0x190   : > { %v6337_v9 = vmax.f32 %v1942_v63, %v2616_v6  ;;  %v1943_v8 = vmax.f32 %v1879_v26, 0.0  ;;  %v1813_v17 = vmul.f32 %v6232_v62, %v1582_v27  ;;  %v2270_v18 = vadd.f32 %v4909_v12, %v6167_v38  ;;  %v1576_v7 = vpop.f32.mrb[11].mxu0  ;;  %v2264_v4 = vpop.f32.mrb[11].mxu1 }
 0x191   : > { %v6341_v5 = vmax.f32 %v1945_v29, %v2619_v55  ;;  %v2617_v13 = vmax.f32 %v2553_v24, 0.0  ;;  %v1574_v14 = vadd.f32 %v6167_v38, %v1573_v54  ;;  %v2262_v44 = vadd.f32 %v6167_v38, %v2261_v19 }
 0x192   : > { %v1884_v48 = vadd.f32 %v6251_v10, %v1813_v17  ;;  %v2494_v16 = vmul.f32 %v6232_v62, %v2270_v18  ;;  %v1585_v20 = vadd.f32 %v4840_v25, %v6167_v38  ;;  %v2273_v21 = vadd.f32 %v4910_v42, %v6167_v38  ;;  %5022 = vmatmul.mubr.msk.bf16.gmra.mrb[116].mxu0 %vm1406_vm1, %v2832_v56 }
 0x193   : > { %v6353_v22 = vmax.f32 %v1943_v8, %v2617_v13  ;;  %v1811_v23 = vmul.f32 %v6232_v62, %v1574_v14  ;;  %v2492_v49 = vmul.f32 %v6232_v62, %v2262_v44  ;;  %v1577_v50 = vadd.f32 %v6167_v38, %v1576_v7  ;;  %5092 = vmatmul.mubr.msk.bf16.gmra.mrb[116].mxu1 %vm1406_vm1, %v3570_v57 }
 0x194   : > { %v1948_v11 = vmax.f32 %v1884_v48, 0.0  ;;  %v2558_v12 = vadd.f32 %v6251_v10, %v2494_v16  ;;  %v1814_v30 = vmul.f32 %v6232_v62, %v1585_v20  ;;  %v2495_v31 = vmul.f32 %v6232_v62, %v2273_v21  ;;  %5025 = vmatprep.mubr.msk.bf16.mxu0 %vm1406_vm1, %v2833_v0  ;;  %5095 = vmatprep.mubr.msk.bf16.mxu1 %vm1406_vm1, %v3571_v1 }
 0x195   : > { %v1882_v32 = vadd.f32 %v6251_v10, %v1811_v23  ;;  %v2556_v33 = vadd.f32 %v6251_v10, %v2492_v49  ;;  %v1812_v56 = vmul.f32 %v6232_v62, %v1577_v50  ;;  %v2265_v57 = vadd.f32 %v6167_v38, %v2264_v4  ;;  %v4843_v63 = vpop.f32.mrb[12].mxu0  ;;  %v4913_v6 = vpop.f32.mrb[12].mxu1 }
 0x196   : > { %v2622_v26 = vmax.f32 %v2558_v12, 0.0  ;;  %v1885_v34 = vadd.f32 %v6251_v10, %v1814_v30  ;;  %v2559_v35 = vadd.f32 %v6251_v10, %v2495_v31  ;;  %v1598_v0 = vadd.f32 %v4843_v63, %v6167_v38  ;;  %v1589_v36 = vpop.f32.mrb[13].mxu0  ;;  %v2277_v37 = vpop.f32.mrb[13].mxu1 }
 0x197   : > { %v1946_v1 = vmax.f32 %v1882_v32, 0.0  ;;  %v2620_v27 = vmax.f32 %v2556_v33, 0.0  ;;  %v1883_v54 = vadd.f32 %v6251_v10, %v1812_v56  ;;  %v2493_v19 = vmul.f32 %v6232_v62, %v2265_v57  ;;  %v4844_v29 = vpop.f32.mrb[14].mxu0  ;;  %v4914_v55 = vpop.f32.mrb[14].mxu1 }
 0x198   : > { %v6382_v24 = vmax.f32 %v1948_v11, %v2622_v26  ;;  %v1949_v25 = vmax.f32 %v1885_v34, 0.0  ;;  %v2623_v42 = vmax.f32 %v2559_v35, 0.0  ;;  %v1817_v8 = vmul.f32 %v6232_v62, %v1598_v0  ;;  %v1592_v17 = vpop.f32.mrb[15].mxu0  ;;  %v2280_v18 = vpop.f32.mrb[15].mxu1 }
 0x199   : > { %v6385_v7 = vmax.f32 %v1946_v1, %v2620_v27  ;;  %v1947_v4 = vmax.f32 %v1883_v54, 0.0  ;;  %v2557_v13 = vadd.f32 %v6251_v10, %v2493_v19  ;;  %v2286_v14 = vadd.f32 %v4913_v6, %v6167_v38 }
 0x19a   : > { %v6389_v44 = vmax.f32 %v1949_v25, %v2623_v42  ;;  %v1888_v48 = vadd.f32 %v6251_v10, %v1817_v8  ;;  %v1590_v16 = vadd.f32 %v6167_v38, %v1589_v36  ;;  %v2278_v20 = vadd.f32 %v6167_v38, %v2277_v37  ;;  %5026 = vmatmul.mubr.msk.bf16.gmra.mrb[120].mxu0 %vm1406_vm1, %v2834_v2 }
 0x19b   : > { %v2621_v21 = vmax.f32 %v2557_v13, 0.0  ;;  %v2498_v23 = vmul.f32 %v6232_v62, %v2286_v14  ;;  %v1601_v49 = vadd.f32 %v4844_v29, %v6167_v38  ;;  %v2289_v50 = vadd.f32 %v4914_v55, %v6167_v38 }
 0x19c   : > { %v7947_v11 = vpack.c.bf16 %v6187_v45, %v6176_v41  ;;  %v7948_v12 = vpack.c.bf16 %v6193_v47, %v6190_v46  ;;  %v1952_v39 = vmax.f32 %v1888_v48, 0.0  ;;  %v1815_v40 = vmul.f32 %v6232_v62, %v1590_v16 }
 0x19d   : > { %v2496_v2 = vmul.f32 %v6232_v62, %v2278_v20  ;;  %v1593_v30 = vadd.f32 %v6167_v38, %v1592_v17  ;;  %v7949_v31 = vpack.c.bf16 %v6207_v52, %v6204_v51  ;;  %v6416_v41 = vmax.f32 %v1947_v4, %v2621_v21  ;;  %v4847_v32 = vpop.f32.mrb[16].mxu0  ;;  %v4917_v33 = vpop.f32.mrb[16].mxu1 }
 0x19e   : > { %5096 = vmatmul.mubr.msk.bf16.gmra.mrb[120].mxu1 %vm1406_vm1, %v7947_v11  ;;  %5029 = vmatprep.mubr.msk.bf16.mxu0 %vm1406_vm1, %v7948_v12  ;;  %v2562_v45 = vadd.f32 %v6251_v10, %v2498_v23  ;;  %v1818_v46 = vmul.f32 %v6232_v62, %v1601_v49  ;;  %v2499_v47 = vmul.f32 %v6232_v62, %v2289_v50  ;;  %v1605_v52 = vpop.f32.mrb[17].mxu0  ;;  %v2293_v6 = vpop.f32.mrb[17].mxu1 }
 0x19f   : > { %5099 = vmatprep.mubr.msk.bf16.mxu1 %vm1406_vm1, %v7949_v31  ;;  %v1886_v56 = vadd.f32 %v6251_v10, %v1815_v40  ;;  %v2560_v57 = vadd.f32 %v6251_v10, %v2496_v2  ;;  %v1816_v63 = vmul.f32 %v6232_v62, %v1593_v30  ;;  %v2281_v51 = vadd.f32 %v6167_v38, %v2280_v18  ;;  %v4848_v36 = vpop.f32.mrb[18].mxu0  ;;  %v4918_v37 = vpop.f32.mrb[18].mxu1 }
 0x1a0   : > { %v2626_v26 = vmax.f32 %v2562_v45, 0.0  ;;  %v1889_v34 = vadd.f32 %v6251_v10, %v1818_v46  ;;  %v2563_v35 = vadd.f32 %v6251_v10, %v2499_v47  ;;  %v1614_v0 = vadd.f32 %v4847_v32, %v6167_v38  ;;  %v1608_v29 = vpop.f32.mrb[19].mxu0  ;;  %v2296_v55 = vpop.f32.mrb[19].mxu1 }
 0x1a1   : > { %v1950_v1 = vmax.f32 %v1886_v56, 0.0  ;;  %v2624_v27 = vmax.f32 %v2560_v57, 0.0  ;;  %v1887_v54 = vadd.f32 %v6251_v10, %v1816_v63  ;;  %v2497_v19 = vmul.f32 %v6232_v62, %v2281_v51 }
 0x1a2   : > { %v6430_v25 = vmax.f32 %v1952_v39, %v2626_v26  ;;  %v1953_v42 = vmax.f32 %v1889_v34, 0.0  ;;  %v2627_v8 = vmax.f32 %v2563_v35, 0.0  ;;  %v1821_v17 = vmul.f32 %v6232_v62, %v1614_v0 }
 0x1a3   : > { %v6433_v18 = vmax.f32 %v1950_v1, %v2624_v27  ;;  %v1951_v4 = vmax.f32 %v1887_v54, 0.0  ;;  %v2561_v13 = vadd.f32 %v6251_v10, %v2497_v19  ;;  %v2302_v14 = vadd.f32 %v4917_v33, %v6167_v38 }
 0x1a4   : > { %v7950_v48 = vpack.c.bf16 %v6221_v58, %v6210_v53  ;;  %v6441_v16 = vmax.f32 %v1953_v42, %v2627_v8  ;;  %v1892_v20 = vadd.f32 %v6251_v10, %v1821_v17  ;;  %v1606_v21 = vadd.f32 %v6167_v38, %v1605_v52 }
 0x1a5   : > { %v2294_v23 = vadd.f32 %v6167_v38, %v2293_v6  ;;  %v7951_v49 = vpack.c.bf16 %v6227_v60, %v6224_v59  ;;  %v2625_v50 = vmax.f32 %v2561_v13, 0.0  ;;  %v2502_v11 = vmul.f32 %v6232_v62, %v2302_v14  ;;  %v4851_v30 = vpop.f32.mrb[20].mxu0  ;;  %v4921_v31 = vpop.f32.mrb[20].mxu1 }
 0x1a6   : > { %5030 = vmatmul.mubr.msk.bf16.gmra.mrb[124].mxu0 %vm1406_vm1, %v7950_v48  ;;  %v1617_v53 = vadd.f32 %v4848_v36, %v6167_v38  ;;  %v2305_v58 = vadd.f32 %v4918_v37, %v6167_v38  ;;  %v1956_v12 = vmax.f32 %v1892_v20, 0.0  ;;  %v1819_v39 = vmul.f32 %v6232_v62, %v1606_v21  ;;  %v1621_v47 = vpop.f32.mrb[21].mxu0  ;;  %v2309_v32 = vpop.f32.mrb[21].mxu1 }
 0x1a7   : > { %5100 = vmatmul.mubr.msk.bf16.gmra.mrb[124].mxu1 %vm1406_vm1, %v7951_v49  ;;  %v2500_v40 = vmul.f32 %v6232_v62, %v2294_v23  ;;  %v1609_v2 = vadd.f32 %v6167_v38, %v1608_v29  ;;  %v6456_v45 = vmax.f32 %v1951_v4, %v2625_v50  ;;  %v2566_v59 = vadd.f32 %v6251_v10, %v2502_v11  ;;  %v4852_v51 = vpop.f32.mrb[22].mxu0  ;;  %v4922_v52 = vpop.f32.mrb[22].mxu1 }
 0x1a8   : > { %v1822_v60 = vmul.f32 %v6232_v62, %v1617_v53  ;;  %v2503_v46 = vmul.f32 %v6232_v62, %v2305_v58  ;;  %v1890_v33 = vadd.f32 %v6251_v10, %v1819_v39  ;;  %v2297_v63 = vadd.f32 %v6167_v38, %v2296_v55  ;;  %v1624_v0 = vpop.f32.mrb[23].mxu0  ;;  %v2312_v36 = vpop.f32.mrb[23].mxu1 }
 0x1a9   : > { %v2564_v56 = vadd.f32 %v6251_v10, %v2500_v40  ;;  %v1820_v57 = vmul.f32 %v6232_v62, %v1609_v2  ;;  %v2630_v6 = vmax.f32 %v2566_v59, 0.0  ;;  %v1630_v35 = vadd.f32 %v4851_v30, %v6167_v38 }
 0x1aa   : > { %v1893_v26 = vadd.f32 %v6251_v10, %v1822_v60  ;;  %v2567_v34 = vadd.f32 %v6251_v10, %v2503_v46  ;;  %v1954_v37 = vmax.f32 %v1890_v33, 0.0  ;;  %v2501_v54 = vmul.f32 %v6232_v62, %v2297_v63 }
 0x1ab   : > { %v2628_v1 = vmax.f32 %v2564_v56, 0.0  ;;  %v1891_v27 = vadd.f32 %v6251_v10, %v1820_v57  ;;  %v6470_v19 = vmax.f32 %v1956_v12, %v2630_v6  ;;  %v1825_v42 = vmul.f32 %v6232_v62, %v1630_v35 }
 0x1ac   : > { %v1957_v29 = vmax.f32 %v1893_v26, 0.0  ;;  %v2631_v55 = vmax.f32 %v2567_v34, 0.0  ;;  %v2565_v4 = vadd.f32 %v6251_v10, %v2501_v54  ;;  %v2318_v13 = vadd.f32 %v4921_v31, %v6167_v38 }
 0x1ad   : > { %v6473_v8 = vmax.f32 %v1954_v37, %v2628_v1  ;;  %v1955_v17 = vmax.f32 %v1891_v27, 0.0  ;;  %v1896_v48 = vadd.f32 %v6251_v10, %v1825_v42  ;;  %v1622_v20 = vadd.f32 %v6167_v38, %v1621_v47  ;;  %v4855_v53 = vpop.f32.mrb[24].mxu0  ;;  %v4925_v58 = vpop.f32.mrb[24].mxu1 }
 0x1ae   : > { %v6477_v14 = vmax.f32 %v1957_v29, %v2631_v55  ;;  %v2310_v21 = vadd.f32 %v6167_v38, %v2309_v32  ;;  %v2629_v23 = vmax.f32 %v2565_v4, 0.0  ;;  %v2506_v49 = vmul.f32 %v6232_v62, %v2318_v13  ;;  %v1637_v30 = vpop.f32.mrb[25].mxu0  ;;  %v2325_v31 = vpop.f32.mrb[25].mxu1 }
 0x1af   : > { %v1633_v50 = vadd.f32 %v4852_v51, %v6167_v38  ;;  %v2321_v11 = vadd.f32 %v4922_v52, %v6167_v38  ;;  %v1960_v12 = vmax.f32 %v1896_v48, 0.0  ;;  %v1823_v39 = vmul.f32 %v6232_v62, %v1622_v20  ;;  %v4856_v32 = vpop.f32.mrb[26].mxu0  ;;  %v4926_v33 = vpop.f32.mrb[26].mxu1 }
 0x1b0   : > { %v2504_v40 = vmul.f32 %v6232_v62, %v2310_v21  ;;  %v1625_v2 = vadd.f32 %v6167_v38, %v1624_v0  ;;  %v6488_v59 = vmax.f32 %v1955_v17, %v2629_v23  ;;  %v2570_v60 = vadd.f32 %v6251_v10, %v2506_v49  ;;  %v1640_v52 = vpop.f32.mrb[27].mxu0  ;;  %v2328_v6 = vpop.f32.mrb[27].mxu1 }
 0x1b1   : > { %v1826_v46 = vmul.f32 %v6232_v62, %v1633_v50  ;;  %v2507_v47 = vmul.f32 %v6232_v62, %v2321_v11  ;;  %v1894_v56 = vadd.f32 %v6251_v10, %v1823_v39  ;;  %v2313_v51 = vadd.f32 %v6167_v38, %v2312_v36 }
 0x1b2   : > { %v2568_v57 = vadd.f32 %v6251_v10, %v2504_v40  ;;  %v1824_v63 = vmul.f32 %v6232_v62, %v1625_v2  ;;  %v2634_v26 = vmax.f32 %v2570_v60, 0.0  ;;  %v1646_v0 = vadd.f32 %v4855_v53, %v6167_v38 }
 0x1b3   : > { %v1897_v34 = vadd.f32 %v6251_v10, %v1826_v46  ;;  %v2571_v35 = vadd.f32 %v6251_v10, %v2507_v47  ;;  %v1958_v37 = vmax.f32 %v1894_v56, 0.0  ;;  %v2505_v54 = vmul.f32 %v6232_v62, %v2313_v51 }
 0x1b4   : > { %v2632_v1 = vmax.f32 %v2568_v57, 0.0  ;;  %v1895_v27 = vadd.f32 %v6251_v10, %v1824_v63  ;;  %v6502_v29 = vmax.f32 %v1960_v12, %v2634_v26  ;;  %v1829_v36 = vmul.f32 %v6232_v62, %v1646_v0 }
 0x1b5   : > { %v1961_v55 = vmax.f32 %v1897_v34, 0.0  ;;  %v2635_v42 = vmax.f32 %v2571_v35, 0.0  ;;  %v2569_v13 = vadd.f32 %v6251_v10, %v2505_v54  ;;  %v2334_v48 = vadd.f32 %v4925_v58, %v6167_v38  ;;  %v4859_v50 = vpop.f32.mrb[28].mxu0  ;;  %v4929_v11 = vpop.f32.mrb[28].mxu1 }
 0x1b6   : > { %v6505_v17 = vmax.f32 %v1958_v37, %v2632_v1  ;;  %v1959_v4 = vmax.f32 %v1895_v27, 0.0  ;;  %v1900_v21 = vadd.f32 %v6251_v10, %v1829_v36  ;;  %v1638_v23 = vadd.f32 %v6167_v38, %v1637_v30  ;;  %v1653_v2 = vpop.f32.mrb[29].mxu0  ;;  %v2341_v60 = vpop.f32.mrb[29].mxu1 }
 0x1b7   : > { %v6509_v20 = vmax.f32 %v1961_v55, %v2635_v42  ;;  %v2326_v49 = vadd.f32 %v6167_v38, %v2325_v31  ;;  %v2633_v53 = vmax.f32 %v2569_v13, 0.0  ;;  %v2510_v12 = vmul.f32 %v6232_v62, %v2334_v48  ;;  %v4860_v56 = vpop.f32.mrb[30].mxu0  ;;  %v4930_v31 = vpop.f32.mrb[30].mxu1 }
 0x1b8   : > { %v1649_v39 = vadd.f32 %v4856_v32, %v6167_v38  ;;  %v2337_v40 = vadd.f32 %v4926_v33, %v6167_v38  ;;  %v1964_v58 = vmax.f32 %v1900_v21, 0.0  ;;  %v1827_v46 = vmul.f32 %v6232_v62, %v1638_v23  ;;  %v1656_v33 = vpop.f32.mrb[31].mxu0  ;;  %v2344_v26 = vpop.f32.mrb[31].mxu1 }
 0x1b9   : > { %v2508_v47 = vmul.f32 %v6232_v62, %v2326_v49  ;;  %v1641_v30 = vadd.f32 %v6167_v38, %v1640_v52  ;;  %v6520_v57 = vmax.f32 %v1959_v4, %v2633_v53  ;;  %v2574_v63 = vadd.f32 %v6251_v10, %v2510_v12 }
 0x1ba   : > { %v1830_v51 = vmul.f32 %v6232_v62, %v1649_v39  ;;  %v2511_v32 = vmul.f32 %v6232_v62, %v2337_v40  ;;  %v1898_v34 = vadd.f32 %v6251_v10, %v1827_v46  ;;  %v2329_v52 = vadd.f32 %v6167_v38, %v2328_v6 }
 0x1bb   : > { %v2572_v35 = vadd.f32 %v6251_v10, %v2508_v47  ;;  %v1828_v0 = vmul.f32 %v6232_v62, %v1641_v30  ;;  %v2638_v37 = vmax.f32 %v2574_v63, 0.0  ;;  %v1662_v54 = vadd.f32 %v4859_v50, %v6167_v38 }
 0x1bc   : > { %v1901_v1 = vadd.f32 %v6251_v10, %v1830_v51  ;;  %v2575_v27 = vadd.f32 %v6251_v10, %v2511_v32  ;;  %v1962_v55 = vmax.f32 %v1898_v34, 0.0  ;;  %v2509_v4 = vmul.f32 %v6232_v62, %v2329_v52 }
 0x1bd   : > { %v2636_v42 = vmax.f32 %v2572_v35, 0.0  ;;  %v1899_v36 = vadd.f32 %v6251_v10, %v1828_v0  ;;  %v6534_v13 = vmax.f32 %v1964_v58, %v2638_v37  ;;  %v1833_v23 = vmul.f32 %v6232_v62, %v1662_v54  ;;  %v4863_v50 = vpop.f32.mrb[32].mxu0  ;;  %v4933_v39 = vpop.f32.mrb[32].mxu1 }
 0x1be   : > { %v1965_v48 = vmax.f32 %v1901_v1, 0.0  ;;  %v2639_v21 = vmax.f32 %v2575_v27, 0.0  ;;  %v2573_v53 = vadd.f32 %v6251_v10, %v2509_v4  ;;  %v2350_v12 = vadd.f32 %v4929_v11, %v6167_v38  ;;  %v1669_v30 = vpop.f32.mrb[33].mxu0  ;;  %v2357_v63 = vpop.f32.mrb[33].mxu1 }
 0x1bf   : > { %7952 = vst [vmem:[#allocation3_spill] sm:$0xff] %v6534_v13  ;;  %v6537_v6 = vmax.f32 %v1962_v55, %v2636_v42  ;;  %v1963_v49 = vmax.f32 %v1899_v36, 0.0  ;;  %v1904_v46 = vadd.f32 %v6251_v10, %v1833_v23  ;;  %v1654_v58 = vadd.f32 %v6167_v38, %v1653_v2  ;;  %v4864_v11 = vpop.f32.mrb[34].mxu0  ;;  %v4934_v0 = vpop.f32.mrb[34].mxu1 }
 0x1c0   : > { %v6541_v40 = vmax.f32 %v1965_v48, %v2639_v21  ;;  %v2342_v47 = vadd.f32 %v6167_v38, %v2341_v60  ;;  %v2637_v51 = vmax.f32 %v2573_v53, 0.0  ;;  %v2514_v32 = vmul.f32 %v6232_v62, %v2350_v12  ;;  %v1672_v27 = vpop.f32.mrb[35].mxu0  ;;  %v2360_v60 = vpop.f32.mrb[35].mxu1 }
 0x1c1   : > { %7953 = vst [vmem:[#allocation4_spill] sm:$0xff] %v6537_v6  ;;  %v1665_v34 = vadd.f32 %v4860_v56, %v6167_v38  ;;  %v2353_v35 = vadd.f32 %v4930_v31, %v6167_v38  ;;  %v1968_v52 = vmax.f32 %v1904_v46, 0.0  ;;  %v1831_v37 = vmul.f32 %v6232_v62, %v1654_v58 }
 0x1c2   : > { %7954 = vst [vmem:[#allocation5_spill] sm:$0xff] %v6541_v40  ;;  %v2512_v1 = vmul.f32 %v6232_v62, %v2342_v47  ;;  %v1657_v2 = vadd.f32 %v6167_v38, %v1656_v33  ;;  %v6552_v54 = vmax.f32 %v1963_v49, %v2637_v51  ;;  %v2578_v55 = vadd.f32 %v6251_v10, %v2514_v32 }
 0x1c3   : > { %v1834_v42 = vmul.f32 %v6232_v62, %v1665_v34  ;;  %v2515_v56 = vmul.f32 %v6232_v62, %v2353_v35  ;;  %v1902_v31 = vadd.f32 %v6251_v10, %v1831_v37  ;;  %v2345_v48 = vadd.f32 %v6167_v38, %v2344_v26 }
 0x1c4   : > { %7955 = vst [vmem:[#allocation6_spill] sm:$0xff] %v6552_v54  ;;  %v2576_v36 = vadd.f32 %v6251_v10, %v2512_v1  ;;  %v1832_v4 = vmul.f32 %v6232_v62, %v1657_v2  ;;  %v2642_v21 = vmax.f32 %v2578_v55, 0.0  ;;  %v1678_v49 = vadd.f32 %v4863_v50, %v6167_v38 }
 0x1c5   : > { %v1905_v33 = vadd.f32 %v6251_v10, %v1834_v42  ;;  %v2579_v23 = vadd.f32 %v6251_v10, %v2515_v56  ;;  %v1966_v53 = vmax.f32 %v1902_v31, 0.0  ;;  %v2513_v58 = vmul.f32 %v6232_v62, %v2345_v48  ;;  %v4867_v26 = vpop.f32.mrb[36].mxu0  ;;  %v4937_v35 = vpop.f32.mrb[36].mxu1 }
 0x1c6   : > { %v2640_v12 = vmax.f32 %v2576_v36, 0.0  ;;  %v1903_v46 = vadd.f32 %v6251_v10, %v1832_v4  ;;  %v6566_v47 = vmax.f32 %v1968_v52, %v2642_v21  ;;  %v1837_v34 = vmul.f32 %v6232_v62, %v1678_v49  ;;  %v1685_v55 = vpop.f32.mrb[37].mxu0  ;;  %v2373_v42 = vpop.f32.mrb[37].mxu1 }
 0x1c7   : > { %v1969_v51 = vmax.f32 %v1905_v33, 0.0  ;;  %v2643_v32 = vmax.f32 %v2579_v23, 0.0  ;;  %v2577_v2 = vadd.f32 %v6251_v10, %v2513_v58  ;;  %v2366_v50 = vadd.f32 %v4933_v39, %v6167_v38  ;;  %v4868_v4 = vpop.f32.mrb[38].mxu0  ;;  %v4938_v48 = vpop.f32.mrb[38].mxu1 }
 0x1c8   : > { %7956 = vst [vmem:[#allocation7_spill] sm:$0xff] %v6566_v47  ;;  %v6569_v37 = vmax.f32 %v1966_v53, %v2640_v12  ;;  %v1967_v1 = vmax.f32 %v1903_v46, 0.0  ;;  %v1908_v52 = vadd.f32 %v6251_v10, %v1837_v34  ;;  %v1670_v31 = vadd.f32 %v6167_v38, %v1669_v30  ;;  %v1688_v39 = vpop.f32.mrb[39].mxu0  ;;  %v2376_v53 = vpop.f32.mrb[39].mxu1 }
 0x1c9   : > { %v6573_v56 = vmax.f32 %v1969_v51, %v2643_v32  ;;  %v2358_v36 = vadd.f32 %v6167_v38, %v2357_v63  ;;  %v2641_v21 = vmax.f32 %v2577_v2, 0.0  ;;  %v2518_v33 = vmul.f32 %v6232_v62, %v2366_v50 }
 0x1ca   : > { %7957 = vst [vmem:[#allocation8_spill] sm:$0xff] %v6569_v37  ;;  %v1681_v23 = vadd.f32 %v4864_v11, %v6167_v38  ;;  %v2369_v49 = vadd.f32 %v4934_v0, %v6167_v38  ;;  %v1972_v12 = vmax.f32 %v1908_v52, 0.0  ;;  %v1835_v46 = vmul.f32 %v6232_v62, %v1670_v31 }
 0x1cb   : > { %7958 = vst [vmem:[#allocation9_spill] sm:$0xff] %v6573_v56  ;;  %v2516_v58 = vmul.f32 %v6232_v62, %v2358_v36  ;;  %v1673_v30 = vadd.f32 %v6167_v38, %v1672_v27  ;;  %v6584_v51 = vmax.f32 %v1967_v1, %v2641_v21  ;;  %v2582_v63 = vadd.f32 %v6251_v10, %v2518_v33 }
 0x1cc   : > { %v1838_v32 = vmul.f32 %v6232_v62, %v1681_v23  ;;  %v2519_v34 = vmul.f32 %v6232_v62, %v2369_v49  ;;  %v1906_v11 = vadd.f32 %v6251_v10, %v1835_v46  ;;  %v2361_v50 = vadd.f32 %v6167_v38, %v2360_v60 }
 0x1cd   : > { %7959 = vst [vmem:[#allocation10_spill] sm:$0xff] %v6584_v51  ;;  %v2580_v0 = vadd.f32 %v6251_v10, %v2516_v58  ;;  %v1836_v2 = vmul.f32 %v6232_v62, %v1673_v30  ;;  %v2646_v52 = vmax.f32 %v2582_v63, 0.0  ;;  %v1694_v1 = vadd.f32 %v4867_v26, %v6167_v38  ;;  %v4871_v49 = vpop.f32.mrb[40].mxu0  ;;  %v4941_v46 = vpop.f32.mrb[40].mxu1 }
 0x1ce   : > { %v1909_v31 = vadd.f32 %v6251_v10, %v1838_v32  ;;  %v2583_v27 = vadd.f32 %v6251_v10, %v2519_v34  ;;  %v1970_v36 = vmax.f32 %v1906_v11, 0.0  ;;  %v2517_v23 = vmul.f32 %v6232_v62, %v2361_v50  ;;  %v1701_v63 = vpop.f32.mrb[41].mxu0  ;;  %v2389_v32 = vpop.f32.mrb[41].mxu1 }
 0x1cf   : > { %v2644_v21 = vmax.f32 %v2580_v0, 0.0  ;;  %v1907_v33 = vadd.f32 %v6251_v10, %v1836_v2  ;;  %v6598_v58 = vmax.f32 %v1972_v12, %v2646_v52  ;;  %v1841_v60 = vmul.f32 %v6232_v62, %v1694_v1  ;;  %v4872_v0 = vpop.f32.mrb[42].mxu0  ;;  %v4942_v2 = vpop.f32.mrb[42].mxu1 }
 0x1d0   : > { %v1973_v30 = vmax.f32 %v1909_v31, 0.0  ;;  %v2647_v51 = vmax.f32 %v2583_v27, 0.0  ;;  %v2581_v26 = vadd.f32 %v6251_v10, %v2517_v23  ;;  %v2382_v11 = vadd.f32 %v4937_v35, %v6167_v38  ;;  %v1704_v27 = vpop.f32.mrb[43].mxu0  ;;  %v2392_v1 = vpop.f32.mrb[43].mxu1 }
 0x1d1   : > { %7960 = vst [vmem:[#allocation11_spill] sm:$0xff] %v6598_v58  ;;  %v6601_v56 = vmax.f32 %v1970_v36, %v2644_v21  ;;  %v1971_v34 = vmax.f32 %v1907_v33, 0.0  ;;  %v1912_v12 = vadd.f32 %v6251_v10, %v1841_v60  ;;  %v1686_v52 = vadd.f32 %v6167_v38, %v1685_v55 }
 0x1d2   : > { %v6605_v50 = vmax.f32 %v1973_v30, %v2647_v51  ;;  %v2374_v31 = vadd.f32 %v6167_v38, %v2373_v42  ;;  %v2645_v58 = vmax.f32 %v2581_v26, 0.0  ;;  %v2522_v36 = vmul.f32 %v6232_v62, %v2382_v11 }
 0x1d3   : > { %7961 = vst [vmem:[#allocation12_spill] sm:$0xff] %v6601_v56  ;;  %v1697_v21 = vadd.f32 %v4868_v4, %v6167_v38  ;;  %v2385_v33 = vadd.f32 %v4938_v48, %v6167_v38  ;;  %v1976_v35 = vmax.f32 %v1912_v12, 0.0  ;;  %v1839_v23 = vmul.f32 %v6232_v62, %v1686_v52 }
 0x1d4   : > { %7962 = vst [vmem:[#allocation13_spill] sm:$0xff] %v6605_v50  ;;  %v2520_v51 = vmul.f32 %v6232_v62, %v2374_v31  ;;  %v1689_v30 = vadd.f32 %v6167_v38, %v1688_v39  ;;  %v6616_v60 = vmax.f32 %v1971_v34, %v2645_v58  ;;  %v2586_v55 = vadd.f32 %v6251_v10, %v2522_v36 }
 0x1d5   : > { %v1842_v42 = vmul.f32 %v6232_v62, %v1697_v21  ;;  %v2523_v26 = vmul.f32 %v6232_v62, %v2385_v33  ;;  %v1910_v11 = vadd.f32 %v6251_v10, %v1839_v23  ;;  %v2377_v12 = vadd.f32 %v6167_v38, %v2376_v53  ;;  %v4875_v34 = vpop.f32.mrb[44].mxu0  ;;  %v6628_v36 = vpop.f32.mrb[44].mxu1 }
 0x1d6   : > { %7963 = vst [vmem:[#allocation14_spill] sm:$0xff] %v6616_v60  ;;  %v2584_v4 = vadd.f32 %v6251_v10, %v2520_v51  ;;  %v1840_v48 = vmul.f32 %v6232_v62, %v1689_v30  ;;  %v2650_v52 = vmax.f32 %v2586_v55, 0.0  ;;  %v1710_v58 = vadd.f32 %v4871_v49, %v6167_v38  ;;  %v6632_v60 = vpop.f32.mrb[45].mxu0  ;;  %v6634_v30 = vpop.f32.mrb[45].mxu1 }
 0x1d7   : > { %v1913_v31 = vadd.f32 %v6251_v10, %v1842_v42  ;;  %v2587_v39 = vadd.f32 %v6251_v10, %v2523_v26  ;;  %v1974_v21 = vmax.f32 %v1910_v11, 0.0  ;;  %v2521_v51 = vmul.f32 %v6232_v62, %v2377_v12  ;;  %v4876_v49 = vpop.f32.mrb[46].mxu0  ;;  %v4946_v50 = vpop.f32.mrb[46].mxu1 }
 0x1d8   : > { %v2648_v33 = vmax.f32 %v2584_v4, 0.0  ;;  %v1911_v23 = vadd.f32 %v6251_v10, %v1840_v48  ;;  %v6636_v53 = vmax.f32 %v1976_v35, %v2650_v52  ;;  %v1845_v26 = vmul.f32 %v6232_v62, %v1710_v58  ;;  %v1720_v12 = vpop.f32.mrb[47].mxu0  ;;  %v6643_v37 = vpop.f32.mrb[47].mxu1  ;;  %v6651_v52 = vld [vmem:[%s7943_s2] ss:$0 sm:$0xff] }
 0x1d9   : > { %v1977_v55 = vmax.f32 %v1913_v31, 0.0  ;;  %v2651_v42 = vmax.f32 %v2587_v39, 0.0  ;;  %v2585_v4 = vadd.f32 %v6251_v10, %v2521_v51  ;;  %v2398_v48 = vadd.f32 %v4941_v46, %v6167_v38 }
 0x1da   : > { %7964 = vst [vmem:[#allocation15_spill] sm:$0xff] %v6636_v53  ;;  %v6639_v56 = vmax.f32 %v1974_v21, %v2648_v33  ;;  %v1975_v11 = vmax.f32 %v1911_v23, 0.0  ;;  %v1916_v35 = vadd.f32 %v6251_v10, %v1845_v26  ;;  %v1702_v31 = vadd.f32 %v6651_v52, %v1701_v63 }
 0x1db   : > { %v6645_v47 = vmax.f32 %v1977_v55, %v2651_v42  ;;  %v2390_v39 = vadd.f32 %v6651_v52, %v2389_v32  ;;  %v2649_v58 = vmax.f32 %v2585_v4, 0.0  ;;  %v2526_v21 = vmul.f32 %v6232_v62, %v2398_v48 }
 0x1dc   : > { %7965 = vst [vmem:[#allocation16_spill] sm:$0xff] %v6639_v56  ;;  %v1713_v38 = vadd.f32 %v6651_v52, %v4872_v0  ;;  %v2401_v46 = vadd.f32 %v6651_v52, %v4942_v2  ;;  %v1980_v33 = vmax.f32 %v1916_v35, 0.0  ;;  %v1843_v23 = vmul.f32 %v6232_v62, %v1702_v31 }
 0x1dd   : > { %7966 = vst [vmem:[#allocation17_spill] sm:$0xff] %v6645_v47  ;;  %v2524_v51 = vmul.f32 %v6232_v62, %v2390_v39  ;;  %v1705_v55 = vadd.f32 %v6651_v52, %v1704_v27  ;;  %v6661_v42 = vmax.f32 %v1975_v11, %v2649_v58  ;;  %v2590_v63 = vadd.f32 %v6251_v10, %v2526_v21  ;;  %v4879_v35 = vpop.f32.mrb[48].mxu0  ;;  %v6670_v31 = vpop.f32.mrb[48].mxu1 }
 0x1de   : > { %v1846_v32 = vmul.f32 %v6232_v62, %v1713_v38  ;;  %v2527_v26 = vmul.f32 %v6232_v62, %v2401_v46  ;;  %v1914_v4 = vadd.f32 %v6251_v10, %v1843_v23  ;;  %v2393_v48 = vadd.f32 %v6651_v52, %v2392_v1  ;;  %v6675_v21 = vpop.f32.mrb[49].mxu0  ;;  %v6677_v38 = vpop.f32.mrb[49].mxu1  ;;  %v6683_v1 = vld [vmem:[%s7944_s3] ss:$0 sm:$0xff] }
 0x1df   : > { %7967 = vst [vmem:[#allocation18_spill] sm:$0xff] %v6661_v42  ;;  %v2588_v0 = vadd.f32 %v6251_v10, %v2524_v51  ;;  %v1844_v2 = vmul.f32 %v6232_v62, %v1705_v55  ;;  %v2654_v27 = vmax.f32 %v2590_v63, 0.0  ;;  %v1726_v58 = vadd.f32 %v6651_v52, %v4875_v34  ;;  %v6686_v55 = vpop.f32.mrb[50].mxu0  ;;  %v6688_v63 = vpop.f32.mrb[50].mxu1 }
 0x1e0   : > { %v1917_v11 = vadd.f32 %v6251_v10, %v1846_v32  ;;  %v2591_v39 = vadd.f32 %v6251_v10, %v2527_v26  ;;  %v1978_v46 = vmax.f32 %v1914_v4, 0.0  ;;  %v2525_v51 = vmul.f32 %v6683_v1, %v2393_v48  ;;  %v6693_v42 = vpop.f32.mrb[51].mxu1  ;;  %v6700_v48 = vld [vmem:[%s7945_s4] ss:$0 sm:$0xff] }
 0x1e1   : > { %v2652_v23 = vmax.f32 %v2588_v0, 0.0  ;;  %v1915_v62 = vadd.f32 %v6251_v10, %v1844_v2  ;;  %v6690_v34 = vmax.f32 %v1980_v33, %v2654_v27  ;;  %v1849_v4 = vmul.f32 %v6683_v1, %v1726_v58  ;;  %v1736_v0 = vpop.f32.mrb[51].mxu0 }
 0x1e2   : > { %v1981_v32 = vmax.f32 %v1917_v11, 0.0  ;;  %v2655_v26 = vmax.f32 %v2591_v39, 0.0  ;;  %v2589_v47 = vadd.f32 %v6700_v48, %v2525_v51  ;;  %v2414_v33 = vadd.f32 %v6651_v52, %v6628_v36 }
 0x1e3   : > { %7968 = vst [vmem:[#allocation19_spill] sm:$0xff] %v6690_v34  ;;  %v6695_v10 = vmax.f32 %v1978_v46, %v2652_v23  ;;  %v1979_v2 = vmax.f32 %v1915_v62, 0.0  ;;  %v1920_v11 = vadd.f32 %v6700_v48, %v1849_v4  ;;  %v1718_v39 = vadd.f32 %v6651_v52, %v6632_v60 }
 0x1e4   : > { %v6705_v27 = vmax.f32 %v1981_v32, %v2655_v26  ;;  %v2406_v58 = vadd.f32 %v6651_v52, %v6634_v30  ;;  %v2653_v46 = vmax.f32 %v2589_v47, 0.0  ;;  %v2530_v23 = vmul.f32 %v6683_v1, %v2414_v33 }
 0x1e5   : > { %7969 = vst [vmem:[#allocation20_spill] sm:$0xff] %v6695_v10  ;;  %v1729_v62 = vadd.f32 %v6651_v52, %v4876_v49  ;;  %v2417_v51 = vadd.f32 %v6651_v52, %v4946_v50  ;;  %v1984_v10 = vmax.f32 %v1920_v11, 0.0  ;;  %v1847_v36 = vmul.f32 %v6683_v1, %v1718_v39  ;;  %v4883_v33 = vpop.f32.mrb[52].mxu0 }
 0x1e6   : > { %7970 = vst [vmem:[#allocation21_spill] sm:$0xff] %v6705_v27  ;;  %v2528_v32 = vmul.f32 %v6683_v1, %v2406_v58  ;;  %v1721_v26 = vadd.f32 %v6651_v52, %v1720_v12  ;;  %v6718_v4 = vmax.f32 %v1979_v2, %v2653_v46  ;;  %v2594_v60 = vadd.f32 %v6700_v48, %v2530_v23  ;;  %v6723_v27 = vpop.f32.mrb[52].mxu1  ;;  %v6730_v2 = vpop.f32.mrb[53].mxu0 }
 0x1e7   : > { %v1850_v30 = vmul.f32 %v6683_v1, %v1729_v62  ;;  %v2531_v47 = vmul.f32 %v6683_v1, %v2417_v51  ;;  %v1918_v50 = vadd.f32 %v6700_v48, %v1847_v36  ;;  %v2409_v12 = vadd.f32 %v6651_v52, %v6643_v37  ;;  %v6732_v39 = vpop.f32.mrb[53].mxu1  ;;  %v6737_v51 = vpop.f32.mrb[54].mxu0 }
 0x1e8   : > { %7971 = vst [vmem:[#allocation22_spill] sm:$0xff] %v6718_v4  ;;  %v2592_v49 = vadd.f32 %v6700_v48, %v2528_v32  ;;  %v1848_v11 = vmul.f32 %v6683_v1, %v1721_v26  ;;  %v2658_v58 = vmax.f32 %v2594_v60, 0.0  ;;  %v1742_v62 = vadd.f32 %v6651_v52, %v4879_v35  ;;  %v6739_v36 = vpop.f32.mrb[54].mxu1  ;;  %v6743_v34 = vpop.f32.mrb[55].mxu0 }
 0x1e9   : > { %v1921_v46 = vadd.f32 %v6700_v48, %v1850_v30  ;;  %v2595_v23 = vadd.f32 %v6700_v48, %v2531_v47  ;;  %v1982_v32 = vmax.f32 %v1918_v50, 0.0  ;;  %v2529_v37 = vmul.f32 %v6683_v1, %v2409_v12  ;;  %v6745_v56 = vpop.f32.mrb[55].mxu1 }
 0x1ea   : > { %v2656_v26 = vmax.f32 %v2592_v49, 0.0  ;;  %v1919_v4 = vadd.f32 %v6700_v48, %v1848_v11  ;;  %v6747_v60 = vmax.f32 %v1984_v10, %v2658_v58  ;;  %v1853_v35 = vmul.f32 %v6683_v1, %v1742_v62 }
 0x1eb   : > { %v1985_v30 = vmax.f32 %v1921_v46, 0.0  ;;  %v2659_v47 = vmax.f32 %v2595_v23, 0.0  ;;  %v2593_v50 = vadd.f32 %v6700_v48, %v2529_v37  ;;  %v2430_v49 = vadd.f32 %v6651_v52, %v6670_v31 }
 0x1ec   : > { %7972 = vst [vmem:[#allocation23_spill] sm:$0xff] %v6747_v60  ;;  %v6750_v53 = vmax.f32 %v1982_v32, %v2656_v26  ;;  %v1983_v54 = vmax.f32 %v1919_v4, 0.0  ;;  %v1924_v12 = vadd.f32 %v6700_v48, %v1853_v35  ;;  %v1734_v10 = vadd.f32 %v6651_v52, %v6675_v21 }
 0x1ed   : > { %v6755_v11 = vmax.f32 %v1985_v30, %v2659_v47  ;;  %v2422_v58 = vadd.f32 %v6651_v52, %v6677_v38  ;;  %v2657_v46 = vmax.f32 %v2593_v50, 0.0  ;;  %v2534_v23 = vmul.f32 %v6683_v1, %v2430_v49  ;;  %v6770_v21 = vpop.f32.mrb[56].mxu0  ;;  %v6772_v30 = vpop.f32.mrb[56].mxu1 }
 0x1ee   : > { %7973 = vst [vmem:[#allocation24_spill] sm:$0xff] %v6750_v53  ;;  %v1745_v4 = vadd.f32 %v6651_v52, %v6686_v55  ;;  %v2433_v62 = vadd.f32 %v6651_v52, %v6688_v63  ;;  %v1988_v31 = vmax.f32 %v1924_v12, 0.0  ;;  %v1851_v32 = vmul.f32 %v6683_v1, %v1734_v10  ;;  %v6779_v63 = vpop.f32.mrb[57].mxu0  ;;  %v6781_v50 = vpop.f32.mrb[57].mxu1 }
 0x1ef   : > { %7974 = vst [vmem:[#allocation25_spill] sm:$0xff] %v6755_v11  ;;  %v2532_v26 = vmul.f32 %v6683_v1, %v2422_v58  ;;  %v1737_v37 = vadd.f32 %v6651_v52, %v1736_v0  ;;  %v6774_v38 = vmax.f32 %v1983_v54, %v2657_v46  ;;  %v2598_v47 = vadd.f32 %v6700_v48, %v2534_v23  ;;  %v6788_v10 = vpop.f32.mrb[58].mxu0  ;;  %v6790_v58 = vpop.f32.mrb[58].mxu1 }
 0x1f0   : > { %v1854_v55 = vmul.f32 %v6683_v1, %v1745_v4  ;;  %v2535_v35 = vmul.f32 %v6683_v1, %v2433_v62  ;;  %v1922_v49 = vadd.f32 %v6700_v48, %v1851_v32  ;;  %v2425_v54 = vadd.f32 %v6651_v52, %v6693_v42  ;;  %v6797_v32 = vpop.f32.mrb[59].mxu1 }
 0x1f1   : > { %7975 = vst [vmem:[#allocation26_spill] sm:$0xff] %v6774_v38  ;;  %v2596_v0 = vadd.f32 %v6700_v48, %v2532_v26  ;;  %v1852_v12 = vmul.f32 %v6683_v1, %v1737_v37  ;;  %v2662_v46 = vmax.f32 %v2598_v47, 0.0  ;;  %v1758_v62 = vadd.f32 %v6651_v52, %v4883_v33  ;;  %v6795_v38 = vpop.f32.mrb[59].mxu0 }
 0x1f2   : > { %v1925_v23 = vadd.f32 %v6700_v48, %v1854_v55  ;;  %v2599_v4 = vadd.f32 %v6700_v48, %v2535_v35  ;;  %v1986_v26 = vmax.f32 %v1922_v49, 0.0  ;;  %v2533_v42 = vmul.f32 %v6683_v1, %v2425_v54 }
 0x1f3   : > { %v2660_v37 = vmax.f32 %v2596_v0, 0.0  ;;  %v1923_v11 = vadd.f32 %v6700_v48, %v1852_v12  ;;  %v6801_v53 = vmax.f32 %v1988_v31, %v2662_v46  ;;  %v1857_v55 = vmul.f32 %v6683_v1, %v1758_v62 }
 0x1f4   : > { %v1989_v60 = vmax.f32 %v1925_v23, 0.0  ;;  %v2663_v47 = vmax.f32 %v2599_v4, 0.0  ;;  %v2597_v33 = vadd.f32 %v6700_v48, %v2533_v42  ;;  %v2446_v6 = vadd.f32 %v6651_v52, %v6723_v27 }
 0x1f5   : > { %7976 = vst [vmem:[#allocation27_spill] sm:$0xff] %v6801_v53  ;;  %v6804_v40 = vmax.f32 %v1986_v26, %v2660_v37  ;;  %v1987_v35 = vmax.f32 %v1923_v11, 0.0  ;;  %v1928_v0 = vadd.f32 %v6700_v48, %v1857_v55  ;;  %v1750_v31 = vadd.f32 %v6651_v52, %v6730_v2  ;;  %v6821_v27 = vpop.f32.mrb[60].mxu0 }
 0x1f6   : > { %v6809_v49 = vmax.f32 %v1989_v60, %v2663_v47  ;;  %v2438_v12 = vadd.f32 %v6651_v52, %v6732_v39  ;;  %v2661_v54 = vmax.f32 %v2597_v33, 0.0  ;;  %v2538_v46 = vmul.f32 %v6683_v1, %v2446_v6  ;;  %v6823_v60 = vpop.f32.mrb[60].mxu1  ;;  %v6829_v26 = vpop.f32.mrb[61].mxu0 }
 0x1f7   : > { %7977 = vst [vmem:[#allocation28_spill] sm:$0xff] %v6804_v40  ;;  %v1761_v11 = vadd.f32 %v6651_v52, %v6737_v51  ;;  %v2449_v23 = vadd.f32 %v6651_v52, %v6739_v36  ;;  %v1992_v4 = vmax.f32 %v1928_v0, 0.0  ;;  %v1855_v62 = vmul.f32 %v6683_v1, %v1750_v31  ;;  %v6831_v6 = vpop.f32.mrb[61].mxu1  ;;  %v6838_v47 = vpop.f32.mrb[62].mxu0 }
 0x1f8   : > { %7978 = vst [vmem:[#allocation29_spill] sm:$0xff] %v6809_v49  ;;  %v2536_v2 = vmul.f32 %v6683_v1, %v2438_v12  ;;  %v1753_v39 = vadd.f32 %v6651_v52, %v6743_v34  ;;  %v6833_v51 = vmax.f32 %v1987_v35, %v2661_v54  ;;  %v2602_v36 = vadd.f32 %v6700_v48, %v2538_v46  ;;  %v6840_v55 = vpop.f32.mrb[62].mxu1  ;;  %v6847_v31 = vpop.f32.mrb[63].mxu0 }
 0x1f9   : > { %v1858_v37 = vmul.f32 %v6683_v1, %v1761_v11  ;;  %v2539_v42 = vmul.f32 %v6683_v1, %v2449_v23  ;;  %v1926_v33 = vadd.f32 %v6700_v48, %v1855_v62  ;;  %v2441_v35 = vadd.f32 %v6651_v52, %v6745_v56  ;;  %v6849_v12 = vpop.f32.mrb[63].mxu1 }
 0x1fa   : > { %7979 = vst [vmem:[#allocation30_spill] sm:$0xff] %v6833_v51  ;;  %v2600_v34 = vadd.f32 %v6700_v48, %v2536_v2  ;;  %v1856_v0 = vmul.f32 %v6683_v1, %v1753_v39  ;;  %v2666_v54 = vmax.f32 %v2602_v36, 0.0  ;;  %v1774_v23 = vadd.f32 %v6651_v52, %v6770_v21 }
 0x1fb   : > { %v1929_v46 = vadd.f32 %v6700_v48, %v1858_v37  ;;  %v2603_v11 = vadd.f32 %v6700_v48, %v2539_v42  ;;  %v1990_v62 = vmax.f32 %v1926_v33, 0.0  ;;  %v2537_v39 = vmul.f32 %v6683_v1, %v2441_v35 }
 0x1fc   : > { %v2664_v51 = vmax.f32 %v2600_v34, 0.0  ;;  %v1927_v2 = vadd.f32 %v6700_v48, %v1856_v0  ;;  %v6857_v49 = vmax.f32 %v1992_v4, %v2666_v54  ;;  %v1861_v53 = vmul.f32 %v6683_v1, %v1774_v23 }
 0x1fd   : > { %v1993_v56 = vmax.f32 %v1929_v46, 0.0  ;;  %v2667_v40 = vmax.f32 %v2603_v11, 0.0  ;;  %v2601_v42 = vadd.f32 %v6700_v48, %v2537_v39  ;;  %v2462_v21 = vadd.f32 %v6651_v52, %v6772_v30  ;;  %v6872_v35 = vpop.f32.mrb[64].mxu0 }
 0x1fe   : > { %7980 = vst [vmem:[#allocation31_spill] sm:$0xff] %v6857_v49  ;;  %v6860_v36 = vmax.f32 %v1990_v62, %v2664_v51  ;;  %v1991_v37 = vmax.f32 %v1927_v2, 0.0  ;;  %v1932_v34 = vadd.f32 %v6700_v48, %v1861_v53  ;;  %v1766_v4 = vadd.f32 %v6651_v52, %v6779_v63  ;;  %v6874_v51 = vpop.f32.mrb[64].mxu1  ;;  %v6881_v53 = vpop.f32.mrb[65].mxu0 }
 0x1ff   : > { %v6865_v33 = vmax.f32 %v1993_v56, %v2667_v40  ;;  %v2454_v0 = vadd.f32 %v6651_v52, %v6781_v50  ;;  %v2665_v54 = vmax.f32 %v2601_v42, 0.0  ;;  %v2542_v46 = vmul.f32 %v6683_v1, %v2462_v21  ;;  %v6883_v11 = vpop.f32.mrb[65].mxu1  ;;  %v6889_v2 = vpop.f32.mrb[66].mxu0 }
 0x200   : > { %7981 = vst [vmem:[#allocation32_spill] sm:$0xff] %v6860_v36  ;;  %v1777_v30 = vadd.f32 %v6651_v52, %v6788_v10  ;;  %v2465_v40 = vadd.f32 %v6651_v52, %v6790_v58  ;;  %v1996_v63 = vmax.f32 %v1932_v34, 0.0  ;;  %v1859_v50 = vmul.f32 %v6683_v1, %v1766_v4  ;;  %v6891_v39 = vpop.f32.mrb[66].mxu1  ;;  %v6898_v21 = vpop.f32.mrb[67].mxu0 }
 0x201   : > { %7982 = vst [vmem:[#allocation33_spill] sm:$0xff] %v6865_v33  ;;  %v2540_v23 = vmul.f32 %v6683_v1, %v2454_v0  ;;  %v1769_v62 = vadd.f32 %v6651_v52, %v6795_v38  ;;  %v6893_v10 = vmax.f32 %v1991_v37, %v2665_v54  ;;  %v2606_v58 = vadd.f32 %v6700_v48, %v2542_v46  ;;  %v6900_v34 = vpop.f32.mrb[67].mxu1 }
 0x202   : > { %v1862_v56 = vmul.f32 %v6683_v1, %v1777_v30  ;;  %v2543_v42 = vmul.f32 %v6683_v1, %v2465_v40  ;;  %v1930_v4 = vadd.f32 %v6700_v48, %v1859_v50  ;;  %v2457_v37 = vadd.f32 %v6651_v52, %v6797_v32 }
 0x203   : > { %7983 = vst [vmem:[#allocation34_spill] sm:$0xff] %v6893_v10  ;;  %v2604_v38 = vadd.f32 %v6700_v48, %v2540_v23  ;;  %v1860_v0 = vmul.f32 %v6683_v1, %v1769_v62  ;;  %v2670_v54 = vmax.f32 %v2606_v58, 0.0  ;;  %v1790_v40 = vadd.f32 %v6651_v52, %v6821_v27 }
 0x204   : > { %v1933_v46 = vadd.f32 %v6700_v48, %v1862_v56  ;;  %v2607_v30 = vadd.f32 %v6700_v48, %v2543_v42  ;;  %v1994_v10 = vmax.f32 %v1930_v4, 0.0  ;;  %v2541_v50 = vmul.f32 %v6683_v1, %v2457_v37 }
 0x205   : > { %v2668_v33 = vmax.f32 %v2604_v38, 0.0  ;;  %v1931_v36 = vadd.f32 %v6700_v48, %v1860_v0  ;;  %v6913_v23 = vmax.f32 %v1996_v63, %v2670_v54  ;;  %v1865_v32 = vmul.f32 %v6683_v1, %v1790_v40  ;;  %v6921_v4 = vpop.f32.mrb[68].mxu0  ;;  %v6923_v38 = vpop.f32.mrb[68].mxu1 }
 0x206   : > { %v1997_v62 = vmax.f32 %v1933_v46, 0.0  ;;  %v2671_v49 = vmax.f32 %v2607_v30, 0.0  ;;  %v2605_v42 = vadd.f32 %v6700_v48, %v2541_v50  ;;  %v2478_v27 = vadd.f32 %v6651_v52, %v6823_v60 }
 0x207   : > { %7984 = vst [vmem:[#allocation35_spill] sm:$0xff] %v6913_v23  ;;  %v6916_v58 = vmax.f32 %v1994_v10, %v2668_v33  ;;  %v1995_v56 = vmax.f32 %v1931_v36, 0.0  ;;  %v1936_v63 = vadd.f32 %v6700_v48, %v1865_v32  ;;  %v1782_v37 = vadd.f32 %v6651_v52, %v6829_v26  ;;  %v6932_v36 = vpop.f32.mrb[69].mxu0  ;;  %v6934_v10 = vpop.f32.mrb[69].mxu1 }
 0x208   : > { %v6925_v0 = vmax.f32 %v1997_v62, %v2671_v49  ;;  %v2470_v33 = vadd.f32 %v6651_v52, %v6831_v6  ;;  %v2669_v54 = vmax.f32 %v2605_v42, 0.0  ;;  %v2546_v60 = vmul.f32 %v6683_v1, %v2478_v27  ;;  %v6945_v26 = vpop.f32.mrb[70].mxu0  ;;  %v6947_v6 = vpop.f32.mrb[70].mxu1 }
 0x209   : > { %7985 = vst [vmem:[#allocation36_spill] sm:$0xff] %v6916_v58  ;;  %v1793_v46 = vadd.f32 %v6651_v52, %v6838_v47  ;;  %v2481_v49 = vadd.f32 %v6651_v52, %v6840_v55  ;;  %v2000_v30 = vmax.f32 %v1936_v63, 0.0  ;;  %v1863_v40 = vmul.f32 %v6683_v1, %v1782_v37  ;;  %v6953_v47 = vpop.f32.mrb[71].mxu0  ;;  %v6955_v32 = vpop.f32.mrb[71].mxu1 }
 0x20a   : > { %7986 = vst [vmem:[#allocation37_spill] sm:$0xff] %v6925_v0  ;;  %v2544_v50 = vmul.f32 %v6683_v1, %v2470_v33  ;;  %v1785_v62 = vadd.f32 %v6651_v52, %v6847_v31  ;;  %v6957_v55 = vmax.f32 %v1995_v56, %v2669_v54  ;;  %v2610_v42 = vadd.f32 %v6700_v48, %v2546_v60 }
 0x20b   : > { %v1866_v27 = vmul.f32 %v6683_v1, %v1793_v46  ;;  %v2547_v0 = vmul.f32 %v6683_v1, %v2481_v49  ;;  %v1934_v63 = vadd.f32 %v6700_v48, %v1863_v40  ;;  %v2473_v31 = vadd.f32 %v6651_v52, %v6849_v12 }
 0x20c   : > { %7987 = vst [vmem:[#allocation38_spill] sm:$0xff] %v6957_v55  ;;  %v2608_v37 = vadd.f32 %v6700_v48, %v2544_v50  ;;  %v1864_v33 = vmul.f32 %v6683_v1, %v1785_v62  ;;  %v2674_v58 = vmax.f32 %v2610_v42, 0.0  ;;  %v2976_v60 = vadd.f32 %v6651_v52, %v6872_v35 }
 0x20d   : > { %v1937_v56 = vadd.f32 %v6700_v48, %v1866_v27  ;;  %v2611_v54 = vadd.f32 %v6700_v48, %v2547_v0  ;;  %v1998_v46 = vmax.f32 %v1934_v63, 0.0  ;;  %v2545_v50 = vmul.f32 %v6683_v1, %v2473_v31  ;;  %v6977_v27 = vpop.f32.mrb[72].mxu0  ;;  %v6979_v23 = vpop.f32.mrb[72].mxu1 }
 0x20e   : > { %v2672_v49 = vmax.f32 %v2608_v37, 0.0  ;;  %v1935_v40 = vadd.f32 %v6700_v48, %v1864_v33  ;;  %v6974_v62 = vmax.f32 %v2000_v30, %v2674_v58  ;;  %v3224_v42 = vmul.f32 %v6683_v1, %v2976_v60  ;;  %v6991_v30 = vpop.f32.mrb[73].mxu0  ;;  %v6993_v63 = vpop.f32.mrb[73].mxu1 }
 0x20f   : > { %v2001_v12 = vmax.f32 %v1937_v56, 0.0  ;;  %v2675_v55 = vmax.f32 %v2611_v54, 0.0  ;;  %v2609_v35 = vadd.f32 %v6700_v48, %v2545_v50  ;;  %v3714_v58 = vadd.f32 %v6651_v52, %v6874_v51  ;;  %v7000_v56 = vpop.f32.mrb[74].mxu0  ;;  %v7002_v54 = vpop.f32.mrb[74].mxu1 }
 0x210   : > { %7988 = vst [vmem:[#allocation39_spill] sm:$0xff] %v6974_v62  ;;  %v6981_v0 = vmax.f32 %v1998_v46, %v2672_v49  ;;  %v1999_v13 = vmax.f32 %v1935_v40, 0.0  ;;  %v3288_v33 = vadd.f32 %v6700_v48, %v3224_v42  ;;  %v2968_v31 = vadd.f32 %v6651_v52, %v6881_v53  ;;  %v7009_v49 = vpop.f32.mrb[75].mxu0  ;;  %v7011_v40 = vpop.f32.mrb[75].mxu1 }
 0x211   : > { %v6995_v37 = vmax.f32 %v2001_v12, %v2675_v55  ;;  %v2673_v60 = vmax.f32 %v2609_v35, 0.0  ;;  %v3962_v51 = vmul.f32 %v6683_v1, %v3714_v58  ;;  %v3706_v46 = vadd.f32 %v6651_v52, %v6883_v11 }
 0x212   : > { %7989 = vst [vmem:[#allocation40_spill] sm:$0xff] %v6981_v0  ;;  %v2979_v55 = vadd.f32 %v6651_v52, %v6889_v2  ;;  %v3352_v50 = vmax.f32 %v3288_v33, 0.0  ;;  %v3222_v53 = vmul.f32 %v6683_v1, %v2968_v31  ;;  %v3717_v12 = vadd.f32 %v6651_v52, %v6891_v39 }
 0x213   : > { %7990 = vst [vmem:[#allocation41_spill] sm:$0xff] %v6995_v37  ;;  %v2971_v42 = vadd.f32 %v6651_v52, %v6898_v21  ;;  %v7018_v35 = vmax.f32 %v1999_v13, %v2673_v60  ;;  %v4026_v11 = vadd.f32 %v6700_v48, %v3962_v51  ;;  %v3960_v2 = vmul.f32 %v6683_v1, %v3706_v46 }
 0x214   : > { %v3225_v58 = vmul.f32 %v6683_v1, %v2979_v55  ;;  %v3416_v37 = vmax.f32 %v6286_v61, %v3352_v50  ;;  %v3286_v33 = vadd.f32 %v6700_v48, %v3222_v53  ;;  %v3963_v31 = vmul.f32 %v6683_v1, %v3717_v12 }
 0x215   : > { %7991 = vst [vmem:[#allocation42_spill] sm:$0xff] %v7018_v35  ;;  %v3223_v39 = vmul.f32 %v6683_v1, %v2971_v42  ;;  %v4090_v0 = vmax.f32 %v4026_v11, 0.0  ;;  %v4024_v21 = vadd.f32 %v6700_v48, %v3960_v2  ;;  %v3709_v60 = vadd.f32 %v6651_v52, %v6900_v34  ;;  %v7041_v50 = vpop.f32.mrb[76].mxu0  ;;  %v7043_v53 = vpop.f32.mrb[76].mxu1 }
 0x216   : > { %v3289_v13 = vadd.f32 %v6700_v48, %v3225_v58  ;;  %v3350_v61 = vmax.f32 %v3286_v33, 0.0  ;;  %v4027_v51 = vadd.f32 %v6700_v48, %v3963_v31  ;;  %v2992_v55 = vadd.f32 %v6651_v52, %v6921_v4  ;;  %v7046_v2 = vpop.f32.mrb[77].mxu0  ;;  %v7048_v58 = vpop.f32.mrb[77].mxu1 }
 0x217   : > { %v3287_v46 = vadd.f32 %v6700_v48, %v3223_v39  ;;  %v4154_v12 = vmax.f32 %v3416_v37, %v4090_v0  ;;  %v4088_v34 = vmax.f32 %v4024_v21, 0.0  ;;  %v3961_v11 = vmul.f32 %v6683_v1, %v3709_v60  ;;  %v7052_v4 = vpop.f32.mrb[78].mxu0  ;;  %v7054_v62 = vpop.f32.mrb[78].mxu1 }
 0x218   : > { %v3353_v42 = vmax.f32 %v3289_v13, 0.0  ;;  %v3414_v33 = vmax.f32 %v6289_v15, %v3350_v61  ;;  %v4091_v31 = vmax.f32 %v4027_v51, 0.0  ;;  %v3228_v35 = vmul.f32 %v6683_v1, %v2992_v55  ;;  %v7064_v13 = vpop.f32.mrb[79].mxu0  ;;  %v7066_v60 = vpop.f32.mrb[79].mxu1 }
 0x219   : > { %v3351_v39 = vmax.f32 %v3287_v46, 0.0  ;;  %4219 = vst.msk [vmem:[%s7035_s11 + $0x10] sm:$0xff] %vm4216_vm2, %v4154_v12  ;;  %v4025_v37 = vadd.f32 %v6700_v48, %v3961_v11  ;;  %v3730_v21 = vadd.f32 %v6651_v52, %v6923_v38  ;;  %v2984_v15 = vadd.f32 %v6651_v52, %v6932_v36 }
 0x21a   : > { %v3417_v0 = vmax.f32 %v6292_v3, %v3353_v42  ;;  %v4152_v61 = vmax.f32 %v3414_v33, %v4088_v34  ;;  %v3292_v46 = vadd.f32 %v6700_v48, %v3228_v35  ;;  %v3722_v3 = vadd.f32 %v6651_v52, %v6934_v10 }
 0x21b   : > { %v3415_v51 = vmax.f32 %v6297_v43, %v3351_v39  ;;  %v4089_v12 = vmax.f32 %v4025_v37, 0.0  ;;  %v3966_v38 = vmul.f32 %v6683_v1, %v3730_v21  ;;  %v3226_v42 = vmul.f32 %v6683_v1, %v2984_v15 }
 0x21c   : > { %v4155_v55 = vmax.f32 %v3417_v0, %v4091_v31  ;;  %4217 = vst.msk [vmem:[%s7035_s11] sm:$0xff] %vm4216_vm2, %v4152_v61  ;;  %v3356_v36 = vmax.f32 %v3292_v46, 0.0  ;;  %v3964_v11 = vmul.f32 %v6683_v1, %v3722_v3  ;;  %v2995_v43 = vadd.f32 %v6651_v52, %v6945_v26 }
 0x21d   : > { %v3733_v35 = vadd.f32 %v6651_v52, %v6947_v6  ;;  %v4153_v10 = vmax.f32 %v3415_v51, %v4089_v12  ;;  %v4030_v34 = vadd.f32 %v6700_v48, %v3966_v38  ;;  %v3290_v33 = vadd.f32 %v6700_v48, %v3226_v42  ;;  %v7091_v21 = vpop.f32.mrb[80].mxu0  ;;  %v7093_v6 = vpop.f32.mrb[80].mxu1 }
 0x21e   : > { %4220 = vst.msk [vmem:[%s7035_s11 + $0x18] sm:$0xff] %vm4216_vm2, %v4155_v55  ;;  %v2987_v31 = vadd.f32 %v6651_v52, %v6953_v47  ;;  %v3420_v39 = vmax.f32 %v6334_v28, %v3356_v36  ;;  %v4028_v0 = vadd.f32 %v6700_v48, %v3964_v11  ;;  %v3229_v37 = vmul.f32 %v6683_v1, %v2995_v43  ;;  %v7100_v28 = vpop.f32.mrb[81].mxu0  ;;  %v7102_v46 = vpop.f32.mrb[81].mxu1 }
 0x21f   : > { %v3967_v26 = vmul.f32 %v6683_v1, %v3733_v35  ;;  %4218 = vst.msk [vmem:[%s7035_s11 + $0x8] sm:$0xff] %vm4216_vm2, %v4153_v10  ;;  %v4094_v15 = vmax.f32 %v4030_v34, 0.0  ;;  %v3354_v61 = vmax.f32 %v3290_v33, 0.0  ;;  %v3725_v47 = vadd.f32 %v6651_v52, %v6955_v32  ;;  %v7108_v42 = vpop.f32.mrb[82].mxu0  ;;  %v7110_v36 = vpop.f32.mrb[82].mxu1 }
 0x220   : > { %v3227_v51 = vmul.f32 %v6683_v1, %v2987_v31  ;;  %v4092_v3 = vmax.f32 %v4028_v0, 0.0  ;;  %v3293_v55 = vadd.f32 %v6700_v48, %v3229_v37  ;;  %v3008_v38 = vadd.f32 %v6651_v52, %v6977_v27  ;;  %v7115_v10 = vpop.f32.mrb[83].mxu0  ;;  %v7117_v34 = vpop.f32.mrb[83].mxu1 }
 0x221   : > { %v4031_v12 = vadd.f32 %v6700_v48, %v3967_v26  ;;  %v4158_v11 = vmax.f32 %v3420_v39, %v4094_v15  ;;  %v3418_v32 = vmax.f32 %v6337_v9, %v3354_v61  ;;  %v3965_v35 = vmul.f32 %v6683_v1, %v3725_v47 }
 0x222   : > { %v3291_v43 = vadd.f32 %v6700_v48, %v3227_v51  ;;  %v3357_v33 = vmax.f32 %v3293_v55, 0.0  ;;  %v3232_v27 = vmul.f32 %v6683_v1, %v3008_v38  ;;  %v3746_v0 = vadd.f32 %v6651_v52, %v6979_v23 }
 0x223   : > { %v4095_v31 = vmax.f32 %v4031_v12, 0.0  ;;  %4223 = vst.msk [vmem:[%s7035_s11 + $0x30] sm:$0xff] %vm4216_vm2, %v4158_v11  ;;  %v4156_v39 = vmax.f32 %v3418_v32, %v4092_v3  ;;  %v4029_v37 = vadd.f32 %v6700_v48, %v3965_v35  ;;  %v3000_v26 = vadd.f32 %v6651_v52, %v6991_v30 }
 0x224   : > { %v3355_v9 = vmax.f32 %v3291_v43, 0.0  ;;  %v3421_v15 = vmax.f32 %v6341_v5, %v3357_v33  ;;  %v3296_v61 = vadd.f32 %v6700_v48, %v3232_v27  ;;  %v3970_v51 = vmul.f32 %v6683_v1, %v3746_v0 }
 0x225   : > { %v3738_v47 = vadd.f32 %v6651_v52, %v6993_v63  ;;  %4221 = vst.msk [vmem:[%s7035_s11 + $0x20] sm:$0xff] %vm4216_vm2, %v4156_v39  ;;  %v4093_v3 = vmax.f32 %v4029_v37, 0.0  ;;  %v3230_v55 = vmul.f32 %v6683_v1, %v3000_v26  ;;  %v3011_v30 = vadd.f32 %v6651_v52, %v7000_v56  ;;  %v7140_v32 = vpop.f32.mrb[84].mxu0  ;;  %v7142_v63 = vpop.f32.mrb[84].mxu1 }
 0x226   : > { %v3419_v23 = vmax.f32 %v6353_v22, %v3355_v9  ;;  %v4159_v12 = vmax.f32 %v3421_v15, %v4095_v31  ;;  %v3360_v5 = vmax.f32 %v3296_v61, 0.0  ;;  %v4034_v38 = vadd.f32 %v6700_v48, %v3970_v51  ;;  %v7148_v56 = vpop.f32.mrb[85].mxu0  ;;  %v7150_v31 = vpop.f32.mrb[85].mxu1 }
 0x227   : > { %v3968_v11 = vmul.f32 %v6683_v1, %v3738_v47  ;;  %v3294_v22 = vadd.f32 %v6700_v48, %v3230_v55  ;;  %v3233_v35 = vmul.f32 %v6683_v1, %v3011_v30  ;;  %v3749_v33 = vadd.f32 %v6651_v52, %v7002_v54  ;;  %v7158_v37 = vpop.f32.mrb[86].mxu0  ;;  %v7160_v26 = vpop.f32.mrb[86].mxu1 }
 0x228   : > { %v4157_v43 = vmax.f32 %v3419_v23, %v4093_v3  ;;  %4224 = vst.msk [vmem:[%s7035_s11 + $0x38] sm:$0xff] %vm4216_vm2, %v4159_v12  ;;  %v3424_v27 = vmax.f32 %v6382_v24, %v3360_v5  ;;  %v4098_v0 = vmax.f32 %v4034_v38, 0.0  ;;  %v3003_v9 = vadd.f32 %v6651_v52, %v7009_v49  ;;  %v7168_v51 = vpop.f32.mrb[87].mxu0  ;;  %v7170_v47 = vpop.f32.mrb[87].mxu1 }
 0x229   : > { %v4032_v39 = vadd.f32 %v6700_v48, %v3968_v11  ;;  %v3358_v54 = vmax.f32 %v3294_v22, 0.0  ;;  %v3297_v15 = vadd.f32 %v6700_v48, %v3233_v35  ;;  %v3971_v61 = vmul.f32 %v6683_v1, %v3749_v33 }
 0x22a   : > { %4222 = vst.msk [vmem:[%s7035_s11 + $0x28] sm:$0xff] %vm4216_vm2, %v4157_v43  ;;  %v3741_v24 = vadd.f32 %v6651_v52, %v7011_v40  ;;  %v4162_v49 = vmax.f32 %v3424_v27, %v4098_v0  ;;  %v3231_v3 = vmul.f32 %v6683_v1, %v3003_v9  ;;  %v3024_v55 = vadd.f32 %v6651_v52, %v7041_v50 }
 0x22b   : > { %v4096_v23 = vmax.f32 %v4032_v39, 0.0  ;;  %v3422_v30 = vmax.f32 %v6385_v7, %v3358_v54  ;;  %v3361_v12 = vmax.f32 %v3297_v15, 0.0  ;;  %v4035_v5 = vadd.f32 %v6700_v48, %v3971_v61 }
 0x22c   : > { %v3969_v38 = vmul.f32 %v6683_v1, %v3741_v24  ;;  %4227 = vst.msk [vmem:[%s7035_s11 + $0x50] sm:$0xff] %vm4216_vm2, %v4162_v49  ;;  %v3295_v40 = vadd.f32 %v6700_v48, %v3231_v3  ;;  %v3236_v11 = vmul.f32 %v6683_v1, %v3024_v55  ;;  %v3762_v43 = vadd.f32 %v6651_v52, %v7043_v53 }
 0x22d   : > { %v3016_v50 = vadd.f32 %v6651_v52, %v7046_v2  ;;  %v4160_v22 = vmax.f32 %v3422_v30, %v4096_v23  ;;  %v3425_v7 = vmax.f32 %v6389_v44, %v3361_v12  ;;  %v4099_v35 = vmax.f32 %v4035_v5, 0.0  ;;  %v7191_v54 = vpop.f32.mrb[88].mxu0  ;;  %v7193_v53 = vpop.f32.mrb[88].mxu1 }
 0x22e   : > { %v4033_v33 = vadd.f32 %v6700_v48, %v3969_v38  ;;  %v3359_v27 = vmax.f32 %v3295_v40, 0.0  ;;  %v3300_v0 = vadd.f32 %v6700_v48, %v3236_v11  ;;  %v3974_v39 = vmul.f32 %v6683_v1, %v3762_v43  ;;  %v7201_v24 = vpop.f32.mrb[89].mxu0  ;;  %v7203_v49 = vpop.f32.mrb[89].mxu1 }
 0x22f   : > { %v3234_v9 = vmul.f32 %v6683_v1, %v3016_v50  ;;  %4225 = vst.msk [vmem:[%s7035_s11 + $0x40] sm:$0xff] %vm4216_vm2, %v4160_v22  ;;  %v4163_v2 = vmax.f32 %v3425_v7, %v4099_v35  ;;  %v3754_v44 = vadd.f32 %v6651_v52, %v7048_v58  ;;  %v3027_v61 = vadd.f32 %v6651_v52, %v7052_v4  ;;  %v7208_v12 = vpop.f32.mrb[90].mxu0  ;;  %v7210_v5 = vpop.f32.mrb[90].mxu1 }
 0x230   : > { %v4097_v15 = vmax.f32 %v4033_v33, 0.0  ;;  %v3423_v23 = vmax.f32 %v6416_v41, %v3359_v27  ;;  %v3364_v3 = vmax.f32 %v3300_v0, 0.0  ;;  %v4038_v55 = vadd.f32 %v6700_v48, %v3974_v39  ;;  %v7220_v40 = vpop.f32.mrb[91].mxu0  ;;  %v7222_v11 = vpop.f32.mrb[91].mxu1 }
 0x231   : > { %v3298_v30 = vadd.f32 %v6700_v48, %v3234_v9  ;;  %4228 = vst.msk [vmem:[%s7035_s11 + $0x58] sm:$0xff] %vm4216_vm2, %v4163_v2  ;;  %v3972_v58 = vmul.f32 %v6683_v1, %v3754_v44  ;;  %v3237_v4 = vmul.f32 %v6683_v1, %v3027_v61  ;;  %v3765_v38 = vadd.f32 %v6651_v52, %v7054_v62 }
 0x232   : > { %v3019_v41 = vadd.f32 %v6651_v52, %v7064_v13  ;;  %v4161_v43 = vmax.f32 %v3423_v23, %v4097_v15  ;;  %v3428_v50 = vmax.f32 %v6430_v25, %v3364_v3  ;;  %v4102_v22 = vmax.f32 %v4038_v55, 0.0 }
 0x233   : > { %v3362_v7 = vmax.f32 %v3298_v30, 0.0  ;;  %v4036_v35 = vadd.f32 %v6700_v48, %v3972_v58  ;;  %v3301_v33 = vadd.f32 %v6700_v48, %v3237_v4  ;;  %v3975_v27 = vmul.f32 %v6683_v1, %v3765_v38 }
 0x234   : > { %v3235_v62 = vmul.f32 %v6683_v1, %v3019_v41  ;;  %4226 = vst.msk [vmem:[%s7035_s11 + $0x48] sm:$0xff] %vm4216_vm2, %v4161_v43  ;;  %v4166_v13 = vmax.f32 %v3428_v50, %v4102_v22  ;;  %v3757_v39 = vadd.f32 %v6651_v52, %v7066_v60  ;;  %v3040_v25 = vadd.f32 %v6651_v52, %v7091_v21 }
 0x235   : > { %v3426_v0 = vmax.f32 %v6433_v18, %v3362_v7  ;;  %v4100_v9 = vmax.f32 %v4036_v35, 0.0  ;;  %v3365_v2 = vmax.f32 %v3301_v33, 0.0  ;;  %v4039_v15 = vadd.f32 %v6700_v48, %v3975_v27  ;;  %v7246_v21 = vpop.f32.mrb[92].mxu0  ;;  %v7248_v3 = vpop.f32.mrb[92].mxu1 }
 0x236   : > { %v3299_v44 = vadd.f32 %v6700_v48, %v3235_v62  ;;  %4231 = vst.msk [vmem:[%s7035_s11 + $0x70] sm:$0xff] %vm4216_vm2, %v4166_v13  ;;  %v3973_v61 = vmul.f32 %v6683_v1, %v3757_v39  ;;  %v3240_v23 = vmul.f32 %v6683_v1, %v3040_v25  ;;  %v3778_v18 = vadd.f32 %v6651_v52, %v7093_v6  ;;  %v7251_v38 = vpop.f32.mrb[93].mxu0  ;;  %v7253_v41 = vpop.f32.mrb[93].mxu1 }
 0x237   : > { %v3032_v60 = vadd.f32 %v6651_v52, %v7100_v28  ;;  %v4164_v55 = vmax.f32 %v3426_v0, %v4100_v9  ;;  %v3429_v30 = vmax.f32 %v6441_v16, %v3365_v2  ;;  %v4103_v58 = vmax.f32 %v4039_v15, 0.0  ;;  %v7259_v22 = vpop.f32.mrb[94].mxu0  ;;  %v7261_v7 = vpop.f32.mrb[94].mxu1 }
 0x238   : > { %v3363_v4 = vmax.f32 %v3299_v44, 0.0  ;;  %v4037_v43 = vadd.f32 %v6700_v48, %v3973_v61  ;;  %v3304_v6 = vadd.f32 %v6700_v48, %v3240_v23  ;;  %v3978_v28 = vmul.f32 %v6683_v1, %v3778_v18  ;;  %v7270_v62 = vpop.f32.mrb[95].mxu0  ;;  %v7272_v13 = vpop.f32.mrb[95].mxu1 }
 0x239   : > { %v3238_v50 = vmul.f32 %v6683_v1, %v3032_v60  ;;  %4229 = vst.msk [vmem:[%s7035_s11 + $0x60] sm:$0xff] %vm4216_vm2, %v4164_v55  ;;  %v4167_v16 = vmax.f32 %v3429_v30, %v4103_v58  ;;  %v3770_v33 = vadd.f32 %v6651_v52, %v7102_v46  ;;  %v3043_v27 = vadd.f32 %v6651_v52, %v7108_v42 }
 0x23a   : > { %v3427_v35 = vmax.f32 %v6456_v45, %v3363_v4  ;;  %v4101_v0 = vmax.f32 %v4037_v43, 0.0  ;;  %v3368_v39 = vmax.f32 %v3304_v6, 0.0  ;;  %v4042_v25 = vadd.f32 %v6700_v48, %v3978_v28 }
 0x23b   : > { %v3302_v9 = vadd.f32 %v6700_v48, %v3238_v50  ;;  %4232 = vst.msk [vmem:[%s7035_s11 + $0x78] sm:$0xff] %vm4216_vm2, %v4167_v16  ;;  %v3976_v45 = vmul.f32 %v6683_v1, %v3770_v33  ;;  %v3241_v46 = vmul.f32 %v6683_v1, %v3043_v27  ;;  %v3781_v42 = vadd.f32 %v6651_v52, %v7110_v36 }
 0x23c   : > { %v3035_v2 = vadd.f32 %v6651_v52, %v7115_v10  ;;  %v4165_v15 = vmax.f32 %v3427_v35, %v4101_v0  ;;  %v3432_v44 = vmax.f32 %v6470_v19, %v3368_v39  ;;  %v4106_v61 = vmax.f32 %v4042_v25, 0.0  ;;  %v7295_v19 = vld [vmem:[%s7943_s2] ss:$0 sm:$0xff] }
 0x23d   : > { %v3366_v23 = vmax.f32 %v3302_v9, 0.0  ;;  %v4040_v18 = vadd.f32 %v6700_v48, %v3976_v45  ;;  %v3305_v60 = vadd.f32 %v6700_v48, %v3241_v46  ;;  %v3979_v55 = vmul.f32 %v6683_v1, %v3781_v42  ;;  %v7301_v4 = vpop.f32.mrb[96].mxu0  ;;  %v7303_v43 = vpop.f32.mrb[96].mxu1 }
 0x23e   : > { %v3239_v30 = vmul.f32 %v6683_v1, %v3035_v2  ;;  %4230 = vst.msk [vmem:[%s7035_s11 + $0x68] sm:$0xff] %vm4216_vm2, %v4165_v15  ;;  %v4170_v36 = vmax.f32 %v3432_v44, %v4106_v61  ;;  %v3773_v52 = vadd.f32 %v7295_v19, %v7117_v34  ;;  %v3056_v10 = vadd.f32 %v7295_v19, %v7140_v32  ;;  %v7307_v16 = vpop.f32.mrb[97].mxu0  ;;  %v7309_v35 = vpop.f32.mrb[97].mxu1 }
 0x23f   : > { %v3430_v58 = vmax.f32 %v6473_v8, %v3366_v23  ;;  %v4104_v6 = vmax.f32 %v4040_v18, 0.0  ;;  %v3369_v28 = vmax.f32 %v3305_v60, 0.0  ;;  %v4043_v50 = vadd.f32 %v6700_v48, %v3979_v55  ;;  %v7319_v0 = vpop.f32.mrb[98].mxu0  ;;  %v7321_v39 = vpop.f32.mrb[98].mxu1 }
 0x240   : > { %v3303_v8 = vadd.f32 %v6700_v48, %v3239_v30  ;;  %4235 = vst.msk [vmem:[%s7035_s11 + $0x90] sm:$0xff] %vm4216_vm2, %v4170_v36  ;;  %v3977_v34 = vmul.f32 %v6683_v1, %v3773_v52  ;;  %v3244_v32 = vmul.f32 %v6683_v1, %v3056_v10  ;;  %v3794_v33 = vadd.f32 %v7295_v19, %v7142_v63  ;;  %v7324_v42 = vpop.f32.mrb[99].mxu0  ;;  %v7326_v2 = vpop.f32.mrb[99].mxu1  ;;  %v7348_v36 = vld [vmem:[%s7945_s4] ss:$0 sm:$0xff] }
 0x241   : > { %v3048_v27 = vadd.f32 %v7295_v19, %v7148_v56  ;;  %v4168_v25 = vmax.f32 %v3430_v58, %v4104_v6  ;;  %v3433_v9 = vmax.f32 %v6477_v14, %v3369_v28  ;;  %v4107_v45 = vmax.f32 %v4043_v50, 0.0  ;;  %v7333_v56 = vld [vmem:[%s7944_s3] ss:$0 sm:$0xff] }
 0x242   : > { %v3367_v46 = vmax.f32 %v3303_v8, 0.0  ;;  %v4041_v1 = vadd.f32 %v6700_v48, %v3977_v34  ;;  %v3308_v63 = vadd.f32 %v6700_v48, %v3244_v32  ;;  %v3982_v15 = vmul.f32 %v7333_v56, %v3794_v33 }
 0x243   : > { %v3242_v14 = vmul.f32 %v7333_v56, %v3048_v27  ;;  %4233 = vst.msk [vmem:[%s7035_s11 + $0x80] sm:$0xff] %vm4216_vm2, %v4168_v25  ;;  %v4171_v44 = vmax.f32 %v3433_v9, %v4107_v45  ;;  %v3786_v23 = vadd.f32 %v7295_v19, %v7150_v31  ;;  %v3059_v18 = vadd.f32 %v7295_v19, %v7158_v37 }
 0x244   : > { %v3431_v61 = vmax.f32 %v6488_v59, %v3367_v46  ;;  %v4105_v60 = vmax.f32 %v4041_v1, 0.0  ;;  %v3372_v55 = vmax.f32 %v3308_v63, 0.0  ;;  %v4046_v30 = vadd.f32 %v6700_v48, %v3982_v15 }
 0x245   : > { %v3306_v58 = vadd.f32 %v7348_v36, %v3242_v14  ;;  %4236 = vst.msk [vmem:[%s7035_s11 + $0x98] sm:$0xff] %vm4216_vm2, %v4171_v44  ;;  %v3980_v59 = vmul.f32 %v7333_v56, %v3786_v23  ;;  %v3245_v31 = vmul.f32 %v7333_v56, %v3059_v18  ;;  %v3797_v37 = vadd.f32 %v7295_v19, %v7160_v26  ;;  %v7360_v50 = vpop.f32.mrb[100].mxu0  ;;  %v7362_v8 = vpop.f32.mrb[100].mxu1 }
 0x246   : > { %v3051_v48 = vadd.f32 %v7295_v19, %v7168_v51  ;;  %v4169_v52 = vmax.f32 %v3431_v61, %v4105_v60  ;;  %v3436_v10 = vmax.f32 %v6502_v29, %v3372_v55  ;;  %v4110_v6 = vmax.f32 %v4046_v30, 0.0  ;;  %v7368_v27 = vpop.f32.mrb[101].mxu0  ;;  %v7370_v51 = vpop.f32.mrb[101].mxu1 }
 0x247   : > { %v3370_v28 = vmax.f32 %v3306_v58, 0.0  ;;  %v4044_v34 = vadd.f32 %v7348_v36, %v3980_v59  ;;  %v3309_v32 = vadd.f32 %v7348_v36, %v3245_v31  ;;  %v3983_v33 = vmul.f32 %v7333_v56, %v3797_v37  ;;  %v7379_v46 = vpop.f32.mrb[102].mxu0  ;;  %v7381_v1 = vpop.f32.mrb[102].mxu1 }
 0x248   : > { %v3243_v26 = vmul.f32 %v7333_v56, %v3051_v48  ;;  %4234 = vst.msk [vmem:[%s7035_s11 + $0x88] sm:$0xff] %vm4216_vm2, %v4169_v52  ;;  %v4174_v29 = vmax.f32 %v3436_v10, %v4110_v6  ;;  %v3789_v9 = vadd.f32 %v7295_v19, %v7170_v47  ;;  %v3072_v45 = vadd.f32 %v7295_v19, %v7191_v54  ;;  %v7385_v61 = vpop.f32.mrb[103].mxu0 }
 0x249   : > { %v3434_v25 = vmax.f32 %v6505_v17, %v3370_v28  ;;  %v4108_v63 = vmax.f32 %v4044_v34, 0.0  ;;  %v3373_v15 = vmax.f32 %v3309_v32, 0.0  ;;  %v4047_v14 = vadd.f32 %v7348_v36, %v3983_v33  ;;  %v7387_v17 = vpop.f32.mrb[103].mxu1 }
 0x24a   : > { %v3307_v44 = vadd.f32 %v7348_v36, %v3243_v26  ;;  %4239 = vst.msk [vmem:[%s7035_s11 + $0xb0] sm:$0xff] %vm4216_vm2, %v4174_v29  ;;  %v3981_v47 = vmul.f32 %v7333_v56, %v3789_v9  ;;  %v3248_v54 = vmul.f32 %v7333_v56, %v3072_v45  ;;  %v3810_v23 = vadd.f32 %v7295_v19, %v7193_v53  ;;  %v7992_v45 = vld [vmem:[#allocation3_spill] sm:$0xff] }
 0x24b   : > { %v3064_v18 = vadd.f32 %v7295_v19, %v7201_v24  ;;  %v4172_v60 = vmax.f32 %v3434_v25, %v4108_v63  ;;  %v3437_v55 = vmax.f32 %v6509_v20, %v3373_v15  ;;  %v4111_v30 = vmax.f32 %v4047_v14, 0.0 }
 0x24c   : > { %v3371_v58 = vmax.f32 %v3307_v44, 0.0  ;;  %v4045_v59 = vadd.f32 %v7348_v36, %v3981_v47  ;;  %v3312_v31 = vadd.f32 %v7348_v36, %v3248_v54  ;;  %v3986_v37 = vmul.f32 %v7333_v56, %v3810_v23 }
 0x24d   : > { %v3246_v48 = vmul.f32 %v7333_v56, %v3064_v18  ;;  %4237 = vst.msk [vmem:[%s7035_s11 + $0xa0] sm:$0xff] %vm4216_vm2, %v4172_v60  ;;  %v4175_v53 = vmax.f32 %v3437_v55, %v4111_v30  ;;  %v3802_v24 = vadd.f32 %v7295_v19, %v7203_v49  ;;  %v3075_v20 = vadd.f32 %v7295_v19, %v7208_v12  ;;  %v7411_v32 = vpop.f32.mrb[104].mxu0  ;;  %v7413_v33 = vpop.f32.mrb[104].mxu1  ;;  %v7993_v30 = vld [vmem:[#allocation4_spill] sm:$0xff] }
 0x24e   : > { %v3435_v52 = vmax.f32 %v6520_v57, %v3371_v58  ;;  %v4109_v10 = vmax.f32 %v4045_v59, 0.0  ;;  %v3376_v6 = vmax.f32 %v3312_v31, 0.0  ;;  %v4050_v28 = vadd.f32 %v7348_v36, %v3986_v37  ;;  %v7423_v29 = vpop.f32.mrb[105].mxu0  ;;  %v7425_v25 = vpop.f32.mrb[105].mxu1 }
 0x24f   : > { %v3310_v34 = vadd.f32 %v7348_v36, %v3246_v48  ;;  %4240 = vst.msk [vmem:[%s7035_s11 + $0xb8] sm:$0xff] %vm4216_vm2, %v4175_v53  ;;  %v3984_v57 = vmul.f32 %v7333_v56, %v3802_v24  ;;  %v3249_v26 = vmul.f32 %v7333_v56, %v3075_v20  ;;  %v3813_v49 = vadd.f32 %v7295_v19, %v7210_v5  ;;  %v7428_v44 = vpop.f32.mrb[106].mxu0  ;;  %v7430_v47 = vpop.f32.mrb[106].mxu1 }
 0x250   : > { %v3067_v12 = vadd.f32 %v7295_v19, %v7220_v40  ;;  %v4173_v9 = vmax.f32 %v3435_v52, %v4109_v10  ;;  %v3440_v63 = vmax.f32 %v7992_v45, %v3376_v6  ;;  %v4114_v15 = vmax.f32 %v4050_v28, 0.0  ;;  %v7436_v18 = vpop.f32.mrb[107].mxu0  ;;  %v7438_v60 = vpop.f32.mrb[107].mxu1  ;;  %v7994_v6 = vld [vmem:[#allocation5_spill] sm:$0xff] }
 0x251   : > { %v3374_v14 = vmax.f32 %v3310_v34, 0.0  ;;  %v4048_v5 = vadd.f32 %v7348_v36, %v3984_v57  ;;  %v3313_v54 = vadd.f32 %v7348_v36, %v3249_v26  ;;  %v3987_v40 = vmul.f32 %v7333_v56, %v3813_v49 }
 0x252   : > { %v3247_v23 = vmul.f32 %v7333_v56, %v3067_v12  ;;  %4238 = vst.msk [vmem:[%s7035_s11 + $0xa8] sm:$0xff] %vm4216_vm2, %v4173_v9  ;;  %v4178_v55 = vmax.f32 %v3440_v63, %v4114_v15  ;;  %v3805_v59 = vadd.f32 %v7295_v19, %v7222_v11  ;;  %v3088_v31 = vadd.f32 %v7295_v19, %v7246_v21 }
 0x253   : > { %v3438_v58 = vmax.f32 %v7993_v30, %v3374_v14  ;;  %v4112_v37 = vmax.f32 %v4048_v5, 0.0  ;;  %v3377_v48 = vmax.f32 %v3313_v54, 0.0  ;;  %v4051_v53 = vadd.f32 %v7348_v36, %v3987_v40 }
 0x254   : > { %v3311_v52 = vadd.f32 %v7348_v36, %v3247_v23  ;;  %4243 = vst.msk [vmem:[%s7035_s11 + $0xd0] sm:$0xff] %vm4216_vm2, %v4178_v55  ;;  %v3985_v24 = vmul.f32 %v7333_v56, %v3805_v59  ;;  %v3252_v20 = vmul.f32 %v7333_v56, %v3088_v31  ;;  %v3826_v10 = vadd.f32 %v7295_v19, %v7248_v3 }
 0x255   : > { %v3080_v11 = vadd.f32 %v7295_v19, %v7251_v38  ;;  %v4176_v21 = vmax.f32 %v3438_v58, %v4112_v37  ;;  %v3441_v28 = vmax.f32 %v7994_v6, %v3377_v48  ;;  %v4115_v34 = vmax.f32 %v4051_v53, 0.0  ;;  %v7462_v45 = vpop.f32.mrb[108].mxu0  ;;  %v7995_v38 = vld [vmem:[#allocation6_spill] sm:$0xff] }
 0x256   : > { %v3375_v57 = vmax.f32 %v3311_v52, 0.0  ;;  %v4049_v26 = vadd.f32 %v7348_v36, %v3985_v24  ;;  %v3316_v49 = vadd.f32 %v7348_v36, %v3252_v20  ;;  %v3990_v12 = vmul.f32 %v7333_v56, %v3826_v10  ;;  %v7471_v5 = vpop.f32.mrb[108].mxu1  ;;  %v7473_v54 = vpop.f32.mrb[109].mxu0  ;;  %v7996_v24 = vld [vmem:[#allocation7_spill] sm:$0xff] }
 0x257   : > { %v3250_v9 = vmul.f32 %v7333_v56, %v3080_v11  ;;  %4241 = vst.msk [vmem:[%s7035_s11 + $0xc0] sm:$0xff] %vm4216_vm2, %v4176_v21  ;;  %v4179_v3 = vmax.f32 %v3441_v28, %v4115_v34  ;;  %v3818_v15 = vadd.f32 %v7295_v19, %v7253_v41  ;;  %v3091_v14 = vadd.f32 %v7295_v19, %v7259_v22  ;;  %v7477_v58 = vpop.f32.mrb[109].mxu1  ;;  %v7479_v59 = vpop.f32.mrb[110].mxu0 }
 0x258   : > { %v3439_v63 = vmax.f32 %v7995_v38, %v3375_v57  ;;  %v4113_v40 = vmax.f32 %v4049_v26, 0.0  ;;  %v3380_v23 = vmax.f32 %v3316_v49, 0.0  ;;  %v4054_v55 = vadd.f32 %v7348_v36, %v3990_v12  ;;  %v7489_v48 = vpop.f32.mrb[110].mxu1  ;;  %v7491_v53 = vpop.f32.mrb[111].mxu0  ;;  %v7997_v57 = vld [vmem:[#allocation8_spill] sm:$0xff] }
 0x259   : > { %v3314_v30 = vadd.f32 %v7348_v36, %v3250_v9  ;;  %4244 = vst.msk [vmem:[%s7035_s11 + $0xd8] sm:$0xff] %vm4216_vm2, %v4179_v3  ;;  %v3988_v41 = vmul.f32 %v7333_v56, %v3818_v15  ;;  %v3253_v22 = vmul.f32 %v7333_v56, %v3091_v14  ;;  %v3829_v31 = vadd.f32 %v7295_v19, %v7261_v7  ;;  %v7494_v21 = vpop.f32.mrb[111].mxu1 }
 0x25a   : > { %v3083_v37 = vadd.f32 %v7295_v19, %v7270_v62  ;;  %v4177_v52 = vmax.f32 %v3439_v63, %v4113_v40  ;;  %v3444_v20 = vmax.f32 %v7996_v24, %v3380_v23  ;;  %v4118_v10 = vmax.f32 %v4054_v55, 0.0  ;;  %v7998_v55 = vld [vmem:[#allocation9_spill] sm:$0xff] }
 0x25b   : > { %v3378_v11 = vmax.f32 %v3314_v30, 0.0  ;;  %v4052_v6 = vadd.f32 %v7348_v36, %v3988_v41  ;;  %v3317_v28 = vadd.f32 %v7348_v36, %v3253_v22  ;;  %v3991_v7 = vmul.f32 %v7333_v56, %v3829_v31 }
 0x25c   : > { %v3251_v62 = vmul.f32 %v7333_v56, %v3083_v37  ;;  %4242 = vst.msk [vmem:[%s7035_s11 + $0xc8] sm:$0xff] %vm4216_vm2, %v4177_v52  ;;  %v4182_v34 = vmax.f32 %v3444_v20, %v4118_v10  ;;  %v3821_v49 = vadd.f32 %v7295_v19, %v7272_v13  ;;  %v3104_v12 = vadd.f32 %v7295_v19, %v7301_v4 }
 0x25d   : > { %v3442_v26 = vmax.f32 %v7997_v57, %v3378_v11  ;;  %v4116_v9 = vmax.f32 %v4052_v6, 0.0  ;;  %v3381_v3 = vmax.f32 %v3317_v28, 0.0  ;;  %v4055_v38 = vadd.f32 %v7348_v36, %v3991_v7  ;;  %v7517_v4 = vpop.f32.mrb[112].mxu0  ;;  %v7999_v6 = vld [vmem:[#allocation10_spill] sm:$0xff] }
 0x25e   : > { %v3315_v63 = vadd.f32 %v7348_v36, %v3251_v62  ;;  %4247 = vst.msk [vmem:[%s7035_s11 + $0xf0] sm:$0xff] %vm4216_vm2, %v4182_v34  ;;  %v3989_v15 = vmul.f32 %v7333_v56, %v3821_v49  ;;  %v3256_v14 = vmul.f32 %v7333_v56, %v3104_v12  ;;  %v3842_v40 = vadd.f32 %v7295_v19, %v7303_v43  ;;  %v7520_v31 = vpop.f32.mrb[112].mxu1  ;;  %v7522_v37 = vpop.f32.mrb[113].mxu0 }
 0x25f   : > { %v3096_v13 = vadd.f32 %v7295_v19, %v7307_v16  ;;  %v4180_v23 = vmax.f32 %v3442_v26, %v4116_v9  ;;  %v3445_v30 = vmax.f32 %v7998_v55, %v3381_v3  ;;  %v4119_v41 = vmax.f32 %v4055_v38, 0.0  ;;  %v7528_v20 = vpop.f32.mrb[113].mxu1  ;;  %v7530_v10 = vpop.f32.mrb[114].mxu0 }
 0x260   : > { %v3379_v22 = vmax.f32 %v3315_v63, 0.0  ;;  %v4053_v52 = vadd.f32 %v7348_v36, %v3989_v15  ;;  %v3320_v24 = vadd.f32 %v7348_v36, %v3256_v14  ;;  %v3994_v43 = vmul.f32 %v7333_v56, %v3842_v40  ;;  %v7539_v34 = vpop.f32.mrb[114].mxu1  ;;  %v7541_v57 = vpop.f32.mrb[115].mxu0  ;;  %v8000_v14 = vld [vmem:[#allocation11_spill] sm:$0xff] }
 0x261   : > { %v3254_v16 = vmul.f32 %v7333_v56, %v3096_v13  ;;  %4245 = vst.msk [vmem:[%s7035_s11 + $0xe0] sm:$0xff] %vm4216_vm2, %v4180_v23  ;;  %v4183_v11 = vmax.f32 %v3445_v30, %v4119_v41  ;;  %v3834_v7 = vadd.f32 %v7295_v19, %v7309_v35  ;;  %v3107_v62 = vadd.f32 %v7295_v19, %v7319_v0  ;;  %v7545_v3 = vpop.f32.mrb[115].mxu1 }
 0x262   : > { %v3443_v28 = vmax.f32 %v7999_v6, %v3379_v22  ;;  %v4117_v26 = vmax.f32 %v4053_v52, 0.0  ;;  %v3384_v49 = vmax.f32 %v3320_v24, 0.0  ;;  %v4058_v12 = vadd.f32 %v7348_v36, %v3994_v43  ;;  %v8001_v52 = vld [vmem:[#allocation12_spill] sm:$0xff] }
 0x263   : > { %v3318_v9 = vadd.f32 %v7348_v36, %v3254_v16  ;;  %4248 = vst.msk [vmem:[%s7035_s11 + $0xf8] sm:$0xff] %vm4216_vm2, %v4183_v11  ;;  %v3992_v35 = vmul.f32 %v7333_v56, %v3834_v7  ;;  %v3257_v38 = vmul.f32 %v7333_v56, %v3107_v62  ;;  %v3845_v0 = vadd.f32 %v7295_v19, %v7321_v39 }
 0x264   : > { %v3099_v63 = vadd.f32 %v7295_v19, %v7324_v42  ;;  %v4181_v15 = vmax.f32 %v3443_v28, %v4117_v26  ;;  %v3448_v40 = vmax.f32 %v8000_v14, %v3384_v49  ;;  %v4122_v13 = vmax.f32 %v4058_v12, 0.0 }
 0x265   : > { %v3382_v23 = vmax.f32 %v3318_v9, 0.0  ;;  %v4056_v55 = vadd.f32 %v7348_v36, %v3992_v35  ;;  %v3321_v30 = vadd.f32 %v7348_v36, %v3257_v38  ;;  %v3995_v41 = vmul.f32 %v7333_v56, %v3845_v0  ;;  %v7567_v16 = vpop.f32.mrb[116].mxu0  ;;  %v8002_v0 = vld [vmem:[#allocation13_spill] sm:$0xff] }
 0x266   : > { %v3255_v22 = vmul.f32 %v7333_v56, %v3099_v63  ;;  %4246 = vst.msk [vmem:[%s7035_s11 + $0xe8] sm:$0xff] %vm4216_vm2, %v4181_v15  ;;  %v4186_v39 = vmax.f32 %v3448_v40, %v4122_v13  ;;  %v3837_v42 = vadd.f32 %v7295_v19, %v7326_v2  ;;  %v3120_v43 = vadd.f32 %v7295_v19, %v7360_v50  ;;  %v7571_v62 = vpop.f32.mrb[116].mxu1  ;;  %v7573_v26 = vpop.f32.mrb[117].mxu0 }
 0x267   : > { %v3446_v24 = vmax.f32 %v8001_v52, %v3382_v23  ;;  %v4120_v11 = vmax.f32 %v4056_v55, 0.0  ;;  %v3385_v6 = vmax.f32 %v3321_v30, 0.0  ;;  %v4059_v28 = vadd.f32 %v7348_v36, %v3995_v41  ;;  %v7583_v9 = vpop.f32.mrb[117].mxu1  ;;  %v7585_v35 = vpop.f32.mrb[118].mxu0 }
 0x268   : > { %v3319_v7 = vadd.f32 %v7348_v36, %v3255_v22  ;;  %4251 = vst.msk [vmem:[%s7035_s11 + $0x110] sm:$0xff] %vm4216_vm2, %v4186_v39  ;;  %v3993_v49 = vmul.f32 %v7333_v56, %v3837_v42  ;;  %v3260_v2 = vmul.f32 %v7333_v56, %v3120_v43  ;;  %v3858_v50 = vadd.f32 %v7295_v19, %v7362_v8  ;;  %v7588_v40 = vpop.f32.mrb[118].mxu1  ;;  %v7590_v13 = vpop.f32.mrb[119].mxu0  ;;  %v8003_v22 = vld [vmem:[#allocation14_spill] sm:$0xff] }
 0x269   : > { %v3112_v12 = vadd.f32 %v7295_v19, %v7368_v27  ;;  %v4184_v38 = vmax.f32 %v3446_v24, %v4120_v11  ;;  %v3449_v63 = vmax.f32 %v8002_v0, %v3385_v6  ;;  %v4123_v15 = vmax.f32 %v4059_v28, 0.0  ;;  %v7596_v30 = vpop.f32.mrb[119].mxu1 }
 0x26a   : > { %v3383_v14 = vmax.f32 %v3319_v7, 0.0  ;;  %v4057_v23 = vadd.f32 %v7348_v36, %v3993_v49  ;;  %v3324_v8 = vadd.f32 %v7348_v36, %v3260_v2  ;;  %v3998_v27 = vmul.f32 %v7333_v56, %v3858_v50  ;;  %v8004_v2 = vld [vmem:[#allocation15_spill] sm:$0xff] }
 0x26b   : > { %v3258_v55 = vmul.f32 %v7333_v56, %v3112_v12  ;;  %4249 = vst.msk [vmem:[%s7035_s11 + $0x100] sm:$0xff] %vm4216_vm2, %v4184_v38  ;;  %v4187_v41 = vmax.f32 %v3449_v63, %v4123_v15  ;;  %v3850_v52 = vadd.f32 %v7295_v19, %v7370_v51  ;;  %v3123_v24 = vadd.f32 %v7295_v19, %v7379_v46 }
 0x26c   : > { %v3447_v39 = vmax.f32 %v8003_v22, %v3383_v14  ;;  %v4121_v42 = vmax.f32 %v4057_v23, 0.0  ;;  %v3388_v43 = vmax.f32 %v3324_v8, 0.0  ;;  %v4062_v11 = vadd.f32 %v7348_v36, %v3998_v27  ;;  %v8005_v27 = vld [vmem:[#allocation16_spill] sm:$0xff] }
 0x26d   : > { %v3322_v6 = vadd.f32 %v7348_v36, %v3258_v55  ;;  %4252 = vst.msk [vmem:[%s7035_s11 + $0x118] sm:$0xff] %vm4216_vm2, %v4187_v41  ;;  %v3996_v28 = vmul.f32 %v7333_v56, %v3850_v52  ;;  %v3261_v7 = vmul.f32 %v7333_v56, %v3123_v24  ;;  %v3861_v49 = vadd.f32 %v7295_v19, %v7381_v1  ;;  %v7616_v0 = vpop.f32.mrb[120].mxu0 }
 0x26e   : > { %v3115_v51 = vadd.f32 %v7295_v19, %v7385_v61  ;;  %v4185_v46 = vmax.f32 %v3447_v39, %v4121_v42  ;;  %v3452_v50 = vmax.f32 %v8004_v2, %v3388_v43  ;;  %v4126_v12 = vmax.f32 %v4062_v11, 0.0  ;;  %v7624_v8 = vpop.f32.mrb[121].mxu0  ;;  %v8006_v2 = vld [vmem:[#allocation17_spill] sm:$0xff] }
 0x26f   : > { %v3386_v38 = vmax.f32 %v3322_v6, 0.0  ;;  %v4060_v63 = vadd.f32 %v7348_v36, %v3996_v28  ;;  %v3325_v15 = vadd.f32 %v7348_v36, %v3261_v7  ;;  %v3999_v14 = vmul.f32 %v7333_v56, %v3861_v49  ;;  %v7635_v52 = vpop.f32.mrb[122].mxu0 }
 0x270   : > { %v3259_v23 = vmul.f32 %v7333_v56, %v3115_v51  ;;  %4250 = vst.msk [vmem:[%s7035_s11 + $0x108] sm:$0xff] %vm4216_vm2, %v4185_v46  ;;  %v4190_v61 = vmax.f32 %v3452_v50, %v4126_v12  ;;  %v3853_v41 = vadd.f32 %v7295_v19, %v7387_v17  ;;  %v3136_v22 = vadd.f32 %v7295_v19, %v7411_v32  ;;  %v7641_v28 = vpop.f32.mrb[123].mxu0 }
 0x271   : > { %v7622_v1 = vpop.f32.mrb[120].mxu1  ;;  %v3450_v55 = vmax.f32 %v8005_v27, %v3386_v38  ;;  %v4124_v24 = vmax.f32 %v4060_v63, 0.0  ;;  %v3389_v42 = vmax.f32 %v3325_v15, 0.0  ;;  %v4063_v43 = vadd.f32 %v7348_v36, %v3999_v14 }
 0x272   : > { %v7633_v39 = vpop.f32.mrb[121].mxu1  ;;  %v3323_v11 = vadd.f32 %v7348_v36, %v3259_v23  ;;  %4255 = vst.msk [vmem:[%s7035_s11 + $0x130] sm:$0xff] %vm4216_vm2, %v4190_v61  ;;  %v3997_v17 = vmul.f32 %v7333_v56, %v3853_v41  ;;  %v3264_v32 = vmul.f32 %v7333_v56, %v3136_v22  ;;  %v3874_v7 = vadd.f32 %v7295_v19, %v7413_v33 }
 0x273   : > { %v7639_v6 = vpop.f32.mrb[122].mxu1  ;;  %v3128_v49 = vadd.f32 %v7295_v19, %v7423_v29  ;;  %v4188_v46 = vmax.f32 %v3450_v55, %v4124_v24  ;;  %v3453_v50 = vmax.f32 %v8006_v2, %v3389_v42  ;;  %v4127_v12 = vmax.f32 %v4063_v43, 0.0  ;;  %v8007_v29 = vld [vmem:[#allocation18_spill] sm:$0xff] }
 0x274   : > { %v7651_v51 = vpop.f32.mrb[123].mxu1  ;;  %v3387_v38 = vmax.f32 %v3323_v11, 0.0  ;;  %v4061_v63 = vadd.f32 %v7348_v36, %v3997_v17  ;;  %v3328_v15 = vadd.f32 %v7348_v36, %v3264_v32  ;;  %v4002_v14 = vmul.f32 %v7333_v56, %v3874_v7 }
 0x275   : > { %v3262_v23 = vmul.f32 %v7333_v56, %v3128_v49  ;;  %4253 = vst.msk [vmem:[%s7035_s11 + $0x120] sm:$0xff] %vm4216_vm2, %v4188_v46  ;;  %v4191_v33 = vmax.f32 %v3453_v50, %v4127_v12  ;;  %v3866_v27 = vadd.f32 %v7295_v19, %v7425_v25  ;;  %v3139_v55 = vadd.f32 %v7295_v19, %v7428_v44  ;;  %v8008_v46 = vld [vmem:[#allocation19_spill] sm:$0xff] }
 0x276   : > { %v3451_v61 = vmax.f32 %v8007_v29, %v3387_v38  ;;  %v4125_v41 = vmax.f32 %v4061_v63, 0.0  ;;  %v3392_v22 = vmax.f32 %v3328_v15, 0.0  ;;  %v4066_v24 = vadd.f32 %v7348_v36, %v4002_v14 }
 0x277   : > { %v3326_v42 = vadd.f32 %v7348_v36, %v3262_v23  ;;  %4256 = vst.msk [vmem:[%s7035_s11 + $0x138] sm:$0xff] %vm4216_vm2, %v4191_v33  ;;  %v4000_v11 = vmul.f32 %v7333_v56, %v3866_v27  ;;  %v3265_v17 = vmul.f32 %v7333_v56, %v3139_v55  ;;  %v3877_v25 = vadd.f32 %v7295_v19, %v7430_v47 }
 0x278   : > { %v3131_v44 = vadd.f32 %v7295_v19, %v7436_v18  ;;  %v4189_v49 = vmax.f32 %v3451_v61, %v4125_v41  ;;  %v3456_v2 = vmax.f32 %v8008_v46, %v3392_v22  ;;  %v4130_v50 = vmax.f32 %v4066_v24, 0.0  ;;  %v8009_v61 = vld [vmem:[#allocation20_spill] sm:$0xff]  ;;  %v8010_v46 = vld [vmem:[#allocation21_spill] sm:$0xff] }
 0x279   : > { %v7667_v43 = vpop.f32.mrb[124].mxu0  ;;  %v3390_v12 = vmax.f32 %v3326_v42, 0.0  ;;  %v4064_v15 = vadd.f32 %v7348_v36, %v4000_v11  ;;  %v3329_v47 = vadd.f32 %v7348_v36, %v3265_v17  ;;  %v4003_v18 = vmul.f32 %v7333_v56, %v3877_v25 }
 0x27a   : > { %v7677_v32 = vpop.f32.mrb[124].mxu1  ;;  %v7679_v7 = vpop.f32.mrb[125].mxu0  ;;  %v3263_v14 = vmul.f32 %v7333_v56, %v3131_v44  ;;  %4254 = vst.msk [vmem:[%s7035_s11 + $0x128] sm:$0xff] %vm4216_vm2, %v4189_v49  ;;  %v4194_v29 = vmax.f32 %v3456_v2, %v4130_v50  ;;  %v3869_v55 = vadd.f32 %v7295_v19, %v7438_v60  ;;  %v3152_v41 = vadd.f32 %v7295_v19, %v7462_v45 }
 0x27b   : > { %v7682_v38 = vpop.f32.mrb[125].mxu1  ;;  %v7684_v63 = vpop.f32.mrb[126].mxu0  ;;  %v3454_v27 = vmax.f32 %v8009_v61, %v3390_v12  ;;  %v4128_v24 = vmax.f32 %v4064_v15, 0.0  ;;  %v3393_v42 = vmax.f32 %v3329_v47, 0.0  ;;  %v4067_v11 = vadd.f32 %v7348_v36, %v4003_v18 }
 0x27c   : > { %v7690_v23 = vpop.f32.mrb[126].mxu1  ;;  %v7692_v33 = vpop.f32.mrb[127].mxu0  ;;  %v3327_v17 = vadd.f32 %v7348_v36, %v3263_v14  ;;  %4259 = vst.msk [vmem:[%s7035_s11 + $0x150] sm:$0xff] %vm4216_vm2, %v4194_v29  ;;  %v4001_v25 = vmul.f32 %v7333_v56, %v3869_v55  ;;  %v3268_v44 = vmul.f32 %v7333_v56, %v3152_v41  ;;  %v3890_v60 = vadd.f32 %v7295_v19, %v7471_v5  ;;  %v8011_v29 = vld [vmem:[#allocation22_spill] sm:$0xff] }
 0x27d   : > { %v7701_v22 = vpop.f32.mrb[127].mxu1  ;;  %v3144_v45 = vadd.f32 %v7295_v19, %v7473_v54  ;;  %v4192_v49 = vmax.f32 %v3454_v27, %v4128_v24  ;;  %v3457_v2 = vmax.f32 %v8010_v46, %v3393_v42  ;;  %v4131_v50 = vmax.f32 %v4067_v11, 0.0 }
 0x27e   : > { %v3391_v12 = vmax.f32 %v3327_v17, 0.0  ;;  %v4065_v15 = vadd.f32 %v7348_v36, %v4001_v25  ;;  %v3332_v47 = vadd.f32 %v7348_v36, %v3268_v44  ;;  %v4006_v18 = vmul.f32 %v7333_v56, %v3890_v60  ;;  %v8012_v44 = vld [vmem:[#allocation23_spill] sm:$0xff] }
 0x27f   : > { %v3266_v14 = vmul.f32 %v7333_v56, %v3144_v45  ;;  %4257 = vst.msk [vmem:[%s7035_s11 + $0x140] sm:$0xff] %vm4216_vm2, %v4192_v49  ;;  %v4195_v5 = vmax.f32 %v3457_v2, %v4131_v50  ;;  %v3882_v54 = vadd.f32 %v7295_v19, %v7477_v58  ;;  %v3155_v27 = vadd.f32 %v7295_v19, %v7479_v59 }
 0x280   : > { %v3455_v61 = vmax.f32 %v8011_v29, %v3391_v12  ;;  %v4129_v55 = vmax.f32 %v4065_v15, 0.0  ;;  %v3396_v41 = vmax.f32 %v3332_v47, 0.0  ;;  %v4070_v24 = vadd.f32 %v7348_v36, %v4006_v18  ;;  %v8013_v15 = vld [vmem:[#allocation24_spill] sm:$0xff] }
 0x281   : > { %v3330_v42 = vadd.f32 %v7348_v36, %v3266_v14  ;;  %4260 = vst.msk [vmem:[%s7035_s11 + $0x158] sm:$0xff] %vm4216_vm2, %v4195_v5  ;;  %v4004_v11 = vmul.f32 %v7333_v56, %v3882_v54  ;;  %v3269_v17 = vmul.f32 %v7333_v56, %v3155_v27  ;;  %v3893_v25 = vadd.f32 %v7295_v19, %v7489_v48 }
 0x282   : > { %v3147_v58 = vadd.f32 %v7295_v19, %v7491_v53  ;;  %v4193_v59 = vmax.f32 %v3455_v61, %v4129_v55  ;;  %v3460_v60 = vmax.f32 %v8012_v44, %v3396_v41  ;;  %v4134_v45 = vmax.f32 %v4070_v24, 0.0  ;;  %v8014_v41 = vld [vmem:[#allocation25_spill] sm:$0xff]  ;;  %v8015_v44 = vld [vmem:[#allocation26_spill] sm:$0xff] }
 0x283   : > { %v3394_v49 = vmax.f32 %v3330_v42, 0.0  ;;  %v4068_v46 = vadd.f32 %v7348_v36, %v4004_v11  ;;  %v3333_v2 = vadd.f32 %v7348_v36, %v3269_v17  ;;  %v4007_v50 = vmul.f32 %v7333_v56, %v3893_v25 }
 0x284   : > { %v3267_v12 = vmul.f32 %v7333_v56, %v3147_v58  ;;  %4258 = vst.msk [vmem:[%s7035_s11 + $0x148] sm:$0xff] %vm4216_vm2, %v4193_v59  ;;  %v4198_v48 = vmax.f32 %v3460_v60, %v4134_v45  ;;  %v3885_v53 = vadd.f32 %v7295_v19, %v7494_v21  ;;  %v3168_v18 = vadd.f32 %v7295_v19, %v7517_v4 }
 0x285   : > { %v3458_v47 = vmax.f32 %v8013_v15, %v3394_v49  ;;  %v4132_v14 = vmax.f32 %v4068_v46, 0.0  ;;  %v3397_v5 = vmax.f32 %v3333_v2, 0.0  ;;  %v4071_v29 = vadd.f32 %v7348_v36, %v4007_v50 }
 0x286   : > { %v3331_v61 = vadd.f32 %v7348_v36, %v3267_v12  ;;  %4263 = vst.msk [vmem:[%s7035_s11 + $0x170] sm:$0xff] %vm4216_vm2, %v4198_v48  ;;  %v4005_v54 = vmul.f32 %v7333_v56, %v3885_v53  ;;  %v3272_v27 = vmul.f32 %v7333_v56, %v3168_v18  ;;  %v3906_v55 = vadd.f32 %v7295_v19, %v7520_v31 }
 0x287   : > { %v3160_v21 = vadd.f32 %v7295_v19, %v7522_v37  ;;  %v4196_v4 = vmax.f32 %v3458_v47, %v4132_v14  ;;  %v3461_v24 = vmax.f32 %v8014_v41, %v3397_v5  ;;  %v4135_v42 = vmax.f32 %v4071_v29, 0.0  ;;  %v8016_v47 = vld [vmem:[#allocation27_spill] sm:$0xff] }
 0x288   : > { %v3395_v11 = vmax.f32 %v3331_v61, 0.0  ;;  %v4069_v17 = vadd.f32 %v7348_v36, %v4005_v54  ;;  %v3336_v25 = vadd.f32 %v7348_v36, %v3272_v27  ;;  %v4010_v58 = vmul.f32 %v7333_v56, %v3906_v55  ;;  %v8017_v27 = vld [vmem:[#allocation28_spill] sm:$0xff] }
 0x289   : > { %v3270_v59 = vmul.f32 %v7333_v56, %v3160_v21  ;;  %4261 = vst.msk [vmem:[%s7035_s11 + $0x160] sm:$0xff] %vm4216_vm2, %v4196_v4  ;;  %v4199_v31 = vmax.f32 %v3461_v24, %v4135_v42  ;;  %v3898_v37 = vadd.f32 %v7295_v19, %v7528_v20  ;;  %v3171_v45 = vadd.f32 %v7295_v19, %v7530_v10 }
 0x28a   : > { %v3459_v60 = vmax.f32 %v8015_v44, %v3395_v11  ;;  %v4133_v49 = vmax.f32 %v4069_v17, 0.0  ;;  %v3400_v46 = vmax.f32 %v3336_v25, 0.0  ;;  %v4074_v2 = vadd.f32 %v7348_v36, %v4010_v58  ;;  %v8018_v58 = vld [vmem:[#allocation29_spill] sm:$0xff] }
 0x28b   : > { %v3334_v50 = vadd.f32 %v7348_v36, %v3270_v59  ;;  %4264 = vst.msk [vmem:[%s7035_s11 + $0x178] sm:$0xff] %vm4216_vm2, %v4199_v31  ;;  %v4008_v12 = vmul.f32 %v7333_v56, %v3898_v37  ;;  %v3273_v48 = vmul.f32 %v7333_v56, %v3171_v45  ;;  %v3909_v15 = vadd.f32 %v7295_v19, %v7539_v34 }
 0x28c   : > { %v3163_v20 = vadd.f32 %v7295_v19, %v7541_v57  ;;  %v4197_v10 = vmax.f32 %v3459_v60, %v4133_v49  ;;  %v3464_v53 = vmax.f32 %v8016_v47, %v3400_v46  ;;  %v4138_v18 = vmax.f32 %v4074_v2, 0.0  ;;  %v8019_v46 = vld [vmem:[#allocation30_spill] sm:$0xff] }
 0x28d   : > { %v3398_v14 = vmax.f32 %v3334_v50, 0.0  ;;  %v4072_v5 = vadd.f32 %v7348_v36, %v4008_v12  ;;  %v3337_v29 = vadd.f32 %v7348_v36, %v3273_v48  ;;  %v4011_v61 = vmul.f32 %v7333_v56, %v3909_v15 }
 0x28e   : > { %v3271_v54 = vmul.f32 %v7333_v56, %v3163_v20  ;;  %4262 = vst.msk [vmem:[%s7035_s11 + $0x168] sm:$0xff] %vm4216_vm2, %v4197_v10  ;;  %v4202_v34 = vmax.f32 %v3464_v53, %v4138_v18  ;;  %v3901_v57 = vadd.f32 %v7295_v19, %v7545_v3  ;;  %v3184_v21 = vadd.f32 %v7295_v19, %v7567_v16  ;;  %v8020_v18 = vld [vmem:[#allocation31_spill] sm:$0xff] }
 0x28f   : > { %v3462_v55 = vmax.f32 %v8017_v27, %v3398_v14  ;;  %v4136_v4 = vmax.f32 %v4072_v5, 0.0  ;;  %v3401_v41 = vmax.f32 %v3337_v29, 0.0  ;;  %v4075_v24 = vadd.f32 %v7348_v36, %v4011_v61 }
 0x290   : > { %v3335_v42 = vadd.f32 %v7348_v36, %v3271_v54  ;;  %4267 = vst.msk [vmem:[%s7035_s11 + $0x190] sm:$0xff] %vm4216_vm2, %v4202_v34  ;;  %v4009_v11 = vmul.f32 %v7333_v56, %v3901_v57  ;;  %v3276_v17 = vmul.f32 %v7333_v56, %v3184_v21  ;;  %v3922_v25 = vadd.f32 %v7295_v19, %v7571_v62 }
 0x291   : > { %v3176_v3 = vadd.f32 %v7295_v19, %v7573_v26  ;;  %v4200_v16 = vmax.f32 %v3462_v55, %v4136_v4  ;;  %v3465_v59 = vmax.f32 %v8018_v58, %v3401_v41  ;;  %v4139_v31 = vmax.f32 %v4075_v24, 0.0  ;;  %v8021_v55 = vld [vmem:[#allocation32_spill] sm:$0xff] }
 0x292   : > { %v3399_v44 = vmax.f32 %v3335_v42, 0.0  ;;  %v4073_v60 = vadd.f32 %v7348_v36, %v4009_v11  ;;  %v3340_v37 = vadd.f32 %v7348_v36, %v3276_v17  ;;  %v4014_v45 = vmul.f32 %v7333_v56, %v3922_v25 }
 0x293   : > { %v3274_v49 = vmul.f32 %v7333_v56, %v3176_v3  ;;  %4265 = vst.msk [vmem:[%s7035_s11 + $0x180] sm:$0xff] %vm4216_vm2, %v4200_v16  ;;  %v4203_v62 = vmax.f32 %v3465_v59, %v4139_v31  ;;  %v3914_v26 = vadd.f32 %v7295_v19, %v7583_v9  ;;  %v3187_v50 = vadd.f32 %v7295_v19, %v7585_v35  ;;  %v8022_v3 = vld [vmem:[#allocation33_spill] sm:$0xff] }
 0x294   : > { %v3463_v2 = vmax.f32 %v8019_v46, %v3399_v44  ;;  %v4137_v12 = vmax.f32 %v4073_v60, 0.0  ;;  %v3404_v48 = vmax.f32 %v3340_v37, 0.0  ;;  %v4078_v15 = vadd.f32 %v7348_v36, %v4014_v45  ;;  %v8023_v45 = vld [vmem:[#allocation34_spill] sm:$0xff] }
 0x295   : > { %v3338_v20 = vadd.f32 %v7348_v36, %v3274_v49  ;;  %4268 = vst.msk [vmem:[%s7035_s11 + $0x198] sm:$0xff] %vm4216_vm2, %v4203_v62  ;;  %v4012_v10 = vmul.f32 %v7333_v56, %v3914_v26  ;;  %v3277_v47 = vmul.f32 %v7333_v56, %v3187_v50  ;;  %v3925_v53 = vadd.f32 %v7295_v19, %v7588_v40 }
 0x296   : > { %v3179_v9 = vadd.f32 %v7295_v19, %v7590_v13  ;;  %v4201_v35 = vmax.f32 %v3463_v2, %v4137_v12  ;;  %v3468_v14 = vmax.f32 %v8020_v18, %v3404_v48  ;;  %v4142_v5 = vmax.f32 %v4078_v15, 0.0 }
 0x297   : > { %v3402_v29 = vmax.f32 %v3338_v20, 0.0  ;;  %v4076_v61 = vadd.f32 %v7348_v36, %v4012_v10  ;;  %v3341_v54 = vadd.f32 %v7348_v36, %v3277_v47  ;;  %v4015_v34 = vmul.f32 %v7333_v56, %v3925_v53  ;;  %v8024_v20 = vld [vmem:[#allocation35_spill] sm:$0xff] }
 0x298   : > { %v3275_v27 = vmul.f32 %v7333_v56, %v3179_v9  ;;  %4266 = vst.msk [vmem:[%s7035_s11 + $0x188] sm:$0xff] %vm4216_vm2, %v4201_v35  ;;  %v4206_v40 = vmax.f32 %v3468_v14, %v4142_v5  ;;  %v3917_v13 = vadd.f32 %v7295_v19, %v7596_v30  ;;  %v3200_v21 = vadd.f32 %v7295_v19, %v7616_v0  ;;  %v8025_v5 = vld [vmem:[#allocation36_spill] sm:$0xff] }
 0x299   : > { %v3466_v57 = vmax.f32 %v8021_v55, %v3402_v29  ;;  %v4140_v4 = vmax.f32 %v4076_v61, 0.0  ;;  %v3405_v41 = vmax.f32 %v3341_v54, 0.0  ;;  %v4079_v24 = vadd.f32 %v7348_v36, %v4015_v34 }
 0x29a   : > { %v3339_v42 = vadd.f32 %v7348_v36, %v3275_v27  ;;  %4271 = vst.msk [vmem:[%s7035_s11 + $0x1b0] sm:$0xff] %vm4216_vm2, %v4206_v40  ;;  %v4013_v11 = vmul.f32 %v7333_v56, %v3917_v13  ;;  %v3280_v17 = vmul.f32 %v7333_v56, %v3200_v21  ;;  %v3938_v25 = vadd.f32 %v7295_v19, %v7622_v1  ;;  %v8026_v21 = vld [vmem:[#allocation37_spill] sm:$0xff] }
 0x29b   : > { %v3192_v30 = vadd.f32 %v7295_v19, %v7624_v8  ;;  %v4204_v0 = vmax.f32 %v3466_v57, %v4140_v4  ;;  %v3469_v16 = vmax.f32 %v8022_v3, %v3405_v41  ;;  %v4143_v58 = vmax.f32 %v4079_v24, 0.0 }
 0x29c   : > { %v3403_v59 = vmax.f32 %v3339_v42, 0.0  ;;  %v4077_v31 = vadd.f32 %v7348_v36, %v4013_v11  ;;  %v3344_v44 = vadd.f32 %v7348_v36, %v3280_v17  ;;  %v4018_v60 = vmul.f32 %v7333_v56, %v3938_v25 }
 0x29d   : > { %v3278_v37 = vmul.f32 %v7333_v56, %v3192_v30  ;;  %4269 = vst.msk [vmem:[%s7035_s11 + $0x1a0] sm:$0xff] %vm4216_vm2, %v4204_v0  ;;  %v4207_v1 = vmax.f32 %v3469_v16, %v4143_v58  ;;  %v3930_v8 = vadd.f32 %v7295_v19, %v7633_v39  ;;  %v3203_v62 = vadd.f32 %v7295_v19, %v7635_v52 }
 0x29e   : > { %v3467_v49 = vmax.f32 %v8023_v45, %v3403_v59  ;;  %v4141_v46 = vmax.f32 %v4077_v31, 0.0  ;;  %v3408_v2 = vmax.f32 %v3344_v44, 0.0  ;;  %v4082_v26 = vadd.f32 %v7348_v36, %v4018_v60  ;;  %v8028_v45 = vld [vmem:[#allocation39_spill] sm:$0xff] }
 0x29f   : > { %v3342_v50 = vadd.f32 %v7348_v36, %v3278_v37  ;;  %4272 = vst.msk [vmem:[%s7035_s11 + $0x1b8] sm:$0xff] %vm4216_vm2, %v4207_v1  ;;  %v4016_v12 = vmul.f32 %v7333_v56, %v3930_v8  ;;  %v3281_v48 = vmul.f32 %v7333_v56, %v3203_v62  ;;  %v3941_v15 = vadd.f32 %v7295_v19, %v7639_v6 }
 0x2a0   : > { %v3195_v39 = vadd.f32 %v7295_v19, %v7641_v28  ;;  %v4205_v52 = vmax.f32 %v3467_v49, %v4141_v46  ;;  %v3472_v10 = vmax.f32 %v8024_v20, %v3408_v2  ;;  %v4146_v47 = vmax.f32 %v4082_v26, 0.0  ;;  %v5141_v2 = vld [vmem:[%s7944_s3] ss:$0 sm:$0xff] }
 0x2a1   : > { %v3406_v53 = vmax.f32 %v3342_v50, 0.0  ;;  %v4080_v9 = vadd.f32 %v7348_v36, %v4016_v12  ;;  %v3345_v35 = vadd.f32 %v7348_v36, %v3281_v48  ;;  %v4019_v18 = vmul.f32 %v7333_v56, %v3941_v15 }
 0x2a2   : > { %v3279_v14 = vmul.f32 %v7333_v56, %v3195_v39  ;;  %4270 = vst.msk [vmem:[%s7035_s11 + $0x1a8] sm:$0xff] %vm4216_vm2, %v4205_v52  ;;  %v4210_v6 = vmax.f32 %v3472_v10, %v4146_v47  ;;  %v3933_v28 = vadd.f32 %v7295_v19, %v7651_v51  ;;  %v3216_v61 = vadd.f32 %v7295_v19, %v7667_v43  ;;  %v5140_v51 = vld [vmem:[%s7943_s2] ss:$0 sm:$0xff]  ;;  %v8030_v47 = vld [vmem:[#allocation41_spill] sm:$0xff] }
 0x2a3   : > { %v3470_v29 = vmax.f32 %v8025_v5, %v3406_v53  ;;  %v4144_v54 = vmax.f32 %v4080_v9, 0.0  ;;  %v3409_v34 = vmax.f32 %v3345_v35, 0.0  ;;  %v4083_v27 = vadd.f32 %v7348_v36, %v4019_v18 }
 0x2a4   : > { %v3343_v40 = vadd.f32 %v7348_v36, %v3279_v14  ;;  %4275 = vst.msk [vmem:[%s7035_s11 + $0x1d0] sm:$0xff] %vm4216_vm2, %v4210_v6  ;;  %v4017_v55 = vmul.f32 %v7333_v56, %v3933_v28  ;;  %v3284_v57 = vmul.f32 %v7333_v56, %v3216_v61  ;;  %v3954_v13 = vadd.f32 %v5140_v51, %v7677_v32  ;;  %v8027_v32 = vld [vmem:[#allocation38_spill] sm:$0xff] }
 0x2a5   : > { %v3208_v19 = vadd.f32 %v5140_v51, %v7679_v7  ;;  %v4208_v43 = vmax.f32 %v3470_v29, %v4144_v54  ;;  %v3473_v4 = vmax.f32 %v8026_v21, %v3409_v34  ;;  %v4147_v41 = vmax.f32 %v4083_v27, 0.0  ;;  %v8031_v14 = vld [vmem:[#allocation42_spill] sm:$0xff] }
 0x2a6   : > { %v3407_v24 = vmax.f32 %v3343_v40, 0.0  ;;  %v4081_v42 = vadd.f32 %v7348_v36, %v4017_v55  ;;  %v3348_v11 = vadd.f32 %v7348_v36, %v3284_v57  ;;  %v4022_v17 = vmul.f32 %v7333_v56, %v3954_v13 }
 0x2a7   : > { %v3282_v25 = vmul.f32 %v7333_v56, %v3208_v19  ;;  %4273 = vst.msk [vmem:[%s7035_s11 + $0x1c0] sm:$0xff] %vm4216_vm2, %v4208_v43  ;;  %v4211_v30 = vmax.f32 %v3473_v4, %v4147_v41  ;;  %v3946_v7 = vadd.f32 %v5140_v51, %v7682_v38  ;;  %v3219_v3 = vadd.f32 %v5140_v51, %v7684_v63 }
 0x2a8   : > { %v3471_v0 = vmax.f32 %v8027_v32, %v3407_v24  ;;  %v4145_v16 = vmax.f32 %v4081_v42, 0.0  ;;  %v3412_v58 = vmax.f32 %v3348_v11, 0.0  ;;  %v4086_v59 = vadd.f32 %v7348_v36, %v4022_v17 }
 0x2a9   : > { %v3346_v31 = vadd.f32 %v7348_v36, %v3282_v25  ;;  %4276 = vst.msk [vmem:[%s7035_s11 + $0x1d8] sm:$0xff] %vm4216_vm2, %v4211_v30  ;;  %v4020_v44 = vmul.f32 %v7333_v56, %v3946_v7  ;;  %v3285_v60 = vmul.f32 %v7333_v56, %v3219_v3  ;;  %v3957_v37 = vadd.f32 %v5140_v51, %v7690_v23 }
 0x2aa   : > { %v3211_v1 = vadd.f32 %v5140_v51, %v7692_v33  ;;  %v4209_v38 = vmax.f32 %v3471_v0, %v4145_v16  ;;  %v3476_v63 = vmax.f32 %v8028_v45, %v3412_v58  ;;  %v4150_v49 = vmax.f32 %v4086_v59, 0.0  ;;  %v8029_v33 = vld [vmem:[#allocation40_spill] sm:$0xff] }
 0x2ab   : > { %v3410_v8 = vmax.f32 %v3346_v31, 0.0  ;;  %v4084_v62 = vadd.f32 %v7348_v36, %v4020_v44  ;;  %v3349_v46 = vadd.f32 %v7348_v36, %v3285_v60  ;;  %v4023_v26 = vmul.f32 %v5141_v2, %v3957_v37  ;;  %v5142_v36 = vld [vmem:[%s7945_s4] ss:$0 sm:$0xff] }
 0x2ac   : > { %v3283_v56 = vmul.f32 %v5141_v2, %v3211_v1  ;;  %4274 = vst.msk [vmem:[%s7035_s11 + $0x1c8] sm:$0xff] %vm4216_vm2, %v4209_v38  ;;  %v4214_v23 = vmax.f32 %v3476_v63, %v4150_v49  ;;  %v3949_v12 = vadd.f32 %v5140_v51, %v7701_v22 }
 0x2ad   : > { %v3474_v50 = vmax.f32 %v8029_v33, %v3410_v8  ;;  %v4148_v48 = vmax.f32 %v4084_v62, 0.0  ;;  %v3413_v15 = vmax.f32 %v3349_v46, 0.0  ;;  %v4087_v39 = vadd.f32 %v5142_v36, %v4023_v26 }
 0x2ae   : > { %v3347_v52 = vadd.f32 %v5142_v36, %v3283_v56  ;;  %4279 = vst.msk [vmem:[%s7035_s11 + $0x1f0] sm:$0xff] %vm4216_vm2, %v4214_v23  ;;  %v4021_v20 = vmul.f32 %v5141_v2, %v3949_v12 }
 0x2af   : > { %v4212_v10 = vmax.f32 %v3474_v50, %v4148_v48  ;;  %v3477_v53 = vmax.f32 %v8030_v47, %v3413_v15  ;;  %v4151_v9 = vmax.f32 %v4087_v39, 0.0 }
 0x2b0   : > { %v3411_v35 = vmax.f32 %v3347_v52, 0.0  ;;  %v4085_v18 = vadd.f32 %v5142_v36, %v4021_v20 }
 0x2b1   : > { %4277 = vst.msk [vmem:[%s7035_s11 + $0x1e0] sm:$0xff] %vm4216_vm2, %v4212_v10  ;;  %v4215_v22 = vmax.f32 %v3477_v53, %v4151_v9 }
 0x2b2   : > { %v3475_v6 = vmax.f32 %v8031_v14, %v3411_v35  ;;  %v4149_v5 = vmax.f32 %v4085_v18, 0.0 }
 0x2b3   : > { %4280 = vst.msk [vmem:[%s7035_s11 + $0x1f8] sm:$0xff] %vm4216_vm2, %v4215_v22 }
 0x2b4   : > { %v4213_v29 = vmax.f32 %v3475_v6, %v4149_v5 }
 0x2b6   : > { %4278 = vst.msk [vmem:[%s7035_s11 + $0x1e8] sm:$0xff] %vm4216_vm2, %v4213_v29 }
 0x2b7 PF: > { %p12_p9 = scmp.ge.s32.totalorder %s5214_s22, 6   ;;  %s8032_s18 = smov %s5161_s19 }
 0x2b8   : > { %s8033_s19 = smov %s5223_s25  ;;  %s8034_s20 = smov %s5214_s22 }
 0x2b9   :  { %14 = sbr.rel (!%p12_p9) target bundleno = 2 (0x2), region = 116 }

// kernel: stem_forward.4
= control target key start
LH: loop header
LB: loop body
LE: loop exit
PB: predicated region body
PF: predicated region fallthrough
CT: control target
= control target key end

     0   :  { %v1030_v0 = vmov 0   ;;  %vm286_vm0 = vcmask 154624   ;;  %vm383_vm1 = vcmask 1040384   ;;  %vm384_vm2 = vcmask 1041408   ;;  %s1917_s1 = inlined_call_operand.vmem [shape: bf16[147,64], index: 1, kind: input, shape index: {}]   ;;  %s1918_s0 = inlined_call_operand.vmem [shape: f32[512,147], index: 0, kind: input, shape index: {}]   ;;  %s1919_s2 = inlined_call_operand.vmem [shape: f32[1,64], index: 2, kind: input, shape index: {}]   ;;  %s1920_s3 = inlined_call_operand.vmem [shape: f32[1,64], index: 3, kind: input, shape index: {}]   ;;  %s1921_s4 = inlined_call_operand.vmem [shape: f32[512,64], index: 4, kind: output, shape index: {}]  }
   0x1   :  { %390 = vmatprep.subr.bf16.mxu0 %v1030_v0  ;;  %998 = vmatprep.subr.bf16.mxu1 %v1030_v0  ;;  %v1020_v1 = vld [vmem:[%s1917_s1] sm:$0xff]   ;;  %v1021_v2 = vld [vmem:[%s1917_s1 + $0x8] sm:$0xff]   ;;  %v1022_v3 = vld [vmem:[%s1917_s1 + $0x10] sm:$0xff]   ;;  %v1031_v15 = vmov 65535   ;;  %vm885_vm3 = vcmask 523264  }
   0x2   :  { %391 = vmatpush1.bf16.msra.mxu0 %v1020_v1  ;;  %1008 = vmatpush1.bf16.msra.mxu1 %v1020_v1  ;;  %v1023_v4 = vld [vmem:[%s1917_s1 + $0x18] sm:$0xff]   ;;  %v19_v5 = vld [vmem:[%s1918_s0 + $0x8] sm:$0xff]  ;;  %v1024_v11 = vld [vmem:[%s1917_s1 + $0x20] sm:$0xff]   ;;  %v385_v16 = vsel %vm383_vm1, 4294967295, %v1031_v15 }
   0x3   :  { %392 = vmatprep.subr.bf16.mxu0 %v1030_v0  ;;  %999 = vmatprep.subr.bf16.mxu1 %v1030_v0  ;;  %v21_v6 = vld [vmem:[%s1918_s0 + $0x18] sm:$0xff]  ;;  %v83_v7 = vld [vmem:[%s1918_s0 + $0x208] sm:$0xff]  ;;  %v1026_v13 = vld [vmem:[%s1917_s1 + $0x30] sm:$0xff]   ;;  %v386_v19 = vsel %vm384_vm2, %v385_v16, 0 }
   0x4   :  { %v85_v8 = vld [vmem:[%s1918_s0 + $0x218] sm:$0xff]  ;;  %v147_v9 = vpack.c.bf16 %v21_v6, %v19_v5  ;;  %v1025_v12 = vld [vmem:[%s1917_s1 + $0x28] sm:$0xff]   ;;  %v1028_v17 = vld [vmem:[%s1917_s1 + $0x40] sm:$0xff]  }
   0x5   :  { %v179_v10 = vpack.c.bf16 %v85_v8, %v83_v7  ;;  %v1027_v14 = vld [vmem:[%s1917_s1 + $0x38] sm:$0xff]   ;;  %v1029_v18 = vld [vmem:[%s1917_s1 + $0x48] ss:$0 sps:$4 sm:$0x33]   ;;  %v18_v20 = vld [vmem:[%s1918_s0] sm:$0xff] }
   0x6   :  { %393 = vmatpush1.bf16.msra.mxu0 %v1021_v2  ;;  %1009 = vmatpush1.bf16.msra.mxu1 %v1021_v2  ;;  %v20_v21 = vld [vmem:[%s1918_s0 + $0x10] sm:$0xff]  ;;  %v388_v22 = vand.u32 %v1029_v18, %v386_v19  ;;  %v82_v23 = vld [vmem:[%s1918_s0 + $0x200] sm:$0xff]  ;;  %v23_v25 = vld [vmem:[%s1918_s0 + $0x28] sm:$0xff] }
   0x7   :  { %394 = vmatprep.subr.bf16.mxu0 %v1030_v0  ;;  %1000 = vmatprep.subr.bf16.mxu1 %v1030_v0  ;;  %v84_v24 = vld [vmem:[%s1918_s0 + $0x210] sm:$0xff]  ;;  %v25_v26 = vld [vmem:[%s1918_s0 + $0x38] sm:$0xff]  ;;  %v87_v27 = vld [vmem:[%s1918_s0 + $0x228] sm:$0xff]  ;;  %v146_v29 = vpack.c.bf16 %v20_v21, %v18_v20 }
   0x8   :  { %964 = vmatprep.mubr.msk.bf16.mxu0 %vm286_vm0, %v147_v9  ;;  %980 = vmatprep.mubr.msk.bf16.mxu1 %vm286_vm0, %v179_v10  ;;  %v89_v28 = vld [vmem:[%s1918_s0 + $0x238] sm:$0xff]  ;;  %v178_v30 = vpack.c.bf16 %v84_v24, %v82_v23  ;;  %v149_v31 = vpack.c.bf16 %v25_v26, %v23_v25  ;;  %v22_v33 = vld [vmem:[%s1918_s0 + $0x20] sm:$0xff]  ;;  %v24_v34 = vld [vmem:[%s1918_s0 + $0x30] sm:$0xff] }
   0x9   :  { %v181_v32 = vpack.c.bf16 %v89_v28, %v87_v27  ;;  %v86_v35 = vld [vmem:[%s1918_s0 + $0x220] sm:$0xff]  ;;  %v88_v36 = vld [vmem:[%s1918_s0 + $0x230] sm:$0xff]  ;;  %v27_v37 = vld [vmem:[%s1918_s0 + $0x48] sm:$0xff]  ;;  %v148_v41 = vpack.c.bf16 %v24_v34, %v22_v33 }
   0xa   :  { %395 = vmatpush1.bf16.msra.mxu0 %v1022_v3  ;;  %1010 = vmatpush1.bf16.msra.mxu1 %v1022_v3  ;;  %v29_v38 = vld [vmem:[%s1918_s0 + $0x58] sm:$0xff]  ;;  %v91_v39 = vld [vmem:[%s1918_s0 + $0x248] sm:$0xff]  ;;  %v180_v42 = vpack.c.bf16 %v88_v36, %v86_v35  ;;  %v26_v45 = vld [vmem:[%s1918_s0 + $0x40] sm:$0xff] }
   0xb   :  { %396 = vmatprep.subr.bf16.mxu0 %v1030_v0  ;;  %1001 = vmatprep.subr.bf16.mxu1 %v1030_v0  ;;  %v93_v40 = vld [vmem:[%s1918_s0 + $0x258] sm:$0xff]  ;;  %v151_v43 = vpack.c.bf16 %v29_v38, %v27_v37  ;;  %v28_v46 = vld [vmem:[%s1918_s0 + $0x50] sm:$0xff]  ;;  %v90_v47 = vld [vmem:[%s1918_s0 + $0x240] sm:$0xff] }
   0xc   :  { %v183_v44 = vpack.c.bf16 %v93_v40, %v91_v39  ;;  %v92_v48 = vld [vmem:[%s1918_s0 + $0x250] sm:$0xff]  ;;  %v31_v49 = vld [vmem:[%s1918_s0 + $0x68] sm:$0xff]  ;;  %v33_v50 = vld [vmem:[%s1918_s0 + $0x78] sm:$0xff]  ;;  %v150_v53 = vpack.c.bf16 %v28_v46, %v26_v45 }
   0xd   :  { %v95_v51 = vld [vmem:[%s1918_s0 + $0x268] sm:$0xff]  ;;  %v97_v52 = vld [vmem:[%s1918_s0 + $0x278] sm:$0xff]  ;;  %v182_v54 = vpack.c.bf16 %v92_v48, %v90_v47  ;;  %v153_v55 = vpack.c.bf16 %v33_v50, %v31_v49  ;;  %v30_v57 = vld [vmem:[%s1918_s0 + $0x60] sm:$0xff] }
   0xe   :  { %397 = vmatpush1.bf16.msra.mxu0 %v1023_v4  ;;  %1011 = vmatpush1.bf16.msra.mxu1 %v1023_v4  ;;  %v185_v56 = vpack.c.bf16 %v97_v52, %v95_v51  ;;  %v32_v58 = vld [vmem:[%s1918_s0 + $0x70] sm:$0xff]  ;;  %v94_v59 = vld [vmem:[%s1918_s0 + $0x260] sm:$0xff]  ;;  %v35_v61 = vld [vmem:[%s1918_s0 + $0x88] sm:$0xff] }
   0xf   :  { %398 = vmatprep.subr.bf16.mxu0 %v1030_v0  ;;  %1002 = vmatprep.subr.bf16.mxu1 %v1030_v0  ;;  %v96_v60 = vld [vmem:[%s1918_s0 + $0x270] sm:$0xff]  ;;  %v37_v62 = vld [vmem:[%s1918_s0 + $0x98] sm:$0xff]  ;;  %v99_v63 = vld [vmem:[%s1918_s0 + $0x288] sm:$0xff]  ;;  %v152_v1 = vpack.c.bf16 %v32_v58, %v30_v57 }
  0x10   :  { %v184_v2 = vpack.c.bf16 %v96_v60, %v94_v59  ;;  %v155_v3 = vpack.c.bf16 %v37_v62, %v35_v61  ;;  %v34_v5 = vld [vmem:[%s1918_s0 + $0x80] sm:$0xff]  ;;  %v36_v6 = vld [vmem:[%s1918_s0 + $0x90] sm:$0xff]  ;;  %v39_v9 = vld [vmem:[%s1918_s0 + $0xa8] sm:$0xff] }
  0x11   :  { %v98_v7 = vld [vmem:[%s1918_s0 + $0x280] sm:$0xff]  ;;  %v100_v8 = vld [vmem:[%s1918_s0 + $0x290] sm:$0xff]  ;;  %v41_v10 = vld [vmem:[%s1918_s0 + $0xb8] sm:$0xff] }
  0x12   :  { %399 = vmatpush1.bf16.msra.mxu0 %v1024_v11  ;;  %1012 = vmatpush1.bf16.msra.mxu1 %v1024_v11  ;;  %v103_v11 = vld [vmem:[%s1918_s0 + $0x2a8] sm:$0xff]  ;;  %v157_v15 = vpack.c.bf16 %v41_v10, %v39_v9  ;;  %v40_v18 = vld [vmem:[%s1918_s0 + $0xb0] sm:$0xff]  ;;  %v102_v19 = vld [vmem:[%s1918_s0 + $0x2a0] sm:$0xff] }
  0x13   :  { %400 = vmatprep.subr.bf16.mxu0 %v1030_v0  ;;  %1003 = vmatprep.subr.bf16.mxu1 %v1030_v0  ;;  %v104_v20 = vld [vmem:[%s1918_s0 + $0x2b0] sm:$0xff]  ;;  %v43_v21 = vld [vmem:[%s1918_s0 + $0xc8] sm:$0xff]  ;;  %v109_v24 = vld [vmem:[%s1918_s0 + $0x2d8] sm:$0xff] }
  0x14   :  { %v107_v23 = vld [vmem:[%s1918_s0 + $0x2c8] sm:$0xff]  ;;  %v188_v26 = vpack.c.bf16 %v104_v20, %v102_v19  ;;  %v49_v34 = vld [vmem:[%s1918_s0 + $0xf8] sm:$0xff] }
  0x15   :  { %v191_v28 = vpack.c.bf16 %v109_v24, %v107_v23  ;;  %v47_v33 = vld [vmem:[%s1918_s0 + $0xe8] sm:$0xff]  ;;  %v113_v36 = vld [vmem:[%s1918_s0 + $0x2f8] sm:$0xff] }
  0x16   :  { %401 = vmatpush1.bf16.msra.mxu0 %v1025_v12  ;;  %1013 = vmatpush1.bf16.msra.mxu1 %v1025_v12  ;;  %v105_v12 = vld [vmem:[%s1918_s0 + $0x2b8] sm:$0xff]  ;;  %v111_v35 = vld [vmem:[%s1918_s0 + $0x2e8] sm:$0xff]  ;;  %v161_v39 = vpack.c.bf16 %v49_v34, %v47_v33 }
  0x17   :  { %402 = vmatprep.subr.bf16.mxu0 %v1030_v0  ;;  %1004 = vmatprep.subr.bf16.mxu1 %v1030_v0  ;;  %v189_v16 = vpack.c.bf16 %v105_v12, %v103_v11  ;;  %v193_v40 = vpack.c.bf16 %v113_v36, %v111_v35  ;;  %v51_v45 = vld [vmem:[%s1918_s0 + $0x108] sm:$0xff]  ;;  %v53_v46 = vld [vmem:[%s1918_s0 + $0x118] sm:$0xff] }
  0x18   :  { %v115_v47 = vld [vmem:[%s1918_s0 + $0x308] sm:$0xff]  ;;  %v117_v48 = vld [vmem:[%s1918_s0 + $0x318] sm:$0xff]  ;;  %v163_v51 = vpack.c.bf16 %v53_v46, %v51_v45 }
  0x19   :  { %v195_v52 = vpack.c.bf16 %v117_v48, %v115_v47  ;;  %v55_v57 = vld [vmem:[%s1918_s0 + $0x128] sm:$0xff]  ;;  %v57_v58 = vld [vmem:[%s1918_s0 + $0x138] sm:$0xff] }
  0x1a   :  { %403 = vmatpush1.bf16.msra.mxu0 %v1026_v13  ;;  %1014 = vmatpush1.bf16.msra.mxu1 %v1026_v13  ;;  %v154_v13 = vpack.c.bf16 %v36_v6, %v34_v5  ;;  %v119_v59 = vld [vmem:[%s1918_s0 + $0x328] sm:$0xff]  ;;  %v121_v60 = vld [vmem:[%s1918_s0 + $0x338] sm:$0xff] }
  0x1b   :  { %404 = vmatprep.subr.bf16.mxu0 %v1030_v0  ;;  %1005 = vmatprep.subr.bf16.mxu1 %v1030_v0  ;;  %v59_v5 = vld [vmem:[%s1918_s0 + $0x148] sm:$0xff]  ;;  %v61_v6 = vld [vmem:[%s1918_s0 + $0x158] sm:$0xff] }
  0x1c   :  { %v167_v11 = vpack.c.bf16 %v61_v6, %v59_v5  ;;  %v127_v19 = vld [vmem:[%s1918_s0 + $0x368] sm:$0xff]  ;;  %v129_v20 = vld [vmem:[%s1918_s0 + $0x378] sm:$0xff] }
  0x1d   :  { %v201_v24 = vpack.c.bf16 %v129_v20, %v127_v19 }
  0x1e   :  { %405 = vmatpush1.bf16.msra.mxu0 %v1027_v14  ;;  %1015 = vmatpush1.bf16.msra.mxu1 %v1027_v14  ;;  %v186_v14 = vpack.c.bf16 %v100_v8, %v98_v7  ;;  %v123_v7 = vld [vmem:[%s1918_s0 + $0x348] sm:$0xff]  ;;  %v125_v8 = vld [vmem:[%s1918_s0 + $0x358] sm:$0xff] }
  0x1f   :  { %406 = vmatprep.subr.bf16.mxu0 %v1030_v0  ;;  %1006 = vmatprep.subr.bf16.mxu1 %v1030_v0  ;;  %v199_v12 = vpack.c.bf16 %v125_v8, %v123_v7 }
  0x22   :  { %407 = vmatpush1.bf16.msra.mxu0 %v1028_v17  ;;  %1016 = vmatpush1.bf16.msra.mxu1 %v1028_v17  ;;  %v38_v17 = vld [vmem:[%s1918_s0 + $0xa0] sm:$0xff] }
  0x23   :  { %408 = vmatprep.subr.bf16.mxu0 %v1030_v0  ;;  %1007 = vmatprep.subr.bf16.mxu1 %v1030_v0  ;;  %v101_v0 = vld [vmem:[%s1918_s0 + $0x298] sm:$0xff]  ;;  %v156_v25 = vpack.c.bf16 %v40_v18, %v38_v17  ;;  %v63_v17 = vld [vmem:[%s1918_s0 + $0x168] sm:$0xff] }
  0x24   :  { %v187_v4 = vpack.c.bf16 %v101_v0, %v99_v63  ;;  %v165_v63 = vpack.c.bf16 %v57_v58, %v55_v57  ;;  %v197_v0 = vpack.c.bf16 %v121_v60, %v119_v59  ;;  %v65_v18 = vld [vmem:[%s1918_s0 + $0x178] sm:$0xff] }
  0x25   :  { %v169_v23 = vpack.c.bf16 %v65_v18, %v63_v17  ;;  %v1531_v17 = vld [vmem:[%s1920_s3] ss:$0 sm:$0xff] }
  0x26   :  { %409 = vmatpush1.bf16.msra.mxu0 %v388_v22  ;;  %1017 = vmatpush1.bf16.msra.mxu1 %v388_v22  ;;  %v45_v22 = vld [vmem:[%s1918_s0 + $0xd8] sm:$0xff] }
  0x27   :  { %v159_v27 = vpack.c.bf16 %v45_v22, %v43_v21 }
  0x29   :  { %423 = vmatmul.mubr.bf16.vlgmr.msra.gmra.mrb[0].mxu0 %v146_v29  ;;  %551 = vmatmul.mubr.bf16.vlgmr.msra.gmra.mrb[0].mxu1 %v178_v30  ;;  %v42_v29 = vld [vmem:[%s1918_s0 + $0xc0] sm:$0xff]  ;;  %v44_v30 = vld [vmem:[%s1918_s0 + $0xd0] sm:$0xff] }
  0x2a   :  { %965 = vmatprep.mubr.msk.bf16.mxu0 %vm286_vm0, %v149_v31  ;;  %981 = vmatprep.mubr.msk.bf16.mxu1 %vm286_vm0, %v181_v32  ;;  %v106_v31 = vld [vmem:[%s1918_s0 + $0x2c0] sm:$0xff]  ;;  %v108_v32 = vld [vmem:[%s1918_s0 + $0x2d0] sm:$0xff]  ;;  %v158_v37 = vpack.c.bf16 %v44_v30, %v42_v29  ;;  %v67_v29 = vld [vmem:[%s1918_s0 + $0x188] sm:$0xff] }
  0x2b   :  { %v190_v38 = vpack.c.bf16 %v108_v32, %v106_v31  ;;  %v69_v30 = vld [vmem:[%s1918_s0 + $0x198] sm:$0xff]  ;;  %v131_v31 = vld [vmem:[%s1918_s0 + $0x388] sm:$0xff] }
  0x2c   :  { %v133_v32 = vld [vmem:[%s1918_s0 + $0x398] sm:$0xff]  ;;  %v171_v35 = vpack.c.bf16 %v69_v30, %v67_v29 }
  0x2d   :  { %v203_v36 = vpack.c.bf16 %v133_v32, %v131_v31 }
  0x31   :  { %431 = vmatmul.mubr.bf16.gmra.mrb[4].mxu0 %v148_v41  ;;  %559 = vmatmul.mubr.bf16.gmra.mrb[4].mxu1 %v180_v42  ;;  %v46_v41 = vld [vmem:[%s1918_s0 + $0xe0] sm:$0xff]  ;;  %v48_v42 = vld [vmem:[%s1918_s0 + $0xf0] sm:$0xff] }
  0x32   :  { %966 = vmatprep.mubr.msk.bf16.mxu0 %vm286_vm0, %v151_v43  ;;  %982 = vmatprep.mubr.msk.bf16.mxu1 %vm286_vm0, %v183_v44  ;;  %v110_v43 = vld [vmem:[%s1918_s0 + $0x2e0] sm:$0xff]  ;;  %v112_v44 = vld [vmem:[%s1918_s0 + $0x2f0] sm:$0xff]  ;;  %v160_v49 = vpack.c.bf16 %v48_v42, %v46_v41  ;;  %v71_v41 = vld [vmem:[%s1918_s0 + $0x1a8] sm:$0xff] }
  0x33   :  { %v192_v50 = vpack.c.bf16 %v112_v44, %v110_v43  ;;  %v73_v42 = vld [vmem:[%s1918_s0 + $0x1b8] sm:$0xff]  ;;  %v135_v43 = vld [vmem:[%s1918_s0 + $0x3a8] sm:$0xff] }
  0x34   :  { %v137_v44 = vld [vmem:[%s1918_s0 + $0x3b8] sm:$0xff]  ;;  %v173_v47 = vpack.c.bf16 %v73_v42, %v71_v41 }
  0x35   :  { %v205_v48 = vpack.c.bf16 %v137_v44, %v135_v43 }
  0x39   :  { %439 = vmatmul.mubr.bf16.gmra.mrb[8].mxu0 %v150_v53  ;;  %567 = vmatmul.mubr.bf16.gmra.mrb[8].mxu1 %v182_v54  ;;  %v50_v53 = vld [vmem:[%s1918_s0 + $0x100] sm:$0xff]  ;;  %v52_v54 = vld [vmem:[%s1918_s0 + $0x110] sm:$0xff] }
  0x3a   :  { %967 = vmatprep.mubr.msk.bf16.mxu0 %vm286_vm0, %v153_v55  ;;  %983 = vmatprep.mubr.msk.bf16.mxu1 %vm286_vm0, %v185_v56  ;;  %v114_v55 = vld [vmem:[%s1918_s0 + $0x300] sm:$0xff]  ;;  %v116_v56 = vld [vmem:[%s1918_s0 + $0x310] sm:$0xff]  ;;  %v162_v61 = vpack.c.bf16 %v52_v54, %v50_v53  ;;  %v75_v53 = vld [vmem:[%s1918_s0 + $0x1c8] sm:$0xff] }
  0x3b   :  { %v194_v62 = vpack.c.bf16 %v116_v56, %v114_v55  ;;  %v77_v54 = vld [vmem:[%s1918_s0 + $0x1d8] sm:$0xff]  ;;  %v139_v55 = vld [vmem:[%s1918_s0 + $0x3c8] sm:$0xff] }
  0x3c   :  { %v141_v56 = vld [vmem:[%s1918_s0 + $0x3d8] sm:$0xff]  ;;  %v175_v59 = vpack.c.bf16 %v77_v54, %v75_v53 }
  0x3d   :  { %v207_v60 = vpack.c.bf16 %v141_v56, %v139_v55 }
  0x41   :  { %447 = vmatmul.mubr.bf16.gmra.mrb[12].mxu0 %v152_v1  ;;  %575 = vmatmul.mubr.bf16.gmra.mrb[12].mxu1 %v184_v2  ;;  %v54_v1 = vld [vmem:[%s1918_s0 + $0x120] sm:$0xff]  ;;  %v56_v2 = vld [vmem:[%s1918_s0 + $0x130] sm:$0xff] }
  0x42   :  { %968 = vmatprep.mubr.msk.bf16.mxu0 %vm286_vm0, %v155_v3  ;;  %984 = vmatprep.mubr.msk.bf16.mxu1 %vm286_vm0, %v187_v4  ;;  %v118_v3 = vld [vmem:[%s1918_s0 + $0x320] sm:$0xff]  ;;  %v120_v4 = vld [vmem:[%s1918_s0 + $0x330] sm:$0xff]  ;;  %v164_v9 = vpack.c.bf16 %v56_v2, %v54_v1  ;;  %v79_v1 = vld [vmem:[%s1918_s0 + $0x1e8] sm:$0xff] }
  0x43   :  { %v196_v10 = vpack.c.bf16 %v120_v4, %v118_v3  ;;  %v81_v2 = vld [vmem:[%s1918_s0 + $0x1f8] sm:$0xff]  ;;  %v143_v3 = vld [vmem:[%s1918_s0 + $0x3e8] sm:$0xff] }
  0x44   :  { %v145_v4 = vld [vmem:[%s1918_s0 + $0x3f8] sm:$0xff]  ;;  %v177_v7 = vpack.c.bf16 %v81_v2, %v79_v1 }
  0x45   :  { %v209_v8 = vpack.c.bf16 %v145_v4, %v143_v3 }
  0x49   :  { %455 = vmatmul.mubr.bf16.gmra.mrb[16].mxu0 %v154_v13  ;;  %583 = vmatmul.mubr.bf16.gmra.mrb[16].mxu1 %v186_v14  ;;  %v58_v13 = vld [vmem:[%s1918_s0 + $0x140] sm:$0xff]  ;;  %v60_v14 = vld [vmem:[%s1918_s0 + $0x150] sm:$0xff] }
  0x4a   :  { %969 = vmatprep.mubr.msk.bf16.mxu0 %vm286_vm0, %v157_v15  ;;  %985 = vmatprep.mubr.msk.bf16.mxu1 %vm286_vm0, %v189_v16  ;;  %v122_v15 = vld [vmem:[%s1918_s0 + $0x340] sm:$0xff]  ;;  %v124_v16 = vld [vmem:[%s1918_s0 + $0x350] sm:$0xff]  ;;  %v166_v21 = vpack.c.bf16 %v60_v14, %v58_v13 }
  0x4b   :  { %v198_v22 = vpack.c.bf16 %v124_v16, %v122_v15  ;;  %v1526_v15 = vld [vmem:[%s1919_s2] ss:$0 sm:$0xff] }
  0x51   :  { %463 = vmatmul.mubr.bf16.gmra.mrb[20].mxu0 %v156_v25  ;;  %591 = vmatmul.mubr.bf16.gmra.mrb[20].mxu1 %v188_v26  ;;  %v62_v25 = vld [vmem:[%s1918_s0 + $0x160] sm:$0xff]  ;;  %v64_v26 = vld [vmem:[%s1918_s0 + $0x170] sm:$0xff] }
  0x52   :  { %970 = vmatprep.mubr.msk.bf16.mxu0 %vm286_vm0, %v159_v27  ;;  %986 = vmatprep.mubr.msk.bf16.mxu1 %vm286_vm0, %v191_v28  ;;  %v126_v27 = vld [vmem:[%s1918_s0 + $0x360] sm:$0xff]  ;;  %v128_v28 = vld [vmem:[%s1918_s0 + $0x370] sm:$0xff]  ;;  %v168_v33 = vpack.c.bf16 %v64_v26, %v62_v25 }
  0x53   :  { %v200_v34 = vpack.c.bf16 %v128_v28, %v126_v27 }
  0x59   :  { %471 = vmatmul.mubr.bf16.gmra.mrb[24].mxu0 %v158_v37  ;;  %599 = vmatmul.mubr.bf16.gmra.mrb[24].mxu1 %v190_v38  ;;  %v66_v37 = vld [vmem:[%s1918_s0 + $0x180] sm:$0xff]  ;;  %v68_v38 = vld [vmem:[%s1918_s0 + $0x190] sm:$0xff] }
  0x5a   :  { %971 = vmatprep.mubr.msk.bf16.mxu0 %vm286_vm0, %v161_v39  ;;  %987 = vmatprep.mubr.msk.bf16.mxu1 %vm286_vm0, %v193_v40  ;;  %v130_v39 = vld [vmem:[%s1918_s0 + $0x380] sm:$0xff]  ;;  %v132_v40 = vld [vmem:[%s1918_s0 + $0x390] sm:$0xff]  ;;  %v170_v45 = vpack.c.bf16 %v68_v38, %v66_v37 }
  0x5b   :  { %v202_v46 = vpack.c.bf16 %v132_v40, %v130_v39 }
  0x61   :  { %479 = vmatmul.mubr.bf16.gmra.mrb[28].mxu0 %v160_v49  ;;  %607 = vmatmul.mubr.bf16.gmra.mrb[28].mxu1 %v192_v50  ;;  %v70_v49 = vld [vmem:[%s1918_s0 + $0x1a0] sm:$0xff]  ;;  %v72_v50 = vld [vmem:[%s1918_s0 + $0x1b0] sm:$0xff] }
  0x62   :  { %972 = vmatprep.mubr.msk.bf16.mxu0 %vm286_vm0, %v163_v51  ;;  %988 = vmatprep.mubr.msk.bf16.mxu1 %vm286_vm0, %v195_v52  ;;  %v134_v51 = vld [vmem:[%s1918_s0 + $0x3a0] sm:$0xff]  ;;  %v136_v52 = vld [vmem:[%s1918_s0 + $0x3b0] sm:$0xff]  ;;  %v172_v57 = vpack.c.bf16 %v72_v50, %v70_v49 }
  0x63   :  { %v204_v58 = vpack.c.bf16 %v136_v52, %v134_v51 }
  0x69   :  { %487 = vmatmul.mubr.bf16.gmra.mrb[32].mxu0 %v162_v61  ;;  %615 = vmatmul.mubr.bf16.gmra.mrb[32].mxu1 %v194_v62  ;;  %v74_v61 = vld [vmem:[%s1918_s0 + $0x1c0] sm:$0xff]  ;;  %v76_v62 = vld [vmem:[%s1918_s0 + $0x1d0] sm:$0xff] }
  0x6a   :  { %973 = vmatprep.mubr.msk.bf16.mxu0 %vm286_vm0, %v165_v63  ;;  %989 = vmatprep.mubr.msk.bf16.mxu1 %vm286_vm0, %v197_v0  ;;  %v138_v63 = vld [vmem:[%s1918_s0 + $0x3c0] sm:$0xff]  ;;  %v140_v0 = vld [vmem:[%s1918_s0 + $0x3d0] sm:$0xff]  ;;  %v174_v5 = vpack.c.bf16 %v76_v62, %v74_v61 }
  0x6b   :  { %v206_v6 = vpack.c.bf16 %v140_v0, %v138_v63 }
  0x71   :  { %495 = vmatmul.mubr.bf16.gmra.mrb[36].mxu0 %v164_v9  ;;  %623 = vmatmul.mubr.bf16.gmra.mrb[36].mxu1 %v196_v10  ;;  %v78_v9 = vld [vmem:[%s1918_s0 + $0x1e0] sm:$0xff]  ;;  %v80_v10 = vld [vmem:[%s1918_s0 + $0x1f0] sm:$0xff] }
  0x72   :  { %974 = vmatprep.mubr.msk.bf16.mxu0 %vm286_vm0, %v167_v11  ;;  %990 = vmatprep.mubr.msk.bf16.mxu1 %vm286_vm0, %v199_v12  ;;  %v142_v11 = vld [vmem:[%s1918_s0 + $0x3e0] sm:$0xff]  ;;  %v144_v12 = vld [vmem:[%s1918_s0 + $0x3f0] sm:$0xff]  ;;  %v176_v13 = vpack.c.bf16 %v80_v10, %v78_v9 }
  0x73   :  { %v208_v14 = vpack.c.bf16 %v144_v12, %v142_v11 }
  0x79   :  { %503 = vmatmul.mubr.bf16.gmra.mrb[40].mxu0 %v166_v21  ;;  %631 = vmatmul.mubr.bf16.gmra.mrb[40].mxu1 %v198_v22 }
  0x7a   :  { %975 = vmatprep.mubr.msk.bf16.mxu0 %vm286_vm0, %v169_v23  ;;  %991 = vmatprep.mubr.msk.bf16.mxu1 %vm286_vm0, %v201_v24 }
  0x81   :  { %511 = vmatmul.mubr.bf16.gmra.mrb[44].mxu0 %v168_v33  ;;  %639 = vmatmul.mubr.bf16.gmra.mrb[44].mxu1 %v200_v34 }
  0x82   :  { %976 = vmatprep.mubr.msk.bf16.mxu0 %vm286_vm0, %v171_v35  ;;  %992 = vmatprep.mubr.msk.bf16.mxu1 %vm286_vm0, %v203_v36 }
  0x89   :  { %519 = vmatmul.mubr.bf16.gmra.mrb[48].mxu0 %v170_v45  ;;  %647 = vmatmul.mubr.bf16.gmra.mrb[48].mxu1 %v202_v46 }
  0x8a   :  { %977 = vmatprep.mubr.msk.bf16.mxu0 %vm286_vm0, %v173_v47  ;;  %993 = vmatprep.mubr.msk.bf16.mxu1 %vm286_vm0, %v205_v48 }
  0x91   :  { %527 = vmatmul.mubr.bf16.gmra.mrb[52].mxu0 %v172_v57  ;;  %655 = vmatmul.mubr.bf16.gmra.mrb[52].mxu1 %v204_v58 }
  0x92   :  { %978 = vmatprep.mubr.msk.bf16.mxu0 %vm286_vm0, %v175_v59  ;;  %994 = vmatprep.mubr.msk.bf16.mxu1 %vm286_vm0, %v207_v60 }
  0x99   :  { %535 = vmatmul.mubr.bf16.gmra.mrb[56].mxu0 %v174_v5  ;;  %663 = vmatmul.mubr.bf16.gmra.mrb[56].mxu1 %v206_v6 }
  0x9a   :  { %979 = vmatprep.mubr.msk.bf16.mxu0 %vm286_vm0, %v177_v7  ;;  %995 = vmatprep.mubr.msk.bf16.mxu1 %vm286_vm0, %v209_v8 }
  0xa1   :  { %543 = vmatmul.mubr.bf16.gmra.mrb[60].mxu0 %v176_v13  ;;  %671 = vmatmul.mubr.bf16.gmra.mrb[60].mxu1 %v208_v14 }
  0xfc   :  { %v424_v16 = vpop.f32.mrb[0].mxu0  ;;  %v552_v18 = vpop.f32.mrb[0].mxu1 }
  0xfd   :  { %v686_v19 = vmul.f32 %v1526_v15, %v424_v16  ;;  %v718_v20 = vmul.f32 %v1526_v15, %v552_v18  ;;  %v426_v21 = vpop.f32.mrb[1].mxu0  ;;  %v554_v22 = vpop.f32.mrb[1].mxu1 }
  0xfe   :  { %v427_v23 = vpop.f32.mrb[2].mxu0  ;;  %v555_v24 = vpop.f32.mrb[2].mxu1 }
  0xff   :  { %v757_v25 = vadd.f32 %v1531_v17, %v686_v19  ;;  %v789_v26 = vadd.f32 %v1531_v17, %v718_v20  ;;  %v687_v27 = vmul.f32 %v1526_v15, %v427_v23  ;;  %v719_v28 = vmul.f32 %v1526_v15, %v555_v24  ;;  %v429_v29 = vpop.f32.mrb[3].mxu0  ;;  %v557_v30 = vpop.f32.mrb[3].mxu1 }
 0x101   :  { %v821_v31 = vmax.f32 %v757_v25, 0.0  ;;  %v853_v32 = vmax.f32 %v789_v26, 0.0  ;;  %v758_v33 = vadd.f32 %v1531_v17, %v687_v27  ;;  %v790_v34 = vadd.f32 %v1531_v17, %v719_v28 }
 0x103   :  { %886 = vst.msk [vmem:[%s1921_s4] sm:$0xff] %vm885_vm3, %v821_v31  ;;  %918 = vst.msk [vmem:[%s1921_s4 + $0x100] sm:$0xff] %vm885_vm3, %v853_v32  ;;  %v822_v35 = vmax.f32 %v758_v33, 0.0  ;;  %v854_v36 = vmax.f32 %v790_v34, 0.0 }
 0x104   :  { %v432_v37 = vpop.f32.mrb[4].mxu0  ;;  %v560_v38 = vpop.f32.mrb[4].mxu1 }
 0x105   :  { %887 = vst.msk [vmem:[%s1921_s4 + $0x8] sm:$0xff] %vm885_vm3, %v822_v35  ;;  %919 = vst.msk [vmem:[%s1921_s4 + $0x108] sm:$0xff] %vm885_vm3, %v854_v36  ;;  %v688_v39 = vmul.f32 %v1526_v15, %v432_v37  ;;  %v720_v40 = vmul.f32 %v1526_v15, %v560_v38  ;;  %v434_v41 = vpop.f32.mrb[5].mxu0  ;;  %v562_v42 = vpop.f32.mrb[5].mxu1 }
 0x106   :  { %v435_v43 = vpop.f32.mrb[6].mxu0  ;;  %v563_v44 = vpop.f32.mrb[6].mxu1 }
 0x107   :  { %v759_v45 = vadd.f32 %v1531_v17, %v688_v39  ;;  %v791_v46 = vadd.f32 %v1531_v17, %v720_v40  ;;  %v689_v47 = vmul.f32 %v1526_v15, %v435_v43  ;;  %v721_v48 = vmul.f32 %v1526_v15, %v563_v44  ;;  %v437_v49 = vpop.f32.mrb[7].mxu0  ;;  %v565_v50 = vpop.f32.mrb[7].mxu1 }
 0x109   :  { %v823_v51 = vmax.f32 %v759_v45, 0.0  ;;  %v855_v52 = vmax.f32 %v791_v46, 0.0  ;;  %v760_v53 = vadd.f32 %v1531_v17, %v689_v47  ;;  %v792_v54 = vadd.f32 %v1531_v17, %v721_v48 }
 0x10b   :  { %888 = vst.msk [vmem:[%s1921_s4 + $0x10] sm:$0xff] %vm885_vm3, %v823_v51  ;;  %920 = vst.msk [vmem:[%s1921_s4 + $0x110] sm:$0xff] %vm885_vm3, %v855_v52  ;;  %v824_v55 = vmax.f32 %v760_v53, 0.0  ;;  %v856_v56 = vmax.f32 %v792_v54, 0.0 }
 0x10c   :  { %v440_v57 = vpop.f32.mrb[8].mxu0  ;;  %v568_v58 = vpop.f32.mrb[8].mxu1 }
 0x10d   :  { %889 = vst.msk [vmem:[%s1921_s4 + $0x18] sm:$0xff] %vm885_vm3, %v824_v55  ;;  %921 = vst.msk [vmem:[%s1921_s4 + $0x118] sm:$0xff] %vm885_vm3, %v856_v56  ;;  %v690_v59 = vmul.f32 %v1526_v15, %v440_v57  ;;  %v722_v60 = vmul.f32 %v1526_v15, %v568_v58  ;;  %v442_v61 = vpop.f32.mrb[9].mxu0  ;;  %v570_v62 = vpop.f32.mrb[9].mxu1 }
 0x10e   :  { %v443_v63 = vpop.f32.mrb[10].mxu0  ;;  %v571_v0 = vpop.f32.mrb[10].mxu1 }
 0x10f   :  { %v761_v1 = vadd.f32 %v1531_v17, %v690_v59  ;;  %v793_v2 = vadd.f32 %v1531_v17, %v722_v60  ;;  %v691_v3 = vmul.f32 %v1526_v15, %v443_v63  ;;  %v723_v4 = vmul.f32 %v1526_v15, %v571_v0  ;;  %v445_v5 = vpop.f32.mrb[11].mxu0  ;;  %v573_v6 = vpop.f32.mrb[11].mxu1 }
 0x111   :  { %v825_v7 = vmax.f32 %v761_v1, 0.0  ;;  %v857_v8 = vmax.f32 %v793_v2, 0.0  ;;  %v762_v9 = vadd.f32 %v1531_v17, %v691_v3  ;;  %v794_v10 = vadd.f32 %v1531_v17, %v723_v4 }
 0x113   :  { %890 = vst.msk [vmem:[%s1921_s4 + $0x20] sm:$0xff] %vm885_vm3, %v825_v7  ;;  %922 = vst.msk [vmem:[%s1921_s4 + $0x120] sm:$0xff] %vm885_vm3, %v857_v8  ;;  %v826_v11 = vmax.f32 %v762_v9, 0.0  ;;  %v858_v12 = vmax.f32 %v794_v10, 0.0 }
 0x114   :  { %v448_v13 = vpop.f32.mrb[12].mxu0  ;;  %v576_v14 = vpop.f32.mrb[12].mxu1 }
 0x115   :  { %891 = vst.msk [vmem:[%s1921_s4 + $0x28] sm:$0xff] %vm885_vm3, %v826_v11  ;;  %923 = vst.msk [vmem:[%s1921_s4 + $0x128] sm:$0xff] %vm885_vm3, %v858_v12  ;;  %v692_v16 = vmul.f32 %v1526_v15, %v448_v13  ;;  %v724_v18 = vmul.f32 %v1526_v15, %v576_v14  ;;  %v450_v19 = vpop.f32.mrb[13].mxu0  ;;  %v578_v20 = vpop.f32.mrb[13].mxu1 }
 0x116   :  { %v451_v21 = vpop.f32.mrb[14].mxu0  ;;  %v579_v22 = vpop.f32.mrb[14].mxu1 }
 0x117   :  { %v763_v23 = vadd.f32 %v1531_v17, %v692_v16  ;;  %v795_v24 = vadd.f32 %v1531_v17, %v724_v18  ;;  %v693_v25 = vmul.f32 %v1526_v15, %v451_v21  ;;  %v725_v26 = vmul.f32 %v1526_v15, %v579_v22  ;;  %v453_v27 = vpop.f32.mrb[15].mxu0  ;;  %v581_v28 = vpop.f32.mrb[15].mxu1 }
 0x119   :  { %v827_v29 = vmax.f32 %v763_v23, 0.0  ;;  %v859_v30 = vmax.f32 %v795_v24, 0.0  ;;  %v764_v31 = vadd.f32 %v1531_v17, %v693_v25  ;;  %v796_v32 = vadd.f32 %v1531_v17, %v725_v26 }
 0x11b   :  { %892 = vst.msk [vmem:[%s1921_s4 + $0x30] sm:$0xff] %vm885_vm3, %v827_v29  ;;  %924 = vst.msk [vmem:[%s1921_s4 + $0x130] sm:$0xff] %vm885_vm3, %v859_v30  ;;  %v828_v33 = vmax.f32 %v764_v31, 0.0  ;;  %v860_v34 = vmax.f32 %v796_v32, 0.0 }
 0x11c   :  { %v456_v35 = vpop.f32.mrb[16].mxu0  ;;  %v584_v36 = vpop.f32.mrb[16].mxu1 }
 0x11d   :  { %893 = vst.msk [vmem:[%s1921_s4 + $0x38] sm:$0xff] %vm885_vm3, %v828_v33  ;;  %925 = vst.msk [vmem:[%s1921_s4 + $0x138] sm:$0xff] %vm885_vm3, %v860_v34  ;;  %v694_v37 = vmul.f32 %v1526_v15, %v456_v35  ;;  %v726_v38 = vmul.f32 %v1526_v15, %v584_v36  ;;  %v458_v39 = vpop.f32.mrb[17].mxu0  ;;  %v586_v40 = vpop.f32.mrb[17].mxu1 }
 0x11e   :  { %v459_v41 = vpop.f32.mrb[18].mxu0  ;;  %v587_v42 = vpop.f32.mrb[18].mxu1 }
 0x11f   :  { %v765_v43 = vadd.f32 %v1531_v17, %v694_v37  ;;  %v797_v44 = vadd.f32 %v1531_v17, %v726_v38  ;;  %v695_v45 = vmul.f32 %v1526_v15, %v459_v41  ;;  %v727_v46 = vmul.f32 %v1526_v15, %v587_v42  ;;  %v461_v47 = vpop.f32.mrb[19].mxu0  ;;  %v589_v48 = vpop.f32.mrb[19].mxu1 }
 0x121   :  { %v829_v49 = vmax.f32 %v765_v43, 0.0  ;;  %v861_v50 = vmax.f32 %v797_v44, 0.0  ;;  %v766_v51 = vadd.f32 %v1531_v17, %v695_v45  ;;  %v798_v52 = vadd.f32 %v1531_v17, %v727_v46 }
 0x123   :  { %894 = vst.msk [vmem:[%s1921_s4 + $0x40] sm:$0xff] %vm885_vm3, %v829_v49  ;;  %926 = vst.msk [vmem:[%s1921_s4 + $0x140] sm:$0xff] %vm885_vm3, %v861_v50  ;;  %v830_v53 = vmax.f32 %v766_v51, 0.0  ;;  %v862_v54 = vmax.f32 %v798_v52, 0.0 }
 0x124   :  { %v464_v55 = vpop.f32.mrb[20].mxu0  ;;  %v592_v56 = vpop.f32.mrb[20].mxu1 }
 0x125   :  { %895 = vst.msk [vmem:[%s1921_s4 + $0x48] sm:$0xff] %vm885_vm3, %v830_v53  ;;  %927 = vst.msk [vmem:[%s1921_s4 + $0x148] sm:$0xff] %vm885_vm3, %v862_v54  ;;  %v696_v57 = vmul.f32 %v1526_v15, %v464_v55  ;;  %v728_v58 = vmul.f32 %v1526_v15, %v592_v56  ;;  %v466_v59 = vpop.f32.mrb[21].mxu0  ;;  %v594_v60 = vpop.f32.mrb[21].mxu1 }
 0x126   :  { %v467_v61 = vpop.f32.mrb[22].mxu0  ;;  %v595_v62 = vpop.f32.mrb[22].mxu1 }
 0x127   :  { %v767_v63 = vadd.f32 %v1531_v17, %v696_v57  ;;  %v799_v0 = vadd.f32 %v1531_v17, %v728_v58  ;;  %v697_v1 = vmul.f32 %v1526_v15, %v467_v61  ;;  %v729_v2 = vmul.f32 %v1526_v15, %v595_v62  ;;  %v469_v3 = vpop.f32.mrb[23].mxu0  ;;  %v597_v4 = vpop.f32.mrb[23].mxu1 }
 0x129   :  { %v831_v5 = vmax.f32 %v767_v63, 0.0  ;;  %v863_v6 = vmax.f32 %v799_v0, 0.0  ;;  %v768_v7 = vadd.f32 %v1531_v17, %v697_v1  ;;  %v800_v8 = vadd.f32 %v1531_v17, %v729_v2 }
 0x12b   :  { %896 = vst.msk [vmem:[%s1921_s4 + $0x50] sm:$0xff] %vm885_vm3, %v831_v5  ;;  %928 = vst.msk [vmem:[%s1921_s4 + $0x150] sm:$0xff] %vm885_vm3, %v863_v6  ;;  %v832_v9 = vmax.f32 %v768_v7, 0.0  ;;  %v864_v10 = vmax.f32 %v800_v8, 0.0 }
 0x12c   :  { %v472_v11 = vpop.f32.mrb[24].mxu0  ;;  %v600_v12 = vpop.f32.mrb[24].mxu1 }
 0x12d   :  { %897 = vst.msk [vmem:[%s1921_s4 + $0x58] sm:$0xff] %vm885_vm3, %v832_v9  ;;  %929 = vst.msk [vmem:[%s1921_s4 + $0x158] sm:$0xff] %vm885_vm3, %v864_v10  ;;  %v698_v13 = vmul.f32 %v1526_v15, %v472_v11  ;;  %v730_v14 = vmul.f32 %v1526_v15, %v600_v12  ;;  %v474_v16 = vpop.f32.mrb[25].mxu0  ;;  %v602_v18 = vpop.f32.mrb[25].mxu1 }
 0x12e   :  { %v475_v19 = vpop.f32.mrb[26].mxu0  ;;  %v603_v20 = vpop.f32.mrb[26].mxu1 }
 0x12f   :  { %v769_v21 = vadd.f32 %v1531_v17, %v698_v13  ;;  %v801_v22 = vadd.f32 %v1531_v17, %v730_v14  ;;  %v699_v23 = vmul.f32 %v1526_v15, %v475_v19  ;;  %v731_v24 = vmul.f32 %v1526_v15, %v603_v20  ;;  %v477_v25 = vpop.f32.mrb[27].mxu0  ;;  %v605_v26 = vpop.f32.mrb[27].mxu1 }
 0x131   :  { %v833_v27 = vmax.f32 %v769_v21, 0.0  ;;  %v865_v28 = vmax.f32 %v801_v22, 0.0  ;;  %v770_v29 = vadd.f32 %v1531_v17, %v699_v23  ;;  %v802_v30 = vadd.f32 %v1531_v17, %v731_v24 }
 0x133   :  { %898 = vst.msk [vmem:[%s1921_s4 + $0x60] sm:$0xff] %vm885_vm3, %v833_v27  ;;  %930 = vst.msk [vmem:[%s1921_s4 + $0x160] sm:$0xff] %vm885_vm3, %v865_v28  ;;  %v834_v31 = vmax.f32 %v770_v29, 0.0  ;;  %v866_v32 = vmax.f32 %v802_v30, 0.0 }
 0x134   :  { %v480_v33 = vpop.f32.mrb[28].mxu0  ;;  %v608_v34 = vpop.f32.mrb[28].mxu1 }
 0x135   :  { %899 = vst.msk [vmem:[%s1921_s4 + $0x68] sm:$0xff] %vm885_vm3, %v834_v31  ;;  %931 = vst.msk [vmem:[%s1921_s4 + $0x168] sm:$0xff] %vm885_vm3, %v866_v32  ;;  %v700_v35 = vmul.f32 %v1526_v15, %v480_v33  ;;  %v732_v36 = vmul.f32 %v1526_v15, %v608_v34  ;;  %v482_v37 = vpop.f32.mrb[29].mxu0  ;;  %v610_v38 = vpop.f32.mrb[29].mxu1 }
 0x136   :  { %v483_v39 = vpop.f32.mrb[30].mxu0  ;;  %v611_v40 = vpop.f32.mrb[30].mxu1 }
 0x137   :  { %v771_v41 = vadd.f32 %v1531_v17, %v700_v35  ;;  %v803_v42 = vadd.f32 %v1531_v17, %v732_v36  ;;  %v701_v43 = vmul.f32 %v1526_v15, %v483_v39  ;;  %v733_v44 = vmul.f32 %v1526_v15, %v611_v40  ;;  %v485_v45 = vpop.f32.mrb[31].mxu0  ;;  %v613_v46 = vpop.f32.mrb[31].mxu1 }
 0x139   :  { %v835_v47 = vmax.f32 %v771_v41, 0.0  ;;  %v867_v48 = vmax.f32 %v803_v42, 0.0  ;;  %v772_v49 = vadd.f32 %v1531_v17, %v701_v43  ;;  %v804_v50 = vadd.f32 %v1531_v17, %v733_v44 }
 0x13b   :  { %900 = vst.msk [vmem:[%s1921_s4 + $0x70] sm:$0xff] %vm885_vm3, %v835_v47  ;;  %932 = vst.msk [vmem:[%s1921_s4 + $0x170] sm:$0xff] %vm885_vm3, %v867_v48  ;;  %v836_v51 = vmax.f32 %v772_v49, 0.0  ;;  %v868_v52 = vmax.f32 %v804_v50, 0.0 }
 0x13c   :  { %v488_v53 = vpop.f32.mrb[32].mxu0  ;;  %v616_v54 = vpop.f32.mrb[32].mxu1 }
 0x13d   :  { %901 = vst.msk [vmem:[%s1921_s4 + $0x78] sm:$0xff] %vm885_vm3, %v836_v51  ;;  %933 = vst.msk [vmem:[%s1921_s4 + $0x178] sm:$0xff] %vm885_vm3, %v868_v52  ;;  %v702_v55 = vmul.f32 %v1526_v15, %v488_v53  ;;  %v734_v56 = vmul.f32 %v1526_v15, %v616_v54  ;;  %v490_v57 = vpop.f32.mrb[33].mxu0  ;;  %v618_v58 = vpop.f32.mrb[33].mxu1 }
 0x13e   :  { %v491_v59 = vpop.f32.mrb[34].mxu0  ;;  %v619_v60 = vpop.f32.mrb[34].mxu1 }
 0x13f   :  { %v773_v61 = vadd.f32 %v1531_v17, %v702_v55  ;;  %v805_v62 = vadd.f32 %v1531_v17, %v734_v56  ;;  %v703_v63 = vmul.f32 %v1526_v15, %v491_v59  ;;  %v735_v0 = vmul.f32 %v1526_v15, %v619_v60  ;;  %v493_v1 = vpop.f32.mrb[35].mxu0  ;;  %v621_v2 = vpop.f32.mrb[35].mxu1 }
 0x141   :  { %v837_v3 = vmax.f32 %v773_v61, 0.0  ;;  %v869_v4 = vmax.f32 %v805_v62, 0.0  ;;  %v774_v5 = vadd.f32 %v1531_v17, %v703_v63  ;;  %v806_v6 = vadd.f32 %v1531_v17, %v735_v0 }
 0x143   :  { %902 = vst.msk [vmem:[%s1921_s4 + $0x80] sm:$0xff] %vm885_vm3, %v837_v3  ;;  %934 = vst.msk [vmem:[%s1921_s4 + $0x180] sm:$0xff] %vm885_vm3, %v869_v4  ;;  %v838_v7 = vmax.f32 %v774_v5, 0.0  ;;  %v870_v8 = vmax.f32 %v806_v6, 0.0 }
 0x144   :  { %v496_v9 = vpop.f32.mrb[36].mxu0  ;;  %v624_v10 = vpop.f32.mrb[36].mxu1 }
 0x145   :  { %903 = vst.msk [vmem:[%s1921_s4 + $0x88] sm:$0xff] %vm885_vm3, %v838_v7  ;;  %935 = vst.msk [vmem:[%s1921_s4 + $0x188] sm:$0xff] %vm885_vm3, %v870_v8  ;;  %v704_v11 = vmul.f32 %v1526_v15, %v496_v9  ;;  %v736_v12 = vmul.f32 %v1526_v15, %v624_v10  ;;  %v498_v13 = vpop.f32.mrb[37].mxu0  ;;  %v626_v14 = vpop.f32.mrb[37].mxu1 }
 0x146   :  { %v499_v16 = vpop.f32.mrb[38].mxu0  ;;  %v627_v18 = vpop.f32.mrb[38].mxu1 }
 0x147   :  { %v775_v19 = vadd.f32 %v1531_v17, %v704_v11  ;;  %v807_v20 = vadd.f32 %v1531_v17, %v736_v12  ;;  %v705_v21 = vmul.f32 %v1526_v15, %v499_v16  ;;  %v737_v22 = vmul.f32 %v1526_v15, %v627_v18  ;;  %v501_v23 = vpop.f32.mrb[39].mxu0  ;;  %v629_v24 = vpop.f32.mrb[39].mxu1 }
 0x149   :  { %v839_v25 = vmax.f32 %v775_v19, 0.0  ;;  %v871_v26 = vmax.f32 %v807_v20, 0.0  ;;  %v776_v27 = vadd.f32 %v1531_v17, %v705_v21  ;;  %v808_v28 = vadd.f32 %v1531_v17, %v737_v22 }
 0x14b   :  { %904 = vst.msk [vmem:[%s1921_s4 + $0x90] sm:$0xff] %vm885_vm3, %v839_v25  ;;  %936 = vst.msk [vmem:[%s1921_s4 + $0x190] sm:$0xff] %vm885_vm3, %v871_v26  ;;  %v840_v29 = vmax.f32 %v776_v27, 0.0  ;;  %v872_v30 = vmax.f32 %v808_v28, 0.0 }
 0x14c   :  { %v504_v31 = vpop.f32.mrb[40].mxu0  ;;  %v632_v32 = vpop.f32.mrb[40].mxu1 }
 0x14d   :  { %905 = vst.msk [vmem:[%s1921_s4 + $0x98] sm:$0xff] %vm885_vm3, %v840_v29  ;;  %937 = vst.msk [vmem:[%s1921_s4 + $0x198] sm:$0xff] %vm885_vm3, %v872_v30  ;;  %v706_v33 = vmul.f32 %v1526_v15, %v504_v31  ;;  %v738_v34 = vmul.f32 %v1526_v15, %v632_v32  ;;  %v506_v35 = vpop.f32.mrb[41].mxu0  ;;  %v634_v36 = vpop.f32.mrb[41].mxu1 }
 0x14e   :  { %v507_v37 = vpop.f32.mrb[42].mxu0  ;;  %v635_v38 = vpop.f32.mrb[42].mxu1 }
 0x14f   :  { %v777_v39 = vadd.f32 %v1531_v17, %v706_v33  ;;  %v809_v40 = vadd.f32 %v1531_v17, %v738_v34  ;;  %v707_v41 = vmul.f32 %v1526_v15, %v507_v37  ;;  %v739_v42 = vmul.f32 %v1526_v15, %v635_v38  ;;  %v509_v43 = vpop.f32.mrb[43].mxu0  ;;  %v637_v44 = vpop.f32.mrb[43].mxu1 }
 0x151   :  { %v841_v45 = vmax.f32 %v777_v39, 0.0  ;;  %v873_v46 = vmax.f32 %v809_v40, 0.0  ;;  %v778_v47 = vadd.f32 %v1531_v17, %v707_v41  ;;  %v810_v48 = vadd.f32 %v1531_v17, %v739_v42 }
 0x153   :  { %906 = vst.msk [vmem:[%s1921_s4 + $0xa0] sm:$0xff] %vm885_vm3, %v841_v45  ;;  %938 = vst.msk [vmem:[%s1921_s4 + $0x1a0] sm:$0xff] %vm885_vm3, %v873_v46  ;;  %v842_v49 = vmax.f32 %v778_v47, 0.0  ;;  %v874_v50 = vmax.f32 %v810_v48, 0.0 }
 0x154   :  { %v512_v51 = vpop.f32.mrb[44].mxu0  ;;  %v640_v52 = vpop.f32.mrb[44].mxu1 }
 0x155   :  { %907 = vst.msk [vmem:[%s1921_s4 + $0xa8] sm:$0xff] %vm885_vm3, %v842_v49  ;;  %939 = vst.msk [vmem:[%s1921_s4 + $0x1a8] sm:$0xff] %vm885_vm3, %v874_v50  ;;  %v708_v53 = vmul.f32 %v1526_v15, %v512_v51  ;;  %v740_v54 = vmul.f32 %v1526_v15, %v640_v52  ;;  %v514_v55 = vpop.f32.mrb[45].mxu0  ;;  %v642_v56 = vpop.f32.mrb[45].mxu1 }
 0x156   :  { %v515_v57 = vpop.f32.mrb[46].mxu0  ;;  %v643_v58 = vpop.f32.mrb[46].mxu1 }
 0x157   :  { %v779_v59 = vadd.f32 %v1531_v17, %v708_v53  ;;  %v811_v60 = vadd.f32 %v1531_v17, %v740_v54  ;;  %v709_v61 = vmul.f32 %v1526_v15, %v515_v57  ;;  %v741_v62 = vmul.f32 %v1526_v15, %v643_v58  ;;  %v517_v63 = vpop.f32.mrb[47].mxu0  ;;  %v645_v0 = vpop.f32.mrb[47].mxu1 }
 0x159   :  { %v843_v1 = vmax.f32 %v779_v59, 0.0  ;;  %v875_v2 = vmax.f32 %v811_v60, 0.0  ;;  %v780_v3 = vadd.f32 %v1531_v17, %v709_v61  ;;  %v812_v4 = vadd.f32 %v1531_v17, %v741_v62 }
 0x15b   :  { %908 = vst.msk [vmem:[%s1921_s4 + $0xb0] sm:$0xff] %vm885_vm3, %v843_v1  ;;  %940 = vst.msk [vmem:[%s1921_s4 + $0x1b0] sm:$0xff] %vm885_vm3, %v875_v2  ;;  %v844_v5 = vmax.f32 %v780_v3, 0.0  ;;  %v876_v6 = vmax.f32 %v812_v4, 0.0 }
 0x15c   :  { %v520_v7 = vpop.f32.mrb[48].mxu0  ;;  %v648_v8 = vpop.f32.mrb[48].mxu1 }
 0x15d   :  { %909 = vst.msk [vmem:[%s1921_s4 + $0xb8] sm:$0xff] %vm885_vm3, %v844_v5  ;;  %941 = vst.msk [vmem:[%s1921_s4 + $0x1b8] sm:$0xff] %vm885_vm3, %v876_v6  ;;  %v710_v9 = vmul.f32 %v1526_v15, %v520_v7  ;;  %v742_v10 = vmul.f32 %v1526_v15, %v648_v8  ;;  %v522_v11 = vpop.f32.mrb[49].mxu0  ;;  %v650_v12 = vpop.f32.mrb[49].mxu1 }
 0x15e   :  { %v523_v13 = vpop.f32.mrb[50].mxu0  ;;  %v651_v14 = vpop.f32.mrb[50].mxu1 }
 0x15f   :  { %v781_v16 = vadd.f32 %v1531_v17, %v710_v9  ;;  %v813_v18 = vadd.f32 %v1531_v17, %v742_v10  ;;  %v711_v19 = vmul.f32 %v1526_v15, %v523_v13  ;;  %v743_v20 = vmul.f32 %v1526_v15, %v651_v14  ;;  %v525_v21 = vpop.f32.mrb[51].mxu0  ;;  %v653_v22 = vpop.f32.mrb[51].mxu1 }
 0x161   :  { %v845_v23 = vmax.f32 %v781_v16, 0.0  ;;  %v877_v24 = vmax.f32 %v813_v18, 0.0  ;;  %v782_v25 = vadd.f32 %v1531_v17, %v711_v19  ;;  %v814_v26 = vadd.f32 %v1531_v17, %v743_v20 }
 0x163   :  { %910 = vst.msk [vmem:[%s1921_s4 + $0xc0] sm:$0xff] %vm885_vm3, %v845_v23  ;;  %942 = vst.msk [vmem:[%s1921_s4 + $0x1c0] sm:$0xff] %vm885_vm3, %v877_v24  ;;  %v846_v27 = vmax.f32 %v782_v25, 0.0  ;;  %v878_v28 = vmax.f32 %v814_v26, 0.0 }
 0x164   :  { %v528_v29 = vpop.f32.mrb[52].mxu0  ;;  %v656_v30 = vpop.f32.mrb[52].mxu1 }
 0x165   :  { %911 = vst.msk [vmem:[%s1921_s4 + $0xc8] sm:$0xff] %vm885_vm3, %v846_v27  ;;  %943 = vst.msk [vmem:[%s1921_s4 + $0x1c8] sm:$0xff] %vm885_vm3, %v878_v28  ;;  %v712_v31 = vmul.f32 %v1526_v15, %v528_v29  ;;  %v744_v32 = vmul.f32 %v1526_v15, %v656_v30  ;;  %v530_v33 = vpop.f32.mrb[53].mxu0  ;;  %v658_v34 = vpop.f32.mrb[53].mxu1 }
 0x166   :  { %v531_v35 = vpop.f32.mrb[54].mxu0  ;;  %v659_v36 = vpop.f32.mrb[54].mxu1 }
 0x167   :  { %v783_v37 = vadd.f32 %v1531_v17, %v712_v31  ;;  %v815_v38 = vadd.f32 %v1531_v17, %v744_v32  ;;  %v713_v39 = vmul.f32 %v1526_v15, %v531_v35  ;;  %v745_v40 = vmul.f32 %v1526_v15, %v659_v36  ;;  %v533_v41 = vpop.f32.mrb[55].mxu0  ;;  %v661_v42 = vpop.f32.mrb[55].mxu1 }
 0x169   :  { %v847_v43 = vmax.f32 %v783_v37, 0.0  ;;  %v879_v44 = vmax.f32 %v815_v38, 0.0  ;;  %v784_v45 = vadd.f32 %v1531_v17, %v713_v39  ;;  %v816_v46 = vadd.f32 %v1531_v17, %v745_v40 }
 0x16b   :  { %912 = vst.msk [vmem:[%s1921_s4 + $0xd0] sm:$0xff] %vm885_vm3, %v847_v43  ;;  %944 = vst.msk [vmem:[%s1921_s4 + $0x1d0] sm:$0xff] %vm885_vm3, %v879_v44  ;;  %v848_v47 = vmax.f32 %v784_v45, 0.0  ;;  %v880_v48 = vmax.f32 %v816_v46, 0.0 }
 0x16c   :  { %v536_v49 = vpop.f32.mrb[56].mxu0  ;;  %v664_v50 = vpop.f32.mrb[56].mxu1 }
 0x16d   :  { %913 = vst.msk [vmem:[%s1921_s4 + $0xd8] sm:$0xff] %vm885_vm3, %v848_v47  ;;  %945 = vst.msk [vmem:[%s1921_s4 + $0x1d8] sm:$0xff] %vm885_vm3, %v880_v48  ;;  %v714_v51 = vmul.f32 %v1526_v15, %v536_v49  ;;  %v746_v52 = vmul.f32 %v1526_v15, %v664_v50  ;;  %v538_v53 = vpop.f32.mrb[57].mxu0  ;;  %v666_v54 = vpop.f32.mrb[57].mxu1 }
 0x16e   :  { %v539_v55 = vpop.f32.mrb[58].mxu0  ;;  %v667_v56 = vpop.f32.mrb[58].mxu1 }
 0x16f   :  { %v785_v57 = vadd.f32 %v1531_v17, %v714_v51  ;;  %v817_v58 = vadd.f32 %v1531_v17, %v746_v52  ;;  %v715_v59 = vmul.f32 %v1526_v15, %v539_v55  ;;  %v747_v60 = vmul.f32 %v1526_v15, %v667_v56  ;;  %v541_v61 = vpop.f32.mrb[59].mxu0  ;;  %v669_v62 = vpop.f32.mrb[59].mxu1 }
 0x171   :  { %v849_v63 = vmax.f32 %v785_v57, 0.0  ;;  %v881_v0 = vmax.f32 %v817_v58, 0.0  ;;  %v786_v1 = vadd.f32 %v1531_v17, %v715_v59  ;;  %v818_v2 = vadd.f32 %v1531_v17, %v747_v60 }
 0x173   :  { %914 = vst.msk [vmem:[%s1921_s4 + $0xe0] sm:$0xff] %vm885_vm3, %v849_v63  ;;  %946 = vst.msk [vmem:[%s1921_s4 + $0x1e0] sm:$0xff] %vm885_vm3, %v881_v0  ;;  %v850_v3 = vmax.f32 %v786_v1, 0.0  ;;  %v882_v4 = vmax.f32 %v818_v2, 0.0 }
 0x174   :  { %v544_v5 = vpop.f32.mrb[60].mxu0  ;;  %v672_v6 = vpop.f32.mrb[60].mxu1 }
 0x175   :  { %915 = vst.msk [vmem:[%s1921_s4 + $0xe8] sm:$0xff] %vm885_vm3, %v850_v3  ;;  %947 = vst.msk [vmem:[%s1921_s4 + $0x1e8] sm:$0xff] %vm885_vm3, %v882_v4  ;;  %v716_v7 = vmul.f32 %v1526_v15, %v544_v5  ;;  %v748_v8 = vmul.f32 %v1526_v15, %v672_v6  ;;  %v546_v9 = vpop.f32.mrb[61].mxu0  ;;  %v674_v10 = vpop.f32.mrb[61].mxu1 }
 0x176   :  { %v547_v11 = vpop.f32.mrb[62].mxu0  ;;  %v675_v12 = vpop.f32.mrb[62].mxu1 }
 0x177   :  { %v787_v13 = vadd.f32 %v1531_v17, %v716_v7  ;;  %v819_v14 = vadd.f32 %v1531_v17, %v748_v8  ;;  %v717_v16 = vmul.f32 %v1526_v15, %v547_v11  ;;  %v749_v18 = vmul.f32 %v1526_v15, %v675_v12  ;;  %v549_v19 = vpop.f32.mrb[63].mxu0  ;;  %v677_v20 = vpop.f32.mrb[63].mxu1 }
 0x179   :  { %v851_v21 = vmax.f32 %v787_v13, 0.0  ;;  %v883_v22 = vmax.f32 %v819_v14, 0.0  ;;  %v788_v23 = vadd.f32 %v1531_v17, %v717_v16  ;;  %v820_v24 = vadd.f32 %v1531_v17, %v749_v18 }
 0x17b   :  { %916 = vst.msk [vmem:[%s1921_s4 + $0xf0] sm:$0xff] %vm885_vm3, %v851_v21  ;;  %948 = vst.msk [vmem:[%s1921_s4 + $0x1f0] sm:$0xff] %vm885_vm3, %v883_v22  ;;  %v852_v25 = vmax.f32 %v788_v23, 0.0  ;;  %v884_v15 = vmax.f32 %v820_v24, 0.0 }
 0x17d   :  { %917 = vst.msk [vmem:[%s1921_s4 + $0xf8] sm:$0xff] %vm885_vm3, %v852_v25  ;;  %949 = vst.msk [vmem:[%s1921_s4 + $0x1f8] sm:$0xff] %vm885_vm3, %v884_v15 }

// kernel: stem_forward.5
= control target key start
LH: loop header
LB: loop body
LE: loop exit
PB: predicated region body
PF: predicated region fallthrough
CT: control target
= control target key end

     0   :  { %vm289_vm0 = vcmask 523264   ;;  %s950_s0 = inlined_call_operand.vmem [shape: f32[9,128,64], index: 0, kind: input, shape index: {}]   ;;  %s951_s1 = inlined_call_operand.hbm [shape: f32[128,64], index: 1, kind: output, shape index: {}]  }
   0x1   :  { %v9_v0 = vld [vmem:[%s950_s0] sm:$0xff]  ;;  %v10_v6 = vld [vmem:[%s950_s0 + $0x8] sm:$0xff]  ;;  %v11_v15 = vld [vmem:[%s950_s0 + $0x10] sm:$0xff] }
   0x2   :  { %v322_v1 = vld [vmem:[%s950_s0 + $0x80] sm:$0xff]  ;;  %v323_v7 = vld [vmem:[%s950_s0 + $0x88] sm:$0xff]  ;;  %v324_v16 = vld [vmem:[%s950_s0 + $0x90] sm:$0xff] }
   0x3   :  { %v338_v2 = vld [vmem:[%s950_s0 + $0x100] sm:$0xff]  ;;  %v42_v3 = vmax.f32 %v9_v0, %v322_v1  ;;  %v339_v8 = vld [vmem:[%s950_s0 + $0x108] sm:$0xff]  ;;  %v43_v10 = vmax.f32 %v10_v6, %v323_v7  ;;  %v340_v17 = vld [vmem:[%s950_s0 + $0x110] sm:$0xff]  ;;  %v44_v20 = vmax.f32 %v11_v15, %v324_v16 }
   0x4   :  { %v354_v4 = vld [vmem:[%s950_s0 + $0x180] sm:$0xff]  ;;  %v355_v13 = vld [vmem:[%s950_s0 + $0x188] sm:$0xff]  ;;  %v356_v24 = vld [vmem:[%s950_s0 + $0x190] sm:$0xff] }
   0x5   :  { %v75_v5 = vmax.f32 %v42_v3, %v338_v2  ;;  %v370_v9 = vld [vmem:[%s950_s0 + $0x200] sm:$0xff]  ;;  %v76_v14 = vmax.f32 %v43_v10, %v339_v8  ;;  %v371_v19 = vld [vmem:[%s950_s0 + $0x208] sm:$0xff]  ;;  %v77_v26 = vmax.f32 %v44_v20, %v340_v17  ;;  %v12_v27 = vld [vmem:[%s950_s0 + $0x18] sm:$0xff] }
   0x6   :  { %v386_v12 = vld [vmem:[%s950_s0 + $0x280] sm:$0xff]  ;;  %v387_v23 = vld [vmem:[%s950_s0 + $0x288] sm:$0xff]  ;;  %v325_v28 = vld [vmem:[%s950_s0 + $0x98] sm:$0xff] }
   0x7   :  { %v108_v11 = vmax.f32 %v75_v5, %v354_v4  ;;  %v402_v21 = vld [vmem:[%s950_s0 + $0x300] sm:$0xff]  ;;  %v109_v22 = vmax.f32 %v76_v14, %v355_v13  ;;  %v341_v29 = vld [vmem:[%s950_s0 + $0x118] sm:$0xff]  ;;  %v372_v33 = vld [vmem:[%s950_s0 + $0x210] sm:$0xff]  ;;  %v45_v34 = vmax.f32 %v12_v27, %v325_v28  ;;  %v110_v37 = vmax.f32 %v77_v26, %v356_v24 }
   0x8   :  { %v418_v30 = vld [vmem:[%s950_s0 + $0x380] sm:$0xff]  ;;  %v403_v36 = vld [vmem:[%s950_s0 + $0x308] sm:$0xff]  ;;  %v388_v38 = vld [vmem:[%s950_s0 + $0x290] sm:$0xff] }
   0x9   :  { %v141_v18 = vmax.f32 %v108_v11, %v370_v9  ;;  %v434_v31 = vld [vmem:[%s950_s0 + $0x400] sm:$0xff]  ;;  %v142_v32 = vmax.f32 %v109_v22, %v371_v19  ;;  %v357_v39 = vld [vmem:[%s950_s0 + $0x198] sm:$0xff]  ;;  %v78_v41 = vmax.f32 %v45_v34, %v341_v29  ;;  %v419_v46 = vld [vmem:[%s950_s0 + $0x388] sm:$0xff]  ;;  %v143_v48 = vmax.f32 %v110_v37, %v372_v33 }
   0xa   :  { %v13_v42 = vld [vmem:[%s950_s0 + $0x20] sm:$0xff]  ;;  %v435_v47 = vld [vmem:[%s950_s0 + $0x408] sm:$0xff]  ;;  %v373_v49 = vld [vmem:[%s950_s0 + $0x218] sm:$0xff] }
   0xb   :  { %v174_v25 = vmax.f32 %v141_v18, %v386_v12  ;;  %v175_v40 = vmax.f32 %v142_v32, %v387_v23  ;;  %v326_v43 = vld [vmem:[%s950_s0 + $0xa0] sm:$0xff]  ;;  %v404_v52 = vld [vmem:[%s950_s0 + $0x310] sm:$0xff]  ;;  %v111_v53 = vmax.f32 %v78_v41, %v357_v39  ;;  %v389_v54 = vld [vmem:[%s950_s0 + $0x298] sm:$0xff]  ;;  %v176_v57 = vmax.f32 %v143_v48, %v388_v38 }
   0xc   :  { %v342_v44 = vld [vmem:[%s950_s0 + $0x120] sm:$0xff]  ;;  %v46_v50 = vmax.f32 %v13_v42, %v326_v43  ;;  %v14_v59 = vld [vmem:[%s950_s0 + $0x28] sm:$0xff]  ;;  %v420_v63 = vld [vmem:[%s950_s0 + $0x390] sm:$0xff] }
   0xd   :  { %v207_v35 = vmax.f32 %v174_v25, %v402_v21  ;;  %v208_v51 = vmax.f32 %v175_v40, %v403_v36  ;;  %v358_v55 = vld [vmem:[%s950_s0 + $0x1a0] sm:$0xff]  ;;  %v327_v60 = vld [vmem:[%s950_s0 + $0xa8] sm:$0xff]  ;;  %v436_v0 = vld [vmem:[%s950_s0 + $0x410] sm:$0xff]  ;;  %v144_v1 = vmax.f32 %v111_v53, %v373_v49  ;;  %v209_v4 = vmax.f32 %v176_v57, %v404_v52 }
   0xe   :  { %v79_v58 = vmax.f32 %v46_v50, %v342_v44  ;;  %v343_v61 = vld [vmem:[%s950_s0 + $0x128] sm:$0xff]  ;;  %v374_v2 = vld [vmem:[%s950_s0 + $0x220] sm:$0xff]  ;;  %v47_v3 = vmax.f32 %v14_v59, %v327_v60  ;;  %v405_v5 = vld [vmem:[%s950_s0 + $0x318] sm:$0xff] }
   0xf   :  { %v240_v45 = vmax.f32 %v207_v35, %v418_v30  ;;  %v241_v62 = vmax.f32 %v208_v51, %v419_v46  ;;  %v390_v7 = vld [vmem:[%s950_s0 + $0x2a0] sm:$0xff]  ;;  %v359_v8 = vld [vmem:[%s950_s0 + $0x1a8] sm:$0xff]  ;;  %v177_v10 = vmax.f32 %v144_v1, %v389_v54  ;;  %v15_v12 = vld [vmem:[%s950_s0 + $0x30] sm:$0xff]  ;;  %v242_v15 = vmax.f32 %v209_v4, %v420_v63 }
  0x10   :  { %v112_v6 = vmax.f32 %v79_v58, %v358_v55  ;;  %v80_v11 = vmax.f32 %v47_v3, %v343_v61  ;;  %v328_v13 = vld [vmem:[%s950_s0 + $0xb0] sm:$0xff]  ;;  %v421_v16 = vld [vmem:[%s950_s0 + $0x398] sm:$0xff]  ;;  %v375_v19 = vld [vmem:[%s950_s0 + $0x228] sm:$0xff] }
  0x11   :  { %v273_v56 = vmax.f32 %v240_v45, %v434_v31  ;;  %v274_v9 = vmax.f32 %v241_v62, %v435_v47  ;;  %v344_v14 = vld [vmem:[%s950_s0 + $0x130] sm:$0xff]  ;;  %v437_v17 = vld [vmem:[%s950_s0 + $0x418] sm:$0xff]  ;;  %v48_v20 = vmax.f32 %v15_v12, %v328_v13  ;;  %v210_v21 = vmax.f32 %v177_v10, %v405_v5  ;;  %v406_v22 = vld [vmem:[%s950_s0 + $0x320] sm:$0xff] }
  0x12   :  { %v145_v18 = vmax.f32 %v112_v6, %v374_v2  ;;  %v113_v23 = vmax.f32 %v80_v11, %v359_v8  ;;  %v391_v24 = vld [vmem:[%s950_s0 + $0x2a8] sm:$0xff]  ;;  %v360_v25 = vld [vmem:[%s950_s0 + $0x1b0] sm:$0xff]  ;;  %v275_v26 = vmax.f32 %v242_v15, %v436_v0  ;;  %v16_v29 = vld [vmem:[%s950_s0 + $0x38] sm:$0xff] }
  0x13   :  { %290 = vst.msk [vmem:[#allocation2] sm:$0xff] %vm289_vm0, %v273_v56  ;;  %291 = vst.msk [vmem:[#allocation2 + $0x8] sm:$0xff] %vm289_vm0, %v274_v9  ;;  %v81_v28 = vmax.f32 %v48_v20, %v344_v14  ;;  %v329_v30 = vld [vmem:[%s950_s0 + $0xb8] sm:$0xff]  ;;  %v243_v32 = vmax.f32 %v210_v21, %v421_v16  ;;  %v422_v33 = vld [vmem:[%s950_s0 + $0x3a0] sm:$0xff] }
  0x14   :  { %v178_v27 = vmax.f32 %v145_v18, %v390_v7  ;;  %v345_v31 = vld [vmem:[%s950_s0 + $0x138] sm:$0xff]  ;;  %v438_v34 = vld [vmem:[%s950_s0 + $0x420] sm:$0xff]  ;;  %v146_v35 = vmax.f32 %v113_v23, %v375_v19  ;;  %v376_v36 = vld [vmem:[%s950_s0 + $0x230] sm:$0xff]  ;;  %v49_v37 = vmax.f32 %v16_v29, %v329_v30  ;;  %292 = vst.msk [vmem:[#allocation2 + $0x10] sm:$0xff] %vm289_vm0, %v275_v26 }
  0x15   :  { %v407_v39 = vld [vmem:[%s950_s0 + $0x328] sm:$0xff]  ;;  %v114_v40 = vmax.f32 %v81_v28, %v360_v25  ;;  %v392_v41 = vld [vmem:[%s950_s0 + $0x2b0] sm:$0xff]  ;;  %v361_v42 = vld [vmem:[%s950_s0 + $0x1b8] sm:$0xff]  ;;  %v276_v43 = vmax.f32 %v243_v32, %v437_v17 }
  0x16   :  { %v211_v38 = vmax.f32 %v178_v27, %v406_v22  ;;  %v179_v44 = vmax.f32 %v146_v35, %v391_v24  ;;  %v82_v45 = vmax.f32 %v49_v37, %v345_v31  ;;  %v17_v46 = vld [vmem:[%s950_s0 + $0x40] sm:$0xff]  ;;  %v423_v50 = vld [vmem:[%s950_s0 + $0x3a8] sm:$0xff]  ;;  %v377_v53 = vld [vmem:[%s950_s0 + $0x238] sm:$0xff] }
  0x17   :  { %v330_v47 = vld [vmem:[%s950_s0 + $0xc0] sm:$0xff]  ;;  %v439_v51 = vld [vmem:[%s950_s0 + $0x428] sm:$0xff]  ;;  %v147_v52 = vmax.f32 %v114_v40, %v376_v36  ;;  %293 = vst.msk [vmem:[#allocation2 + $0x18] sm:$0xff] %vm289_vm0, %v276_v43  ;;  %v408_v56 = vld [vmem:[%s950_s0 + $0x330] sm:$0xff] }
  0x18   :  { %v346_v48 = vld [vmem:[%s950_s0 + $0x140] sm:$0xff]  ;;  %v244_v49 = vmax.f32 %v211_v38, %v422_v33  ;;  %v50_v54 = vmax.f32 %v17_v46, %v330_v47  ;;  %v212_v55 = vmax.f32 %v179_v44, %v407_v39  ;;  %v115_v57 = vmax.f32 %v82_v45, %v361_v42  ;;  %v393_v58 = vld [vmem:[%s950_s0 + $0x2b8] sm:$0xff]  ;;  %v18_v63 = vld [vmem:[%s950_s0 + $0x48] sm:$0xff] }
  0x19   :  { %v362_v59 = vld [vmem:[%s950_s0 + $0x1c0] sm:$0xff]  ;;  %v180_v61 = vmax.f32 %v147_v52, %v392_v41  ;;  %v331_v0 = vld [vmem:[%s950_s0 + $0xc8] sm:$0xff]  ;;  %v424_v3 = vld [vmem:[%s950_s0 + $0x3b0] sm:$0xff] }
  0x1a   :  { %v277_v60 = vmax.f32 %v244_v49, %v438_v34  ;;  %v83_v62 = vmax.f32 %v50_v54, %v346_v48  ;;  %v347_v1 = vld [vmem:[%s950_s0 + $0x148] sm:$0xff]  ;;  %v245_v2 = vmax.f32 %v212_v55, %v423_v50  ;;  %v440_v4 = vld [vmem:[%s950_s0 + $0x430] sm:$0xff]  ;;  %v148_v5 = vmax.f32 %v115_v57, %v377_v53  ;;  %v378_v6 = vld [vmem:[%s950_s0 + $0x240] sm:$0xff] }
  0x1b   :  { %v51_v7 = vmax.f32 %v18_v63, %v331_v0  ;;  %v213_v8 = vmax.f32 %v180_v61, %v408_v56  ;;  %v409_v9 = vld [vmem:[%s950_s0 + $0x338] sm:$0xff]  ;;  %v394_v11 = vld [vmem:[%s950_s0 + $0x2c0] sm:$0xff]  ;;  %v363_v12 = vld [vmem:[%s950_s0 + $0x1c8] sm:$0xff] }
  0x1c   :  { %294 = vst.msk [vmem:[#allocation2 + $0x20] sm:$0xff] %vm289_vm0, %v277_v60  ;;  %v116_v10 = vmax.f32 %v83_v62, %v362_v59  ;;  %v278_v13 = vmax.f32 %v245_v2, %v439_v51  ;;  %v181_v14 = vmax.f32 %v148_v5, %v393_v58  ;;  %v19_v16 = vld [vmem:[%s950_s0 + $0x50] sm:$0xff]  ;;  %v425_v20 = vld [vmem:[%s950_s0 + $0x3b8] sm:$0xff]  ;;  %v379_v23 = vld [vmem:[%s950_s0 + $0x248] sm:$0xff] }
  0x1d   :  { %v84_v15 = vmax.f32 %v51_v7, %v347_v1  ;;  %v332_v17 = vld [vmem:[%s950_s0 + $0xd0] sm:$0xff]  ;;  %v246_v19 = vmax.f32 %v213_v8, %v424_v3  ;;  %v441_v21 = vld [vmem:[%s950_s0 + $0x438] sm:$0xff]  ;;  %v410_v26 = vld [vmem:[%s950_s0 + $0x340] sm:$0xff] }
  0x1e   :  { %v348_v18 = vld [vmem:[%s950_s0 + $0x150] sm:$0xff]  ;;  %v149_v22 = vmax.f32 %v116_v10, %v378_v6  ;;  %v52_v24 = vmax.f32 %v19_v16, %v332_v17  ;;  %295 = vst.msk [vmem:[#allocation2 + $0x28] sm:$0xff] %vm289_vm0, %v278_v13  ;;  %v214_v25 = vmax.f32 %v181_v14, %v409_v9  ;;  %v395_v28 = vld [vmem:[%s950_s0 + $0x2c8] sm:$0xff]  ;;  %v20_v33 = vld [vmem:[%s950_s0 + $0x58] sm:$0xff] }
  0x1f   :  { %v117_v27 = vmax.f32 %v84_v15, %v363_v12  ;;  %v364_v29 = vld [vmem:[%s950_s0 + $0x1d0] sm:$0xff]  ;;  %v279_v30 = vmax.f32 %v246_v19, %v440_v4  ;;  %v333_v34 = vld [vmem:[%s950_s0 + $0xd8] sm:$0xff]  ;;  %v426_v37 = vld [vmem:[%s950_s0 + $0x3c0] sm:$0xff] }
  0x20   :  { %v182_v31 = vmax.f32 %v149_v22, %v394_v11  ;;  %v85_v32 = vmax.f32 %v52_v24, %v348_v18  ;;  %v349_v35 = vld [vmem:[%s950_s0 + $0x158] sm:$0xff]  ;;  %v247_v36 = vmax.f32 %v214_v25, %v425_v20  ;;  %v442_v38 = vld [vmem:[%s950_s0 + $0x440] sm:$0xff]  ;;  %v380_v40 = vld [vmem:[%s950_s0 + $0x250] sm:$0xff]  ;;  %v53_v41 = vmax.f32 %v20_v33, %v333_v34 }
  0x21   :  { %v150_v39 = vmax.f32 %v117_v27, %v379_v23  ;;  %296 = vst.msk [vmem:[#allocation2 + $0x30] sm:$0xff] %vm289_vm0, %v279_v30  ;;  %v411_v43 = vld [vmem:[%s950_s0 + $0x348] sm:$0xff]  ;;  %v396_v45 = vld [vmem:[%s950_s0 + $0x2d0] sm:$0xff]  ;;  %v365_v46 = vld [vmem:[%s950_s0 + $0x1d8] sm:$0xff] }
  0x22   :  { %v215_v42 = vmax.f32 %v182_v31, %v410_v26  ;;  %v118_v44 = vmax.f32 %v85_v32, %v364_v29  ;;  %v280_v47 = vmax.f32 %v247_v36, %v441_v21  ;;  %v86_v49 = vmax.f32 %v53_v41, %v349_v35  ;;  %v21_v50 = vld [vmem:[%s950_s0 + $0x60] sm:$0xff]  ;;  %v427_v54 = vld [vmem:[%s950_s0 + $0x3c8] sm:$0xff]  ;;  %v381_v57 = vld [vmem:[%s950_s0 + $0x258] sm:$0xff] }
  0x23   :  { %v183_v48 = vmax.f32 %v150_v39, %v395_v28  ;;  %v334_v51 = vld [vmem:[%s950_s0 + $0xe0] sm:$0xff]  ;;  %v443_v55 = vld [vmem:[%s950_s0 + $0x448] sm:$0xff]  ;;  %v412_v60 = vld [vmem:[%s950_s0 + $0x350] sm:$0xff] }
  0x24   :  { %v350_v52 = vld [vmem:[%s950_s0 + $0x160] sm:$0xff]  ;;  %v248_v53 = vmax.f32 %v215_v42, %v426_v37  ;;  %v151_v56 = vmax.f32 %v118_v44, %v380_v40  ;;  %v54_v58 = vmax.f32 %v21_v50, %v334_v51  ;;  %297 = vst.msk [vmem:[#allocation2 + $0x38] sm:$0xff] %vm289_vm0, %v280_v47  ;;  %v119_v61 = vmax.f32 %v86_v49, %v365_v46  ;;  %v397_v62 = vld [vmem:[%s950_s0 + $0x2d8] sm:$0xff]  ;;  %v22_v3 = vld [vmem:[%s950_s0 + $0x68] sm:$0xff] }
  0x25   :  { %v216_v59 = vmax.f32 %v183_v48, %v411_v43  ;;  %v366_v63 = vld [vmem:[%s950_s0 + $0x1e0] sm:$0xff]  ;;  %v335_v4 = vld [vmem:[%s950_s0 + $0xe8] sm:$0xff]  ;;  %v428_v7 = vld [vmem:[%s950_s0 + $0x3d0] sm:$0xff] }
  0x26   :  { %v281_v0 = vmax.f32 %v248_v53, %v442_v38  ;;  %v184_v1 = vmax.f32 %v151_v56, %v396_v45  ;;  %v87_v2 = vmax.f32 %v54_v58, %v350_v52  ;;  %v351_v5 = vld [vmem:[%s950_s0 + $0x168] sm:$0xff]  ;;  %v444_v8 = vld [vmem:[%s950_s0 + $0x450] sm:$0xff]  ;;  %v152_v9 = vmax.f32 %v119_v61, %v381_v57  ;;  %v382_v10 = vld [vmem:[%s950_s0 + $0x260] sm:$0xff] }
  0x27   :  { %v249_v6 = vmax.f32 %v216_v59, %v427_v54  ;;  %v55_v11 = vmax.f32 %v22_v3, %v335_v4  ;;  %v413_v13 = vld [vmem:[%s950_s0 + $0x358] sm:$0xff]  ;;  %v398_v15 = vld [vmem:[%s950_s0 + $0x2e0] sm:$0xff]  ;;  %v367_v16 = vld [vmem:[%s950_s0 + $0x1e8] sm:$0xff] }
  0x28   :  { %298 = vst.msk [vmem:[#allocation2 + $0x40] sm:$0xff] %vm289_vm0, %v281_v0  ;;  %v217_v12 = vmax.f32 %v184_v1, %v412_v60  ;;  %v120_v14 = vmax.f32 %v87_v2, %v366_v63  ;;  %v185_v18 = vmax.f32 %v152_v9, %v397_v62  ;;  %v23_v20 = vld [vmem:[%s950_s0 + $0x70] sm:$0xff]  ;;  %v429_v24 = vld [vmem:[%s950_s0 + $0x3d8] sm:$0xff]  ;;  %v383_v27 = vld [vmem:[%s950_s0 + $0x268] sm:$0xff] }
  0x29   :  { %v282_v17 = vmax.f32 %v249_v6, %v443_v55  ;;  %v88_v19 = vmax.f32 %v55_v11, %v351_v5  ;;  %v336_v21 = vld [vmem:[%s950_s0 + $0xf0] sm:$0xff]  ;;  %v445_v25 = vld [vmem:[%s950_s0 + $0x458] sm:$0xff]  ;;  %v414_v30 = vld [vmem:[%s950_s0 + $0x360] sm:$0xff] }
  0x2a   :  { %v352_v22 = vld [vmem:[%s950_s0 + $0x170] sm:$0xff]  ;;  %v250_v23 = vmax.f32 %v217_v12, %v428_v7  ;;  %v153_v26 = vmax.f32 %v120_v14, %v382_v10  ;;  %v56_v28 = vmax.f32 %v23_v20, %v336_v21  ;;  %v218_v29 = vmax.f32 %v185_v18, %v413_v13  ;;  %v399_v32 = vld [vmem:[%s950_s0 + $0x2e8] sm:$0xff]  ;;  %v24_v37 = vld [vmem:[%s950_s0 + $0x78] sm:$0xff] }
  0x2b   :  { %299 = vst.msk [vmem:[#allocation2 + $0x48] sm:$0xff] %vm289_vm0, %v282_v17  ;;  %v121_v31 = vmax.f32 %v88_v19, %v367_v16  ;;  %v368_v33 = vld [vmem:[%s950_s0 + $0x1f0] sm:$0xff]  ;;  %v337_v38 = vld [vmem:[%s950_s0 + $0xf8] sm:$0xff]  ;;  %v430_v41 = vld [vmem:[%s950_s0 + $0x3e0] sm:$0xff] }
  0x2c   :  { %v283_v34 = vmax.f32 %v250_v23, %v444_v8  ;;  %v186_v35 = vmax.f32 %v153_v26, %v398_v15  ;;  %v89_v36 = vmax.f32 %v56_v28, %v352_v22  ;;  %v353_v39 = vld [vmem:[%s950_s0 + $0x178] sm:$0xff]  ;;  %v251_v40 = vmax.f32 %v218_v29, %v429_v24  ;;  %v384_v43 = vld [vmem:[%s950_s0 + $0x270] sm:$0xff]  ;;  %v415_v46 = vld [vmem:[%s950_s0 + $0x368] sm:$0xff] }
  0x2d   :  { %v154_v42 = vmax.f32 %v121_v31, %v383_v27  ;;  %v57_v44 = vmax.f32 %v24_v37, %v337_v38  ;;  %v369_v48 = vld [vmem:[%s950_s0 + $0x1f8] sm:$0xff]  ;;  %v446_v50 = vld [vmem:[%s950_s0 + $0x460] sm:$0xff]  ;;  %v400_v52 = vld [vmem:[%s950_s0 + $0x2f0] sm:$0xff] }
  0x2e   :  { %300 = vst.msk [vmem:[#allocation2 + $0x50] sm:$0xff] %vm289_vm0, %v283_v34  ;;  %v219_v45 = vmax.f32 %v186_v35, %v414_v30  ;;  %v122_v47 = vmax.f32 %v89_v36, %v368_v33  ;;  %v284_v49 = vmax.f32 %v251_v40, %v445_v25 }
  0x2f   :  { %v187_v51 = vmax.f32 %v154_v42, %v399_v32  ;;  %v90_v53 = vmax.f32 %v57_v44, %v353_v39 }
  0x30   :  { %6 = vsyncpa [#allocation3], 0  ;;  %v252_v54 = vmax.f32 %v219_v45, %v430_v41  ;;  %v431_v55 = vld [vmem:[%s950_s0 + $0x3e8] sm:$0xff]  ;;  %v155_v56 = vmax.f32 %v122_v47, %v384_v43  ;;  %v385_v57 = vld [vmem:[%s950_s0 + $0x278] sm:$0xff]  ;;  %301 = vst.msk [vmem:[#allocation2 + $0x58] sm:$0xff] %vm289_vm0, %v284_v49  ;;  %s477_s4 = smov [#allocation2]  }
  0x31   :  { %v220_v58 = vmax.f32 %v187_v51, %v415_v46  ;;  %v416_v59 = vld [vmem:[%s950_s0 + $0x370] sm:$0xff]  ;;  %v123_v60 = vmax.f32 %v90_v53, %v369_v48  ;;  %v447_v62 = vld [vmem:[%s950_s0 + $0x468] sm:$0xff]  ;;  %v401_v0 = vld [vmem:[%s950_s0 + $0x2f8] sm:$0xff]  ;;  %s311_s5 = sshll.u32 %s477_s4, 4  ;;  %s312_s5 = int_to_ptr.vmem [resolvable:$true] %s311_s5 }
  0x32   :  { %v285_v61 = vmax.f32 %v252_v54, %v446_v50  ;;  %v188_v63 = vmax.f32 %v155_v56, %v400_v52  ;;  %v432_v2 = vld [vmem:[%s950_s0 + $0x3f0] sm:$0xff]  ;;  %v417_v5 = vld [vmem:[%s950_s0 + $0x378] sm:$0xff]  ;;  %s453_s6 = scalar_lea.vmem %s312_s5, 2048  ;;  %p458_p1 = scmp.lt.s32.totalorder %s312_s5, %s312_s5 }
  0x33   :  { %v253_v1 = vmax.f32 %v220_v58, %v431_v55  ;;  %v156_v3 = vmax.f32 %v123_v60, %v385_v57  ;;  %v448_v7 = vld [vmem:[%s950_s0 + $0x470] sm:$0xff]  ;;  %v433_v10 = vld [vmem:[%s950_s0 + $0x3f8] sm:$0xff]  ;;  %p454_p0 = scmp.ne.s32.totalorder %s312_s5, %s453_s6  ;;  %p459_p2 = scmp.lt.s32.totalorder %s453_s6, %s453_s6 }
  0x34   :  { %302 = vst.msk [vmem:[#allocation2 + $0x60] sm:$0xff] %vm289_vm0, %v285_v61  ;;  %v221_v4 = vmax.f32 %v188_v63, %v416_v59  ;;  %v449_v13 = vld [vmem:[%s950_s0 + $0x478] sm:$0xff] }
  0x35   :  { %v286_v6 = vmax.f32 %v253_v1, %v447_v62  ;;  %v189_v8 = vmax.f32 %v156_v3, %v401_v0  ;;  %p460_p3 = por %p459_p2, %p458_p1 }
  0x36   :  { %v254_v9 = vmax.f32 %v221_v4, %v432_v2 }
  0x37   :  { %303 = vst.msk [vmem:[#allocation2 + $0x68] sm:$0xff] %vm289_vm0, %v286_v6  ;;  %v222_v11 = vmax.f32 %v189_v8, %v417_v5  ;;  %p461_p4 = pnand %p460_p3, %p454_p0 }
  0x38   :  { %v287_v12 = vmax.f32 %v254_v9, %v448_v7 }
  0x39   :  { %v255_v14 = vmax.f32 %v222_v11, %v433_v10 }
  0x3a   :  { %304 = vst.msk [vmem:[#allocation2 + $0x70] sm:$0xff] %vm289_vm0, %v287_v12 }
  0x3b   :  { %v288_v15 = vmax.f32 %v255_v14, %v449_v13 }
  0x3d   :  { %305 = vst.msk [vmem:[#allocation2 + $0x78] sm:$0xff] %vm289_vm0, %v288_v15 }
  0x3e   :  { %464 = shalt.err (!%p461_p4)
}
  0x3f   :  { %s465_s0 = scalar_lea.hbm %s951_s1, 2048 }
  0x40   :  { %p466_p5 = scmp.ne.s32.totalorder %s951_s1, %s465_s0  ;;  %p469_p6 = scmp.lt.u32.totalorder %s465_s0, %s951_s1 }
  0x42   :  { %p471_p7 = pnand %p469_p6, %p466_p5 }
  0x44   :  { %474 = shalt.err (!%p471_p7)
}
  0x45   :  { %s478_s13 = smov 128   ;;  %s479_s14 = smov 8  }
  0x46   :  { %317 = dma.vmem_to_hbm [thread:$0]  %s312_s5, 2048, %s951_s1, [#allocation3], %s478_s13, %s478_s13, %s479_s14  }
  0x47   :  { %475 = dma.done.wait [#allocation3], 2048  }
  0x48   :  { %476 = vsyncadd [#allocation3], 4294965248 }
  0x49   :  { %321 = vsyncpa [#allocation3], 1 }

</bundles_post_ra>
